<compile_context>
chip_gen: v6e
topology: v6e:2x2x1
jax: 0.10.0
libtpu: 0.0.40
codegen_flags: <defaults>
</compile_context>

<pallas_src>
import jax
import jax.numpy as jnp
from jax import lax
from jax.experimental import pallas as pl
from jax.experimental.pallas import tpu as pltpu

# ---- model hyper-parameters (small-shape demo consistent with the module) ----
N_EMBED = 64
N_HEADS = 8
HEAD_SIZE = N_EMBED // N_HEADS
N_LAYERS = 10
CONTEXT_LEN = 64          # module default is 256; small context for the demo
VOCAB_SIZE = 65           # e.g. tiny-shakespeare char vocab
V_PAD = 128               # lane-dense padded lm_head output width
LN_EPS = 1e-5
NEG_INF = -1e30
B, T = 4, 32              # example input shape (BT = 128 amortizes overhead)
BT = B * T


# ----------------------------- kernel helpers --------------------------------
def _layernorm(x, w, b):
    # x: (N, E); w, b: (1, E); biased variance + eps, like torch.nn.LayerNorm.
    mean = jnp.mean(x, axis=-1, keepdims=True)
    var = jnp.mean((x - mean) ** 2, axis=-1, keepdims=True)
    return (x - mean) * lax.rsqrt(var + LN_EPS) * w + b


# --------------------------- fused whole-model kernel --------------------------
def fused_kernel(x0_ref, mask_ref, lnb_ref, wqkv_ref, wproj_ref, w1_ref,
                 b1_ref, w2_ref, lnf_ref, wh_ref, bh_ref, out_ref):
    # Hoisted additive causal mask (0 on/below diagonal, -1e30 above), f32.
    mask = mask_ref[...]                                   # (T, T)
    # NOTE: the torch code scales by C ** 0.5 with C == n_embed, not head_size.
    scale = 1.0 / (N_EMBED ** 0.5)

    def layer_body(l, x):                                  # x: (BT, E) f32
        # ---- per-layer params (dynamic leading-index loads, all VMEM-resident)
        lnb = lnb_ref[l]                                   # (8, E) f32 pack
        ln1w, ln1b = lnb[0:1, :], lnb[1:2, :]
        ln2w, ln2b = lnb[2:3, :], lnb[3:4, :]
        bproj, b2 = lnb[4:5, :], lnb[5:6, :]
        wqkv = wqkv_ref[l]                                 # (E, 3E)  bf16
        wproj = wproj_ref[l]                               # (E, E)   bf16
        w1 = w1_ref[l]                                     # (E, 4E)  bf16
        b1 = b1_ref[l]                                     # (1, 4E)  f32
        w2 = w2_ref[l]                                     # (4E, E)  bf16

        # ---- multi-head causal self-attention on ln1(x) ----
        h = _layernorm(x, ln1w, ln1b)
        qkv = jnp.dot(h.astype(jnp.bfloat16), wqkv,
                      preferred_element_type=jnp.float32)  # (BT, 3E) f32
        qkv_b = qkv.reshape(B, T, 3 * N_EMBED).astype(jnp.bfloat16)

        outs = []
        for hd in range(N_HEADS):                          # unrolled at trace time
            o = hd * HEAD_SIZE
            qh = qkv_b[:, :, o:o + HEAD_SIZE]                          # (B, T, D)
            kh = qkv_b[:, :, N_EMBED + o:N_EMBED + o + HEAD_SIZE]      # (B, T, D)
            vh = qkv_b[:, :, 2 * N_EMBED + o:2 * N_EMBED + o + HEAD_SIZE]
            s = jnp.einsum('bqd,bkd->bqk', qh, kh,
                           preferred_element_type=jnp.float32)         # (B, T, T)
            s = s * scale + mask
            s = s - jnp.max(s, axis=-1, keepdims=True)
            p = jnp.exp(s)
            # approx reciprocal (EUP slot); ~1e-3 rel error, covered by the
            # 3e-2 comparison tolerance on the logits.
            p = p * pl.reciprocal(jnp.sum(p, axis=-1, keepdims=True), approx=True)
            outs.append(jnp.einsum('bqk,bkd->bqd', p.astype(jnp.bfloat16), vh,
                                   preferred_element_type=jnp.float32))  # (B,T,D)

        # Assemble heads once and run a SINGLE K=64 projection matmul.
        o_all = jnp.concatenate(outs, axis=-1).reshape(BT, N_EMBED)     # (BT, E)
        attn = jnp.dot(o_all.astype(jnp.bfloat16), wproj,
                       preferred_element_type=jnp.float32) + bproj
        x = x + attn

        # ---- feed-forward (Linear -> ReLU -> Linear) on ln2(x) ----
        h2 = _layernorm(x, ln2w, ln2b)
        ff = jnp.dot(h2.astype(jnp.bfloat16), w1,
                     preferred_element_type=jnp.float32) + b1
        ff = jnp.maximum(ff, 0.0)
        ff = jnp.dot(ff.astype(jnp.bfloat16), w2,
                     preferred_element_type=jnp.float32) + b2
        return x + ff

    x = lax.fori_loop(0, N_LAYERS, layer_body, x0_ref[...])

    # ---- final LN + lm_head (lane-dense, padded to 128) ----
    lnf = lnf_ref[...]                                     # (2, E)
    hf = _layernorm(x, lnf[0:1, :], lnf[1:2, :])
    out_ref[...] = jnp.dot(hf.astype(jnp.bfloat16), wh_ref[...],
                           preferred_element_type=jnp.float32) + bh_ref[...]


# ------------------------------ pallas wrapper ---------------------------------
def fused_forward(x0_flat, mask, sp):
    vmem = pl.BlockSpec(memory_space=pltpu.MemorySpace.VMEM)  # whole array, VMEM-resident
    return pl.pallas_call(
        fused_kernel,
        out_shape=jax.ShapeDtypeStruct((BT, V_PAD), jnp.float32),
        in_specs=[vmem] * 11,
        out_specs=vmem,
    )(x0_flat, mask, sp["lnb"], sp["wqkv"], sp["wproj"], sp["w1"], sp["b1"],
      sp["w2"], sp["lnf"], sp["wh"], sp["bh"])


def language_model_forward(idx, sp):
    # Embedding gathers + mask build are glue (plain JAX); everything else runs
    # inside the single fused Pallas kernel.
    Bx, Tx = idx.shape
    tok = jnp.take(sp["tok_emb"], idx, axis=0)                   # (B, T, E)
    pos = sp["pos_emb"][:Tx]                                     # (T, E)
    x0 = (tok + pos[None]).astype(jnp.float32).reshape(Bx * Tx, N_EMBED)
    row = jnp.arange(Tx)[:, None]
    col = jnp.arange(Tx)[None, :]
    mask = jnp.where(row >= col, 0.0, NEG_INF).astype(jnp.float32)  # (T, T)
    logits_p = fused_forward(x0, mask, sp)                       # (B*T, 128)
    return logits_p[:, :VOCAB_SIZE].reshape(Bx, Tx, VOCAB_SIZE)


# ------------------------ weight stacking / preparation ------------------------
def stack_params(params):
    bs = params["blocks"]
    zpad = jnp.zeros((2, N_EMBED), jnp.float32)
    sp = {
        "tok_emb": params["tok_emb"],
        "pos_emb": params["pos_emb"],
        # [ln1w, ln1b, ln2w, ln2b, bproj, b2, pad, pad] per layer -> (L, 8, E)
        "lnb": jnp.stack([jnp.concatenate(
            [b["ln1w"], b["ln1b"], b["ln2w"], b["ln2b"], b["bproj"], b["b2"],
             zpad], axis=0) for b in bs]),
        "wqkv": jnp.stack([jnp.concatenate([b["wq"], b["wk"], b["wv"]], axis=1)
                           for b in bs]).astype(jnp.bfloat16),   # (L, E, 3E)
        "wproj": jnp.stack([b["wproj"] for b in bs]).astype(jnp.bfloat16),
        "w1": jnp.stack([b["w1"] for b in bs]).astype(jnp.bfloat16),
        "b1": jnp.stack([b["b1"] for b in bs]),                  # (L, 1, 4E) f32
        "w2": jnp.stack([b["w2"] for b in bs]).astype(jnp.bfloat16),
        "lnf": jnp.concatenate([params["lnfw"], params["lnfb"]], axis=0),  # (2, E)
    }
    wh = jnp.zeros((N_EMBED, V_PAD), jnp.float32)
    wh = wh.at[:, :VOCAB_SIZE].set(params["w_head"])
    sp["wh"] = wh.astype(jnp.bfloat16)
    sp["bh"] = jnp.zeros((1, V_PAD), jnp.float32).at[:, :VOCAB_SIZE].set(
        params["b_head"])
    return sp


# ------------------------------ pure-JAX reference ----------------------------
def _ref_ln(x, w, b):
    mean = jnp.mean(x, axis=-1, keepdims=True)
    var = jnp.mean((x - mean) ** 2, axis=-1, keepdims=True)
    return (x - mean) / jnp.sqrt(var + LN_EPS) * w + b


def _bdot(a, w):
    return jnp.dot(a.astype(jnp.bfloat16), w.astype(jnp.bfloat16),
                   preferred_element_type=jnp.float32)


def ref_forward(idx, params):
    Tx = idx.shape[1]
    x = jnp.take(params["tok_emb"], idx, axis=0) + params["pos_emb"][:Tx][None]
    causal = jnp.tril(jnp.ones((Tx, Tx), dtype=bool))
    scale = 1.0 / (N_EMBED ** 0.5)
    for bp in params["blocks"]:
        h = _ref_ln(x, bp["ln1w"], bp["ln1b"])
        q = _bdot(h, bp["wq"]); k = _bdot(h, bp["wk"]); v = _bdot(h, bp["wv"])
        outs = []
        for hd in range(N_HEADS):
            sl = slice(hd * HEAD_SIZE, (hd + 1) * HEAD_SIZE)
            w = jnp.einsum("btd,bsd->bts",
                           q[..., sl].astype(jnp.bfloat16),
                           k[..., sl].astype(jnp.bfloat16),
                           preferred_element_type=jnp.float32) * scale
            w = jnp.where(causal[None], w, -jnp.inf)
            w = jax.nn.softmax(w, axis=-1)
            outs.append(jnp.einsum("bts,bsd->btd",
                                   w.astype(jnp.bfloat16),
                                   v[..., sl].astype(jnp.bfloat16),
                                   preferred_element_type=jnp.float32))
        attn = _bdot(jnp.concatenate(outs, axis=-1), bp["wproj"]) + bp["bproj"]
        x = x + attn
        h2 = _ref_ln(x, bp["ln2w"], bp["ln2b"])
        ff = jnp.maximum(_bdot(h2, bp["w1"]) + bp["b1"], 0.0)
        ff = _bdot(ff, bp["w2"]) + bp["b2"]
        x = x + ff
    h = _ref_ln(x, params["lnfw"], params["lnfb"])
    return _bdot(h, params["w_head"]) + params["b_head"]


# ------------------------------ parameter init --------------------------------
def init_params(key):
    def nrm(k, shape, scale=0.02):
        return (scale * jax.random.normal(k, shape)).astype(jnp.float32)

    keys = jax.random.split(key, 4 + N_LAYERS)
    params = {
        "tok_emb": nrm(keys[0], (VOCAB_SIZE, N_EMBED)),
        "pos_emb": nrm(keys[1], (CONTEXT_LEN, N_EMBED)),
        "lnfw": jnp.ones((1, N_EMBED), jnp.float32),
        "lnfb": jnp.zeros((1, N_EMBED), jnp.float32),
        "w_head": nrm(keys[2], (N_EMBED, VOCAB_SIZE)),
        "b_head": jnp.zeros((1, VOCAB_SIZE), jnp.float32),
        "blocks": [],
    }
    for li in range(N_LAYERS):
        ks = jax.random.split(keys[4 + li], 8)
        params["blocks"].append({
            "ln1w": jnp.ones((1, N_EMBED), jnp.float32),
            "ln1b": jnp.zeros((1, N_EMBED), jnp.float32),
            "wq": nrm(ks[0], (N_EMBED, N_EMBED)),
            "wk": nrm(ks[1], (N_EMBED, N_EMBED)),
            "wv": nrm(ks[2], (N_EMBED, N_EMBED)),
            "wproj": nrm(ks[3], (N_EMBED, N_EMBED)),
            "bproj": jnp.zeros((1, N_EMBED), jnp.float32),
            "ln2w": jnp.ones((1, N_EMBED), jnp.float32),
            "ln2b": jnp.zeros((1, N_EMBED), jnp.float32),
            "w1": nrm(ks[4], (N_EMBED, 4 * N_EMBED)),
            "b1": jnp.zeros((1, 4 * N_EMBED), jnp.float32),
            "w2": nrm(ks[5], (4 * N_EMBED, N_EMBED)),
            "b2": jnp.zeros((1, N_EMBED), jnp.float32),
        })
    return params


# ------------------------------------ main -------------------------------------
if __name__ == "__main__":
    key = jax.random.PRNGKey(0)
    pkey, ikey = jax.random.split(key)
    params = init_params(pkey)
    sp = stack_params(params)
    idx = jax.random.randint(ikey, (B, T), 0, VOCAB_SIZE, dtype=jnp.int32)

    fwd = jax.jit(language_model_forward)
    logits = jax.block_until_ready(fwd(idx, sp))

    ref = ref_forward(idx, params)
    assert logits.shape == (B, T, VOCAB_SIZE)
    # Tolerance accounts for bf16 MXU inputs + approx softmax reciprocal (~1e-3 rel).
    assert jnp.allclose(logits, ref, atol=3e-2, rtol=3e-2), "mismatch vs JAX reference"
    # TODO(synk): cross-entropy loss branch (targets) and generate()'s multinomial
    # sampling are not part of the fused forward kernel; left to plain JAX if needed.
    print("KERNEL_OK")
</pallas_src>

<mosaic_0001>
module attributes {stable_mosaic.version = 11 : i64} {
  func.func @fused_kernel(%arg0: memref<128x64xf32, #tpu.memory_space<vmem>>, %arg1: memref<32x32xf32, #tpu.memory_space<vmem>>, %arg2: memref<10x8x64xf32, #tpu.memory_space<vmem>>, %arg3: memref<10x64x192xbf16, #tpu.memory_space<vmem>>, %arg4: memref<10x64x64xbf16, #tpu.memory_space<vmem>>, %arg5: memref<10x64x256xbf16, #tpu.memory_space<vmem>>, %arg6: memref<10x1x256xf32, #tpu.memory_space<vmem>>, %arg7: memref<10x256x64xbf16, #tpu.memory_space<vmem>>, %arg8: memref<2x64xf32, #tpu.memory_space<vmem>>, %arg9: memref<64x128xbf16, #tpu.memory_space<vmem>>, %arg10: memref<1x128xf32, #tpu.memory_space<vmem>>, %arg11: memref<128x128xf32, #tpu.memory_space<vmem>>) attributes {dimension_semantics = [], scalar_prefetch = 0 : i64, scratch_operands = 0 : i64, tpu.core_type = #tpu.core_type<tc>} {
    %c0 = arith.constant 0 : index
    %c0_0 = arith.constant 0 : index
    %0 = vector.load %arg1[%c0, %c0_0] : memref<32x32xf32, #tpu.memory_space<vmem>>, vector<32x32xf32>
    %c0_1 = arith.constant 0 : index
    %c0_2 = arith.constant 0 : index
    %1 = vector.load %arg0[%c0_1, %c0_2] : memref<128x64xf32, #tpu.memory_space<vmem>>, vector<128x64xf32>
    %c0_i32 = arith.constant 0 : i32
    %c10_i32 = arith.constant 10 : i32
    %2 = arith.addi %c0_i32, %c10_i32 : i32
    %c1_i32 = arith.constant 1 : i32
    %3 = scf.for %arg12 = %c0_i32 to %2 step %c1_i32 iter_args(%arg13 = %1) -> (vector<128x64xf32>)  : i32 {
      %36 = arith.index_cast %arg12 : i32 to index
      %c0_17 = arith.constant 0 : index
      %c0_18 = arith.constant 0 : index
      %37 = vector.load %arg2[%36, %c0_17, %c0_18] : memref<10x8x64xf32, #tpu.memory_space<vmem>>, vector<1x8x64xf32>
      %38 = vector.shape_cast %37 : vector<1x8x64xf32> to vector<8x64xf32>
      %39 = vector.extract_strided_slice %38 {offsets = [0, 0], sizes = [1, 64], strides = [1, 1]} : vector<8x64xf32> to vector<1x64xf32>
      %40 = vector.extract_strided_slice %38 {offsets = [1, 0], sizes = [1, 64], strides = [1, 1]} : vector<8x64xf32> to vector<1x64xf32>
      %41 = vector.extract_strided_slice %38 {offsets = [2, 0], sizes = [1, 64], strides = [1, 1]} : vector<8x64xf32> to vector<1x64xf32>
      %42 = vector.extract_strided_slice %38 {offsets = [3, 0], sizes = [1, 64], strides = [1, 1]} : vector<8x64xf32> to vector<1x64xf32>
      %43 = vector.extract_strided_slice %38 {offsets = [4, 0], sizes = [1, 64], strides = [1, 1]} : vector<8x64xf32> to vector<1x64xf32>
      %44 = vector.extract_strided_slice %38 {offsets = [5, 0], sizes = [1, 64], strides = [1, 1]} : vector<8x64xf32> to vector<1x64xf32>
      %45 = arith.index_cast %arg12 : i32 to index
      %c0_19 = arith.constant 0 : index
      %c0_20 = arith.constant 0 : index
      %46 = vector.load %arg3[%45, %c0_19, %c0_20] : memref<10x64x192xbf16, #tpu.memory_space<vmem>>, vector<1x64x192xbf16>
      %47 = vector.shape_cast %46 : vector<1x64x192xbf16> to vector<64x192xbf16>
      %48 = arith.index_cast %arg12 : i32 to index
      %c0_21 = arith.constant 0 : index
      %c0_22 = arith.constant 0 : index
      %49 = vector.load %arg4[%48, %c0_21, %c0_22] : memref<10x64x64xbf16, #tpu.memory_space<vmem>>, vector<1x64x64xbf16>
      %50 = vector.shape_cast %49 : vector<1x64x64xbf16> to vector<64x64xbf16>
      %51 = arith.index_cast %arg12 : i32 to index
      %c0_23 = arith.constant 0 : index
      %c0_24 = arith.constant 0 : index
      %52 = vector.load %arg5[%51, %c0_23, %c0_24] : memref<10x64x256xbf16, #tpu.memory_space<vmem>>, vector<1x64x256xbf16>
      %53 = vector.shape_cast %52 : vector<1x64x256xbf16> to vector<64x256xbf16>
      %54 = arith.index_cast %arg12 : i32 to index
      %c0_25 = arith.constant 0 : index
      %c0_26 = arith.constant 0 : index
      %55 = vector.load %arg6[%54, %c0_25, %c0_26] : memref<10x1x256xf32, #tpu.memory_space<vmem>>, vector<1x1x256xf32>
      %56 = vector.shape_cast %55 : vector<1x1x256xf32> to vector<1x256xf32>
      %57 = arith.index_cast %arg12 : i32 to index
      %c0_27 = arith.constant 0 : index
      %c0_28 = arith.constant 0 : index
      %58 = vector.load %arg7[%57, %c0_27, %c0_28] : memref<10x256x64xbf16, #tpu.memory_space<vmem>>, vector<1x256x64xbf16>
      %59 = vector.shape_cast %58 : vector<1x256x64xbf16> to vector<256x64xbf16>
      %cst_29 = arith.constant dense<0.000000e+00> : vector<128xf32>
      %60 = vector.multi_reduction <add>, %arg13, %cst_29 [1] : vector<128x64xf32> to vector<128xf32>
      %61 = vector.shape_cast %60 : vector<128xf32> to vector<128x1xf32>
      %cst_30 = arith.constant 6.400000e+01 : f32
      %62 = vector.broadcast %cst_30 : f32 to vector<128x1xf32>
      %63 = arith.divf %61, %62 : vector<128x1xf32>
      %64 = vector.broadcast %63 : vector<128x1xf32> to vector<128x64xf32>
      %65 = arith.subf %arg13, %64 : vector<128x64xf32>
      %66 = arith.mulf %65, %65 : vector<128x64xf32>
      %cst_31 = arith.constant dense<0.000000e+00> : vector<128xf32>
      %67 = vector.multi_reduction <add>, %66, %cst_31 [1] : vector<128x64xf32> to vector<128xf32>
      %68 = vector.shape_cast %67 : vector<128xf32> to vector<128x1xf32>
      %cst_32 = arith.constant 6.400000e+01 : f32
      %69 = vector.broadcast %cst_32 : f32 to vector<128x1xf32>
      %70 = arith.divf %68, %69 : vector<128x1xf32>
      %71 = vector.broadcast %63 : vector<128x1xf32> to vector<128x64xf32>
      %72 = arith.subf %arg13, %71 : vector<128x64xf32>
      %cst_33 = arith.constant 9.99999974E-6 : f32
      %73 = vector.broadcast %cst_33 : f32 to vector<128x1xf32>
      %74 = arith.addf %70, %73 : vector<128x1xf32>
      %75 = math.rsqrt %74 : vector<128x1xf32>
      %76 = vector.broadcast %75 : vector<128x1xf32> to vector<128x64xf32>
      %77 = arith.mulf %72, %76 : vector<128x64xf32>
      %78 = vector.broadcast %39 : vector<1x64xf32> to vector<128x64xf32>
      %79 = arith.mulf %77, %78 : vector<128x64xf32>
      %80 = vector.broadcast %40 : vector<1x64xf32> to vector<128x64xf32>
      %81 = arith.addf %79, %80 : vector<128x64xf32>
      %82 = arith.truncf %81 : vector<128x64xf32> to vector<128x64xbf16>
      %cst_34 = arith.constant dense<0.000000e+00> : vector<128x192xf32>
      %83 = tpu.matmul %82, %47, %cst_34 {dimension_numbers = #tpu.dot_dimension_numbers<[1], [0], [0], [1], [0, 0, 1, 1], [], []>} : vector<128x64xbf16>, vector<64x192xbf16>, vector<128x192xf32> -> vector<128x192xf32>
      %84 = vector.shape_cast %83 : vector<128x192xf32> to vector<4x32x192xf32>
      %85 = arith.truncf %84 : vector<4x32x192xf32> to vector<4x32x192xbf16>
      %86 = vector.extract_strided_slice %85 {offsets = [0, 0, 0], sizes = [4, 32, 8], strides = [1, 1, 1]} : vector<4x32x192xbf16> to vector<4x32x8xbf16>
      %87 = vector.extract_strided_slice %85 {offsets = [0, 0, 64], sizes = [4, 32, 8], strides = [1, 1, 1]} : vector<4x32x192xbf16> to vector<4x32x8xbf16>
      %88 = vector.extract_strided_slice %85 {offsets = [0, 0, 128], sizes = [4, 32, 8], strides = [1, 1, 1]} : vector<4x32x192xbf16> to vector<4x32x8xbf16>
      "tpu.trace_start"() <{level = 10 : i32, message = "bqd,bkd->bqk"}> : () -> ()
      %cst_35 = arith.constant dense<0.000000e+00> : vector<4x32x32xf32>
      %89 = tpu.matmul %86, %87, %cst_35 {dimension_numbers = #tpu.dot_dimension_numbers<[2], [2], [1], [1], [0, 0, 0, 1, 1, 1], [0], [0]>} : vector<4x32x8xbf16>, vector<4x32x8xbf16>, vector<4x32x32xf32> -> vector<4x32x32xf32>
      "tpu.trace_stop"() : () -> ()
      %cst_36 = arith.constant 1.250000e-01 : f32
      %90 = vector.broadcast %cst_36 : f32 to vector<4x32x32xf32>
      %91 = arith.mulf %89, %90 : vector<4x32x32xf32>
      %92 = vector.shape_cast %0 : vector<32x32xf32> to vector<1x32x32xf32>
      %93 = vector.broadcast %92 : vector<1x32x32xf32> to vector<4x32x32xf32>
      %94 = arith.addf %91, %93 : vector<4x32x32xf32>
      %cst_37 = arith.constant dense<0xFF800000> : vector<4x32xf32>
      %95 = vector.multi_reduction <maximumf>, %94, %cst_37 [2] : vector<4x32x32xf32> to vector<4x32xf32>
      %96 = vector.shape_cast %95 : vector<4x32xf32> to vector<4x32x1xf32>
      %97 = vector.broadcast %96 : vector<4x32x1xf32> to vector<4x32x32xf32>
      %98 = arith.subf %94, %97 : vector<4x32x32xf32>
      %99 = math.exp %98 : vector<4x32x32xf32>
      %cst_38 = arith.constant dense<0.000000e+00> : vector<4x32xf32>
      %100 = vector.multi_reduction <add>, %99, %cst_38 [2] : vector<4x32x32xf32> to vector<4x32xf32>
      %101 = vector.shape_cast %100 : vector<4x32xf32> to vector<4x32x1xf32>
      %102 = tpu.reciprocal %101 {approx = true} : vector<4x32x1xf32> -> vector<4x32x1xf32>
      %103 = vector.broadcast %102 : vector<4x32x1xf32> to vector<4x32x32xf32>
      %104 = arith.mulf %99, %103 : vector<4x32x32xf32>
      %105 = arith.truncf %104 : vector<4x32x32xf32> to vector<4x32x32xbf16>
      "tpu.trace_start"() <{level = 10 : i32, message = "bqk,bkd->bqd"}> : () -> ()
      %cst_39 = arith.constant dense<0.000000e+00> : vector<4x32x8xf32>
      %106 = tpu.matmul %105, %88, %cst_39 {dimension_numbers = #tpu.dot_dimension_numbers<[2], [1], [1], [2], [0, 0, 0, 1, 1, 2], [0], [0]>} : vector<4x32x32xbf16>, vector<4x32x8xbf16>, vector<4x32x8xf32> -> vector<4x32x8xf32>
      "tpu.trace_stop"() : () -> ()
      %107 = vector.extract_strided_slice %85 {offsets = [0, 0, 8], sizes = [4, 32, 8], strides = [1, 1, 1]} : vector<4x32x192xbf16> to vector<4x32x8xbf16>
      %108 = vector.extract_strided_slice %85 {offsets = [0, 0, 72], sizes = [4, 32, 8], strides = [1, 1, 1]} : vector<4x32x192xbf16> to vector<4x32x8xbf16>
      %109 = vector.extract_strided_slice %85 {offsets = [0, 0, 136], sizes = [4, 32, 8], strides = [1, 1, 1]} : vector<4x32x192xbf16> to vector<4x32x8xbf16>
      "tpu.trace_start"() <{level = 10 : i32, message = "bqd,bkd->bqk"}> : () -> ()
      %cst_40 = arith.constant dense<0.000000e+00> : vector<4x32x32xf32>
      %110 = tpu.matmul %107, %108, %cst_40 {dimension_numbers = #tpu.dot_dimension_numbers<[2], [2], [1], [1], [0, 0, 0, 1, 1, 1], [0], [0]>} : vector<4x32x8xbf16>, vector<4x32x8xbf16>, vector<4x32x32xf32> -> vector<4x32x32xf32>
      "tpu.trace_stop"() : () -> ()
      %cst_41 = arith.constant 1.250000e-01 : f32
      %111 = vector.broadcast %cst_41 : f32 to vector<4x32x32xf32>
      %112 = arith.mulf %110, %111 : vector<4x32x32xf32>
      %113 = vector.shape_cast %0 : vector<32x32xf32> to vector<1x32x32xf32>
      %114 = vector.broadcast %113 : vector<1x32x32xf32> to vector<4x32x32xf32>
      %115 = arith.addf %112, %114 : vector<4x32x32xf32>
      %cst_42 = arith.constant dense<0xFF800000> : vector<4x32xf32>
      %116 = vector.multi_reduction <maximumf>, %115, %cst_42 [2] : vector<4x32x32xf32> to vector<4x32xf32>
      %117 = vector.shape_cast %116 : vector<4x32xf32> to vector<4x32x1xf32>
      %118 = vector.broadcast %117 : vector<4x32x1xf32> to vector<4x32x32xf32>
      %119 = arith.subf %115, %118 : vector<4x32x32xf32>
      %120 = math.exp %119 : vector<4x32x32xf32>
      %cst_43 = arith.constant dense<0.000000e+00> : vector<4x32xf32>
      %121 = vector.multi_reduction <add>, %120, %cst_43 [2] : vector<4x32x32xf32> to vector<4x32xf32>
      %122 = vector.shape_cast %121 : vector<4x32xf32> to vector<4x32x1xf32>
      %123 = tpu.reciprocal %122 {approx = true} : vector<4x32x1xf32> -> vector<4x32x1xf32>
      %124 = vector.broadcast %123 : vector<4x32x1xf32> to vector<4x32x32xf32>
      %125 = arith.mulf %120, %124 : vector<4x32x32xf32>
      %126 = arith.truncf %125 : vector<4x32x32xf32> to vector<4x32x32xbf16>
      "tpu.trace_start"() <{level = 10 : i32, message = "bqk,bkd->bqd"}> : () -> ()
      %cst_44 = arith.constant dense<0.000000e+00> : vector<4x32x8xf32>
      %127 = tpu.matmul %126, %109, %cst_44 {dimension_numbers = #tpu.dot_dimension_numbers<[2], [1], [1], [2], [0, 0, 0, 1, 1, 2], [0], [0]>} : vector<4x32x32xbf16>, vector<4x32x8xbf16>, vector<4x32x8xf32> -> vector<4x32x8xf32>
      "tpu.trace_stop"() : () -> ()
      %128 = vector.extract_strided_slice %85 {offsets = [0, 0, 16], sizes = [4, 32, 8], strides = [1, 1, 1]} : vector<4x32x192xbf16> to vector<4x32x8xbf16>
      %129 = vector.extract_strided_slice %85 {offsets = [0, 0, 80], sizes = [4, 32, 8], strides = [1, 1, 1]} : vector<4x32x192xbf16> to vector<4x32x8xbf16>
      %130 = vector.extract_strided_slice %85 {offsets = [0, 0, 144], sizes = [4, 32, 8], strides = [1, 1, 1]} : vector<4x32x192xbf16> to vector<4x32x8xbf16>
      "tpu.trace_start"() <{level = 10 : i32, message = "bqd,bkd->bqk"}> : () -> ()
      %cst_45 = arith.constant dense<0.000000e+00> : vector<4x32x32xf32>
      %131 = tpu.matmul %128, %129, %cst_45 {dimension_numbers = #tpu.dot_dimension_numbers<[2], [2], [1], [1], [0, 0, 0, 1, 1, 1], [0], [0]>} : vector<4x32x8xbf16>, vector<4x32x8xbf16>, vector<4x32x32xf32> -> vector<4x32x32xf32>
      "tpu.trace_stop"() : () -> ()
      %cst_46 = arith.constant 1.250000e-01 : f32
      %132 = vector.broadcast %cst_46 : f32 to vector<4x32x32xf32>
      %133 = arith.mulf %131, %132 : vector<4x32x32xf32>
      %134 = vector.shape_cast %0 : vector<32x32xf32> to vector<1x32x32xf32>
      %135 = vector.broadcast %134 : vector<1x32x32xf32> to vector<4x32x32xf32>
      %136 = arith.addf %133, %135 : vector<4x32x32xf32>
      %cst_47 = arith.constant dense<0xFF800000> : vector<4x32xf32>
      %137 = vector.multi_reduction <maximumf>, %136, %cst_47 [2] : vector<4x32x32xf32> to vector<4x32xf32>
      %138 = vector.shape_cast %137 : vector<4x32xf32> to vector<4x32x1xf32>
      %139 = vector.broadcast %138 : vector<4x32x1xf32> to vector<4x32x32xf32>
      %140 = arith.subf %136, %139 : vector<4x32x32xf32>
      %141 = math.exp %140 : vector<4x32x32xf32>
      %cst_48 = arith.constant dense<0.000000e+00> : vector<4x32xf32>
      %142 = vector.multi_reduction <add>, %141, %cst_48 [2] : vector<4x32x32xf32> to vector<4x32xf32>
      %143 = vector.shape_cast %142 : vector<4x32xf32> to vector<4x32x1xf32>
      %144 = tpu.reciprocal %143 {approx = true} : vector<4x32x1xf32> -> vector<4x32x1xf32>
      %145 = vector.broadcast %144 : vector<4x32x1xf32> to vector<4x32x32xf32>
      %146 = arith.mulf %141, %145 : vector<4x32x32xf32>
      %147 = arith.truncf %146 : vector<4x32x32xf32> to vector<4x32x32xbf16>
      "tpu.trace_start"() <{level = 10 : i32, message = "bqk,bkd->bqd"}> : () -> ()
      %cst_49 = arith.constant dense<0.000000e+00> : vector<4x32x8xf32>
      %148 = tpu.matmul %147, %130, %cst_49 {dimension_numbers = #tpu.dot_dimension_numbers<[2], [1], [1], [2], [0, 0, 0, 1, 1, 2], [0], [0]>} : vector<4x32x32xbf16>, vector<4x32x8xbf16>, vector<4x32x8xf32> -> vector<4x32x8xf32>
      "tpu.trace_stop"() : () -> ()
      %149 = vector.extract_strided_slice %85 {offsets = [0, 0, 24], sizes = [4, 32, 8], strides = [1, 1, 1]} : vector<4x32x192xbf16> to vector<4x32x8xbf16>
      %150 = vector.extract_strided_slice %85 {offsets = [0, 0, 88], sizes = [4, 32, 8], strides = [1, 1, 1]} : vector<4x32x192xbf16> to vector<4x32x8xbf16>
      %151 = vector.extract_strided_slice %85 {offsets = [0, 0, 152], sizes = [4, 32, 8], strides = [1, 1, 1]} : vector<4x32x192xbf16> to vector<4x32x8xbf16>
      "tpu.trace_start"() <{level = 10 : i32, message = "bqd,bkd->bqk"}> : () -> ()
      %cst_50 = arith.constant dense<0.000000e+00> : vector<4x32x32xf32>
      %152 = tpu.matmul %149, %150, %cst_50 {dimension_numbers = #tpu.dot_dimension_numbers<[2], [2], [1], [1], [0, 0, 0, 1, 1, 1], [0], [0]>} : vector<4x32x8xbf16>, vector<4x32x8xbf16>, vector<4x32x32xf32> -> vector<4x32x32xf32>
      "tpu.trace_stop"() : () -> ()
      %cst_51 = arith.constant 1.250000e-01 : f32
      %153 = vector.broadcast %cst_51 : f32 to vector<4x32x32xf32>
      %154 = arith.mulf %152, %153 : vector<4x32x32xf32>
      %155 = vector.shape_cast %0 : vector<32x32xf32> to vector<1x32x32xf32>
      %156 = vector.broadcast %155 : vector<1x32x32xf32> to vector<4x32x32xf32>
      %157 = arith.addf %154, %156 : vector<4x32x32xf32>
      %cst_52 = arith.constant dense<0xFF800000> : vector<4x32xf32>
      %158 = vector.multi_reduction <maximumf>, %157, %cst_52 [2] : vector<4x32x32xf32> to vector<4x32xf32>
      %159 = vector.shape_cast %158 : vector<4x32xf32> to vector<4x32x1xf32>
      %160 = vector.broadcast %159 : vector<4x32x1xf32> to vector<4x32x32xf32>
      %161 = arith.subf %157, %160 : vector<4x32x32xf32>
      %162 = math.exp %161 : vector<4x32x32xf32>
      %cst_53 = arith.constant dense<0.000000e+00> : vector<4x32xf32>
      %163 = vector.multi_reduction <add>, %162, %cst_53 [2] : vector<4x32x32xf32> to vector<4x32xf32>
      %164 = vector.shape_cast %163 : vector<4x32xf32> to vector<4x32x1xf32>
      %165 = tpu.reciprocal %164 {approx = true} : vector<4x32x1xf32> -> vector<4x32x1xf32>
      %166 = vector.broadcast %165 : vector<4x32x1xf32> to vector<4x32x32xf32>
      %167 = arith.mulf %162, %166 : vector<4x32x32xf32>
      %168 = arith.truncf %167 : vector<4x32x32xf32> to vector<4x32x32xbf16>
      "tpu.trace_start"() <{level = 10 : i32, message = "bqk,bkd->bqd"}> : () -> ()
      %cst_54 = arith.constant dense<0.000000e+00> : vector<4x32x8xf32>
      %169 = tpu.matmul %168, %151, %cst_54 {dimension_numbers = #tpu.dot_dimension_numbers<[2], [1], [1], [2], [0, 0, 0, 1, 1, 2], [0], [0]>} : vector<4x32x32xbf16>, vector<4x32x8xbf16>, vector<4x32x8xf32> -> vector<4x32x8xf32>
      "tpu.trace_stop"() : () -> ()
      %170 = vector.extract_strided_slice %85 {offsets = [0, 0, 32], sizes = [4, 32, 8], strides = [1, 1, 1]} : vector<4x32x192xbf16> to vector<4x32x8xbf16>
      %171 = vector.extract_strided_slice %85 {offsets = [0, 0, 96], sizes = [4, 32, 8], strides = [1, 1, 1]} : vector<4x32x192xbf16> to vector<4x32x8xbf16>
      %172 = vector.extract_strided_slice %85 {offsets = [0, 0, 160], sizes = [4, 32, 8], strides = [1, 1, 1]} : vector<4x32x192xbf16> to vector<4x32x8xbf16>
      "tpu.trace_start"() <{level = 10 : i32, message = "bqd,bkd->bqk"}> : () -> ()
      %cst_55 = arith.constant dense<0.000000e+00> : vector<4x32x32xf32>
      %173 = tpu.matmul %170, %171, %cst_55 {dimension_numbers = #tpu.dot_dimension_numbers<[2], [2], [1], [1], [0, 0, 0, 1, 1, 1], [0], [0]>} : vector<4x32x8xbf16>, vector<4x32x8xbf16>, vector<4x32x32xf32> -> vector<4x32x32xf32>
      "tpu.trace_stop"() : () -> ()
      %cst_56 = arith.constant 1.250000e-01 : f32
      %174 = vector.broadcast %cst_56 : f32 to vector<4x32x32xf32>
      %175 = arith.mulf %173, %174 : vector<4x32x32xf32>
      %176 = vector.shape_cast %0 : vector<32x32xf32> to vector<1x32x32xf32>
      %177 = vector.broadcast %176 : vector<1x32x32xf32> to vector<4x32x32xf32>
      %178 = arith.addf %175, %177 : vector<4x32x32xf32>
      %cst_57 = arith.constant dense<0xFF800000> : vector<4x32xf32>
      %179 = vector.multi_reduction <maximumf>, %178, %cst_57 [2] : vector<4x32x32xf32> to vector<4x32xf32>
      %180 = vector.shape_cast %179 : vector<4x32xf32> to vector<4x32x1xf32>
      %181 = vector.broadcast %180 : vector<4x32x1xf32> to vector<4x32x32xf32>
      %182 = arith.subf %178, %181 : vector<4x32x32xf32>
      %183 = math.exp %182 : vector<4x32x32xf32>
      %cst_58 = arith.constant dense<0.000000e+00> : vector<4x32xf32>
      %184 = vector.multi_reduction <add>, %183, %cst_58 [2] : vector<4x32x32xf32> to vector<4x32xf32>
      %185 = vector.shape_cast %184 : vector<4x32xf32> to vector<4x32x1xf32>
      %186 = tpu.reciprocal %185 {approx = true} : vector<4x32x1xf32> -> vector<4x32x1xf32>
      %187 = vector.broadcast %186 : vector<4x32x1xf32> to vector<4x32x32xf32>
      %188 = arith.mulf %183, %187 : vector<4x32x32xf32>
      %189 = arith.truncf %188 : vector<4x32x32xf32> to vector<4x32x32xbf16>
      "tpu.trace_start"() <{level = 10 : i32, message = "bqk,bkd->bqd"}> : () -> ()
      %cst_59 = arith.constant dense<0.000000e+00> : vector<4x32x8xf32>
      %190 = tpu.matmul %189, %172, %cst_59 {dimension_numbers = #tpu.dot_dimension_numbers<[2], [1], [1], [2], [0, 0, 0, 1, 1, 2], [0], [0]>} : vector<4x32x32xbf16>, vector<4x32x8xbf16>, vector<4x32x8xf32> -> vector<4x32x8xf32>
      "tpu.trace_stop"() : () -> ()
      %191 = vector.extract_strided_slice %85 {offsets = [0, 0, 40], sizes = [4, 32, 8], strides = [1, 1, 1]} : vector<4x32x192xbf16> to vector<4x32x8xbf16>
      %192 = vector.extract_strided_slice %85 {offsets = [0, 0, 104], sizes = [4, 32, 8], strides = [1, 1, 1]} : vector<4x32x192xbf16> to vector<4x32x8xbf16>
      %193 = vector.extract_strided_slice %85 {offsets = [0, 0, 168], sizes = [4, 32, 8], strides = [1, 1, 1]} : vector<4x32x192xbf16> to vector<4x32x8xbf16>
      "tpu.trace_start"() <{level = 10 : i32, message = "bqd,bkd->bqk"}> : () -> ()
      %cst_60 = arith.constant dense<0.000000e+00> : vector<4x32x32xf32>
      %194 = tpu.matmul %191, %192, %cst_60 {dimension_numbers = #tpu.dot_dimension_numbers<[2], [2], [1], [1], [0, 0, 0, 1, 1, 1], [0], [0]>} : vector<4x32x8xbf16>, vector<4x32x8xbf16>, vector<4x32x32xf32> -> vector<4x32x32xf32>
      "tpu.trace_stop"() : () -> ()
      %cst_61 = arith.constant 1.250000e-01 : f32
      %195 = vector.broadcast %cst_61 : f32 to vector<4x32x32xf32>
      %196 = arith.mulf %194, %195 : vector<4x32x32xf32>
      %197 = vector.shape_cast %0 : vector<32x32xf32> to vector<1x32x32xf32>
      %198 = vector.broadcast %197 : vector<1x32x32xf32> to vector<4x32x32xf32>
      %199 = arith.addf %196, %198 : vector<4x32x32xf32>
      %cst_62 = arith.constant dense<0xFF800000> : vector<4x32xf32>
      %200 = vector.multi_reduction <maximumf>, %199, %cst_62 [2] : vector<4x32x32xf32> to vector<4x32xf32>
      %201 = vector.shape_cast %200 : vector<4x32xf32> to vector<4x32x1xf32>
      %202 = vector.broadcast %201 : vector<4x32x1xf32> to vector<4x32x32xf32>
      %203 = arith.subf %199, %202 : vector<4x32x32xf32>
      %204 = math.exp %203 : vector<4x32x32xf32>
      %cst_63 = arith.constant dense<0.000000e+00> : vector<4x32xf32>
      %205 = vector.multi_reduction <add>, %204, %cst_63 [2] : vector<4x32x32xf32> to vector<4x32xf32>
      %206 = vector.shape_cast %205 : vector<4x32xf32> to vector<4x32x1xf32>
      %207 = tpu.reciprocal %206 {approx = true} : vector<4x32x1xf32> -> vector<4x32x1xf32>
      %208 = vector.broadcast %207 : vector<4x32x1xf32> to vector<4x32x32xf32>
      %209 = arith.mulf %204, %208 : vector<4x32x32xf32>
      %210 = arith.truncf %209 : vector<4x32x32xf32> to vector<4x32x32xbf16>
      "tpu.trace_start"() <{level = 10 : i32, message = "bqk,bkd->bqd"}> : () -> ()
      %cst_64 = arith.constant dense<0.000000e+00> : vector<4x32x8xf32>
      %211 = tpu.matmul %210, %193, %cst_64 {dimension_numbers = #tpu.dot_dimension_numbers<[2], [1], [1], [2], [0, 0, 0, 1, 1, 2], [0], [0]>} : vector<4x32x32xbf16>, vector<4x32x8xbf16>, vector<4x32x8xf32> -> vector<4x32x8xf32>
      "tpu.trace_stop"() : () -> ()
      %212 = vector.extract_strided_slice %85 {offsets = [0, 0, 48], sizes = [4, 32, 8], strides = [1, 1, 1]} : vector<4x32x192xbf16> to vector<4x32x8xbf16>
      %213 = vector.extract_strided_slice %85 {offsets = [0, 0, 112], sizes = [4, 32, 8], strides = [1, 1, 1]} : vector<4x32x192xbf16> to vector<4x32x8xbf16>
      %214 = vector.extract_strided_slice %85 {offsets = [0, 0, 176], sizes = [4, 32, 8], strides = [1, 1, 1]} : vector<4x32x192xbf16> to vector<4x32x8xbf16>
      "tpu.trace_start"() <{level = 10 : i32, message = "bqd,bkd->bqk"}> : () -> ()
      %cst_65 = arith.constant dense<0.000000e+00> : vector<4x32x32xf32>
      %215 = tpu.matmul %212, %213, %cst_65 {dimension_numbers = #tpu.dot_dimension_numbers<[2], [2], [1], [1], [0, 0, 0, 1, 1, 1], [0], [0]>} : vector<4x32x8xbf16>, vector<4x32x8xbf16>, vector<4x32x32xf32> -> vector<4x32x32xf32>
      "tpu.trace_stop"() : () -> ()
      %cst_66 = arith.constant 1.250000e-01 : f32
      %216 = vector.broadcast %cst_66 : f32 to vector<4x32x32xf32>
      %217 = arith.mulf %215, %216 : vector<4x32x32xf32>
      %218 = vector.shape_cast %0 : vector<32x32xf32> to vector<1x32x32xf32>
      %219 = vector.broadcast %218 : vector<1x32x32xf32> to vector<4x32x32xf32>
      %220 = arith.addf %217, %219 : vector<4x32x32xf32>
      %cst_67 = arith.constant dense<0xFF800000> : vector<4x32xf32>
      %221 = vector.multi_reduction <maximumf>, %220, %cst_67 [2] : vector<4x32x32xf32> to vector<4x32xf32>
      %222 = vector.shape_cast %221 : vector<4x32xf32> to vector<4x32x1xf32>
      %223 = vector.broadcast %222 : vector<4x32x1xf32> to vector<4x32x32xf32>
      %224 = arith.subf %220, %223 : vector<4x32x32xf32>
      %225 = math.exp %224 : vector<4x32x32xf32>
      %cst_68 = arith.constant dense<0.000000e+00> : vector<4x32xf32>
      %226 = vector.multi_reduction <add>, %225, %cst_68 [2] : vector<4x32x32xf32> to vector<4x32xf32>
      %227 = vector.shape_cast %226 : vector<4x32xf32> to vector<4x32x1xf32>
      %228 = tpu.reciprocal %227 {approx = true} : vector<4x32x1xf32> -> vector<4x32x1xf32>
      %229 = vector.broadcast %228 : vector<4x32x1xf32> to vector<4x32x32xf32>
      %230 = arith.mulf %225, %229 : vector<4x32x32xf32>
      %231 = arith.truncf %230 : vector<4x32x32xf32> to vector<4x32x32xbf16>
      "tpu.trace_start"() <{level = 10 : i32, message = "bqk,bkd->bqd"}> : () -> ()
      %cst_69 = arith.constant dense<0.000000e+00> : vector<4x32x8xf32>
      %232 = tpu.matmul %231, %214, %cst_69 {dimension_numbers = #tpu.dot_dimension_numbers<[2], [1], [1], [2], [0, 0, 0, 1, 1, 2], [0], [0]>} : vector<4x32x32xbf16>, vector<4x32x8xbf16>, vector<4x32x8xf32> -> vector<4x32x8xf32>
      "tpu.trace_stop"() : () -> ()
      %233 = vector.extract_strided_slice %85 {offsets = [0, 0, 56], sizes = [4, 32, 8], strides = [1, 1, 1]} : vector<4x32x192xbf16> to vector<4x32x8xbf16>
      %234 = vector.extract_strided_slice %85 {offsets = [0, 0, 120], sizes = [4, 32, 8], strides = [1, 1, 1]} : vector<4x32x192xbf16> to vector<4x32x8xbf16>
      %235 = vector.extract_strided_slice %85 {offsets = [0, 0, 184], sizes = [4, 32, 8], strides = [1, 1, 1]} : vector<4x32x192xbf16> to vector<4x32x8xbf16>
      "tpu.trace_start"() <{level = 10 : i32, message = "bqd,bkd->bqk"}> : () -> ()
      %cst_70 = arith.constant dense<0.000000e+00> : vector<4x32x32xf32>
      %236 = tpu.matmul %233, %234, %cst_70 {dimension_numbers = #tpu.dot_dimension_numbers<[2], [2], [1], [1], [0, 0, 0, 1, 1, 1], [0], [0]>} : vector<4x32x8xbf16>, vector<4x32x8xbf16>, vector<4x32x32xf32> -> vector<4x32x32xf32>
      "tpu.trace_stop"() : () -> ()
      %cst_71 = arith.constant 1.250000e-01 : f32
      %237 = vector.broadcast %cst_71 : f32 to vector<4x32x32xf32>
      %238 = arith.mulf %236, %237 : vector<4x32x32xf32>
      %239 = vector.shape_cast %0 : vector<32x32xf32> to vector<1x32x32xf32>
      %240 = vector.broadcast %239 : vector<1x32x32xf32> to vector<4x32x32xf32>
      %241 = arith.addf %238, %240 : vector<4x32x32xf32>
      %cst_72 = arith.constant dense<0xFF800000> : vector<4x32xf32>
      %242 = vector.multi_reduction <maximumf>, %241, %cst_72 [2] : vector<4x32x32xf32> to vector<4x32xf32>
      %243 = vector.shape_cast %242 : vector<4x32xf32> to vector<4x32x1xf32>
      %244 = vector.broadcast %243 : vector<4x32x1xf32> to vector<4x32x32xf32>
      %245 = arith.subf %241, %244 : vector<4x32x32xf32>
      %246 = math.exp %245 : vector<4x32x32xf32>
      %cst_73 = arith.constant dense<0.000000e+00> : vector<4x32xf32>
      %247 = vector.multi_reduction <add>, %246, %cst_73 [2] : vector<4x32x32xf32> to vector<4x32xf32>
      %248 = vector.shape_cast %247 : vector<4x32xf32> to vector<4x32x1xf32>
      %249 = tpu.reciprocal %248 {approx = true} : vector<4x32x1xf32> -> vector<4x32x1xf32>
      %250 = vector.broadcast %249 : vector<4x32x1xf32> to vector<4x32x32xf32>
      %251 = arith.mulf %246, %250 : vector<4x32x32xf32>
      %252 = arith.truncf %251 : vector<4x32x32xf32> to vector<4x32x32xbf16>
      "tpu.trace_start"() <{level = 10 : i32, message = "bqk,bkd->bqd"}> : () -> ()
      %cst_74 = arith.constant dense<0.000000e+00> : vector<4x32x8xf32>
      %253 = tpu.matmul %252, %235, %cst_74 {dimension_numbers = #tpu.dot_dimension_numbers<[2], [1], [1], [2], [0, 0, 0, 1, 1, 2], [0], [0]>} : vector<4x32x32xbf16>, vector<4x32x8xbf16>, vector<4x32x8xf32> -> vector<4x32x8xf32>
      "tpu.trace_stop"() : () -> ()
      %254 = tpu.concatenate %106, %127, %148, %169, %190, %211, %232, %253 in 2 : vector<4x32x8xf32>, vector<4x32x8xf32>, vector<4x32x8xf32>, vector<4x32x8xf32>, vector<4x32x8xf32>, vector<4x32x8xf32>, vector<4x32x8xf32>, vector<4x32x8xf32> -> vector<4x32x64xf32>
      %255 = vector.shape_cast %254 : vector<4x32x64xf32> to vector<128x64xf32>
      %256 = arith.truncf %255 : vector<128x64xf32> to vector<128x64xbf16>
      %cst_75 = arith.constant dense<0.000000e+00> : vector<128x64xf32>
      %257 = tpu.matmul %256, %50, %cst_75 {dimension_numbers = #tpu.dot_dimension_numbers<[1], [0], [0], [1], [0, 0, 1, 1], [], []>} : vector<128x64xbf16>, vector<64x64xbf16>, vector<128x64xf32> -> vector<128x64xf32>
      %258 = vector.broadcast %43 : vector<1x64xf32> to vector<128x64xf32>
      %259 = arith.addf %257, %258 : vector<128x64xf32>
      %260 = arith.addf %arg13, %259 : vector<128x64xf32>
      %cst_76 = arith.constant dense<0.000000e+00> : vector<128xf32>
      %261 = vector.multi_reduction <add>, %260, %cst_76 [1] : vector<128x64xf32> to vector<128xf32>
      %262 = vector.shape_cast %261 : vector<128xf32> to vector<128x1xf32>
      %cst_77 = arith.constant 6.400000e+01 : f32
      %263 = vector.broadcast %cst_77 : f32 to vector<128x1xf32>
      %264 = arith.divf %262, %263 : vector<128x1xf32>
      %265 = vector.broadcast %264 : vector<128x1xf32> to vector<128x64xf32>
      %266 = arith.subf %260, %265 : vector<128x64xf32>
      %267 = arith.mulf %266, %266 : vector<128x64xf32>
      %cst_78 = arith.constant dense<0.000000e+00> : vector<128xf32>
      %268 = vector.multi_reduction <add>, %267, %cst_78 [1] : vector<128x64xf32> to vector<128xf32>
      %269 = vector.shape_cast %268 : vector<128xf32> to vector<128x1xf32>
      %cst_79 = arith.constant 6.400000e+01 : f32
      %270 = vector.broadcast %cst_79 : f32 to vector<128x1xf32>
      %271 = arith.divf %269, %270 : vector<128x1xf32>
      %272 = vector.broadcast %264 : vector<128x1xf32> to vector<128x64xf32>
      %273 = arith.subf %260, %272 : vector<128x64xf32>
      %cst_80 = arith.constant 9.99999974E-6 : f32
      %274 = vector.broadcast %cst_80 : f32 to vector<128x1xf32>
      %275 = arith.addf %271, %274 : vector<128x1xf32>
      %276 = math.rsqrt %275 : vector<128x1xf32>
      %277 = vector.broadcast %276 : vector<128x1xf32> to vector<128x64xf32>
      %278 = arith.mulf %273, %277 : vector<128x64xf32>
      %279 = vector.broadcast %41 : vector<1x64xf32> to vector<128x64xf32>
      %280 = arith.mulf %278, %279 : vector<128x64xf32>
      %281 = vector.broadcast %42 : vector<1x64xf32> to vector<128x64xf32>
      %282 = arith.addf %280, %281 : vector<128x64xf32>
      %283 = arith.truncf %282 : vector<128x64xf32> to vector<128x64xbf16>
      %cst_81 = arith.constant dense<0.000000e+00> : vector<128x256xf32>
      %284 = tpu.matmul %283, %53, %cst_81 {dimension_numbers = #tpu.dot_dimension_numbers<[1], [0], [0], [1], [0, 0, 1, 1], [], []>} : vector<128x64xbf16>, vector<64x256xbf16>, vector<128x256xf32> -> vector<128x256xf32>
      %285 = vector.broadcast %56 : vector<1x256xf32> to vector<128x256xf32>
      %286 = arith.addf %284, %285 : vector<128x256xf32>
      %cst_82 = arith.constant 0.000000e+00 : f32
      %287 = vector.broadcast %cst_82 : f32 to vector<128x256xf32>
      %288 = arith.maximumf %286, %287 : vector<128x256xf32>
      %289 = arith.truncf %288 : vector<128x256xf32> to vector<128x256xbf16>
      %cst_83 = arith.constant dense<0.000000e+00> : vector<128x64xf32>
      %290 = tpu.matmul %289, %59, %cst_83 {dimension_numbers = #tpu.dot_dimension_numbers<[1], [0], [0], [1], [0, 0, 1, 1], [], []>} : vector<128x256xbf16>, vector<256x64xbf16>, vector<128x64xf32> -> vector<128x64xf32>
      %291 = vector.broadcast %44 : vector<1x64xf32> to vector<128x64xf32>
      %292 = arith.addf %290, %291 : vector<128x64xf32>
      %293 = arith.addf %260, %292 : vector<128x64xf32>
      scf.yield %293 : vector<128x64xf32>
    }
    %c10_i32_3 = arith.constant 10 : i32
    %c0_4 = arith.constant 0 : index
    %c0_5 = arith.constant 0 : index
    %4 = vector.load %arg8[%c0_4, %c0_5] : memref<2x64xf32, #tpu.memory_space<vmem>>, vector<2x64xf32>
    %5 = vector.extract_strided_slice %4 {offsets = [0, 0], sizes = [1, 64], strides = [1, 1]} : vector<2x64xf32> to vector<1x64xf32>
    %6 = vector.extract_strided_slice %4 {offsets = [1, 0], sizes = [1, 64], strides = [1, 1]} : vector<2x64xf32> to vector<1x64xf32>
    %cst = arith.constant dense<0.000000e+00> : vector<128xf32>
    %7 = vector.multi_reduction <add>, %3, %cst [1] : vector<128x64xf32> to vector<128xf32>
    %8 = vector.shape_cast %7 : vector<128xf32> to vector<128x1xf32>
    %cst_6 = arith.constant 6.400000e+01 : f32
    %9 = vector.broadcast %cst_6 : f32 to vector<128x1xf32>
    %10 = arith.divf %8, %9 : vector<128x1xf32>
    %11 = vector.broadcast %10 : vector<128x1xf32> to vector<128x64xf32>
    %12 = arith.subf %3, %11 : vector<128x64xf32>
    %13 = arith.mulf %12, %12 : vector<128x64xf32>
    %cst_7 = arith.constant dense<0.000000e+00> : vector<128xf32>
    %14 = vector.multi_reduction <add>, %13, %cst_7 [1] : vector<128x64xf32> to vector<128xf32>
    %15 = vector.shape_cast %14 : vector<128xf32> to vector<128x1xf32>
    %cst_8 = arith.constant 6.400000e+01 : f32
    %16 = vector.broadcast %cst_8 : f32 to vector<128x1xf32>
    %17 = arith.divf %15, %16 : vector<128x1xf32>
    %18 = vector.broadcast %10 : vector<128x1xf32> to vector<128x64xf32>
    %19 = arith.subf %3, %18 : vector<128x64xf32>
    %cst_9 = arith.constant 9.99999974E-6 : f32
    %20 = vector.broadcast %cst_9 : f32 to vector<128x1xf32>
    %21 = arith.addf %17, %20 : vector<128x1xf32>
    %22 = math.rsqrt %21 : vector<128x1xf32>
    %23 = vector.broadcast %22 : vector<128x1xf32> to vector<128x64xf32>
    %24 = arith.mulf %19, %23 : vector<128x64xf32>
    %25 = vector.broadcast %5 : vector<1x64xf32> to vector<128x64xf32>
    %26 = arith.mulf %24, %25 : vector<128x64xf32>
    %27 = vector.broadcast %6 : vector<1x64xf32> to vector<128x64xf32>
    %28 = arith.addf %26, %27 : vector<128x64xf32>
    %29 = arith.truncf %28 : vector<128x64xf32> to vector<128x64xbf16>
    %c0_10 = arith.constant 0 : index
    %c0_11 = arith.constant 0 : index
    %30 = vector.load %arg9[%c0_10, %c0_11] : memref<64x128xbf16, #tpu.memory_space<vmem>>, vector<64x128xbf16>
    %cst_12 = arith.constant dense<0.000000e+00> : vector<128x128xf32>
    %31 = tpu.matmul %29, %30, %cst_12 {dimension_numbers = #tpu.dot_dimension_numbers<[1], [0], [0], [1], [0, 0, 1, 1], [], []>} : vector<128x64xbf16>, vector<64x128xbf16>, vector<128x128xf32> -> vector<128x128xf32>
    %c0_13 = arith.constant 0 : index
    %c0_14 = arith.constant 0 : index
    %32 = vector.load %arg10[%c0_13, %c0_14] : memref<1x128xf32, #tpu.memory_space<vmem>>, vector<1x128xf32>
    %33 = vector.broadcast %32 : vector<1x128xf32> to vector<128x128xf32>
    %34 = arith.addf %31, %33 : vector<128x128xf32>
    %c0_15 = arith.constant 0 : index
    %c0_16 = arith.constant 0 : index
    %35 = vector.load %arg11[%c0_15, %c0_16] : memref<128x128xf32, #tpu.memory_space<vmem>>, vector<128x128xf32>
    tpu.vector_store %arg11[%c0_15, %c0_16], %34 {strides = array<i32>} : memref<128x128xf32, #tpu.memory_space<vmem>>, vector<128x128xf32>,
    return
  }
}

</mosaic_0001>

<bundles_post_ra>
// kernel: language_model_forward.1
= control target key start
LH: loop header
LB: loop body
LE: loop exit
PB: predicated region body
PF: predicated region fallthrough
CT: control target
= control target key end

     0   :  { %16 = vsyncpa [#allocation3], 0  ;;  %s14949_s0 = inlined_call_operand.vmem [shape: f32[128,64], index: 0, kind: input, shape index: {}]   ;;  %s14950_s1 = inlined_call_operand.vmem [shape: f32[32,32], index: 1, kind: input, shape index: {}]   ;;  %s14951_s2 = inlined_call_operand.vmem [shape: f32[10,8,64], index: 2, kind: input, shape index: {}]   ;;  %s14952_s3 = inlined_call_operand.vmem [shape: bf16[10,64,192], index: 3, kind: input, shape index: {}]   ;;  %s14953_s4 = inlined_call_operand.vmem [shape: bf16[10,64,64], index: 4, kind: input, shape index: {}]   ;;  %s14954_s5 = inlined_call_operand.vmem [shape: bf16[10,64,256], index: 5, kind: input, shape index: {}]   ;;  %s14955_s6 = inlined_call_operand.vmem [shape: f32[10,1,256], index: 6, kind: input, shape index: {}]   ;;  %s14956_s7 = inlined_call_operand.vmem [shape: bf16[10,256,64], index: 7, kind: input, shape index: {}]   ;;  %s14957_s8 = inlined_call_operand.vmem [shape: f32[2,64], index: 8, kind: input, shape index: {}]   ;;  %s14958_s9 = inlined_call_operand.vmem [shape: bf16[64,128], index: 9, kind: input, shape index: {}]   ;;  %s14959_s10 = inlined_call_operand.vmem [shape: f32[1,128], index: 10, kind: input, shape index: {}]   ;;  %s14960_s11 = inlined_call_operand.hbm [shape: f32[128,128], index: 11, kind: output, shape index: {}]  }
   0x1   :  { %v10950_v0 = vld [vmem:[%s14950_s1] sm:$0xff]  ;;  %v10955_v1 = vld [vmem:[%s14950_s1 + $0x8] sm:$0xff]  ;;  %v10960_v2 = vld [vmem:[%s14950_s1 + $0x10] sm:$0xff] }
   0x2   :  { %15044 = vst [vmem:[#allocation5_spill] sm:$0xff] %v10950_v0  ;;  %15045 = vst [vmem:[#allocation6_spill] sm:$0xff] %v10955_v1  ;;  %v10965_v3 = vld [vmem:[%s14950_s1 + $0x18] sm:$0xff]  ;;  %v44_v4 = vld [vmem:[%s14949_s0] sm:$0xff]  }
   0x3   :  { %15046 = vst [vmem:[#allocation7_spill] sm:$0xff] %v10960_v2  ;;  %v45_v5 = vld [vmem:[%s14949_s0 + $0x8] sm:$0xff]   ;;  %v46_v6 = vld [vmem:[%s14949_s0 + $0x10] sm:$0xff]   ;;  %v47_v7 = vld [vmem:[%s14949_s0 + $0x18] sm:$0xff]  }
   0x4   :  { %v48_v8 = vld [vmem:[%s14949_s0 + $0x20] sm:$0xff]   ;;  %v49_v9 = vld [vmem:[%s14949_s0 + $0x28] sm:$0xff]   ;;  %v50_v10 = vld [vmem:[%s14949_s0 + $0x30] sm:$0xff]  }
   0x5   :  { %v51_v11 = vld [vmem:[%s14949_s0 + $0x38] sm:$0xff]   ;;  %v52_v12 = vld [vmem:[%s14949_s0 + $0x40] sm:$0xff]   ;;  %v53_v13 = vld [vmem:[%s14949_s0 + $0x48] sm:$0xff]  }
   0x6   :  { %v54_v14 = vld [vmem:[%s14949_s0 + $0x50] sm:$0xff]   ;;  %v55_v15 = vld [vmem:[%s14949_s0 + $0x58] sm:$0xff]   ;;  %v56_v16 = vld [vmem:[%s14949_s0 + $0x60] sm:$0xff]  }
   0x7   :  { %v57_v17 = vld [vmem:[%s14949_s0 + $0x68] sm:$0xff]   ;;  %v58_v18 = vld [vmem:[%s14949_s0 + $0x70] sm:$0xff]   ;;  %v59_v19 = vld [vmem:[%s14949_s0 + $0x78] sm:$0xff]   ;;  %s11047_s0 = smov 0  }
   0x8 LB: > { %15050 = vst [vmem:[#allocation8_spill] sm:$0xff] %v10802_v19  ;;  %15051 = vst [vmem:[#allocation9_spill] sm:$0xff] %v10806_v18  ;;  %vm154_vm0 = vcmask 523264   ;;  %s8639_s17 = sshll.u32 %s10866_s0, 6  ;;  %s8430_s21 = sshll.u32 %s10866_s0, 3  ;;  %vm611_vm1 = vcmask 64512   ;;  %v10810_v17 = vphi %v57_v17, %v15322_v17   ;;  %v10806_v18 = vphi %v58_v18, %v15321_v18   ;;  %v10802_v19 = vphi %v59_v19, %v15320_v19   ;;  %s10866_s0 = sphi %s11047_s0, %s65_s0   ;;  %v10862_v4 = vphi %v44_v4, %v15335_v4   ;;  %v10858_v5 = vphi %v45_v5, %v15334_v5   ;;  %v10854_v6 = vphi %v46_v6, %v15333_v6   ;;  %v10850_v7 = vphi %v47_v7, %v15332_v7   ;;  %v10846_v8 = vphi %v48_v8, %v15331_v8   ;;  %v10842_v9 = vphi %v49_v9, %v15330_v9   ;;  %v10838_v10 = vphi %v50_v10, %v15329_v10   ;;  %v10834_v11 = vphi %v51_v11, %v15328_v11   ;;  %v10830_v12 = vphi %v52_v12, %v15327_v12   ;;  %v10826_v13 = vphi %v53_v13, %v15326_v13   ;;  %v10822_v14 = vphi %v54_v14, %v15325_v14   ;;  %v10818_v15 = vphi %v55_v15, %v15324_v15   ;;  %v10814_v16 = vphi %v56_v16, %v15323_v16  }
   0x9   : > { %v15048_v1 = vld [vmem:[#allocation6_spill] sm:$0xff]  ;;  %v15049_v0 = vld [vmem:[#allocation5_spill] sm:$0xff]  ;;  %15052 = vst [vmem:[#allocation10_spill] sm:$0xff] %v10810_v17  ;;  %15053 = vst [vmem:[#allocation11_spill] sm:$0xff] %v10814_v16  ;;  %v155_v20 = vsel %vm154_vm0, %v10862_v4, 0.0  ;;  %v161_v21 = vsel %vm154_vm0, %v10854_v6, 0.0  ;;  %s11218_s20 = scalar_lea.vmem %s14952_s3, %s8639_s17  ;;  %s83_s24 = scalar_lea.vmem %s14951_s2, %s8430_s21 }
   0xa   : > { %v15047_v2 = vld [vmem:[#allocation7_spill] sm:$0xff]  ;;  %15054 = vst [vmem:[#allocation12_spill] sm:$0xff] %v10818_v15  ;;  %15055 = vst [vmem:[#allocation13_spill] sm:$0xff] %v10822_v14  ;;  %156 = vadd.xlane.f32.xlu0 %v155_v20  ;;  %162 = vadd.xlane.f32.xlu1 %v161_v21  ;;  %v158_v22 = vsel %vm154_vm0, %v10858_v5, 0.0  ;;  %v164_v23 = vsel %vm154_vm0, %v10850_v7, 0.0  ;;  %v167_v24 = vsel %vm154_vm0, %v10846_v8, 0.0  ;;  %s11248_s27 = scalar_lea.vmem %s14954_s5, %s8639_s17 }
   0xb   : > { %15056 = vst [vmem:[#allocation14_spill] sm:$0xff] %v10826_v13  ;;  %15057 = vst [vmem:[#allocation15_spill] sm:$0xff] %v10830_v12  ;;  %v170_v25 = vsel %vm154_vm0, %v10842_v9, 0.0  ;;  %v173_v26 = vsel %vm154_vm0, %v10838_v10, 0.0  ;;  %v176_v27 = vsel %vm154_vm0, %v10834_v11, 0.0  ;;  %v179_v28 = vsel %vm154_vm0, %v10830_v12, 0.0 }
   0xc   : > { %15058 = vst [vmem:[#allocation16_spill] sm:$0xff] %v10834_v11  ;;  %15059 = vst [vmem:[#allocation17_spill] sm:$0xff] %v10838_v10  ;;  %v182_v29 = vsel %vm154_vm0, %v10826_v13, 0.0  ;;  %v185_v30 = vsel %vm154_vm0, %v10822_v14, 0.0  ;;  %v188_v31 = vsel %vm154_vm0, %v10818_v15, 0.0  ;;  %v191_v32 = vsel %vm154_vm0, %v10814_v16, 0.0 }
   0xd   : > { %15060 = vst [vmem:[#allocation18_spill] sm:$0xff] %v10842_v9  ;;  %15061 = vst [vmem:[#allocation19_spill] sm:$0xff] %v10846_v8  ;;  %v194_v33 = vsel %vm154_vm0, %v10810_v17, 0.0  ;;  %v197_v34 = vsel %vm154_vm0, %v10806_v18, 0.0  ;;  %v200_v35 = vsel %vm154_vm0, %v10802_v19, 0.0  ;;  %s8642_s28 = sshll.u32 %s10866_s0, 7 }
   0xe   : > { %15062 = vst [vmem:[#allocation20_spill] sm:$0xff] %v10850_v7  ;;  %15063 = vst [vmem:[#allocation21_spill] sm:$0xff] %v10854_v6  ;;  %159 = vadd.xlane.f32.xlu0 %v158_v22  ;;  %165 = vadd.xlane.f32.xlu1 %v164_v23  ;;  %s11269_s12 = scalar_lea.vmem %s14956_s7, %s8642_s28  ;;  %s10869_s13 = smov 64   ;;  %vm906_vm2 = vcmask 261120   ;;  %vm6935_vm3 = vcmask 130048   ;;  %vm6952_vm4 = vcmask 195584  }
   0xf   : > { %15064 = vst [vmem:[#allocation22_spill] sm:$0xff] %v10858_v5  ;;  %15065 = vst [vmem:[#allocation23_spill] sm:$0xff] %v10862_v4  ;;  %s10870_s14 = smov 56   ;;  %s10871_s15 = smov 120   ;;  %vm6985_vm5 = vcmask 326656   ;;  %vm7002_vm6 = vcmask 392192  }
  0x10   : > { %s10872_s1 = smov 48   ;;  %s10873_s16 = smov 112   ;;  %vm7019_vm7 = vcmask 457728  }
  0x11   : > { %s10874_s17 = smov 40   ;;  %s10875_s18 = smov 104  }
  0x12   : > { %168 = vadd.xlane.f32.xlu0 %v167_v24  ;;  %171 = vadd.xlane.f32.xlu1 %v170_v25  ;;  %s10876_s19 = smov 32   ;;  %s10878_s21 = smov 24  }
  0x13   : > { %s10879_s22 = smov 88   ;;  %s10880_s23 = smov 16  }
  0x14   : > { %s10882_s25 = smov 8   ;;  %s10883_s26 = smov 72  }
  0x15   : > { %s8640_s28 = sshll.u32 %s10866_s0, 5 }
  0x16   : > { %174 = vadd.xlane.f32.xlu0 %v173_v26  ;;  %177 = vadd.xlane.f32.xlu1 %v176_v27 }
  0x1a   : > { %180 = vadd.xlane.f32.xlu0 %v179_v28  ;;  %183 = vadd.xlane.f32.xlu1 %v182_v29 }
  0x1e   : > { %186 = vadd.xlane.f32.xlu0 %v185_v30  ;;  %189 = vadd.xlane.f32.xlu1 %v188_v31 }
  0x22   : > { %192 = vadd.xlane.f32.xlu0 %v191_v32  ;;  %195 = vadd.xlane.f32.xlu1 %v194_v33 }
  0x26   : > { %198 = vadd.xlane.f32.xlu0 %v197_v34  ;;  %201 = vadd.xlane.f32.xlu1 %v200_v35 }
  0x93   : > { %v157_v36 = vpop.xlane.xlu0 %156  ;;  %v163_v37 = vpop.xlane.xlu1 %162 }
  0x94   : > { %v204_v38 = vmul.f32 0.015625, %v157_v36  ;;  %v206_v39 = vmul.f32 0.015625, %v163_v37 }
  0x96   : > { %v11133_v40 = vsub.f32 %v10862_v4, %v204_v38  ;;  %v11136_v41 = vsub.f32 %v10854_v6, %v206_v39 }
  0x97   : > { %v160_v42 = vpop.xlane.xlu0 %159  ;;  %v166_v43 = vpop.xlane.xlu1 %165 }
  0x98   : > { %v205_v44 = vmul.f32 0.015625, %v160_v42  ;;  %v207_v45 = vmul.f32 0.015625, %v166_v43  ;;  %v236_v46 = vmul.f32 %v11133_v40, %v11133_v40  ;;  %v238_v47 = vmul.f32 %v11136_v41, %v11136_v41 }
  0x9a   : > { %v11143_v48 = vsub.f32 %v10858_v5, %v205_v44  ;;  %v11146_v49 = vsub.f32 %v10850_v7, %v207_v45  ;;  %v252_v50 = vsel %vm154_vm0, %v236_v46, 0.0  ;;  %v258_v53 = vsel %vm154_vm0, %v238_v47, 0.0 }
  0x9b   : > { %v169_v51 = vpop.xlane.xlu0 %168  ;;  %253 = vadd.xlane.f32.xlu0 %v252_v50  ;;  %v172_v52 = vpop.xlane.xlu1 %171 }
  0x9c   : > { %v208_v54 = vmul.f32 0.015625, %v169_v51  ;;  %v209_v55 = vmul.f32 0.015625, %v172_v52  ;;  %v237_v56 = vmul.f32 %v11143_v48, %v11143_v48  ;;  %v239_v57 = vmul.f32 %v11146_v49, %v11146_v49 }
  0x9e   : > { %v11155_v58 = vsub.f32 %v10846_v8, %v208_v54  ;;  %v11158_v59 = vsub.f32 %v10842_v9, %v209_v55  ;;  %v255_v60 = vsel %vm154_vm0, %v237_v56, 0.0  ;;  %v261_v63 = vsel %vm154_vm0, %v239_v57, 0.0 }
  0x9f   : > { %v175_v61 = vpop.xlane.xlu0 %174  ;;  %259 = vadd.xlane.f32.xlu0 %v258_v53  ;;  %256 = vadd.xlane.f32.xlu1 %v255_v60  ;;  %v178_v62 = vpop.xlane.xlu1 %177 }
  0xa0   : > { %v210_v20 = vmul.f32 0.015625, %v175_v61  ;;  %v211_v21 = vmul.f32 0.015625, %v178_v62  ;;  %v240_v22 = vmul.f32 %v11155_v58, %v11155_v58  ;;  %v241_v23 = vmul.f32 %v11158_v59, %v11158_v59 }
  0xa2   : > { %v11167_v24 = vsub.f32 %v10838_v10, %v210_v20  ;;  %v11170_v25 = vsub.f32 %v10834_v11, %v211_v21  ;;  %v264_v26 = vsel %vm154_vm0, %v240_v22, 0.0  ;;  %v267_v29 = vsel %vm154_vm0, %v241_v23, 0.0 }
  0xa3   : > { %v181_v27 = vpop.xlane.xlu0 %180  ;;  %265 = vadd.xlane.f32.xlu0 %v264_v26  ;;  %262 = vadd.xlane.f32.xlu1 %v261_v63  ;;  %v184_v28 = vpop.xlane.xlu1 %183 }
  0xa4   : > { %v212_v30 = vmul.f32 0.015625, %v181_v27  ;;  %v213_v31 = vmul.f32 0.015625, %v184_v28  ;;  %v242_v32 = vmul.f32 %v11167_v24, %v11167_v24  ;;  %v243_v33 = vmul.f32 %v11170_v25, %v11170_v25 }
  0xa6   : > { %v11179_v34 = vsub.f32 %v10830_v12, %v212_v30  ;;  %v11182_v35 = vsub.f32 %v10826_v13, %v213_v31  ;;  %v270_v36 = vsel %vm154_vm0, %v242_v32, 0.0  ;;  %v273_v39 = vsel %vm154_vm0, %v243_v33, 0.0  ;;  %v10054_v31 = vld [vmem:[%s11218_s20 + $0x34] ss:$8 sps:$4 sm:$0xff]   ;;  %v10056_v33 = vld [vmem:[%s11218_s20 + $0x30] ss:$8 sps:$4 sm:$0xff]  }
  0xa7   : > { %v187_v37 = vpop.xlane.xlu0 %186  ;;  %271 = vadd.xlane.f32.xlu0 %v270_v36  ;;  %268 = vadd.xlane.f32.xlu1 %v267_v29  ;;  %v190_v38 = vpop.xlane.xlu1 %189  ;;  %v364_v32 = vlaneseq }
  0xa8   : > { %v214_v42 = vmul.f32 0.015625, %v187_v37  ;;  %v215_v43 = vmul.f32 0.015625, %v190_v38  ;;  %v244_v44 = vmul.f32 %v11179_v34, %v11179_v34  ;;  %v245_v45 = vmul.f32 %v11182_v35, %v11182_v35  ;;  %484 = vmatprep.subr.bf16.mxu0 %v10054_v31 }
  0xa9   : > { %485 = vmatpush1.bf16.msra.mxu0 %v10056_v33 }
  0xaa   : > { %v11191_v46 = vsub.f32 %v10822_v14, %v214_v42  ;;  %v11194_v47 = vsub.f32 %v10818_v15, %v215_v43  ;;  %v276_v50 = vsel %vm154_vm0, %v244_v44, 0.0  ;;  %v279_v53 = vsel %vm154_vm0, %v245_v45, 0.0  ;;  %v10057_v43 = vld [vmem:[%s11218_s20 + $0x24] ss:$8 sps:$4 sm:$0xff]  }
  0xab   : > { %v193_v51 = vpop.xlane.xlu0 %192  ;;  %277 = vadd.xlane.f32.xlu0 %v276_v50  ;;  %274 = vadd.xlane.f32.xlu1 %v273_v39  ;;  %v196_v52 = vpop.xlane.xlu1 %195  ;;  %v11235_v39 = vshrl.u32 %v364_v32, 7  ;;  %v11243_v45 = vld [vmem:[%s83_s24] sm:$0xff]  ;;  %s10881_s24 = smov 80  }
  0xac   : > { %v216_v54 = vmul.f32 0.015625, %v193_v51  ;;  %v217_v55 = vmul.f32 0.015625, %v196_v52  ;;  %v246_v56 = vmul.f32 %v11191_v46, %v11191_v46  ;;  %v247_v57 = vmul.f32 %v11194_v47, %v11194_v47  ;;  %486 = vmatprep.subr.bf16.mxu0 %v10057_v43 }
  0xad   : > { %v7046_v50 = vsub.s32 4, %v11235_v39  ;;  %v7419_v51 = vsub.s32 2, %v11235_v39  ;;  %v7439_v52 = vsub.s32 3, %v11235_v39 }
  0xae   : > { %v11203_v60 = vsub.f32 %v10814_v16, %v216_v54  ;;  %v11206_v61 = vsub.f32 %v10810_v17, %v217_v55  ;;  %v282_v62 = vsel %vm154_vm0, %v246_v56, 0.0  ;;  %v285_v20 = vsel %vm154_vm0, %v247_v57, 0.0  ;;  %v10059_v54 = vld [vmem:[%s11218_s20 + $0x20] ss:$8 sps:$4 sm:$0xff]  }
  0xaf   : > { %283 = vadd.xlane.f32.xlu0 %v282_v62  ;;  %v199_v63 = vpop.xlane.xlu0 %198  ;;  %280 = vadd.xlane.f32.xlu1 %v279_v53  ;;  %v202_v21 = vpop.xlane.xlu1 %201  ;;  %v7703_v53 = vsub.s32 5, %v11235_v39  ;;  %v11257_v55 = vrot.slane %v11243_v45, %v7046_v50  ;;  %v11260_v56 = vrot.slane %v11243_v45, %v7419_v51  ;;  %v11263_v57 = vrot.slane %v11243_v45, %v7439_v52  ;;  %v10060_v62 = vld [vmem:[%s11218_s20 + $0x14] ss:$8 sps:$4 sm:$0xff]  }
  0xb0   : > { %v218_v22 = vmul.f32 0.015625, %v199_v63  ;;  %v248_v23 = vmul.f32 %v11203_v60, %v11203_v60  ;;  %v219_v26 = vmul.f32 0.015625, %v202_v21  ;;  %v249_v27 = vmul.f32 %v11206_v61, %v11206_v61  ;;  %487 = vmatpush1.bf16.msra.mxu0 %v10059_v54  ;;  %v10063_v21 = vld [vmem:[%s11218_s20 + $0x4] ss:$8 sps:$4 sm:$0xff]  }
  0xb1   : > { %15066 = vst [vmem:[#allocation24_spill] sm:$0xff] %v11257_v55  ;;  %15067 = vst [vmem:[#allocation25_spill] sm:$0xff] %v11260_v56  ;;  %v11272_v63 = vrot.slane %v11243_v45, %v7703_v53  ;;  %488 = vmatprep.subr.bf16.mxu0 %v10060_v62 }
  0xb2   : > { %v11221_v28 = vsub.f32 %v10806_v18, %v218_v22  ;;  %v288_v29 = vsel %vm154_vm0, %v248_v23, 0.0  ;;  %v11225_v30 = vsub.f32 %v10802_v19, %v219_v26  ;;  %v291_v37 = vsel %vm154_vm0, %v249_v27, 0.0  ;;  %15068 = vst [vmem:[#allocation26_spill] sm:$0xff] %v11263_v57  ;;  %v10065_v22 = vld [vmem:[%s11218_s20] ss:$8 sps:$4 sm:$0xff]  }
  0xb3   : > { %289 = vadd.xlane.f32.xlu0 %v288_v29  ;;  %286 = vadd.xlane.f32.xlu1 %v285_v20  ;;  %15069 = vst [vmem:[#allocation27_spill] sm:$0xff] %v11272_v63  ;;  %v10062_v20 = vld [vmem:[%s11218_s20 + $0x10] ss:$8 sps:$4 sm:$0xff]   ;;  %v14961_v23 = vmov 0   ;;  %s10877_s20 = smov 96  }
  0xb4   : > { %v250_v36 = vmul.f32 %v11221_v28, %v11221_v28  ;;  %v251_v38 = vmul.f32 %v11225_v30, %v11225_v30  ;;  %489 = vmatpush1.bf16.msra.mxu0 %v10062_v20  ;;  %508 = vmatprep.mubr.bf16.mxu0 %v14961_v23 }
  0xb5   : > { %490 = vmatprep.subr.bf16.mxu0 %v10063_v21  ;;  %v11279_v21 = vsub.s32 0, %v11235_v39 }
  0xb6   : > { %v294_v42 = vsel %vm154_vm0, %v250_v36, 0.0  ;;  %v297_v44 = vsel %vm154_vm0, %v251_v38, 0.0 }
  0xb7   : > { %295 = vadd.xlane.f32.xlu0 %v294_v42  ;;  %292 = vadd.xlane.f32.xlu1 %v291_v37  ;;  %15070 = vst [vmem:[#allocation28_spill] sm:$0xff] %v11279_v21 }
  0xb8   : > { %491 = vmatpush1.bf16.msra.mxu0 %v10065_v22 }
  0xbb   : > { %298 = vadd.xlane.f32.xlu1 %v297_v44 }
 0x124   : > { %v254_v26 = vpop.xlane.xlu0 %253 }
 0x125   : > { %v300_v27 = vmul.f32 0.015625, %v254_v26 }
 0x127   : > { %v316_v29 = vadd.f32 1e-05, %v300_v27 }
 0x128   : > { %v260_v31 = vpop.xlane.xlu0 %259  ;;  %v257_v32 = vpop.xlane.xlu1 %256 }
 0x129   : > { %10098 = vrsqrt.f32 %v316_v29  ;;  %v302_v33 = vmul.f32 0.015625, %v260_v31  ;;  %v301_v36 = vmul.f32 0.015625, %v257_v32  ;;  %v11283_v31 = vrot.slane %v11243_v45, %v11279_v21 }
 0x12a   : > { %v11286_v32 = vsub.s32 1, %v11235_v39 }
 0x12b   : > { %v317_v37 = vadd.f32 1e-05, %v301_v36  ;;  %v318_v38 = vadd.f32 1e-05, %v302_v33 }
 0x12c   : > { %v263_v42 = vpop.xlane.xlu1 %262  ;;  %v266_v43 = vpop.xlane.xlu0 %265  ;;  %15071 = vst [vmem:[#allocation29_spill] sm:$0xff] %v11286_v32 }
 0x12d   : > { %v303_v44 = vmul.f32 0.015625, %v263_v42  ;;  %10100 = vrsqrt.f32 %v317_v37  ;;  %v304_v51 = vmul.f32 0.015625, %v266_v43  ;;  %v11291_v43 = vrot.slane %v11243_v45, %v11286_v32 }
 0x12e   : > { %10102 = vrsqrt.f32 %v318_v38 }
 0x12f   : > { %v319_v50 = vadd.f32 1e-05, %v303_v44  ;;  %v320_v62 = vadd.f32 1e-05, %v304_v51 }
 0x130   : > { %v269_v52 = vpop.xlane.xlu1 %268  ;;  %v272_v20 = vpop.xlane.xlu0 %271 }
 0x131   : > { %v305_v53 = vmul.f32 0.015625, %v269_v52  ;;  %10104 = vrsqrt.f32 %v319_v50  ;;  %v306_v29 = vmul.f32 0.015625, %v272_v20 }
 0x133   : > { %v321_v54 = vadd.f32 1e-05, %v305_v53  ;;  %v322_v38 = vadd.f32 1e-05, %v306_v29 }
 0x134   : > { %v275_v22 = vpop.xlane.xlu1 %274  ;;  %v278_v44 = vpop.xlane.xlu0 %277 }
 0x135   : > { %10106 = vrsqrt.f32 %v321_v54  ;;  %v307_v27 = vmul.f32 0.015625, %v275_v22 }
 0x136   : > { %v10099_v26 = vpop.eup %10098  ;;  %10108 = vrsqrt.f32 %v320_v62 }
 0x137   : > { %v348_v33 = vmul.f32 %v10099_v26, %v11133_v40  ;;  %v323_v36 = vadd.f32 1e-05, %v307_v27  ;;  %v308_v40 = vmul.f32 0.015625, %v278_v44 }
 0x138   : > { %v281_v42 = vpop.xlane.xlu1 %280 }
 0x139   : > { %v368_v51 = vmul.f32 %v11283_v31, %v348_v33  ;;  %10110 = vrsqrt.f32 %v323_v36  ;;  %v309_v53 = vmul.f32 0.015625, %v281_v42  ;;  %v324_v36 = vadd.f32 1e-05, %v308_v40  ;;  %v284_v42 = vpop.xlane.xlu0 %283 }
 0x13a   : > { %v10101_v37 = vpop.eup %10100  ;;  %10112 = vrsqrt.f32 %v322_v38 }
 0x13b   : > { %v349_v50 = vmul.f32 %v10101_v37, %v11143_v48  ;;  %v10103_v52 = vpop.eup %10102  ;;  %v388_v62 = vadd.f32 %v11291_v43, %v368_v51  ;;  %v325_v26 = vadd.f32 1e-05, %v309_v53 }
 0x13c   : > { %v350_v45 = vmul.f32 %v10103_v52, %v11136_v41  ;;  %v287_v33 = vpop.xlane.xlu1 %286 }
 0x13d   : > { %v369_v39 = vmul.f32 %v11283_v31, %v349_v50  ;;  %10114 = vrsqrt.f32 %v325_v26  ;;  %v311_v44 = vmul.f32 0.015625, %v287_v33  ;;  %v310_v50 = vmul.f32 0.015625, %v284_v42  ;;  %v290_v26 = vpop.xlane.xlu0 %289 }
 0x13e   : > { %v10105_v54 = vpop.eup %10104  ;;  %v370_v37 = vmul.f32 %v11283_v31, %v350_v45  ;;  %10116 = vrsqrt.f32 %v324_v36 }
 0x13f   : > { %v389_v20 = vadd.f32 %v11291_v43, %v369_v39  ;;  %v351_v22 = vmul.f32 %v10105_v54, %v11146_v49  ;;  %v327_v53 = vadd.f32 1e-05, %v311_v44  ;;  %v326_v45 = vadd.f32 1e-05, %v310_v50 }
 0x140   : > { %v390_v51 = vadd.f32 %v11291_v43, %v370_v37 }
 0x141   : > { %v404_v48 = vpack.c.bf16 %v389_v20, %v388_v62  ;;  %v371_v27 = vmul.f32 %v11283_v31, %v351_v22  ;;  %v293_v62 = vpop.xlane.xlu1 %292  ;;  %10118 = vrsqrt.f32 %v327_v53 }
 0x142   : > { %v10107_v29 = vpop.eup %10106  ;;  %10120 = vrsqrt.f32 %v326_v45 }
 0x143   : > { %8446 = vmatmul.mubr.msk.bf16.vlgmr.msra.gmra.mxu0 %vm154_vm0, %v404_v48  ;;  %v10109_v38 = vpop.eup %10108  ;;  %v391_v41 = vadd.f32 %v11291_v43, %v371_v27  ;;  %v353_v49 = vmul.f32 %v10107_v29, %v11158_v59  ;;  %v313_v59 = vmul.f32 0.015625, %v293_v62  ;;  %v312_v27 = vmul.f32 0.015625, %v290_v26 }
 0x144   : > { %518 = vmatprep.mubr.bf16.mxu0 %v14961_v23  ;;  %v352_v52 = vmul.f32 %v10109_v38, %v11155_v58 }
 0x145   : > { %v405_v39 = vpack.c.bf16 %v391_v41, %v390_v51  ;;  %v373_v54 = vmul.f32 %v11283_v31, %v353_v49  ;;  %v329_v36 = vadd.f32 1e-05, %v313_v59  ;;  %v299_v44 = vpop.xlane.xlu1 %298  ;;  %v328_v41 = vadd.f32 1e-05, %v312_v27  ;;  %v296_v51 = vpop.xlane.xlu0 %295 }
 0x146   : > { %v10111_v40 = vpop.eup %10110  ;;  %v372_v22 = vmul.f32 %v11283_v31, %v352_v52  ;;  %v314_v53 = vmul.f32 0.015625, %v296_v51 }
 0x147   : > { %v10113_v20 = vpop.eup %10112  ;;  %v393_v48 = vadd.f32 %v11291_v43, %v373_v54  ;;  %v355_v58 = vmul.f32 %v10111_v40, %v11170_v25  ;;  %10122 = vrsqrt.f32 %v329_v36  ;;  %v315_v25 = vmul.f32 0.015625, %v299_v44 }
 0x148   : > { %v392_v29 = vadd.f32 %v11291_v43, %v372_v22  ;;  %v354_v33 = vmul.f32 %v10113_v20, %v11167_v24  ;;  %10124 = vrsqrt.f32 %v328_v41  ;;  %v330_v22 = vadd.f32 1e-05, %v314_v53 }
 0x149   : > { %v375_v38 = vmul.f32 %v11283_v31, %v355_v58  ;;  %v331_v40 = vadd.f32 1e-05, %v315_v25 }
 0x14a   : > { %v406_v37 = vpack.c.bf16 %v393_v48, %v392_v29  ;;  %v10115_v42 = vpop.eup %10114  ;;  %v374_v49 = vmul.f32 %v11283_v31, %v354_v33 }
 0x14b   : > { %8447 = vmatmul.mubr.msk.bf16.gmra.mxu0 %vm154_vm0, %v405_v39  ;;  %v10117_v50 = vpop.eup %10116  ;;  %v395_v52 = vadd.f32 %v11291_v43, %v375_v38  ;;  %v357_v24 = vmul.f32 %v10115_v42, %v11182_v35  ;;  %10126 = vrsqrt.f32 %v331_v40 }
 0x14c   : > { %528 = vmatprep.mubr.bf16.mxu0 %v14961_v23  ;;  %v394_v39 = vadd.f32 %v11291_v43, %v374_v49  ;;  %v356_v54 = vmul.f32 %v10117_v50, %v11179_v34  ;;  %10128 = vrsqrt.f32 %v330_v22 }
 0x14d   : > { %v377_v20 = vmul.f32 %v11283_v31, %v357_v24 }
 0x14e   : > { %v407_v62 = vpack.c.bf16 %v395_v52, %v394_v39  ;;  %v10119_v45 = vpop.eup %10118  ;;  %v376_v26 = vmul.f32 %v11283_v31, %v356_v54 }
 0x14f   : > { %v10121_v59 = vpop.eup %10120  ;;  %v397_v35 = vadd.f32 %v11291_v43, %v377_v20  ;;  %v359_v48 = vmul.f32 %v10119_v45, %v11194_v47 }
 0x150   : > { %v396_v34 = vadd.f32 %v11291_v43, %v376_v26  ;;  %v358_v58 = vmul.f32 %v10121_v59, %v11191_v46 }
 0x151   : > { %v379_v29 = vmul.f32 %v11283_v31, %v359_v48 }
 0x152   : > { %v408_v27 = vpack.c.bf16 %v397_v35, %v396_v34  ;;  %v378_v36 = vmul.f32 %v11283_v31, %v358_v58 }
 0x153   : > { %8448 = vmatmul.mubr.msk.bf16.gmra.mxu0 %vm154_vm0, %v406_v37  ;;  %v399_v38 = vadd.f32 %v11291_v43, %v379_v29 }
 0x154   : > { %538 = vmatprep.mubr.bf16.mxu0 %v14961_v23  ;;  %v10123_v33 = vpop.eup %10122  ;;  %v398_v42 = vadd.f32 %v11291_v43, %v378_v36 }
 0x155   : > { %v10125_v37 = vpop.eup %10124  ;;  %v361_v47 = vmul.f32 %v10123_v33, %v11206_v61 }
 0x156   : > { %v360_v44 = vmul.f32 %v10125_v37, %v11203_v60  ;;  %v409_v46 = vpack.c.bf16 %v399_v38, %v398_v42 }
 0x157   : > { %v381_v41 = vmul.f32 %v11283_v31, %v361_v47 }
 0x158   : > { %v10127_v49 = vpop.eup %10126  ;;  %v380_v50 = vmul.f32 %v11283_v31, %v360_v44 }
 0x159   : > { %v10129_v51 = vpop.eup %10128  ;;  %v401_v25 = vadd.f32 %v11291_v43, %v381_v41  ;;  %v363_v52 = vmul.f32 %v10127_v49, %v11225_v30 }
 0x15a   : > { %v400_v61 = vadd.f32 %v11291_v43, %v380_v50  ;;  %v362_v24 = vmul.f32 %v10129_v51, %v11221_v28 }
 0x15b   : > { %8449 = vmatmul.mubr.msk.bf16.gmra.mxu0 %vm154_vm0, %v407_v62  ;;  %v383_v53 = vmul.f32 %v11283_v31, %v363_v52 }
 0x15c   : > { %548 = vmatprep.mubr.bf16.mxu0 %v14961_v23  ;;  %v410_v60 = vpack.c.bf16 %v401_v25, %v400_v61  ;;  %v382_v39 = vmul.f32 %v11283_v31, %v362_v24 }
 0x15d   : > { %v403_v54 = vadd.f32 %v11291_v43, %v383_v53 }
 0x15e   : > { %v402_v40 = vadd.f32 %v11291_v43, %v382_v39 }
 0x160   : > { %v411_v62 = vpack.c.bf16 %v403_v54, %v402_v40 }
 0x163   : > { %8450 = vmatmul.mubr.msk.bf16.gmra.mxu0 %vm154_vm0, %v408_v27 }
 0x164   : > { %558 = vmatprep.mubr.bf16.mxu0 %v14961_v23 }
 0x16b   : > { %8451 = vmatmul.mubr.msk.bf16.gmra.mxu0 %vm154_vm0, %v409_v46 }
 0x16c   : > { %568 = vmatprep.mubr.bf16.mxu0 %v14961_v23 }
 0x173   : > { %8452 = vmatmul.mubr.msk.bf16.gmra.mxu0 %vm154_vm0, %v410_v60 }
 0x174   : > { %578 = vmatprep.mubr.bf16.mxu0 %v14961_v23 }
 0x17b   : > { %8453 = vmatmul.mubr.msk.bf16.gmra.mxu0 %vm154_vm0, %v411_v62 }
 0x203   : > { %v510_v30 = vpop.f32.mrf.mxu0 }
 0x205   : > { %v11355_v20 = vpop.f32.mrf.mxu0 }
 0x207   : > { %v514_v28 = vpop.f32.mrf.mxu0 }
 0x208   : > { %v11357_v45 = vpack.c.bf16 %v514_v28, %v510_v30 }
 0x209   : > { %v11359_v22 = vpop.f32.mrf.mxu0 }
 0x20a   : > { %8991 = vmatprep.mubr.msk.bf16.mxu0 %vm611_vm1, %v11357_v45 }
 0x20b   : > { %v520_v31 = vpop.f32.mrf.mxu0 }
 0x20d   : > { %v11363_v26 = vpop.f32.mrf.mxu0 }
 0x20f   : > { %v524_v59 = vpop.f32.mrf.mxu0 }
 0x210   : > { %v11365_v43 = vpack.c.bf16 %v524_v59, %v520_v31 }
 0x211   : > { %v11367_v35 = vpop.f32.mrf.mxu0 }
 0x212   : > { %609 = vrot.lane.b32.xlu1 %v11365_v43, %s10869_s13 }
 0x213   : > { %v530_v48 = vpop.f32.mrf.mxu0 }
 0x215   : > { %v532_v34 = vpop.f32.mrf.mxu0 }
 0x217   : > { %v534_v58 = vpop.f32.mrf.mxu0 }
 0x218   : > { %v11371_v27 = vpack.c.bf16 %v534_v58, %v530_v48 }
 0x219   : > { %v536_v29 = vpop.f32.mrf.mxu0 }
 0x21a   : > { %675 = vrot.lane.b32.xlu1 %v11371_v27, %s10869_s13  ;;  %8999 = vmatprep.mubr.msk.bf16.mxu1 %vm611_vm1, %v11371_v27 }
 0x21b   : > { %v540_v33 = vpop.f32.mrf.mxu0 }
 0x21d   : > { %v542_v36 = vpop.f32.mrf.mxu0 }
 0x21e   : > { %607 = vrot.lane.b32.xlu1 %v11357_v45, %s10869_s13 }
 0x21f   : > { %v544_v37 = vpop.f32.mrf.mxu0 }
 0x220   : > { %v11379_v38 = vpack.c.bf16 %v544_v37, %v540_v33 }
 0x221   : > { %v546_v47 = vpop.f32.mrf.mxu0 }
 0x222   : > { %677 = vrot.lane.b32.xlu0 %v11379_v38, %s10869_s13  ;;  %v11413_v33 = vpack.c.bf16 %v546_v47, %v542_v36 }
 0x223   : > { %v550_v42 = vpop.f32.mrf.mxu0 }
 0x225   : > { %v11383_v44 = vpop.f32.mrf.mxu0 }
 0x227   : > { %v554_v46 = vpop.f32.mrf.mxu0 }
 0x228   : > { %v11385_v41 = vpack.c.bf16 %v554_v46, %v550_v42 }
 0x229   : > { %v11387_v49 = vpop.f32.mrf.mxu0 }
 0x22a   : > { %742 = vrot.lane.b32.xlu1 %v11385_v41, %s10869_s13 }
 0x22b   : > { %v560_v50 = vpop.f32.mrf.mxu0 }
 0x22d   : > { %v11391_v51 = vpop.f32.mrf.mxu0 }
 0x22f   : > { %v564_v25 = vpop.f32.mrf.mxu0 }
 0x230   : > { %v11393_v52 = vpack.c.bf16 %v564_v25, %v560_v50  ;;  %v11421_v50 = vpack.c.bf16 %v536_v29, %v532_v34 }
 0x231   : > { %v11395_v61 = vpop.f32.mrf.mxu0 }
 0x232   : > { %744 = vrot.lane.b32.xlu0 %v11393_v52, %s10869_s13 }
 0x233   : > { %v570_v24 = vpop.f32.mrf.mxu0 }
 0x235   : > { %v11399_v60 = vpop.f32.mrf.mxu0 }
 0x237   : > { %v574_v53 = vpop.f32.mrf.mxu0 }
 0x238   : > { %v11401_v39 = vpack.c.bf16 %v574_v53, %v570_v24 }
 0x239   : > { %v11403_v54 = vpop.f32.mrf.mxu0 }
 0x23a   : > { %809 = vrot.lane.b32.xlu1 %v11401_v39, %s10869_s13 }
 0x23b   : > { %v580_v40 = vpop.f32.mrf.mxu0 }
 0x23d   : > { %v582_v62 = vpop.f32.mrf.mxu0 }
 0x23f   : > { %v584_v30 = vpop.f32.mrf.mxu0 }
 0x240   : > { %v11407_v28 = vpack.c.bf16 %v584_v30, %v580_v40 }
 0x241   : > { %v586_v36 = vpop.f32.mrf.mxu0 }
 0x242   : > { %811 = vrot.lane.b32.xlu0 %v11407_v28, %s10869_s13  ;;  %v11427_v47 = vpack.c.bf16 %v586_v36, %v582_v62  ;;  %s97_s13 = scalar_lea.vmem %s14953_s4, %s8640_s28 }
 0x284   : > { %v610_v31 = vpop.permute.xlu1 %609 }
 0x285   : > { %9555 = vmatprep.subr.msk.bf16.mxu0 %vm611_vm1, %v610_v31  ;;  %v622_v59 = vsel %vm611_vm1, %v610_v31, 0  ;;  %v11449_v31 = vpack.c.bf16 %v11367_v35, %v11363_v26  ;;  %v11463_v26 = vpack.c.bf16 %v11395_v61, %v11391_v51 }
 0x286   : > { %8988 = vmatpush3.bf16.xpose.msra.mxu0 %v622_v59 }
 0x28c   : > { %v676_v48 = vpop.permute.xlu1 %675 }
 0x28d   : > { %v686_v25 = vsel %vm611_vm1, %v676_v48, 0 }
 0x290   : > { %v608_v58 = vpop.permute.xlu1 %607 }
 0x291   : > { %9556 = vmatprep.subr.msk.bf16.mxu0 %vm611_vm1, %v608_v58  ;;  %v619_v37 = vsel %vm611_vm1, %v608_v58, 0 }
 0x292   : > { %8990 = vmatpush3.bf16.xpose.msra.mxu0 %v619_v37 }
 0x293   : > { %9027 = vmatprep.subr.bf16.mxu0 %v11413_v33 }
 0x294   : > { %v678_v42 = vpop.permute.xlu0 %677 }
 0x295   : > { %9557 = vmatprep.subr.msk.bf16.mxu1 %vm611_vm1, %v678_v42  ;;  %v689_v46 = vsel %vm611_vm1, %v678_v42, 0 }
 0x296   : > { %8996 = vmatpush3.bf16.xpose.msra.mxu1 %v689_v46 }
 0x297   : > { %9558 = vmatprep.subr.msk.bf16.mxu1 %vm611_vm1, %v676_v48  ;;  %v11455_v48 = vpack.c.bf16 %v11359_v22, %v11355_v20 }
 0x299   : > { %8992 = vmatmul.mubr.msk.bf16.vlgmr.msra.gmra.mxu0 %vm611_vm1, %v11365_v43 }
 0x29a   : > { %9028 = vmatpush3.bf16.msra.mxu0 %v11413_v33 }
 0x29b   : > { %9029 = vmatprep.subr.bf16.mxu0 %v11421_v50 }
 0x29c   : > { %v743_v29 = vpop.permute.xlu1 %742 }
 0x29d   : > { %v753_v53 = vsel %vm611_vm1, %v743_v29, 0 }
 0x29e   : > { %8998 = vmatpush3.bf16.xpose.msra.mxu1 %v686_v25  ;;  %9030 = vmatpush3.bf16.msra.mxu0 %v11421_v50 }
 0x29f   : > { %9043 = vmatprep.subr.bf16.mxu0 %v11427_v47 }
 0x2a4   : > { %v745_v24 = vpop.permute.xlu0 %744 }
 0x2a5   : > { %9000 = vmatmul.mubr.msk.bf16.vlgmr.msra.gmra.mxu1 %vm611_vm1, %v11379_v38  ;;  %9559 = vmatprep.subr.msk.bf16.mxu1 %vm611_vm1, %v745_v24  ;;  %v756_v34 = vsel %vm611_vm1, %v745_v24, 0 }
 0x2a6   : > { %9004 = vmatpush3.bf16.xpose.msra.mxu1 %v756_v34  ;;  %9007 = vmatprep.mubr.msk.bf16.mxu1 %vm611_vm1, %v11385_v41 }
 0x2a7   : > { %9560 = vmatprep.subr.msk.bf16.mxu1 %vm611_vm1, %v743_v29 }
 0x2ac   : > { %v810_v30 = vpop.permute.xlu1 %809 }
 0x2ad   : > { %v820_v59 = vsel %vm611_vm1, %v810_v30, 0 }
 0x2ae   : > { %9006 = vmatpush3.bf16.xpose.msra.mxu1 %v753_v53 }
 0x2b4   : > { %v812_v40 = vpop.permute.xlu0 %811 }
 0x2b5   : > { %9008 = vmatmul.mubr.msk.bf16.vlgmr.msra.gmra.mxu1 %vm611_vm1, %v11393_v52  ;;  %9561 = vmatprep.subr.msk.bf16.mxu1 %vm611_vm1, %v812_v40  ;;  %v823_v62 = vsel %vm611_vm1, %v812_v40, 0 }
 0x2b6   : > { %9012 = vmatpush3.bf16.xpose.msra.mxu1 %v823_v62  ;;  %9015 = vmatprep.mubr.msk.bf16.mxu1 %vm611_vm1, %v11401_v39 }
 0x2b7   : > { %9562 = vmatprep.subr.msk.bf16.mxu1 %vm611_vm1, %v810_v30 }
 0x2be   : > { %9014 = vmatpush3.bf16.xpose.msra.mxu1 %v820_v59 }
 0x2bf   : > { %9019 = vmatprep.subr.bf16.mxu1 %v11449_v31 }
 0x2c5   : > { %9016 = vmatmul.mubr.msk.bf16.vlgmr.msra.gmra.mxu1 %vm611_vm1, %v11407_v28 }
 0x2c6   : > { %9020 = vmatpush3.bf16.msra.mxu1 %v11449_v31 }
 0x2c7   : > { %9021 = vmatprep.subr.bf16.mxu1 %v11455_v48 }
 0x2ca   : > { %9022 = vmatpush3.bf16.msra.mxu1 %v11455_v48 }
 0x2cb   : > { %9035 = vmatprep.subr.bf16.mxu1 %v11463_v26 }
 0x359   : > { %v8993_v35 = vpop.f32.mrf.mxu0 }
 0x35a   : > { %v876_v58 = vmul.f32 0.125, %v8993_v35 }
 0x35b   : > { %v658_v37 = vpop.f32.mrf.mxu0 }
 0x35c   : > { %v11468_v20 = vadd.f32 %v876_v58, %v15047_v2  ;;  %v874_v22 = vmul.f32 0.125, %v658_v37 }
 0x35d   : > { %v8994_v42 = vpop.f32.mrf.mxu0 }
 0x35e   : > { %v11471_v46 = vadd.f32 %v874_v22, %v15049_v0  ;;  %v877_v36 = vmul.f32 0.125, %v8994_v42  ;;  %v913_v51 = vsel %vm906_vm2, %v11468_v20, -inf }
 0x35f   : > { %914 = vmax.xlane.f32.xlu0 %v913_v51  ;;  %v661_v61 = vpop.f32.mrf.mxu0 }
 0x360   : > { %v875_v25 = vmul.f32 0.125, %v661_v61  ;;  %v11476_v24 = vadd.f32 %v877_v36, %v10965_v3  ;;  %v907_v29 = vsel %vm906_vm2, %v11471_v46, -inf }
 0x362   : > { %v11479_v34 = vadd.f32 %v875_v25, %v15048_v1  ;;  %v916_v62 = vsel %vm906_vm2, %v11476_v24, -inf }
 0x363   : > { %908 = vmax.xlane.f32.xlu0 %v907_v29 }
 0x364   : > { %v910_v53 = vsel %vm906_vm2, %v11479_v34, -inf }
 0x365   : > { %v9001_v40 = vpop.f32.mrf.mxu1  ;;  %911 = vmax.xlane.f32.xlu1 %v910_v53 }
 0x367   : > { %v725_v30 = vpop.f32.mrf.mxu1  ;;  %917 = vmax.xlane.f32.xlu0 %v916_v62 }
 0x369   : > { %v9002_v59 = vpop.f32.mrf.mxu1 }
 0x36a   : > { %v881_v58 = vmul.f32 0.125, %v9002_v59 }
 0x36b   : > { %v728_v35 = vpop.f32.mrf.mxu1 }
 0x36c   : > { %v879_v37 = vmul.f32 0.125, %v728_v35  ;;  %v11491_v42 = vadd.f32 %v881_v58, %v10965_v3 }
 0x36e   : > { %v11488_v22 = vadd.f32 %v879_v37, %v15048_v1  ;;  %v928_v51 = vsel %vm906_vm2, %v11491_v42, -inf  ;;  %v878_v37 = vmul.f32 0.125, %v725_v30  ;;  %v880_v30 = vmul.f32 0.125, %v9001_v40 }
 0x370   : > { %v922_v36 = vsel %vm906_vm2, %v11488_v22, -inf }
 0x371   : > { %923 = vmax.xlane.f32.xlu1 %v922_v36 }
 0x375   : > { %929 = vmax.xlane.f32.xlu1 %v928_v51  ;;  %v9009_v61 = vpop.f32.mrf.mxu1 }
 0x376   : > { %v884_v29 = vmul.f32 0.125, %v9009_v61 }
 0x377   : > { %v792_v25 = vpop.f32.mrf.mxu1 }
 0x378   : > { %v882_v53 = vmul.f32 0.125, %v792_v25  ;;  %v11501_v23 = vadd.f32 %v884_v29, %v15047_v2 }
 0x379   : > { %v9010_v62 = vpop.f32.mrf.mxu1 }
 0x37a   : > { %v11498_v59 = vadd.f32 %v882_v53, %v15049_v0  ;;  %v885_v35 = vmul.f32 0.125, %v9010_v62  ;;  %v11514_v53 = vadd.f32 %v878_v37, %v15049_v0  ;;  %v937_v29 = vsel %vm906_vm2, %v11501_v23, -inf }
 0x37b   : > { %v795_v58 = vpop.f32.mrf.mxu1 }
 0x37c   : > { %v11504_v36 = vadd.f32 %v885_v35, %v10965_v3  ;;  %v883_v63 = vmul.f32 0.125, %v795_v58  ;;  %v931_v51 = vsel %vm906_vm2, %v11498_v59, -inf  ;;  %v11521_v35 = vadd.f32 %v880_v30, %v15047_v2 }
 0x37d   : > { %932 = vmax.xlane.f32.xlu0 %v931_v51 }
 0x37e   : > { %v11509_v61 = vadd.f32 %v883_v63, %v15048_v1  ;;  %v940_v25 = vsel %vm906_vm2, %v11504_v36, -inf  ;;  %v919_v63 = vsel %vm906_vm2, %v11514_v53, -inf }
 0x37f   : > { %941 = vmax.xlane.f32.xlu1 %v940_v25  ;;  %v925_v25 = vsel %vm906_vm2, %v11521_v35, -inf }
 0x380   : > { %v934_v62 = vsel %vm906_vm2, %v11509_v61, -inf }
 0x381   : > { %938 = vmax.xlane.f32.xlu0 %v937_v29 }
 0x383   : > { %935 = vmax.xlane.f32.xlu1 %v934_v62 }
 0x385   : > { %920 = vmax.xlane.f32.xlu0 %v919_v63  ;;  %v9017_v58 = vpop.f32.mrf.mxu1 }
 0x386   : > { %v888_v51 = vmul.f32 0.125, %v9017_v58 }
 0x387   : > { %v859_v40 = vpop.f32.mrf.mxu1 }
 0x388   : > { %v886_v37 = vmul.f32 0.125, %v859_v40  ;;  %v11531_v30 = vadd.f32 %v888_v51, %v15047_v2 }
 0x389   : > { %926 = vmax.xlane.f32.xlu0 %v925_v25  ;;  %v9018_v29 = vpop.f32.mrf.mxu1 }
 0x38a   : > { %v11528_v21 = vadd.f32 %v886_v37, %v15049_v0  ;;  %v889_v62 = vmul.f32 0.125, %v9018_v29  ;;  %v949_v25 = vsel %vm906_vm2, %v11531_v30, -inf }
 0x38b   : > { %v862_v32 = vpop.f32.mrf.mxu1 }
 0x38c   : > { %v11534_v57 = vadd.f32 %v889_v62, %v10965_v3  ;;  %v887_v63 = vmul.f32 0.125, %v862_v32  ;;  %v943_v58 = vsel %vm906_vm2, %v11528_v21, -inf }
 0x38d   : > { %944 = vmax.xlane.f32.xlu0 %v943_v58 }
 0x38e   : > { %v11539_v40 = vadd.f32 %v887_v63, %v15048_v1  ;;  %v952_v37 = vsel %vm906_vm2, %v11534_v57, -inf }
 0x38f   : > { %953 = vmax.xlane.f32.xlu1 %v952_v37 }
 0x390   : > { %v946_v51 = vsel %vm906_vm2, %v11539_v40, -inf }
 0x391   : > { %950 = vmax.xlane.f32.xlu0 %v949_v25 }
 0x393   : > { %947 = vmax.xlane.f32.xlu1 %v946_v51 }
 0x3e8   : > { %v915_v32 = vpop.xlane.xlu0 %914 }
 0x3e9   : > { %v957_v29 = vsub.f32 %v11468_v20, %v915_v32 }
 0x3eb   : > { %v975_v62 = vmul.f32 1.442695, %v957_v29 }
 0x3ec   : > { %v909_v58 = vpop.xlane.xlu0 %908 }
 0x3ed   : > { %10130 = vpow2.f32 %v975_v62  ;;  %v955_v63 = vsub.f32 %v11471_v46, %v909_v58 }
 0x3ee   : > { %v912_v56 = vpop.xlane.xlu1 %911 }
 0x3ef   : > { %v971_v19 = vmul.f32 1.442695, %v955_v63  ;;  %v956_v37 = vsub.f32 %v11479_v34, %v912_v56 }
 0x3f0   : > { %v918_v17 = vpop.xlane.xlu0 %917 }
 0x3f1   : > { %10132 = vpow2.f32 %v971_v19  ;;  %v958_v25 = vsub.f32 %v11476_v24, %v918_v17  ;;  %v973_v18 = vmul.f32 1.442695, %v956_v37 }
 0x3f3   : > { %v977_v16 = vmul.f32 1.442695, %v958_v25 }
 0x3f5   : > { %10134 = vpow2.f32 %v977_v16 }
 0x3f6   : > { %10136 = vpow2.f32 %v973_v18 }
 0x3fa   : > { %v11551_v51 = vpop.eup %10130  ;;  %v924_v20 = vpop.xlane.xlu1 %923 }
 0x3fb   : > { %v1009_v32 = vsel %vm906_vm2, %v11551_v51, 0.0  ;;  %v960_v46 = vsub.f32 %v11488_v22, %v924_v20 }
 0x3fc   : > { %1010 = vadd.xlane.f32.xlu0 %v1009_v32 }
 0x3fd   : > { %v981_v16 = vmul.f32 1.442695, %v960_v46 }
 0x3fe   : > { %v11556_v29 = vpop.eup %10132  ;;  %v930_v56 = vpop.xlane.xlu1 %929 }
 0x3ff   : > { %v962_v19 = vsub.f32 %v11491_v42, %v930_v56  ;;  %v1003_v17 = vsel %vm906_vm2, %v11556_v29, 0.0 }
 0x400   : > { %1004 = vadd.xlane.f32.xlu0 %v1003_v17 }
 0x401   : > { %v985_v18 = vmul.f32 1.442695, %v962_v19 }
 0x402   : > { %v11561_v24 = vpop.eup %10134 }
 0x403   : > { %10138 = vpow2.f32 %v985_v18  ;;  %v1012_v34 = vsel %vm906_vm2, %v11561_v24, 0.0  ;;  %v11565_v62 = vpop.eup %10136 }
 0x404   : > { %1013 = vadd.xlane.f32.xlu1 %v1012_v34  ;;  %10140 = vpow2.f32 %v981_v16  ;;  %v1006_v42 = vsel %vm906_vm2, %v11565_v62, 0.0 }
 0x406   : > { %v933_v22 = vpop.xlane.xlu0 %932 }
 0x408   : > { %1007 = vadd.xlane.f32.xlu1 %v1006_v42 }
 0x40a   : > { %v939_v58 = vpop.xlane.xlu0 %938 }
 0x40b   : > { %v965_v19 = vsub.f32 %v11501_v23, %v939_v58 }
 0x40d   : > { %v991_v34 = vmul.f32 1.442695, %v965_v19 }
 0x40e   : > { %v921_v63 = vpop.xlane.xlu0 %920 }
 0x40f   : > { %v959_v25 = vsub.f32 %v11514_v53, %v921_v63  ;;  %v963_v53 = vsub.f32 %v11498_v59, %v933_v22 }
 0x410   : > { %v11569_v37 = vpop.eup %10138 }
 0x411   : > { %v1024_v20 = vsel %vm906_vm2, %v11569_v37, 0.0  ;;  %v11574_v32 = vpop.eup %10140  ;;  %v979_v17 = vmul.f32 1.442695, %v959_v25  ;;  %v987_v42 = vmul.f32 1.442695, %v963_v53 }
 0x412   : > { %v927_v46 = vpop.xlane.xlu0 %926  ;;  %1025 = vadd.xlane.f32.xlu1 %v1024_v20  ;;  %v1018_v18 = vsel %vm906_vm2, %v11574_v32, 0.0  ;;  %v942_v20 = vpop.xlane.xlu1 %941 }
 0x413   : > { %v961_v56 = vsub.f32 %v11521_v35, %v927_v46 }
 0x415   : > { %v983_v16 = vmul.f32 1.442695, %v961_v56  ;;  %v966_v56 = vsub.f32 %v11504_v36, %v942_v20 }
 0x416   : > { %1019 = vadd.xlane.f32.xlu1 %v1018_v18  ;;  %v936_v19 = vpop.xlane.xlu1 %935  ;;  %v945_v53 = vpop.xlane.xlu0 %944 }
 0x417   : > { %10142 = vpow2.f32 %v983_v16  ;;  %v964_v16 = vsub.f32 %v11509_v61, %v936_v19  ;;  %v967_v61 = vsub.f32 %v11528_v21, %v945_v53 }
 0x418   : > { %10144 = vpow2.f32 %v979_v17  ;;  %v993_v17 = vmul.f32 1.442695, %v966_v56 }
 0x419   : > { %10146 = vpow2.f32 %v991_v34  ;;  %v989_v18 = vmul.f32 1.442695, %v964_v16 }
 0x41a   : > { %10148 = vpow2.f32 %v987_v42  ;;  %v951_v42 = vpop.xlane.xlu0 %950  ;;  %v954_v21 = vpop.xlane.xlu1 %953 }
 0x41b   : > { %10150 = vpow2.f32 %v993_v17  ;;  %v970_v16 = vsub.f32 %v11534_v57, %v954_v21 }
 0x41c   : > { %10152 = vpow2.f32 %v989_v18 }
 0x41d   : > { %v1001_v53 = vmul.f32 1.442695, %v970_v16 }
 0x41e   : > { %v948_v18 = vpop.xlane.xlu1 %947 }
 0x424   : > { %v11581_v63 = vpop.eup %10142 }
 0x425   : > { %v1021_v35 = vsel %vm906_vm2, %v11581_v63, 0.0  ;;  %v11585_v23 = vpop.eup %10144 }
 0x426   : > { %1022 = vadd.xlane.f32.xlu0 %v1021_v35  ;;  %v1015_v59 = vsel %vm906_vm2, %v11585_v23, 0.0  ;;  %v11591_v22 = vpop.eup %10146  ;;  %v969_v35 = vsub.f32 %v11531_v30, %v951_v42  ;;  %v968_v42 = vsub.f32 %v11539_v40, %v948_v18 }
 0x427   : > { %1315 = vrot.lane.b32.xlu1 %v11357_v45, %s10870_s14  ;;  %v1033_v58 = vsel %vm906_vm2, %v11591_v22, 0.0  ;;  %v11597_v25 = vpop.eup %10148 }
 0x428   : > { %v1027_v46 = vsel %vm906_vm2, %v11597_v25, 0.0  ;;  %v11605_v34 = vpop.eup %10150 }
 0x429   : > { %v11610_v36 = vpop.eup %10152 }
 0x42a   : > { %1016 = vadd.xlane.f32.xlu0 %v1015_v59  ;;  %v1036_v59 = vsel %vm906_vm2, %v11605_v34, 0.0  ;;  %v1030_v20 = vsel %vm906_vm2, %v11610_v36, 0.0 }
 0x42b   : > { %1311 = vrot.lane.b32.xlu1 %v11357_v45, %s10871_s15 }
 0x42e   : > { %1034 = vadd.xlane.f32.xlu0 %v1033_v58  ;;  %v999_v58 = vmul.f32 1.442695, %v969_v35  ;;  %v997_v35 = vmul.f32 1.442695, %v968_v42 }
 0x430   : > { %10154 = vpow2.f32 %v999_v58 }
 0x432   : > { %1028 = vadd.xlane.f32.xlu0 %v1027_v46  ;;  %v995_v46 = vmul.f32 1.442695, %v967_v61 }
 0x434   : > { %10156 = vpow2.f32 %v995_v46 }
 0x435   : > { %10158 = vpow2.f32 %v1001_v53  ;;  %v11655_v53 = vpack.c.bf16 %v11387_v49, %v11383_v44 }
 0x436   : > { %10160 = vpow2.f32 %v997_v35 }
 0x43d   : > { %v11615_v56 = vpop.eup %10154 }
 0x43e   : > { %v1045_v30 = vsel %vm906_vm2, %v11615_v56, 0.0 }
 0x441   : > { %v11621_v19 = vpop.eup %10156 }
 0x442   : > { %v1039_v17 = vsel %vm906_vm2, %v11621_v19, 0.0 }
 0x448   : > { %1317 = vrot.lane.b32.xlu0 %v11365_v43, %s10870_s14 }
 0x44f   : > { %1037 = vadd.xlane.f32.xlu1 %v1036_v59  ;;  %v11629_v59 = vpop.eup %10158 }
 0x450   : > { %v1048_v58 = vsel %vm906_vm2, %v11629_v59, 0.0  ;;  %v11635_v57 = vpop.eup %10160 }
 0x451   : > { %v1042_v40 = vsel %vm906_vm2, %v11635_v57, 0.0 }
 0x453   : > { %1031 = vadd.xlane.f32.xlu1 %v1030_v20 }
 0x464   : > { %1386 = vrot.lane.b32.xlu1 %v11379_v38, %s10870_s14 }
 0x467   : > { %1046 = vadd.xlane.f32.xlu0 %v1045_v30 }
 0x46b   : > { %1040 = vadd.xlane.f32.xlu0 %v1039_v17 }
 0x481   : > { %1455 = vrot.lane.b32.xlu0 %v11393_v52, %s10870_s14 }
 0x485   : > { %1384 = vrot.lane.b32.xlu0 %v11371_v27, %s10870_s14  ;;  %v1011_v61 = vpop.xlane.xlu0 %1010 }
 0x488   : > { %1049 = vadd.xlane.f32.xlu1 %v1048_v58 }
 0x489   : > { %1449 = vrot.lane.b32.xlu0 %v11385_v41, %s10871_s15  ;;  %v1005_v20 = vpop.xlane.xlu0 %1004 }
 0x48c   : > { %1043 = vadd.xlane.f32.xlu1 %v1042_v40 }
 0x48d   : > { %1451 = vrot.lane.b32.xlu0 %v11393_v52, %s10871_s15  ;;  %v1014_v46 = vpop.xlane.xlu1 %1013 }
 0x48e   : > { %10162 = vrcp.f32 %v1014_v46 }
 0x48f   : > { %10164 = vrcp.f32 %v1005_v20 }
 0x490   : > { %10166 = vrcp.f32 %v1011_v61 }
 0x491   : > { %1382 = vrot.lane.b32.xlu0 %v11379_v38, %s10871_s15  ;;  %v1008_v30 = vpop.xlane.xlu1 %1007 }
 0x492   : > { %10168 = vrcp.f32 %v1008_v30 }
 0x495   : > { %1518 = vrot.lane.b32.xlu0 %v11401_v39, %s10871_s15 }
 0x499   : > { %1807 = vrot.lane.b32.xlu0 %v11449_v31, %s10871_s15 }
 0x49b   : > { %v10163_v21 = vpop.eup %10162  ;;  %v1026_v44 = vpop.xlane.xlu1 %1025 }
 0x49c   : > { %v10165_v17 = vpop.eup %10164  ;;  %v1070_v42 = vmul.f32 %v10163_v21, %v11561_v24 }
 0x49d   : > { %1933 = vrot.lane.b32.xlu0 %v11463_v26, %s10871_s15  ;;  %1313 = vrot.lane.b32.xlu1 %v11365_v43, %s10871_s15  ;;  %v10167_v16 = vpop.eup %10166  ;;  %v1067_v35 = vmul.f32 %v10165_v17, %v11556_v29 }
 0x49e   : > { %v1069_v58 = vmul.f32 %v10167_v16, %v11551_v51 }
 0x49f   : > { %v10169_v18 = vpop.eup %10168  ;;  %v1020_v49 = vpop.xlane.xlu1 %1019 }
 0x4a0   : > { %v1068_v61 = vmul.f32 %v10169_v18, %v11565_v62  ;;  %v1084_v20 = vpack.c.bf16 %v1070_v42, %v1069_v58 }
 0x4a1   : > { %1931 = vrot.lane.b32.xlu0 %v11655_v53, %s10871_s15  ;;  %1453 = vrot.lane.b32.xlu1 %v11385_v41, %s10870_s14 }
 0x4a2   : > { %v1083_v40 = vpack.c.bf16 %v1068_v61, %v1067_v35 }
 0x4a4   : > { %9023 = vmatprep.mubr.msk.bf16.mxu1 %vm906_vm2, %v1083_v40 }
 0x4a5   : > { %1380 = vrot.lane.b32.xlu1 %v11371_v27, %s10871_s15  ;;  %9024 = vmatmul.mubr.msk.bf16.vlgmr.msra.gmra.mxu1 %vm906_vm2, %v1084_v20  ;;  %v11688_v20 = vpack.c.bf16 %v11403_v54, %v11399_v60 }
 0x4a6   : > { %9036 = vmatpush3.bf16.msra.mxu1 %v11463_v26 }
 0x4a7   : > { %9037 = vmatprep.subr.bf16.mxu1 %v11655_v53 }
 0x4a9   : > { %1524 = vrot.lane.b32.xlu1 %v11407_v28, %s10870_s14 }
 0x4aa   : > { %9038 = vmatpush3.bf16.msra.mxu1 %v11655_v53 }
 0x4ad   : > { %1522 = vrot.lane.b32.xlu1 %v11401_v39, %s10870_s14 }
 0x4af   : > { %v1023_v51 = vpop.xlane.xlu0 %1022 }
 0x4b0   : > { %10170 = vrcp.f32 %v1023_v51 }
 0x4b1   : > { %1520 = vrot.lane.b32.xlu1 %v11407_v28, %s10871_s15  ;;  %10172 = vrcp.f32 %v1020_v49 }
 0x4b2   : > { %10174 = vrcp.f32 %v1026_v44 }
 0x4b3   : > { %v1017_v29 = vpop.xlane.xlu0 %1016 }
 0x4b4   : > { %10176 = vrcp.f32 %v1017_v29 }
 0x4b5   : > { %1805 = vrot.lane.b32.xlu1 %v11455_v48, %s10871_s15 }
 0x4b7   : > { %v1035_v24 = vpop.xlane.xlu0 %1034 }
 0x4bb   : > { %v1029_v62 = vpop.xlane.xlu0 %1028 }
 0x4bd   : > { %v10171_v46 = vpop.eup %10170 }
 0x4be   : > { %v10173_v30 = vpop.eup %10172  ;;  %v1073_v18 = vmul.f32 %v10171_v46, %v11581_v63  ;;  %v1316_v63 = vpop.permute.xlu1 %1315 }
 0x4bf   : > { %v1318_v21 = vpop.permute.xlu0 %1317  ;;  %v10175_v17 = vpop.eup %10174  ;;  %v1072_v35 = vmul.f32 %v10173_v30, %v11574_v32 }
 0x4c0   : > { %9563 = vmatprep.subr.msk.bf16.mxu1 %vm611_vm1, %v1318_v21  ;;  %v1074_v61 = vmul.f32 %v10175_v17, %v11569_v37 }
 0x4c1   : > { %v10177_v16 = vpop.eup %10176 }
 0x4c2   : > { %v1071_v42 = vmul.f32 %v10177_v16, %v11585_v23  ;;  %v1086_v40 = vpack.c.bf16 %v1074_v61, %v1073_v18  ;;  %v1312_v32 = vpop.permute.xlu1 %1311  ;;  %v1329_v18 = vsel %vm611_vm1, %v1318_v21, 0 }
 0x4c4   : > { %v1085_v58 = vpack.c.bf16 %v1072_v35, %v1071_v42 }
 0x4c6   : > { %9031 = vmatprep.mubr.msk.bf16.mxu0 %vm906_vm2, %v1085_v58 }
 0x4c7   : > { %9032 = vmatmul.mubr.msk.bf16.vlgmr.msra.gmra.mxu0 %vm906_vm2, %v1086_v40 }
 0x4c8   : > { %9044 = vmatpush3.bf16.msra.mxu0 %v11427_v47 }
 0x4c9   : > { %9045 = vmatprep.subr.bf16.mxu0 %v11688_v20 }
 0x4cc   : > { %9046 = vmatpush3.bf16.msra.mxu0 %v11688_v20 }
 0x4d8   : > { %v1038_v23 = vpop.xlane.xlu1 %1037 }
 0x4d9   : > { %10178 = vrcp.f32 %v1038_v23 }
 0x4da   : > { %10180 = vrcp.f32 %v1029_v62 }
 0x4db   : > { %10182 = vrcp.f32 %v1035_v24 }
 0x4dc   : > { %v1032_v37 = vpop.xlane.xlu1 %1031 }
 0x4dd   : > { %10184 = vrcp.f32 %v1032_v37 }
 0x4e0   : > { %v1387_v44 = vpop.permute.xlu1 %1386 }
 0x4e1   : > { %9565 = vmatprep.subr.msk.bf16.mxu0 %vm611_vm1, %v1387_v44 }
 0x4e6   : > { %v10179_v60 = vpop.eup %10178 }
 0x4e7   : > { %v10181_v54 = vpop.eup %10180  ;;  %v1078_v29 = vmul.f32 %v10179_v60, %v11605_v34 }
 0x4e8   : > { %v10183_v49 = vpop.eup %10182  ;;  %v1075_v46 = vmul.f32 %v10181_v54, %v11597_v25 }
 0x4e9   : > { %v1077_v17 = vmul.f32 %v10183_v49, %v11591_v22 }
 0x4ea   : > { %v10185_v51 = vpop.eup %10184 }
 0x4eb   : > { %v1076_v30 = vmul.f32 %v10185_v51, %v11610_v36  ;;  %v1088_v62 = vpack.c.bf16 %v1078_v29, %v1077_v17  ;;  %v1326_v36 = vsel %vm611_vm1, %v1316_v63, 0 }
 0x4ed   : > { %v1087_v16 = vpack.c.bf16 %v1076_v30, %v1075_v46 }
 0x4ef   : > { %9039 = vmatprep.mubr.msk.bf16.mxu1 %vm906_vm2, %v1087_v16 }
 0x4f0   : > { %v1047_v24 = vpop.xlane.xlu0 %1046  ;;  %9040 = vmatmul.mubr.msk.bf16.vlgmr.msra.gmra.mxu1 %vm906_vm2, %v1088_v62 }
 0x4f1   : > { %9052 = vmatpush3.bf16.xpose.msra.mxu1 %v1329_v18  ;;  %9055 = vmatprep.mubr.msk.bf16.mxu1 %vm611_vm1, %v1312_v32 }
 0x4f2   : > { %9564 = vmatprep.subr.msk.bf16.mxu1 %vm611_vm1, %v1316_v63 }
 0x4f4   : > { %v1041_v34 = vpop.xlane.xlu0 %1040 }
 0x4f8   : > { %v1456_v25 = vpop.permute.xlu0 %1455 }
 0x4f9   : > { %9054 = vmatpush3.bf16.xpose.msra.mxu1 %v1326_v36  ;;  %v1467_v32 = vsel %vm611_vm1, %v1456_v25, 0 }
 0x4fa   : > { %9567 = vmatprep.subr.msk.bf16.mxu1 %vm611_vm1, %v1456_v25  ;;  %v1398_v25 = vsel %vm611_vm1, %v1387_v44, 0 }
 0x4fc   : > { %v1385_v22 = vpop.permute.xlu0 %1384 }
 0x500   : > { %v1450_v42 = vpop.permute.xlu0 %1449 }
 0x504   : > { %v1452_v35 = vpop.permute.xlu0 %1451 }
 0x508   : > { %v1383_v58 = vpop.permute.xlu0 %1382 }
 0x50c   : > { %v1519_v63 = vpop.permute.xlu0 %1518 }
 0x510   : > { %v1808_v46 = vpop.permute.xlu0 %1807 }
 0x511   : > { %v1050_v61 = vpop.xlane.xlu1 %1049 }
 0x512   : > { %10186 = vrcp.f32 %v1050_v61 }
 0x513   : > { %10188 = vrcp.f32 %v1041_v34 }
 0x514   : > { %10190 = vrcp.f32 %v1047_v24 }
 0x515   : > { %v1044_v21 = vpop.xlane.xlu1 %1043 }
 0x516   : > { %10192 = vrcp.f32 %v1044_v21 }
 0x519   : > { %v1314_v40 = vpop.permute.xlu1 %1313 }
 0x51a   : > { %9056 = vmatmul.mubr.msk.bf16.vlgmr.msra.gmra.mxu1 %vm611_vm1, %v1314_v40 }
 0x51b   : > { %9068 = vmatpush3.bf16.xpose.msra.mxu1 %v1467_v32  ;;  %9071 = vmatprep.mubr.msk.bf16.mxu1 %vm611_vm1, %v1450_v42 }
 0x51d   : > { %v1454_v23 = vpop.permute.xlu1 %1453 }
 0x51e   : > { %9568 = vmatprep.subr.msk.bf16.mxu1 %vm611_vm1, %v1454_v23  ;;  %v1464_v51 = vsel %vm611_vm1, %v1454_v23, 0 }
 0x51f   : > { %v10187_v37 = vpop.eup %10186 }
 0x520   : > { %v10189_v60 = vpop.eup %10188  ;;  %v1082_v30 = vmul.f32 %v10187_v37, %v11629_v59 }
 0x521   : > { %v1381_v54 = vpop.permute.xlu1 %1380  ;;  %v10191_v49 = vpop.eup %10190  ;;  %v1079_v17 = vmul.f32 %v10189_v60, %v11621_v19 }
 0x522   : > { %v1081_v24 = vmul.f32 %v10191_v49, %v11615_v56  ;;  %v1395_v56 = vsel %vm611_vm1, %v1385_v22, 0 }
 0x523   : > { %v10193_v29 = vpop.eup %10192  ;;  %9070 = vmatpush3.bf16.xpose.msra.mxu1 %v1464_v51 }
 0x524   : > { %9083 = vmatprep.subr.bf16.mxu1 %v1808_v46  ;;  %v1080_v16 = vmul.f32 %v10193_v29, %v11635_v57  ;;  %v1090_v34 = vpack.c.bf16 %v1082_v30, %v1081_v24  ;;  %v11722_v57 = vpop.permute.xlu0 %1933 }
 0x525   : > { %v1525_v62 = vpop.permute.xlu1 %1524 }
 0x526   : > { %v1089_v18 = vpack.c.bf16 %v1080_v16, %v1079_v17  ;;  %v1536_v44 = vsel %vm611_vm1, %v1525_v62, 0 }
 0x528   : > { %9047 = vmatprep.mubr.msk.bf16.mxu0 %vm906_vm2, %v1089_v18  ;;  %v11848_v7 = vpop.permute.xlu0 %1931 }
 0x529   : > { %9048 = vmatmul.mubr.msk.bf16.vlgmr.msra.gmra.mxu0 %vm906_vm2, %v1090_v34  ;;  %v1523_v36 = vpop.permute.xlu1 %1522 }
 0x52a   : > { %9060 = vmatpush3.bf16.xpose.msra.mxu0 %v1398_v25  ;;  %9072 = vmatmul.mubr.msk.bf16.vlgmr.msra.gmra.mxu1 %vm611_vm1, %v1452_v35 }
 0x52b   : > { %9566 = vmatprep.subr.msk.bf16.mxu0 %vm611_vm1, %v1385_v22  ;;  %9063 = vmatprep.mubr.msk.bf16.mxu0 %vm611_vm1, %v1381_v54  ;;  %v1533_v22 = vsel %vm611_vm1, %v1523_v36, 0 }
 0x52c   : > { %9084 = vmatpush3.bf16.msra.mxu1 %v1808_v46 }
 0x52d   : > { %v1521_v19 = vpop.permute.xlu1 %1520 }
 0x531   : > { %v1806_v59 = vpop.permute.xlu1 %1805 }
 0x532   : > { %9062 = vmatpush3.bf16.xpose.msra.mxu0 %v1395_v56  ;;  %9085 = vmatprep.subr.bf16.mxu1 %v1806_v59 }
 0x533   : > { %9569 = vmatprep.subr.msk.bf16.mxu0 %vm611_vm1, %v1525_v62  ;;  %9086 = vmatpush3.bf16.msra.mxu1 %v1806_v59 }
 0x534   : > { %9099 = vmatprep.subr.bf16.mxu1 %v11722_v57 }
 0x539   : > { %9064 = vmatmul.mubr.msk.bf16.vlgmr.msra.gmra.mxu0 %vm611_vm1, %v1383_v58 }
 0x53a   : > { %9076 = vmatpush3.bf16.xpose.msra.mxu0 %v1536_v44  ;;  %9079 = vmatprep.mubr.msk.bf16.mxu0 %vm611_vm1, %v1519_v63 }
 0x53b   : > { %9570 = vmatprep.subr.msk.bf16.mxu0 %vm611_vm1, %v1523_v36 }
 0x542   : > { %9078 = vmatpush3.bf16.xpose.msra.mxu0 %v1533_v22 }
 0x549   : > { %9080 = vmatmul.mubr.msk.bf16.vlgmr.msra.gmra.mxu0 %vm611_vm1, %v1521_v19 }
 0x565   : > { %v11732_v42 = vpop.f32.mrf.mxu1 }
 0x566   : > { %15072 = vst [vmem:[#allocation30_spill] sm:$0xff] %v11732_v42 }
 0x567   : > { %v11734_v35 = vpop.f32.mrf.mxu1 }
 0x568   : > { %15073 = vst [vmem:[#allocation31_spill] sm:$0xff] %v11734_v35 }
 0x569   : > { %v11736_v61 = vpop.f32.mrf.mxu1 }
 0x56a   : > { %15074 = vst [vmem:[#allocation32_spill] sm:$0xff] %v11736_v61 }
 0x56b   : > { %v11738_v21 = vpop.f32.mrf.mxu1 }
 0x56c   : > { %15075 = vst [vmem:[#allocation33_spill] sm:$0xff] %v11738_v21 }
 0x587   : > { %v11748_v54 = vpop.f32.mrf.mxu0 }
 0x588   : > { %15080 = vst [vmem:[#allocation38_spill] sm:$0xff] %v11748_v54 }
 0x589   : > { %v11758_v62 = vpop.f32.mrf.mxu0 }
 0x58a   : > { %15081 = vst [vmem:[#allocation39_spill] sm:$0xff] %v11758_v62 }
 0x58b   : > { %v11768_v36 = vpop.f32.mrf.mxu0 }
 0x58c   : > { %15082 = vst [vmem:[#allocation40_spill] sm:$0xff] %v11768_v36 }
 0x58d   : > { %v11774_v59 = vpop.f32.mrf.mxu0 }
 0x58e   : > { %15083 = vst [vmem:[#allocation41_spill] sm:$0xff] %v11774_v59 }
 0x5b0   : > { %v11740_v58 = vpop.f32.mrf.mxu1 }
 0x5b1   : > { %15076 = vst [vmem:[#allocation34_spill] sm:$0xff] %v11740_v58 }
 0x5b2   : > { %v11742_v40 = vpop.f32.mrf.mxu1 }
 0x5b3   : > { %15077 = vst [vmem:[#allocation35_spill] sm:$0xff] %v11742_v40 }
 0x5b4   : > { %v11744_v32 = vpop.f32.mrf.mxu1 }
 0x5b5   : > { %15078 = vst [vmem:[#allocation36_spill] sm:$0xff] %v11744_v32 }
 0x5b6   : > { %v11746_v63 = vpop.f32.mrf.mxu1 }
 0x5b7   : > { %15079 = vst [vmem:[#allocation37_spill] sm:$0xff] %v11746_v63 }
 0x5da   : > { %v9057_v23 = vpop.f32.mrf.mxu1 }
 0x5db   : > { %v1589_v37 = vmul.f32 0.125, %v9057_v23 }
 0x5dc   : > { %v1365_v60 = vpop.f32.mrf.mxu1 }
 0x5dd   : > { %v11751_v49 = vadd.f32 %v1589_v37, %v15047_v2  ;;  %v1587_v51 = vmul.f32 0.125, %v1365_v60 }
 0x5de   : > { %v9058_v29 = vpop.f32.mrf.mxu1 }
 0x5df   : > { %v11754_v46 = vadd.f32 %v1587_v51, %v15049_v0  ;;  %v1590_v30 = vmul.f32 0.125, %v9058_v29  ;;  %v1625_v17 = vsel %vm906_vm2, %v11751_v49, -inf }
 0x5e0   : > { %1626 = vmax.xlane.f32.xlu0 %v1625_v17  ;;  %v1368_v16 = vpop.f32.mrf.mxu1 }
 0x5e1   : > { %v1588_v24 = vmul.f32 0.125, %v1368_v16  ;;  %v11761_v18 = vadd.f32 %v1590_v30, %v10965_v3  ;;  %v1619_v25 = vsel %vm906_vm2, %v11754_v46, -inf }
 0x5e3   : > { %v11764_v34 = vadd.f32 %v1588_v24, %v15048_v1  ;;  %v1628_v56 = vsel %vm906_vm2, %v11761_v18, -inf }
 0x5e4   : > { %1620 = vmax.xlane.f32.xlu0 %v1619_v25 }
 0x5e5   : > { %v1622_v19 = vsel %vm906_vm2, %v11764_v34, -inf }
 0x5e6   : > { %1623 = vmax.xlane.f32.xlu1 %v1622_v19 }
 0x5e8   : > { %1629 = vmax.xlane.f32.xlu0 %v1628_v56 }
 0x5e9   : > { %v11776_v22 = vpop.f32.mrf.mxu0 }
 0x5ea   : > { %v9073_v44 = vpop.f32.mrf.mxu1  ;;  %15084 = vst [vmem:[#allocation42_spill] sm:$0xff] %v11776_v22 }
 0x5eb   : > { %v1597_v23 = vmul.f32 0.125, %v9073_v44  ;;  %v11781_v29 = vpop.f32.mrf.mxu0 }
 0x5ec   : > { %v1503_v37 = vpop.f32.mrf.mxu1  ;;  %15085 = vst [vmem:[#allocation43_spill] sm:$0xff] %v11781_v29 }
 0x5ed   : > { %v11779_v60 = vadd.f32 %v1597_v23, %v15047_v2  ;;  %v11788_v24 = vpop.f32.mrf.mxu0  ;;  %v1595_v56 = vmul.f32 0.125, %v1503_v37 }
 0x5ee   : > { %v9074_v51 = vpop.f32.mrf.mxu1  ;;  %15086 = vst [vmem:[#allocation44_spill] sm:$0xff] %v11788_v24 }
 0x5ef   : > { %v1598_v30 = vmul.f32 0.125, %v9074_v51  ;;  %v1649_v17 = vsel %vm906_vm2, %v11779_v60, -inf  ;;  %v11792_v19 = vpop.f32.mrf.mxu0 }
 0x5f0   : > { %1650 = vmax.xlane.f32.xlu0 %v1649_v17  ;;  %15087 = vst [vmem:[#allocation45_spill] sm:$0xff] %v11792_v19  ;;  %v1506_v15 = vpop.f32.mrf.mxu1  ;;  %v11798_v17 = vadd.f32 %v1595_v56, %v15049_v0 }
 0x5f1   : > { %v11786_v16 = vadd.f32 %v1598_v30, %v10965_v3  ;;  %v1596_v14 = vmul.f32 0.125, %v1506_v15 }
 0x5f3   : > { %v1652_v25 = vsel %vm906_vm2, %v11786_v16, -inf }
 0x5f4   : > { %1653 = vmax.xlane.f32.xlu1 %v1652_v25 }
 0x5f9   : > { %v9065_v44 = vpop.f32.mrf.mxu0 }
 0x5fa   : > { %v1593_v23 = vmul.f32 0.125, %v9065_v44  ;;  %v1643_v44 = vsel %vm906_vm2, %v11798_v17, -inf }
 0x5fb   : > { %v1434_v51 = vpop.f32.mrf.mxu0 }
 0x5fc   : > { %v11795_v13 = vadd.f32 %v1593_v23, %v15047_v2  ;;  %v1591_v12 = vmul.f32 0.125, %v1434_v51  ;;  %v11808_v23 = vadd.f32 %v1596_v14, %v15048_v1 }
 0x5fd   : > { %v9066_v30 = vpop.f32.mrf.mxu0 }
 0x5fe   : > { %v1594_v11 = vmul.f32 0.125, %v9066_v30  ;;  %v1637_v25 = vsel %vm906_vm2, %v11795_v13, -inf  ;;  %v11811_v56 = vadd.f32 %v1591_v12, %v15049_v0 }
 0x5ff   : > { %1638 = vmax.xlane.f32.xlu0 %v1637_v25  ;;  %v1437_v9 = vpop.f32.mrf.mxu0  ;;  %v1646_v25 = vsel %vm906_vm2, %v11808_v23, -inf }
 0x600   : > { %v11803_v37 = vadd.f32 %v1594_v11, %v10965_v3  ;;  %v1592_v15 = vmul.f32 0.125, %v1437_v9  ;;  %v1631_v11 = vsel %vm906_vm2, %v11811_v56, -inf }
 0x602   : > { %v1640_v51 = vsel %vm906_vm2, %v11803_v37, -inf  ;;  %v11816_v30 = vadd.f32 %v1592_v15, %v15048_v1 }
 0x603   : > { %1644 = vmax.xlane.f32.xlu0 %v1643_v44  ;;  %1641 = vmax.xlane.f32.xlu1 %v1640_v51 }
 0x604   : > { %v1634_v9 = vsel %vm906_vm2, %v11816_v30, -inf }
 0x607   : > { %1632 = vmax.xlane.f32.xlu0 %v1631_v11  ;;  %1647 = vmax.xlane.f32.xlu1 %v1646_v25 }
 0x609   : > { %v9081_v14 = vpop.f32.mrf.mxu0 }
 0x60a   : > { %v1601_v12 = vmul.f32 0.125, %v9081_v14 }
 0x60b   : > { %1635 = vmax.xlane.f32.xlu1 %v1634_v9  ;;  %v1572_v10 = vpop.f32.mrf.mxu0 }
 0x60c   : > { %v11825_v44 = vadd.f32 %v1601_v12, %v15047_v2  ;;  %v1599_v15 = vmul.f32 0.125, %v1572_v10 }
 0x60d   : > { %v9082_v25 = vpop.f32.mrf.mxu0 }
 0x60e   : > { %v11828_v51 = vadd.f32 %v1599_v15, %v15049_v0  ;;  %v1661_v8 = vsel %vm906_vm2, %v11825_v44, -inf  ;;  %v1602_v10 = vmul.f32 0.125, %v9082_v25 }
 0x60f   : > { %1662 = vmax.xlane.f32.xlu0 %v1661_v8  ;;  %v1575_v14 = vpop.f32.mrf.mxu0 }
 0x610   : > { %v1655_v11 = vsel %vm906_vm2, %v11828_v51, -inf  ;;  %v11839_v12 = vadd.f32 %v1602_v10, %v10965_v3  ;;  %v1600_v9 = vmul.f32 0.125, %v1575_v14 }
 0x612   : > { %v11842_v8 = vadd.f32 %v1600_v9, %v15048_v1  ;;  %v1664_v15 = vsel %vm906_vm2, %v11839_v12, -inf }
 0x613   : > { %1656 = vmax.xlane.f32.xlu0 %v1655_v11 }
 0x614   : > { %v1658_v11 = vsel %vm906_vm2, %v11842_v8, -inf }
 0x61c   : > { %2061 = vrot.lane.b32.xlu1 %v11365_v43, %s10872_s1 }
 0x629   : > { %1870 = vrot.lane.b32.xlu0 %v11413_v33, %s10871_s15 }
 0x640   : > { %1665 = vmax.xlane.f32.xlu1 %v1664_v15 }
 0x644   : > { %1659 = vmax.xlane.f32.xlu1 %v1658_v11 }
 0x669   : > { %v1627_v5 = vpop.xlane.xlu0 %1626 }
 0x66a   : > { %v1669_v25 = vsub.f32 %v11751_v49, %v1627_v5 }
 0x66c   : > { %v1687_v6 = vmul.f32 1.442695, %v1669_v25 }
 0x66d   : > { %v1621_v10 = vpop.xlane.xlu0 %1620 }
 0x66e   : > { %10194 = vpow2.f32 %v1687_v6  ;;  %v1667_v14 = vsub.f32 %v11754_v46, %v1621_v10 }
 0x66f   : > { %v1624_v9 = vpop.xlane.xlu1 %1623 }
 0x670   : > { %v1683_v4 = vmul.f32 1.442695, %v1667_v14  ;;  %v1668_v55 = vsub.f32 %v11764_v34, %v1624_v9 }
 0x671   : > { %v1630_v22 = vpop.xlane.xlu0 %1629 }
 0x672   : > { %10196 = vpow2.f32 %v1683_v4  ;;  %v1670_v15 = vsub.f32 %v11761_v18, %v1630_v22  ;;  %v1685_v24 = vmul.f32 1.442695, %v1668_v55 }
 0x674   : > { %v1689_v11 = vmul.f32 1.442695, %v1670_v15 }
 0x676   : > { %10198 = vpow2.f32 %v1689_v11 }
 0x677   : > { %10200 = vpow2.f32 %v1685_v24 }
 0x679   : > { %v1651_v29 = vpop.xlane.xlu0 %1650 }
 0x67a   : > { %v1677_v5 = vsub.f32 %v11779_v60, %v1651_v29 }
 0x67b   : > { %v11855_v49 = vpop.eup %10194 }
 0x67c   : > { %v1703_v6 = vmul.f32 1.442695, %v1677_v5  ;;  %v1721_v46 = vsel %vm906_vm2, %v11855_v49, 0.0 }
 0x67d   : > { %1722 = vadd.xlane.f32.xlu0 %v1721_v46 }
 0x67e   : > { %10202 = vpow2.f32 %v1703_v6 }
 0x67f   : > { %v11859_v34 = vpop.eup %10196 }
 0x680   : > { %v1715_v4 = vsel %vm906_vm2, %v11859_v34, 0.0 }
 0x681   : > { %1716 = vadd.xlane.f32.xlu0 %v1715_v4 }
 0x683   : > { %v11863_v55 = vpop.eup %10198 }
 0x684   : > { %v1724_v18 = vsel %vm906_vm2, %v11863_v55, 0.0  ;;  %v11867_v22 = vpop.eup %10200 }
 0x685   : > { %1725 = vadd.xlane.f32.xlu1 %v1724_v18  ;;  %v1718_v29 = vsel %vm906_vm2, %v11867_v22, 0.0 }
 0x688   : > { %v1639_v60 = vpop.xlane.xlu0 %1638 }
 0x689   : > { %v1673_v24 = vsub.f32 %v11795_v13, %v1639_v60  ;;  %1719 = vadd.xlane.f32.xlu1 %v1718_v29  ;;  %v1654_v29 = vpop.xlane.xlu1 %1653 }
 0x68b   : > { %v11872_v25 = vpop.eup %10202  ;;  %v1695_v10 = vmul.f32 1.442695, %v1673_v24 }
 0x68c   : > { %v1645_v14 = vpop.xlane.xlu0 %1644  ;;  %v1745_v9 = vsel %vm906_vm2, %v11872_v25, 0.0 }
 0x68d   : > { %10204 = vpow2.f32 %v1695_v10  ;;  %v1675_v15 = vsub.f32 %v11798_v17, %v1645_v14  ;;  %1746 = vadd.xlane.f32.xlu0 %v1745_v9  ;;  %v1642_v24 = vpop.xlane.xlu1 %1641  ;;  %v1678_v10 = vsub.f32 %v11786_v16, %v1654_v29 }
 0x68f   : > { %v1699_v11 = vmul.f32 1.442695, %v1675_v15  ;;  %v1705_v9 = vmul.f32 1.442695, %v1678_v10  ;;  %v1674_v15 = vsub.f32 %v11803_v37, %v1642_v24 }
 0x690   : > { %v1633_v5 = vpop.xlane.xlu0 %1632 }
 0x691   : > { %10206 = vpow2.f32 %v1699_v11  ;;  %v1648_v14 = vpop.xlane.xlu1 %1647  ;;  %v1697_v11 = vmul.f32 1.442695, %v1674_v15  ;;  %v1671_v42 = vsub.f32 %v11811_v56, %v1633_v5 }
 0x692   : > { %10208 = vpow2.f32 %v1705_v9 }
 0x693   : > { %10210 = vpow2.f32 %v1697_v11  ;;  %v1691_v10 = vmul.f32 1.442695, %v1671_v42 }
 0x695   : > { %v1636_v19 = vpop.xlane.xlu1 %1635 }
 0x698   : > { %v1663_v6 = vpop.xlane.xlu0 %1662 }
 0x699   : > { %v1681_v29 = vsub.f32 %v11825_v44, %v1663_v6 }
 0x69a   : > { %v11877_v46 = vpop.eup %10204  ;;  %1996 = vrot.lane.b32.xlu1 %v11427_v47, %s10871_s15 }
 0x69b   : > { %v1733_v13 = vsel %vm906_vm2, %v11877_v46, 0.0  ;;  %v1711_v37 = vmul.f32 1.442695, %v1681_v29 }
 0x69c   : > { %1734 = vadd.xlane.f32.xlu0 %v1733_v13  ;;  %v1657_v4 = vpop.xlane.xlu0 %1656  ;;  %v1676_v13 = vsub.f32 %v11808_v23, %v1648_v14  ;;  %v11902_v14 = vpop.permute.xlu1 %2061 }
 0x69d   : > { %v1679_v24 = vsub.f32 %v11828_v51, %v1657_v4 }
 0x69e   : > { %v11883_v18 = vpop.eup %10206  ;;  %1994 = vrot.lane.b32.xlu1 %v11688_v20, %s10871_s15 }
 0x69f   : > { %v1739_v17 = vsel %vm906_vm2, %v11883_v18, 0.0  ;;  %v11900_v23 = vpop.eup %10208  ;;  %v1707_v9 = vmul.f32 1.442695, %v1679_v24 }
 0x6a0   : > { %1740 = vadd.xlane.f32.xlu0 %v1739_v17  ;;  %v1871_v60 = vpop.permute.xlu0 %1870  ;;  %v1701_v17 = vmul.f32 1.442695, %v1676_v13  ;;  %v11906_v56 = vpop.eup %10210 }
 0x6a1   : > { %9091 = vmatprep.subr.bf16.mxu0 %v1871_v60  ;;  %v1736_v42 = vsel %vm906_vm2, %v11906_v56, 0.0 }
 0x6a2   : > { %9092 = vmatpush3.bf16.msra.mxu0 %v1871_v60  ;;  %2130 = vrot.lane.b32.xlu1 %v11379_v38, %s10872_s1  ;;  %v1672_v60 = vsub.f32 %v11816_v30, %v1636_v19  ;;  %10212 = vpow2.f32 %v1701_v17  ;;  %v1748_v19 = vsel %vm906_vm2, %v11900_v23, 0.0 }
 0x6a4   : > { %v1693_v16 = vmul.f32 1.442695, %v1672_v60 }
 0x6a6   : > { %10214 = vpow2.f32 %v1693_v16 }
 0x6a7   : > { %10216 = vpow2.f32 %v1691_v10 }
 0x6a8   : > { %10218 = vpow2.f32 %v1711_v37 }
 0x6a9   : > { %10220 = vpow2.f32 %v1707_v9 }
 0x6af   : > { %v11910_v44 = vpop.eup %10212 }
 0x6b0   : > { %v1742_v4 = vsel %vm906_vm2, %v11910_v44, 0.0 }
 0x6b3   : > { %v11915_v15 = vpop.eup %10214 }
 0x6b4   : > { %v11918_v17 = vpop.eup %10216  ;;  %v1730_v60 = vsel %vm906_vm2, %v11915_v15, 0.0 }
 0x6b5   : > { %v11922_v16 = vpop.eup %10218 }
 0x6b6   : > { %1868 = vrot.lane.b32.xlu0 %v11421_v50, %s10871_s15  ;;  %v1757_v29 = vsel %vm906_vm2, %v11922_v16, 0.0  ;;  %v11928_v10 = vpop.eup %10220 }
 0x6c6   : > { %1749 = vadd.xlane.f32.xlu1 %v1748_v19 }
 0x6c9   : > { %v1666_v30 = vpop.xlane.xlu1 %1665 }
 0x6ca   : > { %v1682_v51 = vsub.f32 %v11839_v12, %v1666_v30  ;;  %1737 = vadd.xlane.f32.xlu1 %v1736_v42  ;;  %v1727_v12 = vsel %vm906_vm2, %v11918_v17, 0.0 }
 0x6cc   : > { %v1713_v5 = vmul.f32 1.442695, %v1682_v51 }
 0x6cd   : > { %v1660_v6 = vpop.xlane.xlu1 %1659 }
 0x6ce   : > { %10222 = vpow2.f32 %v1713_v5  ;;  %v1680_v11 = vsub.f32 %v11842_v8, %v1660_v6  ;;  %1743 = vadd.xlane.f32.xlu1 %v1742_v4  ;;  %v1751_v8 = vsel %vm906_vm2, %v11928_v10, 0.0 }
 0x6d0   : > { %v1709_v13 = vmul.f32 1.442695, %v1680_v11 }
 0x6d2   : > { %10224 = vpow2.f32 %v1709_v13  ;;  %1731 = vadd.xlane.f32.xlu1 %v1730_v60 }
 0x6d5   : > { %1728 = vadd.xlane.f32.xlu0 %v1727_v12 }
 0x6d6   : > { %1758 = vadd.xlane.f32.xlu1 %v1757_v29 }
 0x6da   : > { %1752 = vadd.xlane.f32.xlu1 %v1751_v8 }
 0x6db   : > { %v11932_v37 = vpop.eup %10222 }
 0x6dc   : > { %v1760_v24 = vsel %vm906_vm2, %v11932_v37, 0.0 }
 0x6de   : > { %1761 = vadd.xlane.f32.xlu1 %v1760_v24 }
 0x6df   : > { %v11936_v9 = vpop.eup %10224 }
 0x6e0   : > { %v1754_v19 = vsel %vm906_vm2, %v11936_v9, 0.0 }
 0x6e2   : > { %1755 = vadd.xlane.f32.xlu1 %v1754_v19 }
 0x6eb   : > { %2059 = vrot.lane.b32.xlu0 %v11357_v45, %s10872_s1 }
 0x6ef   : > { %2055 = vrot.lane.b32.xlu0 %v11357_v45, %s10873_s16 }
 0x6f3   : > { %2199 = vrot.lane.b32.xlu0 %v11393_v52, %s10872_s1  ;;  %2057 = vrot.lane.b32.xlu1 %v11365_v43, %s10873_s16 }
 0x6f7   : > { %2128 = vrot.lane.b32.xlu0 %v11371_v27, %s10872_s1  ;;  %2197 = vrot.lane.b32.xlu1 %v11385_v41, %s10872_s1 }
 0x6fb   : > { %2193 = vrot.lane.b32.xlu0 %v11385_v41, %s10873_s16  ;;  %2124 = vrot.lane.b32.xlu1 %v11371_v27, %s10873_s16 }
 0x6ff   : > { %2195 = vrot.lane.b32.xlu0 %v11393_v52, %s10873_s16  ;;  %2268 = vrot.lane.b32.xlu1 %v11407_v28, %s10872_s1 }
 0x703   : > { %2126 = vrot.lane.b32.xlu0 %v11379_v38, %s10873_s16  ;;  %2266 = vrot.lane.b32.xlu1 %v11401_v39, %s10872_s1 }
 0x706   : > { %v1723_v30 = vpop.xlane.xlu0 %1722 }
 0x707   : > { %2262 = vrot.lane.b32.xlu0 %v11401_v39, %s10873_s16  ;;  %2264 = vrot.lane.b32.xlu1 %v11407_v28, %s10873_s16 }
 0x70a   : > { %v1717_v42 = vpop.xlane.xlu0 %1716 }
 0x70b   : > { %2549 = vrot.lane.b32.xlu0 %v11449_v31, %s10873_s16  ;;  %2547 = vrot.lane.b32.xlu1 %v11455_v48, %s10873_s16 }
 0x70e   : > { %v1726_v51 = vpop.xlane.xlu1 %1725 }
 0x70f   : > { %2671 = vrot.lane.b32.xlu0 %v11463_v26, %s10873_s16  ;;  %10226 = vrcp.f32 %v1726_v51 }
 0x710   : > { %10228 = vrcp.f32 %v1717_v42 }
 0x711   : > { %10230 = vrcp.f32 %v1723_v30 }
 0x712   : > { %v1720_v5 = vpop.xlane.xlu1 %1719 }
 0x713   : > { %2669 = vrot.lane.b32.xlu0 %v11655_v53, %s10873_s16  ;;  %10232 = vrcp.f32 %v1720_v5 }
 0x716   : > { %v1747_v12 = vpop.xlane.xlu0 %1746 }
 0x71c   : > { %v10227_v6 = vpop.eup %10226 }
 0x71d   : > { %v10229_v4 = vpop.eup %10228  ;;  %v1782_v60 = vmul.f32 %v10227_v6, %v11863_v55 }
 0x71e   : > { %v10231_v11 = vpop.eup %10230  ;;  %v1779_v29 = vmul.f32 %v10229_v4, %v11859_v34 }
 0x71f   : > { %v1781_v24 = vmul.f32 %v10231_v11, %v11855_v49  ;;  %v1997_v49 = vpop.permute.xlu1 %1996 }
 0x720   : > { %v10233_v13 = vpop.eup %10232 }
 0x721   : > { %v1780_v8 = vmul.f32 %v10233_v13, %v11867_v22  ;;  %v1796_v30 = vpack.c.bf16 %v1782_v60, %v1781_v24 }
 0x723   : > { %v1795_v19 = vpack.c.bf16 %v1780_v8, %v1779_v29  ;;  %v11987_v55 = vpop.permute.xlu1 %1994 }
 0x725   : > { %v1735_v42 = vpop.xlane.xlu0 %1734  ;;  %9087 = vmatprep.mubr.msk.bf16.mxu1 %vm906_vm2, %v1795_v19 }
 0x726   : > { %9088 = vmatmul.mubr.msk.bf16.vlgmr.msra.gmra.mxu1 %vm906_vm2, %v1796_v30 }
 0x727   : > { %9100 = vmatpush3.bf16.msra.mxu1 %v11722_v57  ;;  %v11989_v22 = vpop.permute.xlu1 %2130 }
 0x728   : > { %9101 = vmatprep.subr.bf16.mxu1 %v11848_v7 }
 0x729   : > { %v1741_v51 = vpop.xlane.xlu0 %1740 }
 0x72b   : > { %9102 = vmatpush3.bf16.msra.mxu1 %v11848_v7 }
 0x72c   : > { %9571 = vmatprep.subr.msk.bf16.mxu1 %vm611_vm1, %v11902_v14 }
 0x72d   : > { %v1869_v34 = vpop.permute.xlu0 %1868 }
 0x72e   : > { %9093 = vmatprep.subr.bf16.mxu0 %v1869_v34 }
 0x72f   : > { %9094 = vmatpush3.bf16.msra.mxu0 %v1869_v34 }
 0x730   : > { %9107 = vmatprep.subr.bf16.mxu0 %v1997_v49 }
 0x74f   : > { %v1750_v5 = vpop.xlane.xlu1 %1749 }
 0x750   : > { %10234 = vrcp.f32 %v1750_v5 }
 0x751   : > { %10236 = vrcp.f32 %v1741_v51 }
 0x752   : > { %10238 = vrcp.f32 %v1747_v12 }
 0x753   : > { %v1738_v6 = vpop.xlane.xlu1 %1737 }
 0x757   : > { %v1744_v57 = vpop.xlane.xlu1 %1743 }
 0x758   : > { %10240 = vrcp.f32 %v1744_v57 }
 0x759   : > { %10242 = vrcp.f32 %v1738_v6 }
 0x75b   : > { %v1732_v7 = vpop.xlane.xlu1 %1731 }
 0x75c   : > { %10244 = vrcp.f32 %v1732_v7 }
 0x75d   : > { %10246 = vrcp.f32 %v1735_v42  ;;  %v10235_v13 = vpop.eup %10234 }
 0x75e   : > { %v1729_v4 = vpop.xlane.xlu0 %1728  ;;  %v10237_v29 = vpop.eup %10236  ;;  %v1790_v30 = vmul.f32 %v10235_v13, %v11900_v23 }
 0x75f   : > { %10248 = vrcp.f32 %v1729_v4  ;;  %v1759_v11 = vpop.xlane.xlu1 %1758  ;;  %v10239_v24 = vpop.eup %10238  ;;  %v1787_v12 = vmul.f32 %v10237_v29, %v11883_v18  ;;  %v2073_v18 = vsel %vm611_vm1, %v11902_v14, 0 }
 0x760   : > { %v1789_v6 = vmul.f32 %v10239_v24, %v11872_v25 }
 0x762   : > { %v2060_v60 = vpop.permute.xlu0 %2059  ;;  %v1800_v7 = vpack.c.bf16 %v1790_v30, %v1789_v6 }
 0x763   : > { %v1753_v8 = vpop.xlane.xlu1 %1752 }
 0x765   : > { %v10241_v19 = vpop.eup %10240 }
 0x766   : > { %v2056_v34 = vpop.permute.xlu0 %2055  ;;  %v1788_v51 = vmul.f32 %v10241_v19, %v11910_v44  ;;  %v10243_v57 = vpop.eup %10242 }
 0x767   : > { %v1762_v5 = vpop.xlane.xlu1 %1761  ;;  %v1786_v25 = vmul.f32 %v10243_v57, %v11906_v56  ;;  %v2070_v56 = vsel %vm611_vm1, %v2060_v60, 0 }
 0x768   : > { %v1799_v42 = vpack.c.bf16 %v1788_v51, %v1787_v12  ;;  %10250 = vrcp.f32 %v1762_v5 }
 0x769   : > { %v10245_v4 = vpop.eup %10244  ;;  %10252 = vrcp.f32 %v1753_v8 }
 0x76a   : > { %v2200_v61 = vpop.permute.xlu0 %2199  ;;  %9103 = vmatprep.mubr.msk.bf16.mxu1 %vm906_vm2, %v1799_v42  ;;  %v10247_v35 = vpop.eup %10246  ;;  %10254 = vrcp.f32 %v1759_v11  ;;  %v1784_v29 = vmul.f32 %v10245_v4, %v11915_v15 }
 0x76b   : > { %9104 = vmatmul.mubr.msk.bf16.vlgmr.msra.gmra.mxu1 %vm906_vm2, %v1800_v7  ;;  %v1756_v23 = vpop.xlane.xlu1 %1755  ;;  %v1785_v8 = vmul.f32 %v10247_v35, %v11877_v46  ;;  %v2211_v42 = vsel %vm611_vm1, %v2200_v61, 0 }
 0x76c   : > { %v10249_v44 = vpop.eup %10248  ;;  %9116 = vmatpush3.bf16.xpose.msra.mxu1 %v2073_v18  ;;  %10256 = vrcp.f32 %v1756_v23  ;;  %9119 = vmatprep.mubr.msk.bf16.mxu1 %vm611_vm1, %v2056_v34 }
 0x76d   : > { %9572 = vmatprep.subr.msk.bf16.mxu1 %vm611_vm1, %v2060_v60  ;;  %v1783_v13 = vmul.f32 %v10249_v44, %v11918_v17  ;;  %v1798_v14 = vpack.c.bf16 %v1786_v25, %v1785_v8 }
 0x76e   : > { %v2129_v11 = vpop.permute.xlu0 %2128 }
 0x76f   : > { %v2058_v24 = vpop.permute.xlu1 %2057  ;;  %v1797_v19 = vpack.c.bf16 %v1784_v29, %v1783_v13  ;;  %v2139_v23 = vsel %vm611_vm1, %v2129_v11, 0 }
 0x771   : > { %9095 = vmatprep.mubr.msk.bf16.mxu0 %vm906_vm2, %v1797_v19 }
 0x772   : > { %v2194_v30 = vpop.permute.xlu0 %2193  ;;  %9096 = vmatmul.mubr.msk.bf16.vlgmr.msra.gmra.mxu0 %vm906_vm2, %v1798_v14 }
 0x773   : > { %9108 = vmatpush3.bf16.msra.mxu0 %v1997_v49  ;;  %v2198_v34 = vpop.permute.xlu1 %2197 }
 0x774   : > { %9109 = vmatprep.subr.bf16.mxu0 %v11987_v55  ;;  %9118 = vmatpush3.bf16.xpose.msra.mxu1 %v2070_v56 }
 0x775   : > { %9575 = vmatprep.subr.msk.bf16.mxu1 %vm611_vm1, %v2200_v61  ;;  %v10251_v15 = vpop.eup %10250 }
 0x776   : > { %v2196_v17 = vpop.permute.xlu0 %2195  ;;  %v10253_v35 = vpop.eup %10252  ;;  %v1794_v49 = vmul.f32 %v10251_v15, %v11932_v37 }
 0x777   : > { %9110 = vmatpush3.bf16.msra.mxu0 %v11987_v55  ;;  %v2125_v46 = vpop.permute.xlu1 %2124  ;;  %v10255_v12 = vpop.eup %10254  ;;  %v1791_v5 = vmul.f32 %v10253_v35, %v11928_v10  ;;  %v2142_v10 = vsel %vm611_vm1, %v11989_v22, 0 }
 0x778   : > { %9573 = vmatprep.subr.msk.bf16.mxu0 %vm611_vm1, %v11989_v22  ;;  %v1793_v55 = vmul.f32 %v10255_v12, %v11922_v16  ;;  %v2208_v16 = vsel %vm611_vm1, %v2198_v34, 0 }
 0x779   : > { %v10257_v51 = vpop.eup %10256 }
 0x77a   : > { %v2127_v60 = vpop.permute.xlu0 %2126  ;;  %v1792_v6 = vmul.f32 %v10257_v51, %v11936_v9  ;;  %v1802_v4 = vpack.c.bf16 %v1794_v49, %v1793_v55 }
 0x77b   : > { %9120 = vmatmul.mubr.msk.bf16.vlgmr.msra.gmra.mxu1 %vm611_vm1, %v2058_v24  ;;  %v2269_v57 = vpop.permute.xlu1 %2268 }
 0x77c   : > { %9132 = vmatpush3.bf16.xpose.msra.mxu1 %v2211_v42  ;;  %9135 = vmatprep.mubr.msk.bf16.mxu1 %vm611_vm1, %v2194_v30  ;;  %v1801_v7 = vpack.c.bf16 %v1792_v6, %v1791_v5  ;;  %v2280_v44 = vsel %vm611_vm1, %v2269_v57, 0 }
 0x77d   : > { %9576 = vmatprep.subr.msk.bf16.mxu1 %vm611_vm1, %v2198_v34 }
 0x77e   : > { %v2263_v37 = vpop.permute.xlu0 %2262  ;;  %9111 = vmatprep.mubr.msk.bf16.mxu0 %vm906_vm2, %v1801_v7 }
 0x77f   : > { %9112 = vmatmul.mubr.msk.bf16.vlgmr.msra.gmra.mxu0 %vm906_vm2, %v1802_v4  ;;  %v2267_v61 = vpop.permute.xlu1 %2266 }
 0x780   : > { %9124 = vmatpush3.bf16.xpose.msra.mxu0 %v2142_v10  ;;  %9127 = vmatprep.mubr.msk.bf16.mxu0 %vm611_vm1, %v2125_v46  ;;  %v2277_v13 = vsel %vm611_vm1, %v2267_v61, 0 }
 0x781   : > { %9574 = vmatprep.subr.msk.bf16.mxu0 %vm611_vm1, %v2129_v11 }
 0x782   : > { %v2550_v9 = vpop.permute.xlu0 %2549 }
 0x783   : > { %v2265_v18 = vpop.permute.xlu1 %2264 }
 0x784   : > { %9134 = vmatpush3.bf16.xpose.msra.mxu1 %v2208_v16 }
 0x785   : > { %9147 = vmatprep.subr.bf16.mxu1 %v2550_v9 }
 0x786   : > { %v12034_v25 = vpop.permute.xlu0 %2671 }
 0x787   : > { %v2548_v22 = vpop.permute.xlu1 %2547 }
 0x788   : > { %9126 = vmatpush3.bf16.xpose.msra.mxu0 %v2139_v23 }
 0x789   : > { %9577 = vmatprep.subr.msk.bf16.mxu0 %vm611_vm1, %v2269_v57 }
 0x78b   : > { %9136 = vmatmul.mubr.msk.bf16.vlgmr.msra.gmra.mxu1 %vm611_vm1, %v2196_v17 }
 0x78c   : > { %9148 = vmatpush3.bf16.msra.mxu1 %v2550_v9 }
 0x78d   : > { %9149 = vmatprep.subr.bf16.mxu1 %v2548_v22 }
 0x78f   : > { %9128 = vmatmul.mubr.msk.bf16.vlgmr.msra.gmra.mxu0 %vm611_vm1, %v2127_v60 }
 0x790   : > { %9140 = vmatpush3.bf16.xpose.msra.mxu0 %v2280_v44  ;;  %9143 = vmatprep.mubr.msk.bf16.mxu0 %vm611_vm1, %v2263_v37 }
 0x791   : > { %9150 = vmatpush3.bf16.msra.mxu1 %v2548_v22  ;;  %9578 = vmatprep.subr.msk.bf16.mxu0 %vm611_vm1, %v2267_v61 }
 0x792   : > { %9163 = vmatprep.subr.bf16.mxu1 %v12034_v25 }
 0x798   : > { %9142 = vmatpush3.bf16.xpose.msra.mxu0 %v2277_v13 }
 0x79f   : > { %9144 = vmatmul.mubr.msk.bf16.vlgmr.msra.gmra.mxu0 %vm611_vm1, %v2265_v18 }
 0x7e6   : > { %v12040_v29 = vpop.f32.mrf.mxu1 }
 0x7e7   : > { %15088 = vst [vmem:[#allocation46_spill] sm:$0xff] %v12040_v29 }
 0x7e8   : > { %v12042_v11 = vpop.f32.mrf.mxu1 }
 0x7ea   : > { %v12044_v8 = vpop.f32.mrf.mxu1 }
 0x7eb   : > { %15089 = vst [vmem:[#allocation47_spill] sm:$0xff] %v12044_v8 }
 0x7ec   : > { %v12048_v19 = vpop.f32.mrf.mxu1 }
 0x82b   : > { %v12050_v14 = vpop.f32.mrf.mxu1 }
 0x82c   : > { %15090 = vst [vmem:[#allocation48_spill] sm:$0xff] %v12050_v14 }
 0x82d   : > { %v12052_v30 = vpop.f32.mrf.mxu1 }
 0x82e   : > { %15091 = vst [vmem:[#allocation49_spill] sm:$0xff] %v12052_v30 }
 0x82f   : > { %v12054_v56 = vpop.f32.mrf.mxu1 }
 0x830   : > { %15092 = vst [vmem:[#allocation50_spill] sm:$0xff] %v12054_v56 }
 0x831   : > { %v12066_v12 = vpop.f32.mrf.mxu1 }
 0x832   : > { %v12058_v15 = vpop.f32.mrf.mxu0  ;;  %15096 = vst [vmem:[#allocation54_spill] sm:$0xff] %v12066_v12 }
 0x833   : > { %15093 = vst [vmem:[#allocation51_spill] sm:$0xff] %v12058_v15 }
 0x834   : > { %v12060_v17 = vpop.f32.mrf.mxu0 }
 0x835   : > { %15094 = vst [vmem:[#allocation52_spill] sm:$0xff] %v12060_v17 }
 0x836   : > { %v12062_v35 = vpop.f32.mrf.mxu0 }
 0x837   : > { %15095 = vst [vmem:[#allocation53_spill] sm:$0xff] %v12062_v35 }
 0x838   : > { %v12068_v60 = vpop.f32.mrf.mxu0 }
 0x839   : > { %15097 = vst [vmem:[#allocation55_spill] sm:$0xff] %v12068_v60 }
 0x83b   : > { %v9121_v51 = vpop.f32.mrf.mxu1 }
 0x83c   : > { %v2333_v49 = vmul.f32 0.125, %v9121_v51 }
 0x83d   : > { %v2109_v5 = vpop.f32.mrf.mxu1 }
 0x83e   : > { %v12071_v6 = vadd.f32 %v2333_v49, %v15047_v2  ;;  %v2331_v42 = vmul.f32 0.125, %v2109_v5 }
 0x83f   : > { %v9122_v57 = vpop.f32.mrf.mxu1  ;;  %v12073_v55 = vpop.f32.mrf.mxu0 }
 0x840   : > { %15098 = vst [vmem:[#allocation56_spill] sm:$0xff] %v12073_v55  ;;  %v12076_v7 = vadd.f32 %v2331_v42, %v15049_v0  ;;  %v2334_v4 = vmul.f32 0.125, %v9122_v57  ;;  %v2369_v37 = vsel %vm906_vm2, %v12071_v6, -inf }
 0x841   : > { %2370 = vmax.xlane.f32.xlu0 %v2369_v37  ;;  %v2112_v10 = vpop.f32.mrf.mxu1  ;;  %v12080_v61 = vpop.f32.mrf.mxu0 }
 0x842   : > { %15099 = vst [vmem:[#allocation57_spill] sm:$0xff] %v12080_v61  ;;  %v2332_v16 = vmul.f32 0.125, %v2112_v10  ;;  %v12085_v18 = vadd.f32 %v2334_v4, %v10965_v3  ;;  %v2363_v44 = vsel %vm906_vm2, %v12076_v7, -inf  ;;  %v12164_v61 = vpop.permute.xlu0 %2669 }
 0x843   : > { %v12082_v9 = vpop.f32.mrf.mxu0 }
 0x844   : > { %15100 = vst [vmem:[#allocation58_spill] sm:$0xff] %v12082_v9  ;;  %v12088_v23 = vadd.f32 %v2332_v16, %v15048_v1  ;;  %v2372_v51 = vsel %vm906_vm2, %v12085_v18, -inf }
 0x845   : > { %2364 = vmax.xlane.f32.xlu0 %v2363_v44  ;;  %v12098_v42 = vpop.f32.mrf.mxu0 }
 0x846   : > { %v2366_v13 = vsel %vm906_vm2, %v12088_v23, -inf  ;;  %15101 = vst [vmem:[#allocation59_spill] sm:$0xff] %v12098_v42 }
 0x847   : > { %2367 = vmax.xlane.f32.xlu1 %v2366_v13 }
 0x849   : > { %2373 = vmax.xlane.f32.xlu0 %v2372_v51 }
 0x84b   : > { %v9137_v49 = vpop.f32.mrf.mxu1 }
 0x84c   : > { %v2341_v5 = vmul.f32 0.125, %v9137_v49 }
 0x84d   : > { %v2247_v57 = vpop.f32.mrf.mxu1 }
 0x84e   : > { %v12101_v4 = vadd.f32 %v2341_v5, %v15047_v2  ;;  %v2339_v13 = vmul.f32 0.125, %v2247_v57 }
 0x84f   : > { %v9129_v37 = vpop.f32.mrf.mxu0  ;;  %v9138_v10 = vpop.f32.mrf.mxu1 }
 0x850   : > { %v2337_v16 = vmul.f32 0.125, %v9129_v37  ;;  %v2342_v44 = vmul.f32 0.125, %v9138_v10  ;;  %v2393_v22 = vsel %vm906_vm2, %v12101_v4, -inf  ;;  %v12114_v10 = vadd.f32 %v2339_v13, %v15049_v0 }
 0x851   : > { %2394 = vmax.xlane.f32.xlu0 %v2393_v22  ;;  %v2178_v34 = vpop.f32.mrf.mxu0  ;;  %v2250_v46 = vpop.f32.mrf.mxu1 }
 0x852   : > { %v12106_v51 = vadd.f32 %v2337_v16, %v15047_v2  ;;  %v12109_v49 = vadd.f32 %v2342_v44, %v10965_v3  ;;  %v2340_v5 = vmul.f32 0.125, %v2250_v46  ;;  %v2335_v55 = vmul.f32 0.125, %v2178_v34 }
 0x853   : > { %v9130_v24 = vpop.f32.mrf.mxu0  ;;  %v2387_v34 = vsel %vm906_vm2, %v12114_v10, -inf }
 0x854   : > { %v2338_v21 = vmul.f32 0.125, %v9130_v24  ;;  %v2396_v37 = vsel %vm906_vm2, %v12109_v49, -inf  ;;  %v2381_v22 = vsel %vm906_vm2, %v12106_v51, -inf  ;;  %v12122_v44 = vadd.f32 %v2340_v5, %v15048_v1 }
 0x855   : > { %2397 = vmax.xlane.f32.xlu1 %v2396_v37  ;;  %v2181_v57 = vpop.f32.mrf.mxu0  ;;  %2382 = vmax.xlane.f32.xlu0 %v2381_v22  ;;  %v12127_v13 = vadd.f32 %v2335_v55, %v15049_v0 }
 0x856   : > { %v12119_v16 = vadd.f32 %v2338_v21, %v10965_v3  ;;  %v2336_v24 = vmul.f32 0.125, %v2181_v57  ;;  %v2390_v21 = vsel %vm906_vm2, %v12122_v44, -inf }
 0x857   : > { %v2375_v5 = vsel %vm906_vm2, %v12127_v13, -inf }
 0x858   : > { %v2384_v46 = vsel %vm906_vm2, %v12119_v16, -inf  ;;  %v12132_v37 = vadd.f32 %v2336_v24, %v15048_v1 }
 0x859   : > { %2385 = vmax.xlane.f32.xlu1 %v2384_v46  ;;  %2388 = vmax.xlane.f32.xlu0 %v2387_v34 }
 0x85a   : > { %v2378_v55 = vsel %vm906_vm2, %v12132_v37, -inf }
 0x85d   : > { %2391 = vmax.xlane.f32.xlu1 %v2390_v21  ;;  %2376 = vmax.xlane.f32.xlu0 %v2375_v5 }
 0x85f   : > { %v9145_v22 = vpop.f32.mrf.mxu0 }
 0x860   : > { %v2345_v57 = vmul.f32 0.125, %v9145_v22 }
 0x861   : > { %2379 = vmax.xlane.f32.xlu1 %v2378_v55  ;;  %v2316_v9 = vpop.f32.mrf.mxu0 }
 0x862   : > { %v12141_v46 = vadd.f32 %v2345_v57, %v15047_v2  ;;  %v2343_v24 = vmul.f32 0.125, %v2316_v9 }
 0x863   : > { %v9146_v5 = vpop.f32.mrf.mxu0 }
 0x864   : > { %v12144_v34 = vadd.f32 %v2343_v24, %v15049_v0  ;;  %v2405_v42 = vsel %vm906_vm2, %v12141_v46, -inf  ;;  %v2346_v9 = vmul.f32 0.125, %v9146_v5 }
 0x865   : > { %2406 = vmax.xlane.f32.xlu0 %v2405_v42  ;;  %v2319_v22 = vpop.f32.mrf.mxu0 }
 0x866   : > { %v2399_v21 = vsel %vm906_vm2, %v12144_v34, -inf  ;;  %v12155_v57 = vadd.f32 %v2346_v9, %v10965_v3  ;;  %v2344_v55 = vmul.f32 0.125, %v2319_v22 }
 0x868   : > { %v12158_v42 = vadd.f32 %v2344_v55, %v15048_v1  ;;  %v2408_v24 = vsel %vm906_vm2, %v12155_v57, -inf }
 0x869   : > { %2400 = vmax.xlane.f32.xlu0 %v2399_v21 }
 0x86a   : > { %v2402_v21 = vsel %vm906_vm2, %v12158_v42, -inf }
 0x872   : > { %2797 = vrot.lane.b32.xlu1 %v11365_v43, %s10874_s17 }
 0x87f   : > { %2610 = vrot.lane.b32.xlu0 %v11413_v33, %s10873_s16 }
 0x896   : > { %2409 = vmax.xlane.f32.xlu1 %v2408_v24 }
 0x89a   : > { %2403 = vmax.xlane.f32.xlu1 %v2402_v21 }
 0x8ca   : > { %v2371_v58 = vpop.xlane.xlu0 %2370 }
 0x8cb   : > { %v2413_v5 = vsub.f32 %v12071_v6, %v2371_v58 }
 0x8cd   : > { %v2431_v32 = vmul.f32 1.442695, %v2413_v5 }
 0x8ce   : > { %v2365_v9 = vpop.xlane.xlu0 %2364 }
 0x8cf   : > { %10258 = vpow2.f32 %v2431_v32  ;;  %v2411_v22 = vsub.f32 %v12076_v7, %v2365_v9 }
 0x8d0   : > { %v2368_v55 = vpop.xlane.xlu1 %2367 }
 0x8d1   : > { %v2427_v40 = vmul.f32 1.442695, %v2411_v22  ;;  %v2412_v63 = vsub.f32 %v12088_v23, %v2368_v55 }
 0x8d2   : > { %v2374_v54 = vpop.xlane.xlu0 %2373 }
 0x8d3   : > { %10260 = vpow2.f32 %v2427_v40  ;;  %v2414_v24 = vsub.f32 %v12085_v18, %v2374_v54  ;;  %v2429_v36 = vmul.f32 1.442695, %v2412_v63 }
 0x8d5   : > { %v2433_v21 = vmul.f32 1.442695, %v2414_v24 }
 0x8d7   : > { %10262 = vpow2.f32 %v2433_v21 }
 0x8d8   : > { %10264 = vpow2.f32 %v2429_v36 }
 0x8da   : > { %v2395_v62 = vpop.xlane.xlu0 %2394 }
 0x8db   : > { %v2421_v58 = vsub.f32 %v12101_v4, %v2395_v62 }
 0x8dc   : > { %v12171_v6 = vpop.eup %10258 }
 0x8dd   : > { %v2447_v32 = vmul.f32 1.442695, %v2421_v58  ;;  %v2465_v7 = vsel %vm906_vm2, %v12171_v6, 0.0 }
 0x8de   : > { %2466 = vadd.xlane.f32.xlu0 %v2465_v7  ;;  %v2383_v23 = vpop.xlane.xlu0 %2382 }
 0x8df   : > { %10266 = vpow2.f32 %v2447_v32  ;;  %v2417_v40 = vsub.f32 %v12106_v51, %v2383_v23 }
 0x8e0   : > { %v12175_v5 = vpop.eup %10260 }
 0x8e1   : > { %v2459_v63 = vsel %vm906_vm2, %v12175_v5, 0.0  ;;  %v2439_v54 = vmul.f32 1.442695, %v2417_v40 }
 0x8e2   : > { %2460 = vadd.xlane.f32.xlu0 %v2459_v63  ;;  %v2389_v36 = vpop.xlane.xlu0 %2388 }
 0x8e3   : > { %10268 = vpow2.f32 %v2439_v54  ;;  %v2419_v18 = vsub.f32 %v12114_v10, %v2389_v36  ;;  %v2398_v54 = vpop.xlane.xlu1 %2397 }
 0x8e4   : > { %v12180_v62 = vpop.eup %10262 }
 0x8e5   : > { %v2468_v4 = vsel %vm906_vm2, %v12180_v62, 0.0  ;;  %v12185_v9 = vpop.eup %10264  ;;  %v2443_v22 = vmul.f32 1.442695, %v2419_v18  ;;  %v2422_v18 = vsub.f32 %v12109_v49, %v2398_v54 }
 0x8e6   : > { %2469 = vadd.xlane.f32.xlu1 %v2468_v4  ;;  %v2462_v51 = vsel %vm906_vm2, %v12185_v9, 0.0  ;;  %v2377_v55 = vpop.xlane.xlu0 %2376 }
 0x8e7   : > { %10270 = vpow2.f32 %v2443_v22  ;;  %v2386_v36 = vpop.xlane.xlu1 %2385  ;;  %v2449_v22 = vmul.f32 1.442695, %v2422_v18 }
 0x8e9   : > { %10272 = vpow2.f32 %v2449_v22 }
 0x8ea   : > { %2463 = vadd.xlane.f32.xlu1 %v2462_v51  ;;  %v2418_v51 = vsub.f32 %v12119_v16, %v2386_v36 }
 0x8eb   : > { %v2392_v4 = vpop.xlane.xlu1 %2391 }
 0x8ec   : > { %v12189_v24 = vpop.eup %10266 }
 0x8ed   : > { %v2489_v21 = vsel %vm906_vm2, %v12189_v24, 0.0 }
 0x8ee   : > { %v2407_v58 = vpop.xlane.xlu0 %2406  ;;  %2490 = vadd.xlane.f32.xlu0 %v2489_v21  ;;  %v2415_v21 = vsub.f32 %v12127_v13, %v2377_v55 }
 0x8ef   : > { %v2380_v59 = vpop.xlane.xlu1 %2379  ;;  %v2425_v54 = vsub.f32 %v12141_v46, %v2407_v58 }
 0x8f0   : > { %v12193_v10 = vpop.eup %10268  ;;  %v2416_v56 = vsub.f32 %v12132_v37, %v2380_v59 }
 0x8f1   : > { %v2477_v32 = vsel %vm906_vm2, %v12193_v10, 0.0  ;;  %v2455_v13 = vmul.f32 1.442695, %v2425_v54 }
 0x8f2   : > { %v2401_v7 = vpop.xlane.xlu0 %2400  ;;  %2478 = vadd.xlane.f32.xlu0 %v2477_v32  ;;  %v2441_v32 = vmul.f32 1.442695, %v2418_v51  ;;  %v2437_v49 = vmul.f32 1.442695, %v2416_v56 }
 0x8f3   : > { %v12214_v12 = vpop.permute.xlu1 %2797  ;;  %v2423_v55 = vsub.f32 %v12144_v34, %v2401_v7 }
 0x8f4   : > { %v12197_v23 = vpop.eup %10270  ;;  %10274 = vpow2.f32 %v2441_v32 }
 0x8f5   : > { %v2483_v40 = vsel %vm906_vm2, %v12197_v23, 0.0 }
 0x8f6   : > { %v2611_v63 = vpop.permute.xlu0 %2610  ;;  %2484 = vadd.xlane.f32.xlu0 %v2483_v40  ;;  %v2420_v40 = vsub.f32 %v12122_v44, %v2392_v4  ;;  %v12218_v36 = vpop.eup %10272  ;;  %v2451_v44 = vmul.f32 1.442695, %v2423_v55 }
 0x8f7   : > { %9155 = vmatprep.subr.bf16.mxu0 %v2611_v63  ;;  %v2492_v59 = vsel %vm906_vm2, %v12218_v36, 0.0 }
 0x8f8   : > { %9156 = vmatpush3.bf16.msra.mxu0 %v2611_v63  ;;  %v2435_v63 = vmul.f32 1.442695, %v2415_v21  ;;  %v2445_v14 = vmul.f32 1.442695, %v2420_v40 }
 0x8fa   : > { %10276 = vpow2.f32 %v2435_v63 }
 0x8fb   : > { %2732 = vrot.lane.b32.xlu1 %v11427_v47, %s10873_s16  ;;  %10278 = vpow2.f32 %v2445_v14 }
 0x8fc   : > { %10280 = vpow2.f32 %v2437_v49 }
 0x8fd   : > { %10282 = vpow2.f32 %v2455_v13 }
 0x8fe   : > { %10284 = vpow2.f32 %v2451_v44 }
 0x8ff   : > { %2730 = vrot.lane.b32.xlu1 %v11688_v20, %s10873_s16 }
 0x901   : > { %v12223_v37 = vpop.eup %10274 }
 0x902   : > { %v2480_v34 = vsel %vm906_vm2, %v12223_v37, 0.0 }
 0x903   : > { %2866 = vrot.lane.b32.xlu1 %v11379_v38, %s10874_s17 }
 0x907   : > { %v12225_v56 = vpop.eup %10276 }
 0x908   : > { %v12230_v7 = vpop.eup %10278 }
 0x909   : > { %v2486_v22 = vsel %vm906_vm2, %v12230_v7, 0.0  ;;  %v12236_v51 = vpop.eup %10280 }
 0x90a   : > { %v12240_v21 = vpop.eup %10282 }
 0x90b   : > { %v2501_v32 = vsel %vm906_vm2, %v12240_v21, 0.0  ;;  %v12244_v40 = vpop.eup %10284 }
 0x90c   : > { %2608 = vrot.lane.b32.xlu0 %v11421_v50, %s10873_s16  ;;  %v2495_v63 = vsel %vm906_vm2, %v12244_v40, 0.0 }
 0x91f   : > { %v2410_v16 = vpop.xlane.xlu1 %2409 }
 0x920   : > { %v2426_v18 = vsub.f32 %v12155_v57, %v2410_v16  ;;  %v2471_v57 = vsel %vm906_vm2, %v12225_v56, 0.0 }
 0x922   : > { %v2457_v46 = vmul.f32 1.442695, %v2426_v18 }
 0x923   : > { %v2404_v14 = vpop.xlane.xlu1 %2403 }
 0x924   : > { %v2424_v58 = vsub.f32 %v12158_v42, %v2404_v14  ;;  %10286 = vpow2.f32 %v2457_v46  ;;  %v2474_v42 = vsel %vm906_vm2, %v12236_v51, 0.0 }
 0x926   : > { %v2453_v4 = vmul.f32 1.442695, %v2424_v58 }
 0x927   : > { %2493 = vadd.xlane.f32.xlu1 %v2492_v59 }
 0x928   : > { %10288 = vpow2.f32 %v2453_v4 }
 0x92b   : > { %2481 = vadd.xlane.f32.xlu1 %v2480_v34  ;;  %2472 = vadd.xlane.f32.xlu0 %v2471_v57 }
 0x92f   : > { %2487 = vadd.xlane.f32.xlu1 %v2486_v22 }
 0x931   : > { %v12248_v49 = vpop.eup %10286 }
 0x932   : > { %v2504_v54 = vsel %vm906_vm2, %v12248_v49, 0.0 }
 0x933   : > { %2475 = vadd.xlane.f32.xlu1 %v2474_v42 }
 0x935   : > { %v12252_v16 = vpop.eup %10288 }
 0x936   : > { %v2498_v13 = vsel %vm906_vm2, %v12252_v16, 0.0 }
 0x937   : > { %2502 = vadd.xlane.f32.xlu1 %v2501_v32 }
 0x93b   : > { %2496 = vadd.xlane.f32.xlu1 %v2495_v63 }
 0x93f   : > { %2505 = vadd.xlane.f32.xlu1 %v2504_v54 }
 0x941   : > { %2795 = vrot.lane.b32.xlu0 %v11357_v45, %s10874_s17 }
 0x943   : > { %2499 = vadd.xlane.f32.xlu1 %v2498_v13 }
 0x945   : > { %2791 = vrot.lane.b32.xlu0 %v11357_v45, %s10875_s18 }
 0x949   : > { %2935 = vrot.lane.b32.xlu0 %v11393_v52, %s10874_s17 }
 0x94d   : > { %2864 = vrot.lane.b32.xlu0 %v11371_v27, %s10874_s17 }
 0x951   : > { %2929 = vrot.lane.b32.xlu0 %v11385_v41, %s10875_s18 }
 0x954   : > { %2793 = vrot.lane.b32.xlu1 %v11365_v43, %s10875_s18 }
 0x955   : > { %2931 = vrot.lane.b32.xlu0 %v11393_v52, %s10875_s18 }
 0x958   : > { %2933 = vrot.lane.b32.xlu1 %v11385_v41, %s10874_s17 }
 0x959   : > { %2862 = vrot.lane.b32.xlu0 %v11379_v38, %s10875_s18 }
 0x95c   : > { %2860 = vrot.lane.b32.xlu1 %v11371_v27, %s10875_s18 }
 0x95d   : > { %2998 = vrot.lane.b32.xlu0 %v11401_v39, %s10875_s18 }
 0x960   : > { %3004 = vrot.lane.b32.xlu1 %v11407_v28, %s10874_s17 }
 0x961   : > { %3285 = vrot.lane.b32.xlu0 %v11449_v31, %s10875_s18 }
 0x964   : > { %3002 = vrot.lane.b32.xlu1 %v11401_v39, %s10874_s17 }
 0x965   : > { %3407 = vrot.lane.b32.xlu0 %v11463_v26, %s10875_s18 }
 0x967   : > { %v2467_v55 = vpop.xlane.xlu0 %2466 }
 0x968   : > { %3000 = vrot.lane.b32.xlu1 %v11407_v28, %s10875_s18 }
 0x969   : > { %3405 = vrot.lane.b32.xlu0 %v11655_v53, %s10875_s18 }
 0x96b   : > { %v2461_v44 = vpop.xlane.xlu0 %2460 }
 0x96c   : > { %3283 = vrot.lane.b32.xlu1 %v11455_v48, %s10875_s18 }
 0x96f   : > { %v2470_v18 = vpop.xlane.xlu1 %2469 }
 0x970   : > { %10290 = vrcp.f32 %v2470_v18 }
 0x971   : > { %10292 = vrcp.f32 %v2461_v44 }
 0x972   : > { %10294 = vrcp.f32 %v2467_v55 }
 0x973   : > { %v2464_v59 = vpop.xlane.xlu1 %2463 }
 0x974   : > { %10296 = vrcp.f32 %v2464_v59 }
 0x977   : > { %v2491_v14 = vpop.xlane.xlu0 %2490  ;;  %v12296_v18 = vpop.permute.xlu1 %2732 }
 0x97b   : > { %v2479_v46 = vpop.xlane.xlu0 %2478 }
 0x97d   : > { %v10291_v58 = vpop.eup %10290 }
 0x97e   : > { %v10293_v34 = vpop.eup %10292  ;;  %v2526_v42 = vmul.f32 %v10291_v58, %v12180_v62 }
 0x97f   : > { %v10295_v57 = vpop.eup %10294  ;;  %v2485_v4 = vpop.xlane.xlu0 %2484  ;;  %v2523_v32 = vmul.f32 %v10293_v34, %v12175_v5 }
 0x980   : > { %v2525_v54 = vmul.f32 %v10295_v57, %v12171_v6  ;;  %v2731_v6 = vpop.permute.xlu1 %2730 }
 0x981   : > { %v10297_v22 = vpop.eup %10296 }
 0x982   : > { %v2524_v63 = vmul.f32 %v10297_v22, %v12185_v9  ;;  %v2540_v55 = vpack.c.bf16 %v2526_v42, %v2525_v54 }
 0x983   : > { %v2609_v13 = vpop.permute.xlu0 %2608 }
 0x984   : > { %v2539_v44 = vpack.c.bf16 %v2524_v63, %v2523_v32  ;;  %9157 = vmatprep.subr.bf16.mxu0 %v2609_v13  ;;  %v12306_v5 = vpop.permute.xlu1 %2866 }
 0x985   : > { %9158 = vmatpush3.bf16.msra.mxu0 %v2609_v13 }
 0x986   : > { %9151 = vmatprep.mubr.msk.bf16.mxu1 %vm906_vm2, %v2539_v44  ;;  %9171 = vmatprep.subr.bf16.mxu0 %v12296_v18 }
 0x987   : > { %9152 = vmatmul.mubr.msk.bf16.vlgmr.msra.gmra.mxu1 %vm906_vm2, %v2540_v55 }
 0x988   : > { %9164 = vmatpush3.bf16.msra.mxu1 %v12034_v25 }
 0x989   : > { %9165 = vmatprep.subr.bf16.mxu1 %v12164_v61 }
 0x98c   : > { %9166 = vmatpush3.bf16.msra.mxu1 %v12164_v61 }
 0x98d   : > { %9579 = vmatprep.subr.msk.bf16.mxu1 %vm611_vm1, %v12214_v12 }
 0x9b0   : > { %v2494_v62 = vpop.xlane.xlu1 %2493 }
 0x9b1   : > { %10298 = vrcp.f32 %v2494_v62 }
 0x9b2   : > { %10300 = vrcp.f32 %v2485_v4 }
 0x9b3   : > { %10302 = vrcp.f32 %v2491_v14 }
 0x9b4   : > { %v2482_v9 = vpop.xlane.xlu1 %2481  ;;  %v2473_v59 = vpop.xlane.xlu0 %2472 }
 0x9b8   : > { %v2488_v58 = vpop.xlane.xlu1 %2487  ;;  %v2796_v34 = vpop.permute.xlu0 %2795 }
 0x9b9   : > { %10304 = vrcp.f32 %v2488_v58 }
 0x9ba   : > { %10306 = vrcp.f32 %v2482_v9 }
 0x9bb   : > { %10308 = vrcp.f32 %v2473_v59 }
 0x9bc   : > { %10310 = vrcp.f32 %v2479_v46  ;;  %v2476_v25 = vpop.xlane.xlu1 %2475  ;;  %v2792_v61 = vpop.permute.xlu0 %2791 }
 0x9bd   : > { %10312 = vrcp.f32 %v2476_v25 }
 0x9be   : > { %v10299_v42 = vpop.eup %10298 }
 0x9bf   : > { %v10301_v32 = vpop.eup %10300  ;;  %v2534_v44 = vmul.f32 %v10299_v42, %v12218_v36 }
 0x9c0   : > { %v2503_v57 = vpop.xlane.xlu1 %2502  ;;  %v2936_v22 = vpop.permute.xlu0 %2935  ;;  %v2531_v55 = vmul.f32 %v10301_v32, %v12197_v23 }
 0x9c1   : > { %v10303_v54 = vpop.eup %10302 }
 0x9c2   : > { %v2533_v59 = vmul.f32 %v10303_v54, %v12189_v24  ;;  %v2809_v24 = vsel %vm611_vm1, %v12214_v12, 0  ;;  %v2806_v12 = vsel %vm611_vm1, %v2796_v34, 0 }
 0x9c4   : > { %v2497_v63 = vpop.xlane.xlu1 %2496  ;;  %v12309_v14 = vpop.permute.xlu0 %2864  ;;  %v2544_v15 = vpack.c.bf16 %v2534_v44, %v2533_v59 }
 0x9c6   : > { %v10305_v13 = vpop.eup %10304 }
 0x9c7   : > { %v10307_v4 = vpop.eup %10306  ;;  %v2532_v62 = vmul.f32 %v10305_v13, %v12230_v7 }
 0x9c8   : > { %v10309_v46 = vpop.eup %10308  ;;  %v2506_v9 = vpop.xlane.xlu1 %2505  ;;  %v2530_v35 = vmul.f32 %v10307_v4, %v12223_v37 }
 0x9c9   : > { %v10311_v58 = vpop.eup %10310  ;;  %v2543_v25 = vpack.c.bf16 %v2532_v62, %v2531_v55  ;;  %10314 = vrcp.f32 %v2506_v9  ;;  %v2527_v36 = vmul.f32 %v10309_v46, %v12225_v56  ;;  %v2930_v32 = vpop.permute.xlu0 %2929  ;;  %v2875_v9 = vsel %vm611_vm1, %v12309_v14, 0 }
 0x9ca   : > { %v10313_v30 = vpop.eup %10312  ;;  %10316 = vrcp.f32 %v2497_v63  ;;  %v2529_v42 = vmul.f32 %v10311_v58, %v12193_v10 }
 0x9cb   : > { %9167 = vmatprep.mubr.msk.bf16.mxu1 %vm906_vm2, %v2543_v25  ;;  %v2528_v23 = vmul.f32 %v10313_v30, %v12236_v51  ;;  %10318 = vrcp.f32 %v2503_v57 }
 0x9cc   : > { %9168 = vmatmul.mubr.msk.bf16.vlgmr.msra.gmra.mxu1 %vm906_vm2, %v2544_v15  ;;  %v2500_v7 = vpop.xlane.xlu1 %2499  ;;  %v2542_v56 = vpack.c.bf16 %v2530_v35, %v2529_v42 }
 0x9cd   : > { %9180 = vmatpush3.bf16.xpose.msra.mxu1 %v2809_v24  ;;  %10320 = vrcp.f32 %v2500_v7  ;;  %9183 = vmatprep.mubr.msk.bf16.mxu1 %vm611_vm1, %v2792_v61  ;;  %v2541_v37 = vpack.c.bf16 %v2528_v23, %v2527_v36  ;;  %v2932_v15 = vpop.permute.xlu0 %2931 }
 0x9ce   : > { %9580 = vmatprep.subr.msk.bf16.mxu1 %vm611_vm1, %v2796_v34 }
 0x9cf   : > { %9159 = vmatprep.mubr.msk.bf16.mxu0 %vm906_vm2, %v2541_v37 }
 0x9d0   : > { %9160 = vmatmul.mubr.msk.bf16.vlgmr.msra.gmra.mxu0 %vm906_vm2, %v2542_v56  ;;  %v2794_v30 = vpop.permute.xlu1 %2793 }
 0x9d1   : > { %9172 = vmatpush3.bf16.msra.mxu0 %v12296_v18  ;;  %v2863_v63 = vpop.permute.xlu0 %2862 }
 0x9d2   : > { %9173 = vmatprep.subr.bf16.mxu0 %v2731_v6 }
 0x9d4   : > { %v2934_v10 = vpop.permute.xlu1 %2933 }
 0x9d5   : > { %9174 = vmatpush3.bf16.msra.mxu0 %v2731_v6  ;;  %9182 = vmatpush3.bf16.xpose.msra.mxu1 %v2806_v12  ;;  %v2947_v6 = vsel %vm611_vm1, %v2936_v22, 0  ;;  %v2999_v46 = vpop.permute.xlu0 %2998 }
 0x9d6   : > { %9581 = vmatprep.subr.msk.bf16.mxu0 %vm611_vm1, %v12306_v5  ;;  %9583 = vmatprep.subr.msk.bf16.mxu1 %vm611_vm1, %v2936_v22  ;;  %v10315_v35 = vpop.eup %10314 }
 0x9d7   : > { %v10317_v51 = vpop.eup %10316  ;;  %v2538_v18 = vmul.f32 %v10315_v35, %v12248_v49 }
 0x9d8   : > { %v2861_v61 = vpop.permute.xlu1 %2860  ;;  %v10319_v57 = vpop.eup %10318  ;;  %v2535_v13 = vmul.f32 %v10317_v51, %v12244_v40  ;;  %v2878_v40 = vsel %vm611_vm1, %v12306_v5, 0 }
 0x9d9   : > { %v2537_v4 = vmul.f32 %v10319_v57, %v12240_v21  ;;  %v2944_v21 = vsel %vm611_vm1, %v2934_v10, 0 }
 0x9da   : > { %v10321_v54 = vpop.eup %10320 }
 0x9db   : > { %v2536_v34 = vmul.f32 %v10321_v54, %v12252_v16  ;;  %v2546_v62 = vpack.c.bf16 %v2538_v18, %v2537_v4  ;;  %v3286_v16 = vpop.permute.xlu0 %3285 }
 0x9dc   : > { %9184 = vmatmul.mubr.msk.bf16.vlgmr.msra.gmra.mxu1 %vm611_vm1, %v2794_v30  ;;  %v3005_v44 = vpop.permute.xlu1 %3004 }
 0x9dd   : > { %9196 = vmatpush3.bf16.xpose.msra.mxu1 %v2947_v6  ;;  %9199 = vmatprep.mubr.msk.bf16.mxu1 %vm611_vm1, %v2930_v32  ;;  %v2545_v55 = vpack.c.bf16 %v2536_v34, %v2535_v13  ;;  %v3016_v59 = vsel %vm611_vm1, %v3005_v44, 0 }
 0x9de   : > { %9584 = vmatprep.subr.msk.bf16.mxu1 %vm611_vm1, %v2934_v10 }
 0x9df   : > { %9175 = vmatprep.mubr.msk.bf16.mxu0 %vm906_vm2, %v2545_v55  ;;  %v12354_v58 = vpop.permute.xlu0 %3407 }
 0x9e0   : > { %9176 = vmatmul.mubr.msk.bf16.vlgmr.msra.gmra.mxu0 %vm906_vm2, %v2546_v62  ;;  %v3003_v49 = vpop.permute.xlu1 %3002 }
 0x9e1   : > { %9188 = vmatpush3.bf16.xpose.msra.mxu0 %v2878_v40  ;;  %9191 = vmatprep.mubr.msk.bf16.mxu0 %vm611_vm1, %v2861_v61 }
 0x9e2   : > { %9582 = vmatprep.subr.msk.bf16.mxu0 %vm611_vm1, %v12309_v14  ;;  %v3013_v14 = vsel %vm611_vm1, %v3003_v49, 0 }
 0x9e4   : > { %v3001_v22 = vpop.permute.xlu1 %3000 }
 0x9e5   : > { %9198 = vmatpush3.bf16.xpose.msra.mxu1 %v2944_v21 }
 0x9e6   : > { %9211 = vmatprep.subr.bf16.mxu1 %v3286_v16 }
 0x9e8   : > { %v3284_v5 = vpop.permute.xlu1 %3283 }
 0x9e9   : > { %9190 = vmatpush3.bf16.xpose.msra.mxu0 %v2875_v9 }
 0x9ea   : > { %9585 = vmatprep.subr.msk.bf16.mxu0 %vm611_vm1, %v3005_v44 }
 0x9ec   : > { %9200 = vmatmul.mubr.msk.bf16.vlgmr.msra.gmra.mxu1 %vm611_vm1, %v2932_v15 }
 0x9ed   : > { %9212 = vmatpush3.bf16.msra.mxu1 %v3286_v16 }
 0x9ee   : > { %9213 = vmatprep.subr.bf16.mxu1 %v3284_v5 }
 0x9f0   : > { %9192 = vmatmul.mubr.msk.bf16.vlgmr.msra.gmra.mxu0 %vm611_vm1, %v2863_v63 }
 0x9f1   : > { %9204 = vmatpush3.bf16.xpose.msra.mxu0 %v3016_v59  ;;  %9207 = vmatprep.mubr.msk.bf16.mxu0 %vm611_vm1, %v2999_v46 }
 0x9f2   : > { %9214 = vmatpush3.bf16.msra.mxu1 %v3284_v5  ;;  %9586 = vmatprep.subr.msk.bf16.mxu0 %vm611_vm1, %v3003_v49 }
 0x9f3   : > { %9227 = vmatprep.subr.bf16.mxu1 %v12354_v58 }
 0x9f9   : > { %9206 = vmatpush3.bf16.xpose.msra.mxu0 %v3013_v14 }
 0xa00   : > { %9208 = vmatmul.mubr.msk.bf16.vlgmr.msra.gmra.mxu0 %vm611_vm1, %v3001_v22 }
 0xa47   : > { %v12360_v25 = vpop.f32.mrf.mxu1 }
 0xa48   : > { %15102 = vst [vmem:[#allocation60_spill] sm:$0xff] %v12360_v25 }
 0xa49   : > { %v12362_v36 = vpop.f32.mrf.mxu1 }
 0xa4b   : > { %v12364_v23 = vpop.f32.mrf.mxu1 }
 0xa4c   : > { %15103 = vst [vmem:[#allocation61_spill] sm:$0xff] %v12364_v23 }
 0xa4d   : > { %v12368_v7 = vpop.f32.mrf.mxu1 }
 0xa8c   : > { %v12370_v42 = vpop.f32.mrf.mxu1 }
 0xa8d   : > { %15104 = vst [vmem:[#allocation62_spill] sm:$0xff] %v12370_v42 }
 0xa8e   : > { %v12372_v32 = vpop.f32.mrf.mxu1 }
 0xa8f   : > { %15105 = vst [vmem:[#allocation63_spill] sm:$0xff] %v12372_v32 }
 0xa90   : > { %v12374_v37 = vpop.f32.mrf.mxu0  ;;  %v12376_v56 = vpop.f32.mrf.mxu1 }
 0xa91   : > { %15106 = vst [vmem:[#allocation64_spill] sm:$0xff] %v12374_v37  ;;  %15107 = vst [vmem:[#allocation65_spill] sm:$0xff] %v12376_v56 }
 0xa92   : > { %v12380_v15 = vpop.f32.mrf.mxu0  ;;  %v12386_v35 = vpop.f32.mrf.mxu1 }
 0xa93   : > { %15108 = vst [vmem:[#allocation66_spill] sm:$0xff] %v12380_v15  ;;  %15110 = vst [vmem:[#allocation68_spill] sm:$0xff] %v12386_v35 }
 0xa94   : > { %v12382_v12 = vpop.f32.mrf.mxu0 }
 0xa95   : > { %15109 = vst [vmem:[#allocation67_spill] sm:$0xff] %v12382_v12 }
 0xa96   : > { %v12388_v57 = vpop.f32.mrf.mxu0 }
 0xa97   : > { %15111 = vst [vmem:[#allocation69_spill] sm:$0xff] %v12388_v57 }
 0xa9c   : > { %v9185_v51 = vpop.f32.mrf.mxu1 }
 0xa9d   : > { %v3069_v61 = vmul.f32 0.125, %v9185_v51 }
 0xa9e   : > { %v2845_v63 = vpop.f32.mrf.mxu1 }
 0xa9f   : > { %v12391_v54 = vadd.f32 %v3069_v61, %v15047_v2  ;;  %v3067_v18 = vmul.f32 0.125, %v2845_v63 }
 0xaa0   : > { %v9186_v13 = vpop.f32.mrf.mxu1  ;;  %v12393_v34 = vpop.f32.mrf.mxu0 }
 0xaa1   : > { %15112 = vst [vmem:[#allocation70_spill] sm:$0xff] %v12393_v34  ;;  %v12396_v6 = vadd.f32 %v3067_v18, %v15049_v0  ;;  %v3070_v44 = vmul.f32 0.125, %v9186_v13  ;;  %v3105_v4 = vsel %vm906_vm2, %v12391_v54, -inf }
 0xaa2   : > { %3106 = vmax.xlane.f32.xlu0 %v3105_v4  ;;  %v2848_v55 = vpop.f32.mrf.mxu1  ;;  %v12400_v62 = vpop.f32.mrf.mxu0 }
 0xaa3   : > { %15113 = vst [vmem:[#allocation71_spill] sm:$0xff] %v12400_v62  ;;  %v3068_v46 = vmul.f32 0.125, %v2848_v55  ;;  %v12405_v49 = vadd.f32 %v3070_v44, %v10965_v3  ;;  %v3099_v22 = vsel %vm906_vm2, %v12396_v6, -inf }
 0xaa4   : > { %v12402_v40 = vpop.f32.mrf.mxu0 }
 0xaa5   : > { %15114 = vst [vmem:[#allocation72_spill] sm:$0xff] %v12402_v40  ;;  %v12408_v21 = vadd.f32 %v3068_v46, %v15048_v1  ;;  %v3108_v5 = vsel %vm906_vm2, %v12405_v49, -inf  ;;  %v12484_v40 = vpop.permute.xlu0 %3405 }
 0xaa6   : > { %3100 = vmax.xlane.f32.xlu0 %v3099_v22  ;;  %v12418_v51 = vpop.f32.mrf.mxu0 }
 0xaa7   : > { %v3102_v9 = vsel %vm906_vm2, %v12408_v21, -inf  ;;  %15115 = vst [vmem:[#allocation73_spill] sm:$0xff] %v12418_v51 }
 0xaa8   : > { %3103 = vmax.xlane.f32.xlu1 %v3102_v9 }
 0xaaa   : > { %3109 = vmax.xlane.f32.xlu0 %v3108_v5 }
 0xaac   : > { %v9201_v59 = vpop.f32.mrf.mxu1 }
 0xaad   : > { %v3077_v14 = vmul.f32 0.125, %v9201_v59 }
 0xaae   : > { %v2983_v61 = vpop.f32.mrf.mxu1 }
 0xaaf   : > { %v12421_v63 = vadd.f32 %v3077_v14, %v15047_v2  ;;  %v3075_v46 = vmul.f32 0.125, %v2983_v61 }
 0xab0   : > { %v9193_v18 = vpop.f32.mrf.mxu0  ;;  %v9202_v13 = vpop.f32.mrf.mxu1 }
 0xab1   : > { %v3073_v44 = vmul.f32 0.125, %v9193_v18  ;;  %v3078_v4 = vmul.f32 0.125, %v9202_v13  ;;  %v3129_v55 = vsel %vm906_vm2, %v12421_v63, -inf  ;;  %v12434_v13 = vadd.f32 %v3075_v46, %v15049_v0 }
 0xab2   : > { %3130 = vmax.xlane.f32.xlu0 %v3129_v55  ;;  %v2914_v22 = vpop.f32.mrf.mxu0  ;;  %v2986_v9 = vpop.f32.mrf.mxu1 }
 0xab3   : > { %v12426_v5 = vadd.f32 %v3073_v44, %v15047_v2  ;;  %v12429_v59 = vadd.f32 %v3078_v4, %v10965_v3  ;;  %v3076_v14 = vmul.f32 0.125, %v2986_v9  ;;  %v3071_v10 = vmul.f32 0.125, %v2914_v22 }
 0xab4   : > { %v9194_v16 = vpop.f32.mrf.mxu0  ;;  %v3123_v22 = vsel %vm906_vm2, %v12434_v13, -inf }
 0xab5   : > { %v3074_v30 = vmul.f32 0.125, %v9194_v16  ;;  %v3132_v18 = vsel %vm906_vm2, %v12429_v59, -inf  ;;  %v3117_v61 = vsel %vm906_vm2, %v12426_v5, -inf  ;;  %v12442_v4 = vadd.f32 %v3076_v14, %v15048_v1 }
 0xab6   : > { %3133 = vmax.xlane.f32.xlu1 %v3132_v18  ;;  %v2917_v55 = vpop.f32.mrf.mxu0  ;;  %3118 = vmax.xlane.f32.xlu0 %v3117_v61  ;;  %v12447_v46 = vadd.f32 %v3071_v10, %v15049_v0 }
 0xab7   : > { %v12439_v44 = vadd.f32 %v3074_v30, %v10965_v3  ;;  %v3072_v16 = vmul.f32 0.125, %v2917_v55  ;;  %v3126_v30 = vsel %vm906_vm2, %v12442_v4, -inf }
 0xab8   : > { %v3111_v14 = vsel %vm906_vm2, %v12447_v46, -inf }
 0xab9   : > { %v3120_v9 = vsel %vm906_vm2, %v12439_v44, -inf  ;;  %v12452_v18 = vadd.f32 %v3072_v16, %v15048_v1 }
 0xaba   : > { %3121 = vmax.xlane.f32.xlu1 %v3120_v9  ;;  %3124 = vmax.xlane.f32.xlu0 %v3123_v22 }
 0xabb   : > { %v3114_v10 = vsel %vm906_vm2, %v12452_v18, -inf }
 0xabe   : > { %3127 = vmax.xlane.f32.xlu1 %v3126_v30  ;;  %3112 = vmax.xlane.f32.xlu0 %v3111_v14 }
 0xac0   : > { %v9209_v61 = vpop.f32.mrf.mxu0 }
 0xac1   : > { %v3081_v55 = vmul.f32 0.125, %v9209_v61 }
 0xac2   : > { %3115 = vmax.xlane.f32.xlu1 %v3114_v10  ;;  %v3052_v24 = vpop.f32.mrf.mxu0 }
 0xac3   : > { %v12461_v9 = vadd.f32 %v3081_v55, %v15047_v2  ;;  %v3079_v16 = vmul.f32 0.125, %v3052_v24 }
 0xac4   : > { %v9210_v14 = vpop.f32.mrf.mxu0 }
 0xac5   : > { %v12464_v22 = vadd.f32 %v3079_v16, %v15049_v0  ;;  %v3141_v34 = vsel %vm906_vm2, %v12461_v9, -inf  ;;  %v3082_v24 = vmul.f32 0.125, %v9210_v14 }
 0xac6   : > { %3142 = vmax.xlane.f32.xlu0 %v3141_v34  ;;  %v3055_v61 = vpop.f32.mrf.mxu0 }
 0xac7   : > { %v3135_v30 = vsel %vm906_vm2, %v12464_v22, -inf  ;;  %v12475_v55 = vadd.f32 %v3082_v24, %v10965_v3  ;;  %v3080_v10 = vmul.f32 0.125, %v3055_v61 }
 0xac9   : > { %v12478_v34 = vadd.f32 %v3080_v10, %v15048_v1  ;;  %v3144_v16 = vsel %vm906_vm2, %v12475_v55, -inf }
 0xaca   : > { %3136 = vmax.xlane.f32.xlu0 %v3135_v30 }
 0xacb   : > { %v3138_v30 = vsel %vm906_vm2, %v12478_v34, -inf }
 0xad3   : > { %3533 = vrot.lane.b32.xlu1 %v11365_v43, %s10876_s19 }
 0xae0   : > { %3346 = vrot.lane.b32.xlu0 %v11413_v33, %s10875_s18 }
 0xaf7   : > { %3145 = vmax.xlane.f32.xlu1 %v3144_v16 }
 0xafb   : > { %3139 = vmax.xlane.f32.xlu1 %v3138_v30 }
 0xb2b   : > { %v3107_v51 = vpop.xlane.xlu0 %3106 }
 0xb2c   : > { %v3149_v14 = vsub.f32 %v12391_v54, %v3107_v51 }
 0xb2e   : > { %v3167_v62 = vmul.f32 1.442695, %v3149_v14 }
 0xb2f   : > { %v3101_v24 = vpop.xlane.xlu0 %3100 }
 0xb30   : > { %10322 = vpow2.f32 %v3167_v62  ;;  %v3147_v61 = vsub.f32 %v12396_v6, %v3101_v24 }
 0xb31   : > { %v3104_v10 = vpop.xlane.xlu1 %3103 }
 0xb32   : > { %v3163_v42 = vmul.f32 1.442695, %v3147_v61  ;;  %v3148_v56 = vsub.f32 %v12408_v21, %v3104_v10 }
 0xb33   : > { %v3110_v35 = vpop.xlane.xlu0 %3109 }
 0xb34   : > { %10324 = vpow2.f32 %v3163_v42  ;;  %v3150_v16 = vsub.f32 %v12405_v49, %v3110_v35  ;;  %v3165_v32 = vmul.f32 1.442695, %v3148_v56 }
 0xb36   : > { %v3169_v30 = vmul.f32 1.442695, %v3150_v16 }
 0xb38   : > { %10326 = vpow2.f32 %v3169_v30 }
 0xb39   : > { %10328 = vpow2.f32 %v3165_v32 }
 0xb3b   : > { %v3131_v37 = vpop.xlane.xlu0 %3130 }
 0xb3c   : > { %v3157_v54 = vsub.f32 %v12421_v63, %v3131_v37 }
 0xb3d   : > { %v12491_v51 = vpop.eup %10322 }
 0xb3e   : > { %v3183_v62 = vmul.f32 1.442695, %v3157_v54  ;;  %v3201_v6 = vsel %vm906_vm2, %v12491_v51, 0.0 }
 0xb3f   : > { %3202 = vadd.xlane.f32.xlu0 %v3201_v6  ;;  %v3119_v21 = vpop.xlane.xlu0 %3118 }
 0xb40   : > { %10330 = vpow2.f32 %v3183_v62  ;;  %v3153_v42 = vsub.f32 %v12426_v5, %v3119_v21 }
 0xb41   : > { %v12495_v14 = vpop.eup %10324 }
 0xb42   : > { %v3195_v56 = vsel %vm906_vm2, %v12495_v14, 0.0  ;;  %v3175_v32 = vmul.f32 1.442695, %v3153_v42 }
 0xb43   : > { %3196 = vadd.xlane.f32.xlu0 %v3195_v56  ;;  %v3125_v35 = vpop.xlane.xlu0 %3124 }
 0xb44   : > { %10332 = vpow2.f32 %v3175_v32  ;;  %v3155_v49 = vsub.f32 %v12434_v13, %v3125_v35  ;;  %v3134_v32 = vpop.xlane.xlu1 %3133 }
 0xb45   : > { %v12500_v37 = vpop.eup %10326 }
 0xb46   : > { %v3204_v63 = vsel %vm906_vm2, %v12500_v37, 0.0  ;;  %v12505_v24 = vpop.eup %10328  ;;  %v3179_v61 = vmul.f32 1.442695, %v3155_v49  ;;  %v3158_v49 = vsub.f32 %v12429_v59, %v3134_v32 }
 0xb47   : > { %3205 = vadd.xlane.f32.xlu1 %v3204_v63  ;;  %v3198_v5 = vsel %vm906_vm2, %v12505_v24, 0.0  ;;  %v3113_v10 = vpop.xlane.xlu0 %3112 }
 0xb48   : > { %10334 = vpow2.f32 %v3179_v61  ;;  %v3122_v35 = vpop.xlane.xlu1 %3121  ;;  %v3185_v61 = vmul.f32 1.442695, %v3158_v49 }
 0xb4a   : > { %10336 = vpow2.f32 %v3185_v61 }
 0xb4b   : > { %3199 = vadd.xlane.f32.xlu1 %v3198_v5  ;;  %v3154_v5 = vsub.f32 %v12439_v44, %v3122_v35 }
 0xb4c   : > { %v3128_v63 = vpop.xlane.xlu1 %3127 }
 0xb4d   : > { %v12509_v16 = vpop.eup %10330 }
 0xb4e   : > { %v3225_v30 = vsel %vm906_vm2, %v12509_v16, 0.0 }
 0xb4f   : > { %v3143_v54 = vpop.xlane.xlu0 %3142  ;;  %3226 = vadd.xlane.f32.xlu0 %v3225_v30  ;;  %v3151_v30 = vsub.f32 %v12447_v46, %v3113_v10 }
 0xb50   : > { %v3116_v12 = vpop.xlane.xlu1 %3115  ;;  %v3161_v32 = vsub.f32 %v12461_v9, %v3143_v54 }
 0xb51   : > { %v12513_v13 = vpop.eup %10332  ;;  %v3152_v15 = vsub.f32 %v12452_v18, %v3116_v12 }
 0xb52   : > { %v3213_v62 = vsel %vm906_vm2, %v12513_v13, 0.0  ;;  %v3191_v46 = vmul.f32 1.442695, %v3161_v32 }
 0xb53   : > { %v3137_v6 = vpop.xlane.xlu0 %3136  ;;  %3214 = vadd.xlane.f32.xlu0 %v3213_v62  ;;  %v3177_v62 = vmul.f32 1.442695, %v3154_v5  ;;  %v3173_v59 = vmul.f32 1.442695, %v3152_v15 }
 0xb54   : > { %v12534_v60 = vpop.permute.xlu1 %3533  ;;  %v3159_v10 = vsub.f32 %v12464_v22, %v3137_v6 }
 0xb55   : > { %v12517_v21 = vpop.eup %10334  ;;  %10338 = vpow2.f32 %v3177_v62 }
 0xb56   : > { %v3219_v42 = vsel %vm906_vm2, %v12517_v21, 0.0 }
 0xb57   : > { %v3347_v56 = vpop.permute.xlu0 %3346  ;;  %3220 = vadd.xlane.f32.xlu0 %v3219_v42  ;;  %v3156_v42 = vsub.f32 %v12442_v4, %v3128_v63  ;;  %v12538_v35 = vpop.eup %10336  ;;  %v3187_v4 = vmul.f32 1.442695, %v3159_v10 }
 0xb58   : > { %9219 = vmatprep.subr.bf16.mxu0 %v3347_v56  ;;  %v3228_v12 = vsel %vm906_vm2, %v12538_v35, 0.0 }
 0xb59   : > { %9220 = vmatpush3.bf16.msra.mxu0 %v3347_v56  ;;  %v3171_v56 = vmul.f32 1.442695, %v3151_v30  ;;  %v3181_v57 = vmul.f32 1.442695, %v3156_v42 }
 0xb5b   : > { %10340 = vpow2.f32 %v3171_v56 }
 0xb5c   : > { %3468 = vrot.lane.b32.xlu1 %v11427_v47, %s10875_s18  ;;  %10342 = vpow2.f32 %v3181_v57 }
 0xb5d   : > { %10344 = vpow2.f32 %v3173_v59 }
 0xb5e   : > { %10346 = vpow2.f32 %v3191_v46 }
 0xb5f   : > { %10348 = vpow2.f32 %v3187_v4 }
 0xb60   : > { %3466 = vrot.lane.b32.xlu1 %v11688_v20, %s10875_s18 }
 0xb62   : > { %v12543_v18 = vpop.eup %10338 }
 0xb63   : > { %v3216_v22 = vsel %vm906_vm2, %v12543_v18, 0.0 }
 0xb64   : > { %3602 = vrot.lane.b32.xlu1 %v11379_v38, %s10876_s19 }
 0xb68   : > { %v12545_v15 = vpop.eup %10340 }
 0xb69   : > { %v12550_v6 = vpop.eup %10342 }
 0xb6a   : > { %v3222_v61 = vsel %vm906_vm2, %v12550_v6, 0.0  ;;  %v12556_v5 = vpop.eup %10344 }
 0xb6b   : > { %v12560_v30 = vpop.eup %10346 }
 0xb6c   : > { %v3237_v62 = vsel %vm906_vm2, %v12560_v30, 0.0  ;;  %v12564_v42 = vpop.eup %10348 }
 0xb6d   : > { %3344 = vrot.lane.b32.xlu0 %v11421_v50, %s10875_s18  ;;  %v3231_v56 = vsel %vm906_vm2, %v12564_v42, 0.0 }
 0xb80   : > { %v3146_v44 = vpop.xlane.xlu1 %3145 }
 0xb81   : > { %v3162_v49 = vsub.f32 %v12475_v55, %v3146_v44  ;;  %v3207_v55 = vsel %vm906_vm2, %v12545_v15, 0.0 }
 0xb83   : > { %v3193_v9 = vmul.f32 1.442695, %v3162_v49 }
 0xb84   : > { %v3140_v57 = vpop.xlane.xlu1 %3139 }
 0xb85   : > { %v3160_v54 = vsub.f32 %v12478_v34, %v3140_v57  ;;  %10350 = vpow2.f32 %v3193_v9  ;;  %v3210_v34 = vsel %vm906_vm2, %v12556_v5, 0.0 }
 0xb87   : > { %v3189_v63 = vmul.f32 1.442695, %v3160_v54 }
 0xb88   : > { %3229 = vadd.xlane.f32.xlu1 %v3228_v12 }
 0xb89   : > { %10352 = vpow2.f32 %v3189_v63 }
 0xb8c   : > { %3217 = vadd.xlane.f32.xlu1 %v3216_v22  ;;  %3208 = vadd.xlane.f32.xlu0 %v3207_v55 }
 0xb90   : > { %3223 = vadd.xlane.f32.xlu1 %v3222_v61 }
 0xb92   : > { %v12568_v59 = vpop.eup %10350 }
 0xb93   : > { %v3240_v32 = vsel %vm906_vm2, %v12568_v59, 0.0 }
 0xb94   : > { %3211 = vadd.xlane.f32.xlu1 %v3210_v34 }
 0xb96   : > { %v12572_v44 = vpop.eup %10352 }
 0xb97   : > { %v3234_v46 = vsel %vm906_vm2, %v12572_v44, 0.0 }
 0xb98   : > { %3238 = vadd.xlane.f32.xlu1 %v3237_v62 }
 0xb9c   : > { %3232 = vadd.xlane.f32.xlu1 %v3231_v56 }
 0xba0   : > { %3241 = vadd.xlane.f32.xlu1 %v3240_v32 }
 0xba2   : > { %3531 = vrot.lane.b32.xlu0 %v11357_v45, %s10876_s19 }
 0xba4   : > { %3235 = vadd.xlane.f32.xlu1 %v3234_v46 }
 0xba6   : > { %3527 = vrot.lane.b32.xlu0 %v11357_v45, %s10877_s20 }
 0xbaa   : > { %3671 = vrot.lane.b32.xlu0 %v11393_v52, %s10876_s19 }
 0xbae   : > { %3600 = vrot.lane.b32.xlu0 %v11371_v27, %s10876_s19 }
 0xbb2   : > { %3665 = vrot.lane.b32.xlu0 %v11385_v41, %s10877_s20 }
 0xbb5   : > { %3529 = vrot.lane.b32.xlu1 %v11365_v43, %s10877_s20 }
 0xbb6   : > { %3667 = vrot.lane.b32.xlu0 %v11393_v52, %s10877_s20 }
 0xbb9   : > { %3669 = vrot.lane.b32.xlu1 %v11385_v41, %s10876_s19 }
 0xbba   : > { %3598 = vrot.lane.b32.xlu0 %v11379_v38, %s10877_s20 }
 0xbbd   : > { %3596 = vrot.lane.b32.xlu1 %v11371_v27, %s10877_s20 }
 0xbbe   : > { %3734 = vrot.lane.b32.xlu0 %v11401_v39, %s10877_s20 }
 0xbc1   : > { %3740 = vrot.lane.b32.xlu1 %v11407_v28, %s10876_s19 }
 0xbc2   : > { %4021 = vrot.lane.b32.xlu0 %v11449_v31, %s10877_s20 }
 0xbc5   : > { %3738 = vrot.lane.b32.xlu1 %v11401_v39, %s10876_s19 }
 0xbc6   : > { %4143 = vrot.lane.b32.xlu0 %v11463_v26, %s10877_s20 }
 0xbc8   : > { %v3203_v10 = vpop.xlane.xlu0 %3202 }
 0xbc9   : > { %3736 = vrot.lane.b32.xlu1 %v11407_v28, %s10877_s20 }
 0xbca   : > { %4141 = vrot.lane.b32.xlu0 %v11655_v53, %s10877_s20 }
 0xbcc   : > { %v3197_v4 = vpop.xlane.xlu0 %3196 }
 0xbcd   : > { %4019 = vrot.lane.b32.xlu1 %v11455_v48, %s10877_s20 }
 0xbd0   : > { %v3206_v49 = vpop.xlane.xlu1 %3205 }
 0xbd1   : > { %10354 = vrcp.f32 %v3206_v49 }
 0xbd2   : > { %10356 = vrcp.f32 %v3197_v4 }
 0xbd3   : > { %10358 = vrcp.f32 %v3203_v10 }
 0xbd4   : > { %v3200_v12 = vpop.xlane.xlu1 %3199 }
 0xbd5   : > { %10360 = vrcp.f32 %v3200_v12 }
 0xbd8   : > { %v3227_v57 = vpop.xlane.xlu0 %3226  ;;  %v12616_v49 = vpop.permute.xlu1 %3468 }
 0xbdc   : > { %v3215_v9 = vpop.xlane.xlu0 %3214 }
 0xbde   : > { %v10355_v54 = vpop.eup %10354 }
 0xbdf   : > { %v10357_v22 = vpop.eup %10356  ;;  %v3262_v34 = vmul.f32 %v10355_v54, %v12500_v37 }
 0xbe0   : > { %v10359_v55 = vpop.eup %10358  ;;  %v3221_v63 = vpop.xlane.xlu0 %3220  ;;  %v3259_v62 = vmul.f32 %v10357_v22, %v12495_v14 }
 0xbe1   : > { %v3261_v32 = vmul.f32 %v10359_v55, %v12491_v51  ;;  %v3467_v51 = vpop.permute.xlu1 %3466 }
 0xbe2   : > { %v10361_v61 = vpop.eup %10360 }
 0xbe3   : > { %v3260_v56 = vmul.f32 %v10361_v61, %v12505_v24  ;;  %v3276_v10 = vpack.c.bf16 %v3262_v34, %v3261_v32 }
 0xbe4   : > { %v3345_v46 = vpop.permute.xlu0 %3344 }
 0xbe5   : > { %v3275_v4 = vpack.c.bf16 %v3260_v56, %v3259_v62  ;;  %9221 = vmatprep.subr.bf16.mxu0 %v3345_v46  ;;  %v12626_v14 = vpop.permute.xlu1 %3602 }
 0xbe6   : > { %9222 = vmatpush3.bf16.msra.mxu0 %v3345_v46 }
 0xbe7   : > { %9215 = vmatprep.mubr.msk.bf16.mxu1 %vm906_vm2, %v3275_v4  ;;  %9235 = vmatprep.subr.bf16.mxu0 %v12616_v49 }
 0xbe8   : > { %9216 = vmatmul.mubr.msk.bf16.vlgmr.msra.gmra.mxu1 %vm906_vm2, %v3276_v10 }
 0xbe9   : > { %9228 = vmatpush3.bf16.msra.mxu1 %v12354_v58 }
 0xbea   : > { %9229 = vmatprep.subr.bf16.mxu1 %v12484_v40 }
 0xbed   : > { %9230 = vmatpush3.bf16.msra.mxu1 %v12484_v40 }
 0xbee   : > { %9587 = vmatprep.subr.msk.bf16.mxu1 %vm611_vm1, %v12534_v60 }
 0xc11   : > { %v3230_v37 = vpop.xlane.xlu1 %3229 }
 0xc12   : > { %10362 = vrcp.f32 %v3230_v37 }
 0xc13   : > { %10364 = vrcp.f32 %v3221_v63 }
 0xc14   : > { %10366 = vrcp.f32 %v3227_v57 }
 0xc15   : > { %v3218_v24 = vpop.xlane.xlu1 %3217  ;;  %v3209_v12 = vpop.xlane.xlu0 %3208 }
 0xc19   : > { %v3224_v54 = vpop.xlane.xlu1 %3223  ;;  %v3532_v22 = vpop.permute.xlu0 %3531 }
 0xc1a   : > { %10368 = vrcp.f32 %v3224_v54 }
 0xc1b   : > { %10370 = vrcp.f32 %v3218_v24 }
 0xc1c   : > { %10372 = vrcp.f32 %v3209_v12 }
 0xc1d   : > { %10374 = vrcp.f32 %v3215_v9  ;;  %v3212_v58 = vpop.xlane.xlu1 %3211  ;;  %v3528_v40 = vpop.permute.xlu0 %3527 }
 0xc1e   : > { %10376 = vrcp.f32 %v3212_v58 }
 0xc1f   : > { %v10363_v34 = vpop.eup %10362 }
 0xc20   : > { %v10365_v62 = vpop.eup %10364  ;;  %v3270_v4 = vmul.f32 %v10363_v34, %v12538_v35 }
 0xc21   : > { %v3239_v55 = vpop.xlane.xlu1 %3238  ;;  %v3672_v61 = vpop.permute.xlu0 %3671  ;;  %v3267_v10 = vmul.f32 %v10365_v62, %v12517_v21 }
 0xc22   : > { %v10367_v32 = vpop.eup %10366 }
 0xc23   : > { %v3269_v12 = vmul.f32 %v10367_v32, %v12509_v16  ;;  %v3545_v16 = vsel %vm611_vm1, %v12534_v60, 0 }
 0xc25   : > { %v3233_v56 = vpop.xlane.xlu1 %3232  ;;  %v12629_v57 = vpop.permute.xlu0 %3600  ;;  %v3280_v25 = vpack.c.bf16 %v3270_v4, %v3269_v12 }
 0xc27   : > { %v10369_v46 = vpop.eup %10368 }
 0xc28   : > { %v10371_v63 = vpop.eup %10370  ;;  %v3268_v37 = vmul.f32 %v10369_v46, %v12550_v6 }
 0xc29   : > { %v10373_v9 = vpop.eup %10372  ;;  %v3242_v24 = vpop.xlane.xlu1 %3241  ;;  %v3266_v23 = vmul.f32 %v10371_v63, %v12543_v18 }
 0xc2a   : > { %v10375_v54 = vpop.eup %10374  ;;  %v3279_v58 = vpack.c.bf16 %v3268_v37, %v3267_v10  ;;  %10378 = vrcp.f32 %v3242_v24  ;;  %v3263_v35 = vmul.f32 %v10373_v9, %v12545_v15  ;;  %v3666_v62 = vpop.permute.xlu0 %3665  ;;  %v3611_v24 = vsel %vm611_vm1, %v12629_v57, 0 }
 0xc2b   : > { %v10377_v17 = vpop.eup %10376  ;;  %10380 = vrcp.f32 %v3233_v56  ;;  %v3265_v34 = vmul.f32 %v10375_v54, %v12513_v13 }
 0xc2c   : > { %9231 = vmatprep.mubr.msk.bf16.mxu1 %vm906_vm2, %v3279_v58  ;;  %v3264_v21 = vmul.f32 %v10377_v17, %v12556_v5  ;;  %10382 = vrcp.f32 %v3239_v55 }
 0xc2d   : > { %9232 = vmatmul.mubr.msk.bf16.vlgmr.msra.gmra.mxu1 %vm906_vm2, %v3280_v25  ;;  %v3236_v6 = vpop.xlane.xlu1 %3235  ;;  %v3278_v15 = vpack.c.bf16 %v3266_v23, %v3265_v34  ;;  %v3542_v25 = vsel %vm611_vm1, %v3532_v22, 0 }
 0xc2e   : > { %9244 = vmatpush3.bf16.xpose.msra.mxu1 %v3545_v16  ;;  %10384 = vrcp.f32 %v3236_v6  ;;  %9247 = vmatprep.mubr.msk.bf16.mxu1 %vm611_vm1, %v3528_v40  ;;  %v3277_v18 = vpack.c.bf16 %v3264_v21, %v3263_v35  ;;  %v3668_v60 = vpop.permute.xlu0 %3667 }
 0xc2f   : > { %9588 = vmatprep.subr.msk.bf16.mxu1 %vm611_vm1, %v3532_v22 }
 0xc30   : > { %9223 = vmatprep.mubr.msk.bf16.mxu0 %vm906_vm2, %v3277_v18 }
 0xc31   : > { %9224 = vmatmul.mubr.msk.bf16.vlgmr.msra.gmra.mxu0 %vm906_vm2, %v3278_v15  ;;  %v3530_v17 = vpop.permute.xlu1 %3529 }
 0xc32   : > { %9236 = vmatpush3.bf16.msra.mxu0 %v12616_v49  ;;  %v3599_v56 = vpop.permute.xlu0 %3598 }
 0xc33   : > { %9237 = vmatprep.subr.bf16.mxu0 %v3467_v51 }
 0xc35   : > { %v3670_v13 = vpop.permute.xlu1 %3669 }
 0xc36   : > { %9238 = vmatpush3.bf16.msra.mxu0 %v3467_v51  ;;  %9246 = vmatpush3.bf16.xpose.msra.mxu1 %v3542_v25  ;;  %v3683_v51 = vsel %vm611_vm1, %v3672_v61, 0  ;;  %v3735_v9 = vpop.permute.xlu0 %3734 }
 0xc37   : > { %9589 = vmatprep.subr.msk.bf16.mxu0 %vm611_vm1, %v12626_v14  ;;  %9591 = vmatprep.subr.msk.bf16.mxu1 %vm611_vm1, %v3672_v61  ;;  %v10379_v23 = vpop.eup %10378 }
 0xc38   : > { %v10381_v5 = vpop.eup %10380  ;;  %v3274_v49 = vmul.f32 %v10379_v23, %v12568_v59 }
 0xc39   : > { %v3597_v40 = vpop.permute.xlu1 %3596  ;;  %v10383_v55 = vpop.eup %10382  ;;  %v3271_v46 = vmul.f32 %v10381_v5, %v12564_v42  ;;  %v3614_v42 = vsel %vm611_vm1, %v12626_v14, 0 }
 0xc3a   : > { %v3273_v63 = vmul.f32 %v10383_v55, %v12560_v30  ;;  %v3680_v30 = vsel %vm611_vm1, %v3670_v13, 0 }
 0xc3b   : > { %v10385_v32 = vpop.eup %10384 }
 0xc3c   : > { %v3272_v22 = vmul.f32 %v10385_v32, %v12572_v44  ;;  %v3282_v37 = vpack.c.bf16 %v3274_v49, %v3273_v63  ;;  %v4022_v44 = vpop.permute.xlu0 %4021 }
 0xc3d   : > { %9248 = vmatmul.mubr.msk.bf16.vlgmr.msra.gmra.mxu1 %vm611_vm1, %v3530_v17  ;;  %v3741_v4 = vpop.permute.xlu1 %3740 }
 0xc3e   : > { %9260 = vmatpush3.bf16.xpose.msra.mxu1 %v3683_v51  ;;  %9263 = vmatprep.mubr.msk.bf16.mxu1 %vm611_vm1, %v3666_v62  ;;  %v3281_v10 = vpack.c.bf16 %v3272_v22, %v3271_v46  ;;  %v3752_v12 = vsel %vm611_vm1, %v3741_v4, 0 }
 0xc3f   : > { %9592 = vmatprep.subr.msk.bf16.mxu1 %vm611_vm1, %v3670_v13 }
 0xc40   : > { %9239 = vmatprep.mubr.msk.bf16.mxu0 %vm906_vm2, %v3281_v10  ;;  %v12674_v54 = vpop.permute.xlu0 %4143 }
 0xc41   : > { %9240 = vmatmul.mubr.msk.bf16.vlgmr.msra.gmra.mxu0 %vm906_vm2, %v3282_v37  ;;  %v3739_v59 = vpop.permute.xlu1 %3738 }
 0xc42   : > { %9252 = vmatpush3.bf16.xpose.msra.mxu0 %v3614_v42  ;;  %9255 = vmatprep.mubr.msk.bf16.mxu0 %vm611_vm1, %v3597_v40 }
 0xc43   : > { %9590 = vmatprep.subr.msk.bf16.mxu0 %vm611_vm1, %v12629_v57  ;;  %v3749_v57 = vsel %vm611_vm1, %v3739_v59, 0 }
 0xc45   : > { %v3737_v61 = vpop.permute.xlu1 %3736 }
 0xc46   : > { %9262 = vmatpush3.bf16.xpose.msra.mxu1 %v3680_v30 }
 0xc47   : > { %9275 = vmatprep.subr.bf16.mxu1 %v4022_v44 }
 0xc49   : > { %v4020_v14 = vpop.permute.xlu1 %4019 }
 0xc4a   : > { %9254 = vmatpush3.bf16.xpose.msra.mxu0 %v3611_v24 }
 0xc4b   : > { %9593 = vmatprep.subr.msk.bf16.mxu0 %vm611_vm1, %v3741_v4 }
 0xc4d   : > { %9264 = vmatmul.mubr.msk.bf16.vlgmr.msra.gmra.mxu1 %vm611_vm1, %v3668_v60 }
 0xc4e   : > { %9276 = vmatpush3.bf16.msra.mxu1 %v4022_v44 }
 0xc4f   : > { %9277 = vmatprep.subr.bf16.mxu1 %v4020_v14 }
 0xc51   : > { %9256 = vmatmul.mubr.msk.bf16.vlgmr.msra.gmra.mxu0 %vm611_vm1, %v3599_v56 }
 0xc52   : > { %9268 = vmatpush3.bf16.xpose.msra.mxu0 %v3752_v12  ;;  %9271 = vmatprep.mubr.msk.bf16.mxu0 %vm611_vm1, %v3735_v9 }
 0xc53   : > { %9278 = vmatpush3.bf16.msra.mxu1 %v4020_v14  ;;  %9594 = vmatprep.subr.msk.bf16.mxu0 %vm611_vm1, %v3739_v59 }
 0xc54   : > { %9291 = vmatprep.subr.bf16.mxu1 %v12674_v54 }
 0xc5a   : > { %9270 = vmatpush3.bf16.xpose.msra.mxu0 %v3749_v57 }
 0xc61   : > { %9272 = vmatmul.mubr.msk.bf16.vlgmr.msra.gmra.mxu0 %vm611_vm1, %v3737_v61 }
 0xca8   : > { %v12680_v58 = vpop.f32.mrf.mxu1 }
 0xca9   : > { %15116 = vst [vmem:[#allocation74_spill] sm:$0xff] %v12680_v58 }
 0xcaa   : > { %v12682_v35 = vpop.f32.mrf.mxu1 }
 0xcac   : > { %v12684_v21 = vpop.f32.mrf.mxu1 }
 0xcad   : > { %15117 = vst [vmem:[#allocation75_spill] sm:$0xff] %v12684_v21 }
 0xcae   : > { %v12688_v6 = vpop.f32.mrf.mxu1 }
 0xced   : > { %v12690_v34 = vpop.f32.mrf.mxu1 }
 0xcee   : > { %15118 = vst [vmem:[#allocation76_spill] sm:$0xff] %v12690_v34 }
 0xcef   : > { %v12692_v62 = vpop.f32.mrf.mxu1 }
 0xcf0   : > { %15119 = vst [vmem:[#allocation77_spill] sm:$0xff] %v12692_v62 }
 0xcf1   : > { %v12694_v18 = vpop.f32.mrf.mxu0  ;;  %v12696_v15 = vpop.f32.mrf.mxu1 }
 0xcf2   : > { %15120 = vst [vmem:[#allocation78_spill] sm:$0xff] %v12694_v18  ;;  %15121 = vst [vmem:[#allocation79_spill] sm:$0xff] %v12696_v15 }
 0xcf3   : > { %v12700_v60 = vpop.f32.mrf.mxu0  ;;  %v12710_v40 = vpop.f32.mrf.mxu1 }
 0xcf4   : > { %15122 = vst [vmem:[#allocation80_spill] sm:$0xff] %v12700_v60  ;;  %15125 = vst [vmem:[#allocation83_spill] sm:$0xff] %v12710_v40 }
 0xcf5   : > { %v12702_v25 = vpop.f32.mrf.mxu0 }
 0xcf6   : > { %15123 = vst [vmem:[#allocation81_spill] sm:$0xff] %v12702_v25 }
 0xcf7   : > { %v12706_v23 = vpop.f32.mrf.mxu0 }
 0xcf8   : > { %15124 = vst [vmem:[#allocation82_spill] sm:$0xff] %v12706_v23 }
 0xcfd   : > { %v9249_v55 = vpop.f32.mrf.mxu1 }
 0xcfe   : > { %v3805_v56 = vmul.f32 0.125, %v9249_v55 }
 0xcff   : > { %v3581_v32 = vpop.f32.mrf.mxu1 }
 0xd00   : > { %v12713_v49 = vadd.f32 %v3805_v56, %v15047_v2  ;;  %v3803_v46 = vmul.f32 0.125, %v3581_v32 }
 0xd01   : > { %v9250_v22 = vpop.f32.mrf.mxu1  ;;  %v12715_v51 = vpop.f32.mrf.mxu0 }
 0xd02   : > { %15126 = vst [vmem:[#allocation84_spill] sm:$0xff] %v12715_v51  ;;  %v12718_v4 = vadd.f32 %v3803_v46, %v15049_v0  ;;  %v3806_v63 = vmul.f32 0.125, %v9250_v22  ;;  %v3841_v10 = vsel %vm906_vm2, %v12713_v49, -inf }
 0xd03   : > { %3842 = vmax.xlane.f32.xlu0 %v3841_v10  ;;  %v3584_v37 = vpop.f32.mrf.mxu1  ;;  %v12722_v9 = vpop.f32.mrf.mxu0 }
 0xd04   : > { %15127 = vst [vmem:[#allocation85_spill] sm:$0xff] %v12722_v9  ;;  %v3804_v42 = vmul.f32 0.125, %v3584_v37  ;;  %v12727_v30 = vadd.f32 %v3806_v63, %v10965_v3  ;;  %v3835_v24 = vsel %vm906_vm2, %v12718_v4, -inf }
 0xd05   : > { %v12724_v59 = vpop.f32.mrf.mxu0 }
 0xd06   : > { %15128 = vst [vmem:[#allocation86_spill] sm:$0xff] %v12724_v59  ;;  %v12730_v44 = vadd.f32 %v3804_v42, %v15048_v1  ;;  %v3844_v55 = vsel %vm906_vm2, %v12727_v30, -inf  ;;  %v12808_v59 = vpop.permute.xlu0 %4141 }
 0xd07   : > { %3836 = vmax.xlane.f32.xlu0 %v3835_v24  ;;  %v12736_v14 = vpop.f32.mrf.mxu0 }
 0xd08   : > { %15129 = vst [vmem:[#allocation87_spill] sm:$0xff] %v12736_v14  ;;  %v3838_v57 = vsel %vm906_vm2, %v12730_v44, -inf }
 0xd09   : > { %3839 = vmax.xlane.f32.xlu1 %v3838_v57 }
 0xd0b   : > { %3845 = vmax.xlane.f32.xlu0 %v3844_v55 }
 0xd0d   : > { %v9265_v56 = vpop.f32.mrf.mxu1 }
 0xd0e   : > { %v3813_v32 = vmul.f32 0.125, %v9265_v56 }
 0xd0f   : > { %v3719_v46 = vpop.f32.mrf.mxu1 }
 0xd10   : > { %v12745_v22 = vadd.f32 %v3813_v32, %v15047_v2  ;;  %v3811_v61 = vmul.f32 0.125, %v3719_v46 }
 0xd11   : > { %v9257_v63 = vpop.f32.mrf.mxu0  ;;  %v9266_v10 = vpop.f32.mrf.mxu1 }
 0xd12   : > { %v3809_v37 = vmul.f32 0.125, %v9257_v63  ;;  %v3814_v42 = vmul.f32 0.125, %v9266_v10  ;;  %v3865_v24 = vsel %vm906_vm2, %v12745_v22, -inf  ;;  %v12758_v10 = vadd.f32 %v3811_v61, %v15049_v0 }
 0xd13   : > { %3866 = vmax.xlane.f32.xlu0 %v3865_v24  ;;  %v3650_v57 = vpop.f32.mrf.mxu0  ;;  %v3722_v12 = vpop.f32.mrf.mxu1 }
 0xd14   : > { %v12750_v17 = vadd.f32 %v3809_v37, %v15047_v2  ;;  %v12753_v55 = vadd.f32 %v3814_v42, %v10965_v3  ;;  %v3812_v32 = vmul.f32 0.125, %v3722_v12  ;;  %v3807_v5 = vmul.f32 0.125, %v3650_v57 }
 0xd15   : > { %v9258_v56 = vpop.f32.mrf.mxu0  ;;  %v3859_v57 = vsel %vm906_vm2, %v12758_v10, -inf }
 0xd16   : > { %v3810_v13 = vmul.f32 0.125, %v9258_v56  ;;  %v3868_v63 = vsel %vm906_vm2, %v12753_v55, -inf  ;;  %v3853_v46 = vsel %vm906_vm2, %v12750_v17, -inf  ;;  %v12766_v42 = vadd.f32 %v3812_v32, %v15048_v1 }
 0xd17   : > { %3869 = vmax.xlane.f32.xlu1 %v3868_v63  ;;  %v3653_v24 = vpop.f32.mrf.mxu0  ;;  %3854 = vmax.xlane.f32.xlu0 %v3853_v46  ;;  %v12771_v61 = vadd.f32 %v3807_v5, %v15049_v0 }
 0xd18   : > { %v12763_v37 = vadd.f32 %v3810_v13, %v10965_v3  ;;  %v3808_v12 = vmul.f32 0.125, %v3653_v24  ;;  %v3862_v13 = vsel %vm906_vm2, %v12766_v42, -inf }
 0xd19   : > { %v3847_v32 = vsel %vm906_vm2, %v12771_v61, -inf }
 0xd1a   : > { %v3856_v56 = vsel %vm906_vm2, %v12763_v37, -inf  ;;  %v12776_v63 = vadd.f32 %v3808_v12, %v15048_v1 }
 0xd1b   : > { %3857 = vmax.xlane.f32.xlu1 %v3856_v56  ;;  %3860 = vmax.xlane.f32.xlu0 %v3859_v57 }
 0xd1c   : > { %v3850_v5 = vsel %vm906_vm2, %v12776_v63, -inf }
 0xd1f   : > { %3863 = vmax.xlane.f32.xlu1 %v3862_v13  ;;  %3848 = vmax.xlane.f32.xlu0 %v3847_v32 }
 0xd21   : > { %v9273_v46 = vpop.f32.mrf.mxu0 }
 0xd22   : > { %v3817_v24 = vmul.f32 0.125, %v9273_v46 }
 0xd23   : > { %3851 = vmax.xlane.f32.xlu1 %v3850_v5  ;;  %v3788_v16 = vpop.f32.mrf.mxu0 }
 0xd24   : > { %v12785_v56 = vadd.f32 %v3817_v24, %v15047_v2  ;;  %v3815_v12 = vmul.f32 0.125, %v3788_v16 }
 0xd25   : > { %v9274_v32 = vpop.f32.mrf.mxu0 }
 0xd26   : > { %v12788_v57 = vadd.f32 %v3815_v12, %v15049_v0  ;;  %v3877_v51 = vsel %vm906_vm2, %v12785_v56, -inf  ;;  %v3818_v16 = vmul.f32 0.125, %v9274_v32 }
 0xd27   : > { %3878 = vmax.xlane.f32.xlu0 %v3877_v51  ;;  %v3791_v46 = vpop.f32.mrf.mxu0 }
 0xd28   : > { %v3871_v13 = vsel %vm906_vm2, %v12788_v57, -inf  ;;  %v12799_v24 = vadd.f32 %v3818_v16, %v10965_v3  ;;  %v3816_v5 = vmul.f32 0.125, %v3791_v46 }
 0xd2a   : > { %v12802_v51 = vadd.f32 %v3816_v5, %v15048_v1  ;;  %v3880_v12 = vsel %vm906_vm2, %v12799_v24, -inf }
 0xd2b   : > { %3872 = vmax.xlane.f32.xlu0 %v3871_v13 }
 0xd2c   : > { %v3874_v13 = vsel %vm906_vm2, %v12802_v51, -inf }
 0xd34   : > { %4269 = vrot.lane.b32.xlu1 %v11365_v43, %s10878_s21 }
 0xd41   : > { %4082 = vrot.lane.b32.xlu0 %v11413_v33, %s10877_s20 }
 0xd58   : > { %3881 = vmax.xlane.f32.xlu1 %v3880_v12 }
 0xd5c   : > { %3875 = vmax.xlane.f32.xlu1 %v3874_v13 }
 0xd8c   : > { %v3843_v9 = vpop.xlane.xlu0 %3842 }
 0xd8d   : > { %v3885_v32 = vsub.f32 %v12713_v49, %v3843_v9 }
 0xd8f   : > { %v3903_v14 = vmul.f32 1.442695, %v3885_v32 }
 0xd90   : > { %v3837_v16 = vpop.xlane.xlu0 %3836 }
 0xd91   : > { %10386 = vpow2.f32 %v3903_v14  ;;  %v3883_v46 = vsub.f32 %v12718_v4, %v3837_v16 }
 0xd92   : > { %v3840_v5 = vpop.xlane.xlu1 %3839 }
 0xd93   : > { %v3899_v34 = vmul.f32 1.442695, %v3883_v46  ;;  %v3884_v15 = vsub.f32 %v12730_v44, %v3840_v5 }
 0xd94   : > { %v3846_v40 = vpop.xlane.xlu0 %3845 }
 0xd95   : > { %10388 = vpow2.f32 %v3899_v34  ;;  %v3886_v12 = vsub.f32 %v12727_v30, %v3846_v40  ;;  %v3901_v62 = vmul.f32 1.442695, %v3884_v15 }
 0xd97   : > { %v3905_v13 = vmul.f32 1.442695, %v3886_v12 }
 0xd99   : > { %10390 = vpow2.f32 %v3905_v13 }
 0xd9a   : > { %10392 = vpow2.f32 %v3901_v62 }
 0xd9c   : > { %v3867_v18 = vpop.xlane.xlu0 %3866 }
 0xd9d   : > { %v3893_v49 = vsub.f32 %v12745_v22, %v3867_v18 }
 0xd9e   : > { %v12815_v9 = vpop.eup %10386 }
 0xd9f   : > { %v3919_v14 = vmul.f32 1.442695, %v3893_v49  ;;  %v3937_v4 = vsel %vm906_vm2, %v12815_v9, 0.0 }
 0xda0   : > { %3938 = vadd.xlane.f32.xlu0 %v3937_v4  ;;  %v3855_v44 = vpop.xlane.xlu0 %3854 }
 0xda1   : > { %10394 = vpow2.f32 %v3919_v14  ;;  %v3889_v34 = vsub.f32 %v12750_v17, %v3855_v44 }
 0xda2   : > { %v12819_v32 = vpop.eup %10388 }
 0xda3   : > { %v3931_v15 = vsel %vm906_vm2, %v12819_v32, 0.0  ;;  %v3911_v62 = vmul.f32 1.442695, %v3889_v34 }
 0xda4   : > { %3932 = vadd.xlane.f32.xlu0 %v3931_v15  ;;  %v3861_v40 = vpop.xlane.xlu0 %3860 }
 0xda5   : > { %10396 = vpow2.f32 %v3911_v62  ;;  %v3891_v30 = vsub.f32 %v12758_v10, %v3861_v40  ;;  %v3870_v62 = vpop.xlane.xlu1 %3869 }
 0xda6   : > { %v12824_v18 = vpop.eup %10390 }
 0xda7   : > { %v3940_v22 = vsel %vm906_vm2, %v12824_v18, 0.0  ;;  %v12829_v16 = vpop.eup %10392  ;;  %v3915_v46 = vmul.f32 1.442695, %v3891_v30  ;;  %v3894_v30 = vsub.f32 %v12753_v55, %v3870_v62 }
 0xda8   : > { %3941 = vadd.xlane.f32.xlu1 %v3940_v22  ;;  %v3934_v17 = vsel %vm906_vm2, %v12829_v16, 0.0  ;;  %v3849_v5 = vpop.xlane.xlu0 %3848 }
 0xda9   : > { %10398 = vpow2.f32 %v3915_v46  ;;  %v3858_v40 = vpop.xlane.xlu1 %3857  ;;  %v3921_v46 = vmul.f32 1.442695, %v3894_v30 }
 0xdab   : > { %10400 = vpow2.f32 %v3921_v46 }
 0xdac   : > { %3935 = vadd.xlane.f32.xlu1 %v3934_v17  ;;  %v3890_v17 = vsub.f32 %v12763_v37, %v3858_v40 }
 0xdad   : > { %v3864_v22 = vpop.xlane.xlu1 %3863 }
 0xdae   : > { %v12833_v12 = vpop.eup %10394 }
 0xdaf   : > { %v3961_v13 = vsel %vm906_vm2, %v12833_v12, 0.0 }
 0xdb0   : > { %v3879_v49 = vpop.xlane.xlu0 %3878  ;;  %3962 = vadd.xlane.f32.xlu0 %v3961_v13  ;;  %v3887_v13 = vsub.f32 %v12771_v61, %v3849_v5 }
 0xdb1   : > { %v3852_v25 = vpop.xlane.xlu1 %3851  ;;  %v3897_v62 = vsub.f32 %v12785_v56, %v3879_v49 }
 0xdb2   : > { %v12837_v10 = vpop.eup %10396  ;;  %v3888_v23 = vsub.f32 %v12776_v63, %v3852_v25 }
 0xdb3   : > { %v3949_v14 = vsel %vm906_vm2, %v12837_v10, 0.0  ;;  %v3927_v61 = vmul.f32 1.442695, %v3897_v62 }
 0xdb4   : > { %v3873_v4 = vpop.xlane.xlu0 %3872  ;;  %3950 = vadd.xlane.f32.xlu0 %v3949_v14  ;;  %v3913_v14 = vmul.f32 1.442695, %v3890_v17  ;;  %v3909_v55 = vmul.f32 1.442695, %v3888_v23 }
 0xdb5   : > { %v12858_v58 = vpop.permute.xlu1 %4269  ;;  %v3895_v5 = vsub.f32 %v12788_v57, %v3873_v4 }
 0xdb6   : > { %v12841_v44 = vpop.eup %10398  ;;  %10402 = vpow2.f32 %v3913_v14 }
 0xdb7   : > { %v3955_v34 = vsel %vm906_vm2, %v12841_v44, 0.0 }
 0xdb8   : > { %v4083_v15 = vpop.permute.xlu0 %4082  ;;  %3956 = vadd.xlane.f32.xlu0 %v3955_v34  ;;  %v3892_v34 = vsub.f32 %v12766_v42, %v3864_v22  ;;  %v12862_v40 = vpop.eup %10400  ;;  %v3923_v42 = vmul.f32 1.442695, %v3895_v5 }
 0xdb9   : > { %9283 = vmatprep.subr.bf16.mxu0 %v4083_v15  ;;  %v3964_v25 = vsel %vm906_vm2, %v12862_v40, 0.0 }
 0xdba   : > { %9284 = vmatpush3.bf16.msra.mxu0 %v4083_v15  ;;  %v3907_v15 = vmul.f32 1.442695, %v3887_v13  ;;  %v3917_v60 = vmul.f32 1.442695, %v3892_v34 }
 0xdbc   : > { %10404 = vpow2.f32 %v3907_v15 }
 0xdbd   : > { %4204 = vrot.lane.b32.xlu1 %v11427_v47, %s10877_s20  ;;  %10406 = vpow2.f32 %v3917_v60 }
 0xdbe   : > { %10408 = vpow2.f32 %v3909_v55 }
 0xdbf   : > { %10410 = vpow2.f32 %v3927_v61 }
 0xdc0   : > { %10412 = vpow2.f32 %v3923_v42 }
 0xdc1   : > { %4202 = vrot.lane.b32.xlu1 %v11688_v20, %s10877_s20 }
 0xdc3   : > { %v12867_v63 = vpop.eup %10402 }
 0xdc4   : > { %v3952_v57 = vsel %vm906_vm2, %v12867_v63, 0.0 }
 0xdc5   : > { %4338 = vrot.lane.b32.xlu1 %v11379_v38, %s10878_s21 }
 0xdc9   : > { %v12869_v23 = vpop.eup %10404 }
 0xdca   : > { %v12874_v4 = vpop.eup %10406 }
 0xdcb   : > { %v3958_v46 = vsel %vm906_vm2, %v12874_v4, 0.0  ;;  %v12880_v17 = vpop.eup %10408 }
 0xdcc   : > { %v12884_v13 = vpop.eup %10410 }
 0xdcd   : > { %v3973_v14 = vsel %vm906_vm2, %v12884_v13, 0.0  ;;  %v12888_v34 = vpop.eup %10412 }
 0xdce   : > { %4080 = vrot.lane.b32.xlu0 %v11421_v50, %s10877_s20  ;;  %v3967_v15 = vsel %vm906_vm2, %v12888_v34, 0.0 }
 0xde1   : > { %v3882_v37 = vpop.xlane.xlu1 %3881 }
 0xde2   : > { %v3898_v30 = vsub.f32 %v12799_v24, %v3882_v37  ;;  %v3943_v24 = vsel %vm906_vm2, %v12869_v23, 0.0 }
 0xde4   : > { %v3929_v56 = vmul.f32 1.442695, %v3898_v30 }
 0xde5   : > { %v3876_v60 = vpop.xlane.xlu1 %3875 }
 0xde6   : > { %v3896_v49 = vsub.f32 %v12802_v51, %v3876_v60  ;;  %10414 = vpow2.f32 %v3929_v56  ;;  %v3946_v51 = vsel %vm906_vm2, %v12880_v17, 0.0 }
 0xde8   : > { %v3925_v22 = vmul.f32 1.442695, %v3896_v49 }
 0xde9   : > { %3965 = vadd.xlane.f32.xlu1 %v3964_v25 }
 0xdea   : > { %10416 = vpow2.f32 %v3925_v22 }
 0xded   : > { %3953 = vadd.xlane.f32.xlu1 %v3952_v57  ;;  %3944 = vadd.xlane.f32.xlu0 %v3943_v24 }
 0xdf1   : > { %3959 = vadd.xlane.f32.xlu1 %v3958_v46 }
 0xdf3   : > { %v12892_v55 = vpop.eup %10414 }
 0xdf4   : > { %v3976_v62 = vsel %vm906_vm2, %v12892_v55, 0.0 }
 0xdf5   : > { %3947 = vadd.xlane.f32.xlu1 %v3946_v51 }
 0xdf7   : > { %v12896_v37 = vpop.eup %10416 }
 0xdf8   : > { %v3970_v61 = vsel %vm906_vm2, %v12896_v37, 0.0 }
 0xdf9   : > { %3974 = vadd.xlane.f32.xlu1 %v3973_v14 }
 0xdfd   : > { %3968 = vadd.xlane.f32.xlu1 %v3967_v15 }
 0xe01   : > { %3977 = vadd.xlane.f32.xlu1 %v3976_v62 }
 0xe03   : > { %4267 = vrot.lane.b32.xlu0 %v11357_v45, %s10878_s21 }
 0xe05   : > { %3971 = vadd.xlane.f32.xlu1 %v3970_v61 }
 0xe07   : > { %4263 = vrot.lane.b32.xlu0 %v11357_v45, %s10879_s22 }
 0xe0b   : > { %4407 = vrot.lane.b32.xlu0 %v11393_v52, %s10878_s21 }
 0xe0f   : > { %4336 = vrot.lane.b32.xlu0 %v11371_v27, %s10878_s21 }
 0xe13   : > { %4401 = vrot.lane.b32.xlu0 %v11385_v41, %s10879_s22 }
 0xe16   : > { %4265 = vrot.lane.b32.xlu1 %v11365_v43, %s10879_s22 }
 0xe17   : > { %4403 = vrot.lane.b32.xlu0 %v11393_v52, %s10879_s22 }
 0xe1a   : > { %4405 = vrot.lane.b32.xlu1 %v11385_v41, %s10878_s21 }
 0xe1b   : > { %4334 = vrot.lane.b32.xlu0 %v11379_v38, %s10879_s22 }
 0xe1e   : > { %4332 = vrot.lane.b32.xlu1 %v11371_v27, %s10879_s22 }
 0xe1f   : > { %4470 = vrot.lane.b32.xlu0 %v11401_v39, %s10879_s22 }
 0xe22   : > { %4476 = vrot.lane.b32.xlu1 %v11407_v28, %s10878_s21 }
 0xe23   : > { %4757 = vrot.lane.b32.xlu0 %v11449_v31, %s10879_s22 }
 0xe26   : > { %4474 = vrot.lane.b32.xlu1 %v11401_v39, %s10878_s21 }
 0xe27   : > { %4879 = vrot.lane.b32.xlu0 %v11463_v26, %s10879_s22 }
 0xe29   : > { %v3939_v5 = vpop.xlane.xlu0 %3938 }
 0xe2a   : > { %4472 = vrot.lane.b32.xlu1 %v11407_v28, %s10879_s22 }
 0xe2b   : > { %4877 = vrot.lane.b32.xlu0 %v11655_v53, %s10879_s22 }
 0xe2d   : > { %v3933_v42 = vpop.xlane.xlu0 %3932 }
 0xe2e   : > { %4755 = vrot.lane.b32.xlu1 %v11455_v48, %s10879_s22 }
 0xe31   : > { %v3942_v30 = vpop.xlane.xlu1 %3941 }
 0xe32   : > { %10418 = vrcp.f32 %v3942_v30 }
 0xe33   : > { %10420 = vrcp.f32 %v3933_v42 }
 0xe34   : > { %10422 = vrcp.f32 %v3939_v5 }
 0xe35   : > { %v3936_v25 = vpop.xlane.xlu1 %3935 }
 0xe36   : > { %10424 = vrcp.f32 %v3936_v25 }
 0xe39   : > { %v3963_v60 = vpop.xlane.xlu0 %3962  ;;  %v12940_v30 = vpop.permute.xlu1 %4204 }
 0xe3d   : > { %v3951_v56 = vpop.xlane.xlu0 %3950 }
 0xe3f   : > { %v10419_v49 = vpop.eup %10418 }
 0xe40   : > { %v10421_v57 = vpop.eup %10420  ;;  %v3998_v51 = vmul.f32 %v10419_v49, %v12824_v18 }
 0xe41   : > { %v10423_v24 = vpop.eup %10422  ;;  %v3957_v22 = vpop.xlane.xlu0 %3956  ;;  %v3995_v14 = vmul.f32 %v10421_v57, %v12819_v32 }
 0xe42   : > { %v3997_v62 = vmul.f32 %v10423_v24, %v12815_v9  ;;  %v4203_v9 = vpop.permute.xlu1 %4202 }
 0xe43   : > { %v10425_v46 = vpop.eup %10424 }
 0xe44   : > { %v3996_v15 = vmul.f32 %v10425_v46, %v12829_v16  ;;  %v4012_v5 = vpack.c.bf16 %v3998_v51, %v3997_v62 }
 0xe45   : > { %v4081_v61 = vpop.permute.xlu0 %4080 }
 0xe46   : > { %v4011_v42 = vpack.c.bf16 %v3996_v15, %v3995_v14  ;;  %9285 = vmatprep.subr.bf16.mxu0 %v4081_v61  ;;  %v12950_v32 = vpop.permute.xlu1 %4338 }
 0xe47   : > { %9286 = vmatpush3.bf16.msra.mxu0 %v4081_v61 }
 0xe48   : > { %9279 = vmatprep.mubr.msk.bf16.mxu1 %vm906_vm2, %v4011_v42  ;;  %9299 = vmatprep.subr.bf16.mxu0 %v12940_v30 }
 0xe49   : > { %9280 = vmatmul.mubr.msk.bf16.vlgmr.msra.gmra.mxu1 %vm906_vm2, %v4012_v5 }
 0xe4a   : > { %9292 = vmatpush3.bf16.msra.mxu1 %v12674_v54 }
 0xe4b   : > { %9293 = vmatprep.subr.bf16.mxu1 %v12808_v59 }
 0xe4e   : > { %9294 = vmatpush3.bf16.msra.mxu1 %v12808_v59 }
 0xe4f   : > { %9595 = vmatprep.subr.msk.bf16.mxu1 %vm611_vm1, %v12858_v58 }
 0xe72   : > { %v3966_v18 = vpop.xlane.xlu1 %3965 }
 0xe73   : > { %10426 = vrcp.f32 %v3966_v18 }
 0xe74   : > { %10428 = vrcp.f32 %v3957_v22 }
 0xe75   : > { %10430 = vrcp.f32 %v3963_v60 }
 0xe76   : > { %v3954_v16 = vpop.xlane.xlu1 %3953  ;;  %v3945_v25 = vpop.xlane.xlu0 %3944 }
 0xe7a   : > { %v3960_v49 = vpop.xlane.xlu1 %3959  ;;  %v4268_v57 = vpop.permute.xlu0 %4267 }
 0xe7b   : > { %10432 = vrcp.f32 %v3960_v49 }
 0xe7c   : > { %10434 = vrcp.f32 %v3954_v16 }
 0xe7d   : > { %10436 = vrcp.f32 %v3945_v25 }
 0xe7e   : > { %10438 = vrcp.f32 %v3951_v56  ;;  %v3948_v54 = vpop.xlane.xlu1 %3947  ;;  %v4264_v59 = vpop.permute.xlu0 %4263 }
 0xe7f   : > { %10440 = vrcp.f32 %v3948_v54 }
 0xe80   : > { %v10427_v51 = vpop.eup %10426 }
 0xe81   : > { %v10429_v14 = vpop.eup %10428  ;;  %v4006_v42 = vmul.f32 %v10427_v51, %v12862_v40 }
 0xe82   : > { %v3975_v24 = vpop.xlane.xlu1 %3974  ;;  %v4408_v46 = vpop.permute.xlu0 %4407  ;;  %v4003_v5 = vmul.f32 %v10429_v14, %v12841_v44 }
 0xe83   : > { %v10431_v62 = vpop.eup %10430 }
 0xe84   : > { %v4005_v25 = vmul.f32 %v10431_v62, %v12833_v12  ;;  %v4281_v12 = vsel %vm611_vm1, %v12858_v58, 0 }
 0xe86   : > { %v3969_v15 = vpop.xlane.xlu1 %3968  ;;  %v12953_v60 = vpop.permute.xlu0 %4336  ;;  %v4016_v29 = vpack.c.bf16 %v4006_v42, %v4005_v25 }
 0xe88   : > { %v10433_v61 = vpop.eup %10432 }
 0xe89   : > { %v10435_v22 = vpop.eup %10434  ;;  %v4004_v18 = vmul.f32 %v10433_v61, %v12874_v4 }
 0xe8a   : > { %v10437_v56 = vpop.eup %10436  ;;  %v3978_v16 = vpop.xlane.xlu1 %3977  ;;  %v4002_v8 = vmul.f32 %v10435_v22, %v12867_v63 }
 0xe8b   : > { %v10439_v49 = vpop.eup %10438  ;;  %v4015_v54 = vpack.c.bf16 %v4004_v18, %v4003_v5  ;;  %10442 = vrcp.f32 %v3978_v16  ;;  %v3999_v40 = vmul.f32 %v10437_v56, %v12869_v23  ;;  %v4402_v14 = vpop.permute.xlu0 %4401  ;;  %v4347_v16 = vsel %vm611_vm1, %v12953_v60, 0 }
 0xe8c   : > { %v10441_v21 = vpop.eup %10440  ;;  %10444 = vrcp.f32 %v3969_v15  ;;  %v4001_v51 = vmul.f32 %v10439_v49, %v12837_v10 }
 0xe8d   : > { %9295 = vmatprep.mubr.msk.bf16.mxu1 %vm906_vm2, %v4015_v54  ;;  %v4000_v44 = vmul.f32 %v10441_v21, %v12880_v17  ;;  %10446 = vrcp.f32 %v3975_v24  ;;  %v4278_v21 = vsel %vm611_vm1, %v4268_v57, 0 }
 0xe8e   : > { %9296 = vmatmul.mubr.msk.bf16.vlgmr.msra.gmra.mxu1 %vm906_vm2, %v4016_v29  ;;  %v3972_v4 = vpop.xlane.xlu1 %3971  ;;  %v4014_v23 = vpack.c.bf16 %v4002_v8, %v4001_v51 }
 0xe8f   : > { %9308 = vmatpush3.bf16.xpose.msra.mxu1 %v4281_v12  ;;  %10448 = vrcp.f32 %v3972_v4  ;;  %9311 = vmatprep.mubr.msk.bf16.mxu1 %vm611_vm1, %v4264_v59  ;;  %v4013_v63 = vpack.c.bf16 %v4000_v44, %v3999_v40  ;;  %v4404_v58 = vpop.permute.xlu0 %4403 }
 0xe90   : > { %9596 = vmatprep.subr.msk.bf16.mxu1 %vm611_vm1, %v4268_v57 }
 0xe91   : > { %9287 = vmatprep.mubr.msk.bf16.mxu0 %vm906_vm2, %v4013_v63 }
 0xe92   : > { %9288 = vmatmul.mubr.msk.bf16.vlgmr.msra.gmra.mxu0 %vm906_vm2, %v4014_v23  ;;  %v4266_v29 = vpop.permute.xlu1 %4265 }
 0xe93   : > { %9300 = vmatpush3.bf16.msra.mxu0 %v12940_v30  ;;  %v4335_v15 = vpop.permute.xlu0 %4334 }
 0xe94   : > { %9301 = vmatprep.subr.bf16.mxu0 %v4203_v9 }
 0xe96   : > { %v4406_v10 = vpop.permute.xlu1 %4405 }
 0xe97   : > { %9302 = vmatpush3.bf16.msra.mxu0 %v4203_v9  ;;  %9310 = vmatpush3.bf16.xpose.msra.mxu1 %v4278_v21  ;;  %v4419_v9 = vsel %vm611_vm1, %v4408_v46, 0  ;;  %v4471_v56 = vpop.permute.xlu0 %4470 }
 0xe98   : > { %9597 = vmatprep.subr.msk.bf16.mxu0 %vm611_vm1, %v12950_v32  ;;  %9599 = vmatprep.subr.msk.bf16.mxu1 %vm611_vm1, %v4408_v46  ;;  %v10443_v8 = vpop.eup %10442 }
 0xe99   : > { %v10445_v17 = vpop.eup %10444  ;;  %v4010_v30 = vmul.f32 %v10443_v8, %v12892_v55 }
 0xe9a   : > { %v4333_v59 = vpop.permute.xlu1 %4332  ;;  %v10447_v24 = vpop.eup %10446  ;;  %v4007_v61 = vmul.f32 %v10445_v17, %v12888_v34  ;;  %v4350_v34 = vsel %vm611_vm1, %v12950_v32, 0 }
 0xe9b   : > { %v4009_v22 = vmul.f32 %v10447_v24, %v12884_v13  ;;  %v4416_v13 = vsel %vm611_vm1, %v4406_v10, 0 }
 0xe9c   : > { %v10449_v62 = vpop.eup %10448 }
 0xe9d   : > { %v4008_v57 = vmul.f32 %v10449_v62, %v12896_v37  ;;  %v4018_v18 = vpack.c.bf16 %v4010_v30, %v4009_v22  ;;  %v4758_v37 = vpop.permute.xlu0 %4757 }
 0xe9e   : > { %9312 = vmatmul.mubr.msk.bf16.vlgmr.msra.gmra.mxu1 %vm611_vm1, %v4266_v29  ;;  %v4477_v42 = vpop.permute.xlu1 %4476 }
 0xe9f   : > { %9324 = vmatpush3.bf16.xpose.msra.mxu1 %v4419_v9  ;;  %9327 = vmatprep.mubr.msk.bf16.mxu1 %vm611_vm1, %v4402_v14  ;;  %v4017_v5 = vpack.c.bf16 %v4008_v57, %v4007_v61  ;;  %v4488_v25 = vsel %vm611_vm1, %v4477_v42, 0 }
 0xea0   : > { %9600 = vmatprep.subr.msk.bf16.mxu1 %vm611_vm1, %v4406_v10 }
 0xea1   : > { %9303 = vmatprep.mubr.msk.bf16.mxu0 %vm906_vm2, %v4017_v5  ;;  %v12998_v49 = vpop.permute.xlu0 %4879 }
 0xea2   : > { %9304 = vmatmul.mubr.msk.bf16.vlgmr.msra.gmra.mxu0 %vm906_vm2, %v4018_v18  ;;  %v4475_v55 = vpop.permute.xlu1 %4474 }
 0xea3   : > { %9316 = vmatpush3.bf16.xpose.msra.mxu0 %v4350_v34  ;;  %9319 = vmatprep.mubr.msk.bf16.mxu0 %vm611_vm1, %v4333_v59 }
 0xea4   : > { %9598 = vmatprep.subr.msk.bf16.mxu0 %vm611_vm1, %v12953_v60  ;;  %v4485_v60 = vsel %vm611_vm1, %v4475_v55, 0 }
 0xea6   : > { %v4473_v46 = vpop.permute.xlu1 %4472 }
 0xea7   : > { %9326 = vmatpush3.bf16.xpose.msra.mxu1 %v4416_v13 }
 0xea8   : > { %9339 = vmatprep.subr.bf16.mxu1 %v4758_v37 }
 0xeaa   : > { %v4756_v32 = vpop.permute.xlu1 %4755 }
 0xeab   : > { %9318 = vmatpush3.bf16.xpose.msra.mxu0 %v4347_v16 }
 0xeac   : > { %9601 = vmatprep.subr.msk.bf16.mxu0 %vm611_vm1, %v4477_v42 }
 0xeae   : > { %9328 = vmatmul.mubr.msk.bf16.vlgmr.msra.gmra.mxu1 %vm611_vm1, %v4404_v58 }
 0xeaf   : > { %9340 = vmatpush3.bf16.msra.mxu1 %v4758_v37 }
 0xeb0   : > { %9341 = vmatprep.subr.bf16.mxu1 %v4756_v32 }
 0xeb2   : > { %9320 = vmatmul.mubr.msk.bf16.vlgmr.msra.gmra.mxu0 %vm611_vm1, %v4335_v15 }
 0xeb3   : > { %9332 = vmatpush3.bf16.xpose.msra.mxu0 %v4488_v25  ;;  %9335 = vmatprep.mubr.msk.bf16.mxu0 %vm611_vm1, %v4471_v56 }
 0xeb4   : > { %9342 = vmatpush3.bf16.msra.mxu1 %v4756_v32  ;;  %9602 = vmatprep.subr.msk.bf16.mxu0 %vm611_vm1, %v4475_v55 }
 0xeb5   : > { %9355 = vmatprep.subr.bf16.mxu1 %v12998_v49 }
 0xebb   : > { %9334 = vmatpush3.bf16.xpose.msra.mxu0 %v4485_v60 }
 0xec2   : > { %9336 = vmatmul.mubr.msk.bf16.vlgmr.msra.gmra.mxu0 %vm611_vm1, %v4473_v46 }
 0xf09   : > { %v13004_v54 = vpop.f32.mrf.mxu1 }
 0xf0a   : > { %15130 = vst [vmem:[#allocation88_spill] sm:$0xff] %v13004_v54 }
 0xf0b   : > { %v13006_v40 = vpop.f32.mrf.mxu1 }
 0xf0c   : > { %15131 = vst [vmem:[#allocation89_spill] sm:$0xff] %v13006_v40 }
 0xf0d   : > { %v13008_v44 = vpop.f32.mrf.mxu1 }
 0xf0e   : > { %15132 = vst [vmem:[#allocation90_spill] sm:$0xff] %v13008_v44 }
 0xf0f   : > { %v13012_v4 = vpop.f32.mrf.mxu1 }
 0xf10   : > { %15133 = vst [vmem:[#allocation91_spill] sm:$0xff] %v13012_v4 }
 0xf4e   : > { %v13016_v14 = vpop.f32.mrf.mxu1 }
 0xf4f   : > { %15134 = vst [vmem:[#allocation92_spill] sm:$0xff] %v13016_v14 }
 0xf50   : > { %v13018_v63 = vpop.f32.mrf.mxu1 }
 0xf51   : > { %15135 = vst [vmem:[#allocation93_spill] sm:$0xff] %v13018_v63 }
 0xf52   : > { %v13020_v23 = vpop.f32.mrf.mxu0  ;;  %v13022_v29 = vpop.f32.mrf.mxu1 }
 0xf53   : > { %15136 = vst [vmem:[#allocation94_spill] sm:$0xff] %v13020_v23  ;;  %15137 = vst [vmem:[#allocation95_spill] sm:$0xff] %v13022_v29 }
 0xf54   : > { %v13026_v21 = vpop.f32.mrf.mxu0  ;;  %v13028_v10 = vpop.f32.mrf.mxu1 }
 0xf55   : > { %15138 = vst [vmem:[#allocation96_spill] sm:$0xff] %v13026_v21  ;;  %15139 = vst [vmem:[#allocation97_spill] sm:$0xff] %v13028_v10 }
 0xf56   : > { %v13032_v17 = vpop.f32.mrf.mxu0 }
 0xf57   : > { %15140 = vst [vmem:[#allocation98_spill] sm:$0xff] %v13032_v17 }
 0xf58   : > { %v13036_v24 = vpop.f32.mrf.mxu0 }
 0xf59   : > { %15141 = vst [vmem:[#allocation99_spill] sm:$0xff] %v13036_v24 }
 0xf5e   : > { %v9313_v62 = vpop.f32.mrf.mxu1 }
 0xf5f   : > { %v4541_v30 = vmul.f32 0.125, %v9313_v62 }
 0xf60   : > { %v4317_v61 = vpop.f32.mrf.mxu1 }
 0xf61   : > { %v13041_v57 = vadd.f32 %v4541_v30, %v15047_v2  ;;  %v4539_v9 = vmul.f32 0.125, %v4317_v61 }
 0xf62   : > { %v9314_v42 = vpop.f32.mrf.mxu1  ;;  %v13043_v22 = vpop.f32.mrf.mxu0 }
 0xf63   : > { %15142 = vst [vmem:[#allocation100_spill] sm:$0xff] %v13043_v22  ;;  %v13046_v5 = vadd.f32 %v4539_v9, %v15049_v0  ;;  %v4542_v18 = vmul.f32 0.125, %v9314_v42  ;;  %v4577_v56 = vsel %vm906_vm2, %v13041_v57, -inf }
 0xf64   : > { %4578 = vmax.xlane.f32.xlu0 %v4577_v56  ;;  %v4320_v34 = vpop.f32.mrf.mxu1  ;;  %v13050_v55 = vpop.f32.mrf.mxu0 }
 0xf65   : > { %15143 = vst [vmem:[#allocation101_spill] sm:$0xff] %v13050_v55  ;;  %v4540_v13 = vmul.f32 0.125, %v4320_v34  ;;  %v13055_v46 = vadd.f32 %v4542_v18, %v10965_v3  ;;  %v4571_v25 = vsel %vm906_vm2, %v13046_v5, -inf }
 0xf66   : > { %v13052_v37 = vpop.f32.mrf.mxu0 }
 0xf67   : > { %15144 = vst [vmem:[#allocation102_spill] sm:$0xff] %v13052_v37  ;;  %v13058_v16 = vadd.f32 %v4540_v13, %v15048_v1  ;;  %v4580_v61 = vsel %vm906_vm2, %v13055_v46, -inf }
 0xf68   : > { %4572 = vmax.xlane.f32.xlu0 %v4571_v25  ;;  %v13064_v60 = vpop.f32.mrf.mxu0 }
 0xf69   : > { %15145 = vst [vmem:[#allocation103_spill] sm:$0xff] %v13064_v60  ;;  %v4574_v30 = vsel %vm906_vm2, %v13058_v16, -inf  ;;  %v13136_v60 = vpop.permute.xlu0 %4877 }
 0xf6a   : > { %4575 = vmax.xlane.f32.xlu1 %v4574_v30 }
 0xf6c   : > { %4581 = vmax.xlane.f32.xlu0 %v4580_v61 }
 0xf6e   : > { %v9329_v9 = vpop.f32.mrf.mxu1 }
 0xf6f   : > { %v4549_v42 = vmul.f32 0.125, %v9329_v9 }
 0xf70   : > { %v4455_v18 = vpop.f32.mrf.mxu1 }
 0xf71   : > { %v13073_v56 = vadd.f32 %v4549_v42, %v15047_v2  ;;  %v4547_v8 = vmul.f32 0.125, %v4455_v18 }
 0xf72   : > { %v9321_v34 = vpop.f32.mrf.mxu0  ;;  %v9330_v13 = vpop.f32.mrf.mxu1 }
 0xf73   : > { %v4545_v25 = vmul.f32 0.125, %v9321_v34  ;;  %v4550_v32 = vmul.f32 0.125, %v9330_v13  ;;  %v4601_v62 = vsel %vm906_vm2, %v13073_v56, -inf  ;;  %v13086_v13 = vadd.f32 %v4547_v8, %v15049_v0 }
 0xf74   : > { %4602 = vmax.xlane.f32.xlu0 %v4601_v62  ;;  %v4386_v30 = vpop.f32.mrf.mxu0  ;;  %v4458_v58 = vpop.f32.mrf.mxu1 }
 0xf75   : > { %v13078_v59 = vadd.f32 %v4545_v25, %v15047_v2  ;;  %v13081_v61 = vadd.f32 %v4550_v32, %v10965_v3  ;;  %v4548_v42 = vmul.f32 0.125, %v4458_v58  ;;  %v4543_v12 = vmul.f32 0.125, %v4386_v30 }
 0xf76   : > { %v9322_v9 = vpop.f32.mrf.mxu0  ;;  %v4595_v30 = vsel %vm906_vm2, %v13086_v13, -inf }
 0xf77   : > { %v4546_v15 = vmul.f32 0.125, %v9322_v9  ;;  %v4604_v34 = vsel %vm906_vm2, %v13081_v61, -inf  ;;  %v4589_v62 = vsel %vm906_vm2, %v13078_v59, -inf  ;;  %v13094_v32 = vadd.f32 %v4548_v42, %v15048_v1 }
 0xf78   : > { %4605 = vmax.xlane.f32.xlu1 %v4604_v34  ;;  %v4389_v18 = vpop.f32.mrf.mxu0  ;;  %4590 = vmax.xlane.f32.xlu0 %v4589_v62  ;;  %v13099_v8 = vadd.f32 %v4543_v12, %v15049_v0 }
 0xf79   : > { %v13091_v25 = vadd.f32 %v4546_v15, %v10965_v3  ;;  %v4544_v58 = vmul.f32 0.125, %v4389_v18  ;;  %v4598_v15 = vsel %vm906_vm2, %v13094_v32, -inf }
 0xf7a   : > { %v4583_v42 = vsel %vm906_vm2, %v13099_v8, -inf }
 0xf7b   : > { %v4592_v9 = vsel %vm906_vm2, %v13091_v25, -inf  ;;  %v13104_v34 = vadd.f32 %v4544_v58, %v15048_v1 }
 0xf7c   : > { %4593 = vmax.xlane.f32.xlu1 %v4592_v9  ;;  %4596 = vmax.xlane.f32.xlu0 %v4595_v30 }
 0xf7d   : > { %v4586_v12 = vsel %vm906_vm2, %v13104_v34, -inf }
 0xf80   : > { %4599 = vmax.xlane.f32.xlu1 %v4598_v15  ;;  %4584 = vmax.xlane.f32.xlu0 %v4583_v42 }
 0xf82   : > { %v9337_v62 = vpop.f32.mrf.mxu0 }
 0xf83   : > { %v4553_v18 = vmul.f32 0.125, %v9337_v62 }
 0xf84   : > { %4587 = vmax.xlane.f32.xlu1 %v4586_v12  ;;  %v4524_v51 = vpop.f32.mrf.mxu0 }
 0xf85   : > { %v13113_v9 = vadd.f32 %v4553_v18, %v15047_v2  ;;  %v4551_v58 = vmul.f32 0.125, %v4524_v51 }
 0xf86   : > { %v9338_v42 = vpop.f32.mrf.mxu0 }
 0xf87   : > { %v13116_v30 = vadd.f32 %v4551_v58, %v15049_v0  ;;  %v4613_v55 = vsel %vm906_vm2, %v13113_v9, -inf  ;;  %v4554_v51 = vmul.f32 0.125, %v9338_v42 }
 0xf88   : > { %4614 = vmax.xlane.f32.xlu0 %v4613_v55  ;;  %v4527_v62 = vpop.f32.mrf.mxu0 }
 0xf89   : > { %v4607_v15 = vsel %vm906_vm2, %v13116_v30, -inf  ;;  %v13127_v18 = vadd.f32 %v4554_v51, %v10965_v3  ;;  %v4552_v12 = vmul.f32 0.125, %v4527_v62 }
 0xf8b   : > { %v13130_v55 = vadd.f32 %v4552_v12, %v15048_v1  ;;  %v4616_v58 = vsel %vm906_vm2, %v13127_v18, -inf }
 0xf8c   : > { %4608 = vmax.xlane.f32.xlu0 %v4607_v15 }
 0xf8d   : > { %v4610_v15 = vsel %vm906_vm2, %v13130_v55, -inf }
 0xf95   : > { %5005 = vrot.lane.b32.xlu1 %v11365_v43, %s10880_s23 }
 0xfa2   : > { %4818 = vrot.lane.b32.xlu0 %v11413_v33, %s10879_s22 }
 0xfb9   : > { %4617 = vmax.xlane.f32.xlu1 %v4616_v58 }
 0xfbd   : > { %4611 = vmax.xlane.f32.xlu1 %v4610_v15 }
 0xfed   : > { %v4579_v22 = vpop.xlane.xlu0 %4578 }
 0xfee   : > { %v4621_v42 = vsub.f32 %v13041_v57, %v4579_v22 }
 0xff0   : > { %v4639_v37 = vmul.f32 1.442695, %v4621_v42 }
 0xff1   : > { %v4573_v51 = vpop.xlane.xlu0 %4572 }
 0xff2   : > { %10450 = vpow2.f32 %v4639_v37  ;;  %v4619_v62 = vsub.f32 %v13046_v5, %v4573_v51 }
 0xff3   : > { %v4576_v12 = vpop.xlane.xlu1 %4575 }
 0xff4   : > { %v4635_v63 = vmul.f32 1.442695, %v4619_v62  ;;  %v4620_v10 = vsub.f32 %v13058_v16, %v4576_v12 }
 0xff5   : > { %v4582_v14 = vpop.xlane.xlu0 %4581 }
 0xff6   : > { %10452 = vpow2.f32 %v4635_v63  ;;  %v4622_v58 = vsub.f32 %v13055_v46, %v4582_v14  ;;  %v4637_v29 = vmul.f32 1.442695, %v4620_v10 }
 0xff8   : > { %v4641_v15 = vmul.f32 1.442695, %v4622_v58 }
 0xffa   : > { %10454 = vpow2.f32 %v4641_v15 }
 0xffb   : > { %10456 = vpow2.f32 %v4637_v29 }
 0xffd   : > { %v4603_v23 = vpop.xlane.xlu0 %4602 }
 0xffe   : > { %v4629_v57 = vsub.f32 %v13073_v56, %v4603_v23 }
 0xfff   : > { %v13143_v22 = vpop.eup %10450 }
0x1000   : > { %v4655_v37 = vmul.f32 1.442695, %v4629_v57  ;;  %v4673_v5 = vsel %vm906_vm2, %v13143_v22, 0.0 }
0x1001   : > { %4674 = vadd.xlane.f32.xlu0 %v4673_v5  ;;  %v4591_v16 = vpop.xlane.xlu0 %4590 }
0x1002   : > { %10458 = vpow2.f32 %v4655_v37  ;;  %v4625_v14 = vsub.f32 %v13078_v59, %v4591_v16 }
0x1003   : > { %v13147_v42 = vpop.eup %10452 }
0x1004   : > { %v4667_v63 = vsel %vm906_vm2, %v13147_v42, 0.0  ;;  %v4647_v29 = vmul.f32 1.442695, %v4625_v14 }
0x1005   : > { %4668 = vadd.xlane.f32.xlu0 %v4667_v63  ;;  %v4597_v10 = vpop.xlane.xlu0 %4596 }
0x1006   : > { %10460 = vpow2.f32 %v4647_v29  ;;  %v4627_v46 = vsub.f32 %v13086_v13, %v4597_v10  ;;  %v4606_v29 = vpop.xlane.xlu1 %4605 }
0x1007   : > { %v13152_v23 = vpop.eup %10454 }
0x1008   : > { %v4676_v56 = vsel %vm906_vm2, %v13152_v23, 0.0  ;;  %v13157_v51 = vpop.eup %10456  ;;  %v4651_v62 = vmul.f32 1.442695, %v4627_v46  ;;  %v4630_v46 = vsub.f32 %v13081_v61, %v4606_v29 }
0x1009   : > { %4677 = vadd.xlane.f32.xlu1 %v4676_v56  ;;  %v4670_v59 = vsel %vm906_vm2, %v13157_v51, 0.0  ;;  %v4585_v12 = vpop.xlane.xlu0 %4584 }
0x100a   : > { %10462 = vpow2.f32 %v4651_v62  ;;  %v4594_v10 = vpop.xlane.xlu1 %4593  ;;  %v4657_v62 = vmul.f32 1.442695, %v4630_v46 }
0x100c   : > { %10464 = vpow2.f32 %v4657_v62 }
0x100d   : > { %4671 = vadd.xlane.f32.xlu1 %v4670_v59  ;;  %v4626_v59 = vsub.f32 %v13091_v25, %v4594_v10 }
0x100e   : > { %v4600_v56 = vpop.xlane.xlu1 %4599 }
0x100f   : > { %v13161_v58 = vpop.eup %10458 }
0x1010   : > { %v4697_v15 = vsel %vm906_vm2, %v13161_v58, 0.0 }
0x1011   : > { %v4615_v57 = vpop.xlane.xlu0 %4614  ;;  %4698 = vadd.xlane.f32.xlu0 %v4697_v15  ;;  %v4623_v15 = vsub.f32 %v13099_v8, %v4585_v12 }
0x1012   : > { %v4588_v17 = vpop.xlane.xlu1 %4587  ;;  %v4633_v29 = vsub.f32 %v13113_v9, %v4615_v57 }
0x1013   : > { %v13165_v13 = vpop.eup %10460  ;;  %v4624_v24 = vsub.f32 %v13104_v34, %v4588_v17 }
0x1014   : > { %v4685_v37 = vsel %vm906_vm2, %v13165_v13, 0.0  ;;  %v4663_v8 = vmul.f32 1.442695, %v4633_v29 }
0x1015   : > { %v4609_v5 = vpop.xlane.xlu0 %4608  ;;  %4686 = vadd.xlane.f32.xlu0 %v4685_v37  ;;  %v4649_v37 = vmul.f32 1.442695, %v4626_v59  ;;  %v4645_v61 = vmul.f32 1.442695, %v4624_v24 }
0x1016   : > { %v13186_v54 = vpop.permute.xlu1 %5005  ;;  %v4631_v12 = vsub.f32 %v13116_v30, %v4609_v5 }
0x1017   : > { %v13169_v16 = vpop.eup %10462  ;;  %10466 = vpow2.f32 %v4649_v37 }
0x1018   : > { %v4691_v14 = vsel %vm906_vm2, %v13169_v16, 0.0 }
0x1019   : > { %v4819_v63 = vpop.permute.xlu0 %4818  ;;  %4692 = vadd.xlane.f32.xlu0 %v4691_v14  ;;  %v4628_v14 = vsub.f32 %v13094_v32, %v4600_v56  ;;  %v13190_v10 = vpop.eup %10464  ;;  %v4659_v32 = vmul.f32 1.442695, %v4631_v12 }
0x101a   : > { %9347 = vmatprep.subr.bf16.mxu0 %v4819_v63  ;;  %v4700_v17 = vsel %vm906_vm2, %v13190_v10, 0.0 }
0x101b   : > { %9348 = vmatpush3.bf16.msra.mxu0 %v4819_v63  ;;  %v4643_v63 = vmul.f32 1.442695, %v4623_v15  ;;  %v4653_v21 = vmul.f32 1.442695, %v4628_v14 }
0x101d   : > { %10468 = vpow2.f32 %v4643_v63 }
0x101e   : > { %4940 = vrot.lane.b32.xlu1 %v11427_v47, %s10879_s22  ;;  %10470 = vpow2.f32 %v4653_v21 }
0x101f   : > { %10472 = vpow2.f32 %v4645_v61 }
0x1020   : > { %10474 = vpow2.f32 %v4663_v8 }
0x1021   : > { %10476 = vpow2.f32 %v4659_v32 }
0x1022   : > { %4938 = vrot.lane.b32.xlu1 %v11688_v20, %s10879_s22 }
0x1024   : > { %v13195_v34 = vpop.eup %10466 }
0x1025   : > { %v4688_v30 = vsel %vm906_vm2, %v13195_v34, 0.0 }
0x1026   : > { %5074 = vrot.lane.b32.xlu1 %v11379_v38, %s10880_s23 }
0x102a   : > { %v13197_v24 = vpop.eup %10468 }
0x102b   : > { %v13202_v5 = vpop.eup %10470 }
0x102c   : > { %v4694_v62 = vsel %vm906_vm2, %v13202_v5, 0.0  ;;  %v13208_v59 = vpop.eup %10472 }
0x102d   : > { %v13212_v15 = vpop.eup %10474 }
0x102e   : > { %v4709_v37 = vsel %vm906_vm2, %v13212_v15, 0.0  ;;  %v13216_v14 = vpop.eup %10476 }
0x102f   : > { %4816 = vrot.lane.b32.xlu0 %v11421_v50, %s10879_s22  ;;  %v4703_v63 = vsel %vm906_vm2, %v13216_v14, 0.0 }
0x1042   : > { %v4618_v25 = vpop.xlane.xlu1 %4617 }
0x1043   : > { %v4634_v46 = vsub.f32 %v13127_v18, %v4618_v25  ;;  %v4679_v18 = vsel %vm906_vm2, %v13197_v24, 0.0 }
0x1045   : > { %v4665_v9 = vmul.f32 1.442695, %v4634_v46 }
0x1046   : > { %v4612_v21 = vpop.xlane.xlu1 %4611 }
0x1047   : > { %v4632_v57 = vsub.f32 %v13130_v55, %v4612_v21  ;;  %10478 = vpow2.f32 %v4665_v9  ;;  %v4682_v55 = vsel %vm906_vm2, %v13208_v59, 0.0 }
0x1049   : > { %v4661_v56 = vmul.f32 1.442695, %v4632_v57 }
0x104a   : > { %4701 = vadd.xlane.f32.xlu1 %v4700_v17 }
0x104b   : > { %10480 = vpow2.f32 %v4661_v56 }
0x104e   : > { %4689 = vadd.xlane.f32.xlu1 %v4688_v30  ;;  %4680 = vadd.xlane.f32.xlu0 %v4679_v18 }
0x1052   : > { %4695 = vadd.xlane.f32.xlu1 %v4694_v62 }
0x1054   : > { %v13220_v61 = vpop.eup %10478 }
0x1055   : > { %v4712_v29 = vsel %vm906_vm2, %v13220_v61, 0.0 }
0x1056   : > { %4683 = vadd.xlane.f32.xlu1 %v4682_v55 }
0x1058   : > { %v13224_v25 = vpop.eup %10480 }
0x1059   : > { %v4706_v8 = vsel %vm906_vm2, %v13224_v25, 0.0 }
0x105a   : > { %4710 = vadd.xlane.f32.xlu1 %v4709_v37 }
0x105e   : > { %4704 = vadd.xlane.f32.xlu1 %v4703_v63 }
0x1062   : > { %4713 = vadd.xlane.f32.xlu1 %v4712_v29 }
0x1064   : > { %5003 = vrot.lane.b32.xlu0 %v11357_v45, %s10880_s23 }
0x1066   : > { %4707 = vadd.xlane.f32.xlu1 %v4706_v8 }
0x1068   : > { %4999 = vrot.lane.b32.xlu0 %v11357_v45, %s10881_s24 }
0x106c   : > { %5143 = vrot.lane.b32.xlu0 %v11393_v52, %s10880_s23 }
0x1070   : > { %5072 = vrot.lane.b32.xlu0 %v11371_v27, %s10880_s23 }
0x1074   : > { %5137 = vrot.lane.b32.xlu0 %v11385_v41, %s10881_s24 }
0x1077   : > { %5001 = vrot.lane.b32.xlu1 %v11365_v43, %s10881_s24 }
0x1078   : > { %5139 = vrot.lane.b32.xlu0 %v11393_v52, %s10881_s24 }
0x107b   : > { %5141 = vrot.lane.b32.xlu1 %v11385_v41, %s10880_s23 }
0x107c   : > { %5070 = vrot.lane.b32.xlu0 %v11379_v38, %s10881_s24 }
0x107f   : > { %5068 = vrot.lane.b32.xlu1 %v11371_v27, %s10881_s24 }
0x1080   : > { %5206 = vrot.lane.b32.xlu0 %v11401_v39, %s10881_s24 }
0x1083   : > { %5212 = vrot.lane.b32.xlu1 %v11407_v28, %s10880_s23 }
0x1084   : > { %5493 = vrot.lane.b32.xlu0 %v11449_v31, %s10881_s24 }
0x1087   : > { %5210 = vrot.lane.b32.xlu1 %v11401_v39, %s10880_s23 }
0x1088   : > { %5615 = vrot.lane.b32.xlu0 %v11463_v26, %s10881_s24 }
0x108a   : > { %v4675_v12 = vpop.xlane.xlu0 %4674 }
0x108b   : > { %5208 = vrot.lane.b32.xlu1 %v11407_v28, %s10881_s24 }
0x108c   : > { %5613 = vrot.lane.b32.xlu0 %v11655_v53, %s10881_s24 }
0x108e   : > { %v4669_v32 = vpop.xlane.xlu0 %4668 }
0x108f   : > { %5491 = vrot.lane.b32.xlu1 %v11455_v48, %s10881_s24 }
0x1092   : > { %v4678_v46 = vpop.xlane.xlu1 %4677 }
0x1093   : > { %10482 = vrcp.f32 %v4678_v46 }
0x1094   : > { %10484 = vrcp.f32 %v4669_v32 }
0x1095   : > { %10486 = vrcp.f32 %v4675_v12 }
0x1096   : > { %v4672_v17 = vpop.xlane.xlu1 %4671 }
0x1097   : > { %10488 = vrcp.f32 %v4672_v17 }
0x109a   : > { %v4699_v21 = vpop.xlane.xlu0 %4698  ;;  %v13268_v46 = vpop.permute.xlu1 %4940 }
0x109e   : > { %v4687_v9 = vpop.xlane.xlu0 %4686 }
0x10a0   : > { %v10483_v57 = vpop.eup %10482 }
0x10a1   : > { %v10485_v30 = vpop.eup %10484  ;;  %v4734_v55 = vmul.f32 %v10483_v57, %v13152_v23 }
0x10a2   : > { %v10487_v18 = vpop.eup %10486  ;;  %v4693_v56 = vpop.xlane.xlu0 %4692  ;;  %v4731_v37 = vmul.f32 %v10485_v30, %v13147_v42 }
0x10a3   : > { %v4733_v29 = vmul.f32 %v10487_v18, %v13143_v22  ;;  %v4939_v22 = vpop.permute.xlu1 %4938 }
0x10a4   : > { %v10489_v62 = vpop.eup %10488 }
0x10a5   : > { %v4732_v63 = vmul.f32 %v10489_v62, %v13157_v51  ;;  %v4748_v12 = vpack.c.bf16 %v4734_v55, %v4733_v29 }
0x10a6   : > { %v4817_v8 = vpop.permute.xlu0 %4816 }
0x10a7   : > { %v4747_v32 = vpack.c.bf16 %v4732_v63, %v4731_v37  ;;  %9349 = vmatprep.subr.bf16.mxu0 %v4817_v8  ;;  %v13278_v42 = vpop.permute.xlu1 %5074 }
0x10a8   : > { %9350 = vmatpush3.bf16.msra.mxu0 %v4817_v8 }
0x10a9   : > { %9343 = vmatprep.mubr.msk.bf16.mxu1 %vm906_vm2, %v4747_v32  ;;  %9363 = vmatprep.subr.bf16.mxu0 %v13268_v46 }
0x10aa   : > { %9344 = vmatmul.mubr.msk.bf16.vlgmr.msra.gmra.mxu1 %vm906_vm2, %v4748_v12 }
0x10ab   : > { %9356 = vmatpush3.bf16.msra.mxu1 %v12998_v49 }
0x10ac   : > { %9357 = vmatprep.subr.bf16.mxu1 %v13136_v60 }
0x10af   : > { %9358 = vmatpush3.bf16.msra.mxu1 %v13136_v60 }
0x10b0   : > { %9603 = vmatprep.subr.msk.bf16.mxu1 %vm611_vm1, %v13186_v54 }
0x10d3   : > { %v4702_v23 = vpop.xlane.xlu1 %4701 }
0x10d4   : > { %10490 = vrcp.f32 %v4702_v23 }
0x10d5   : > { %10492 = vrcp.f32 %v4693_v56 }
0x10d6   : > { %10494 = vrcp.f32 %v4699_v21 }
0x10d7   : > { %v4690_v51 = vpop.xlane.xlu1 %4689  ;;  %v4681_v17 = vpop.xlane.xlu0 %4680 }
0x10db   : > { %v4696_v57 = vpop.xlane.xlu1 %4695  ;;  %v5004_v30 = vpop.permute.xlu0 %5003 }
0x10dc   : > { %10496 = vrcp.f32 %v4696_v57 }
0x10dd   : > { %10498 = vrcp.f32 %v4690_v51 }
0x10de   : > { %10500 = vrcp.f32 %v4681_v17 }
0x10df   : > { %10502 = vrcp.f32 %v4687_v9  ;;  %v4684_v49 = vpop.xlane.xlu1 %4683  ;;  %v5000_v60 = vpop.permute.xlu0 %4999 }
0x10e0   : > { %10504 = vrcp.f32 %v4684_v49 }
0x10e1   : > { %v10491_v55 = vpop.eup %10490 }
0x10e2   : > { %v10493_v37 = vpop.eup %10492  ;;  %v4742_v32 = vmul.f32 %v10491_v55, %v13190_v10 }
0x10e3   : > { %v4711_v18 = vpop.xlane.xlu1 %4710  ;;  %v5144_v62 = vpop.permute.xlu0 %5143  ;;  %v4739_v12 = vmul.f32 %v10493_v37, %v13169_v16 }
0x10e4   : > { %v10495_v29 = vpop.eup %10494 }
0x10e5   : > { %v4741_v17 = vmul.f32 %v10495_v29, %v13161_v58  ;;  %v5017_v58 = vsel %vm611_vm1, %v13186_v54, 0  ;;  %v5014_v54 = vsel %vm611_vm1, %v5004_v30, 0 }
0x10e7   : > { %v4705_v63 = vpop.xlane.xlu1 %4704  ;;  %v13281_v21 = vpop.permute.xlu0 %5072  ;;  %v4752_v4 = vpack.c.bf16 %v4742_v32, %v4741_v17  ;;  %v5155_v32 = vsel %vm611_vm1, %v5144_v62, 0 }
0x10e9   : > { %v10497_v8 = vpop.eup %10496 }
0x10ea   : > { %v10499_v56 = vpop.eup %10498  ;;  %v4740_v23 = vmul.f32 %v10497_v8, %v13202_v5 }
0x10eb   : > { %v10501_v9 = vpop.eup %10500  ;;  %v4714_v51 = vpop.xlane.xlu1 %4713  ;;  %v4738_v40 = vmul.f32 %v10499_v56, %v13195_v34 }
0x10ec   : > { %v10503_v57 = vpop.eup %10502  ;;  %v4751_v49 = vpack.c.bf16 %v4740_v23, %v4739_v12  ;;  %10506 = vrcp.f32 %v4714_v51  ;;  %v4735_v10 = vmul.f32 %v10501_v9, %v13197_v24  ;;  %v5138_v37 = vpop.permute.xlu0 %5137  ;;  %v5083_v51 = vsel %vm611_vm1, %v13281_v21, 0 }
0x10ed   : > { %v10505_v44 = vpop.eup %10504  ;;  %10508 = vrcp.f32 %v4705_v63  ;;  %v4737_v5 = vmul.f32 %v10503_v57, %v13165_v13 }
0x10ee   : > { %9359 = vmatprep.mubr.msk.bf16.mxu1 %vm906_vm2, %v4751_v49  ;;  %v4736_v16 = vmul.f32 %v10505_v44, %v13208_v59  ;;  %10510 = vrcp.f32 %v4711_v18 }
0x10ef   : > { %9360 = vmatmul.mubr.msk.bf16.vlgmr.msra.gmra.mxu1 %vm906_vm2, %v4752_v4  ;;  %v4708_v55 = vpop.xlane.xlu1 %4707  ;;  %v4750_v24 = vpack.c.bf16 %v4738_v40, %v4737_v5 }
0x10f0   : > { %9372 = vmatpush3.bf16.xpose.msra.mxu1 %v5017_v58  ;;  %10512 = vrcp.f32 %v4708_v55  ;;  %9375 = vmatprep.mubr.msk.bf16.mxu1 %vm611_vm1, %v5000_v60  ;;  %v4749_v34 = vpack.c.bf16 %v4736_v16, %v4735_v10  ;;  %v5140_v4 = vpop.permute.xlu0 %5139 }
0x10f1   : > { %9604 = vmatprep.subr.msk.bf16.mxu1 %vm611_vm1, %v5004_v30 }
0x10f2   : > { %9351 = vmatprep.mubr.msk.bf16.mxu0 %vm906_vm2, %v4749_v34 }
0x10f3   : > { %9352 = vmatmul.mubr.msk.bf16.vlgmr.msra.gmra.mxu0 %vm906_vm2, %v4750_v24  ;;  %v5002_v44 = vpop.permute.xlu1 %5001 }
0x10f4   : > { %9364 = vmatpush3.bf16.msra.mxu0 %v13268_v46  ;;  %v5071_v63 = vpop.permute.xlu0 %5070 }
0x10f5   : > { %9365 = vmatprep.subr.bf16.mxu0 %v4939_v22 }
0x10f7   : > { %v5142_v13 = vpop.permute.xlu1 %5141 }
0x10f8   : > { %9366 = vmatpush3.bf16.msra.mxu0 %v4939_v22  ;;  %9374 = vmatpush3.bf16.xpose.msra.mxu1 %v5014_v54  ;;  %v5207_v9 = vpop.permute.xlu0 %5206 }
0x10f9   : > { %9605 = vmatprep.subr.msk.bf16.mxu0 %vm611_vm1, %v13278_v42  ;;  %9607 = vmatprep.subr.msk.bf16.mxu1 %vm611_vm1, %v5144_v62  ;;  %v10507_v40 = vpop.eup %10506 }
0x10fa   : > { %v10509_v59 = vpop.eup %10508  ;;  %v4746_v46 = vmul.f32 %v10507_v40, %v13220_v61  ;;  %v5152_v61 = vsel %vm611_vm1, %v5142_v13, 0 }
0x10fb   : > { %v5069_v60 = vpop.permute.xlu1 %5068  ;;  %v10511_v18 = vpop.eup %10510  ;;  %v4743_v8 = vmul.f32 %v10509_v59, %v13216_v14 }
0x10fc   : > { %v4745_v22 = vmul.f32 %v10511_v18, %v13212_v15  ;;  %v5086_v15 = vsel %vm611_vm1, %v13278_v42, 0 }
0x10fd   : > { %v10513_v29 = vpop.eup %10512 }
0x10fe   : > { %v4744_v30 = vmul.f32 %v10513_v29, %v13224_v25  ;;  %v4754_v23 = vpack.c.bf16 %v4746_v46, %v4745_v22  ;;  %v5494_v25 = vpop.permute.xlu0 %5493 }
0x10ff   : > { %9376 = vmatmul.mubr.msk.bf16.vlgmr.msra.gmra.mxu1 %vm611_vm1, %v5002_v44  ;;  %v5213_v56 = vpop.permute.xlu1 %5212 }
0x1100   : > { %9388 = vmatpush3.bf16.xpose.msra.mxu1 %v5155_v32  ;;  %9391 = vmatprep.mubr.msk.bf16.mxu1 %vm611_vm1, %v5138_v37  ;;  %v4753_v12 = vpack.c.bf16 %v4744_v30, %v4743_v8  ;;  %v5224_v17 = vsel %vm611_vm1, %v5213_v56, 0 }
0x1101   : > { %9608 = vmatprep.subr.msk.bf16.mxu1 %vm611_vm1, %v5142_v13 }
0x1102   : > { %9367 = vmatprep.mubr.msk.bf16.mxu0 %vm906_vm2, %v4753_v12  ;;  %v13326_v57 = vpop.permute.xlu0 %5615 }
0x1103   : > { %9368 = vmatmul.mubr.msk.bf16.vlgmr.msra.gmra.mxu0 %vm906_vm2, %v4754_v23  ;;  %v5211_v14 = vpop.permute.xlu1 %5210 }
0x1104   : > { %9380 = vmatpush3.bf16.xpose.msra.mxu0 %v5086_v15  ;;  %9383 = vmatprep.mubr.msk.bf16.mxu0 %vm611_vm1, %v5069_v60 }
0x1105   : > { %9606 = vmatprep.subr.msk.bf16.mxu0 %vm611_vm1, %v13281_v21  ;;  %v5221_v21 = vsel %vm611_vm1, %v5211_v14, 0 }
0x1107   : > { %v5209_v62 = vpop.permute.xlu1 %5208 }
0x1108   : > { %9390 = vmatpush3.bf16.xpose.msra.mxu1 %v5152_v61 }
0x1109   : > { %9403 = vmatprep.subr.bf16.mxu1 %v5494_v25 }
0x110b   : > { %v5492_v42 = vpop.permute.xlu1 %5491 }
0x110c   : > { %9382 = vmatpush3.bf16.xpose.msra.mxu0 %v5083_v51 }
0x110d   : > { %9609 = vmatprep.subr.msk.bf16.mxu0 %vm611_vm1, %v5213_v56 }
0x110f   : > { %9392 = vmatmul.mubr.msk.bf16.vlgmr.msra.gmra.mxu1 %vm611_vm1, %v5140_v4 }
0x1110   : > { %9404 = vmatpush3.bf16.msra.mxu1 %v5494_v25 }
0x1111   : > { %9405 = vmatprep.subr.bf16.mxu1 %v5492_v42 }
0x1113   : > { %9384 = vmatmul.mubr.msk.bf16.vlgmr.msra.gmra.mxu0 %vm611_vm1, %v5071_v63 }
0x1114   : > { %9396 = vmatpush3.bf16.xpose.msra.mxu0 %v5224_v17  ;;  %9399 = vmatprep.mubr.msk.bf16.mxu0 %vm611_vm1, %v5207_v9 }
0x1115   : > { %9406 = vmatpush3.bf16.msra.mxu1 %v5492_v42  ;;  %9610 = vmatprep.subr.msk.bf16.mxu0 %vm611_vm1, %v5211_v14 }
0x1116   : > { %9419 = vmatprep.subr.bf16.mxu1 %v13326_v57 }
0x111c   : > { %9398 = vmatpush3.bf16.xpose.msra.mxu0 %v5221_v21 }
0x1123   : > { %9400 = vmatmul.mubr.msk.bf16.vlgmr.msra.gmra.mxu0 %vm611_vm1, %v5209_v62 }
0x116a   : > { %v13332_v49 = vpop.f32.mrf.mxu1 }
0x116c   : > { %v13334_v10 = vpop.f32.mrf.mxu1 }
0x116e   : > { %v13336_v16 = vpop.f32.mrf.mxu1 }
0x1170   : > { %v13340_v58 = vpop.f32.mrf.mxu1 }
0x11af   : > { %v13344_v37 = vpop.f32.mrf.mxu1 }
0x11b0   : > { %15146 = vst [vmem:[#allocation104_spill] sm:$0xff] %v13344_v37 }
0x11b1   : > { %v13346_v34 = vpop.f32.mrf.mxu1 }
0x11b2   : > { %15147 = vst [vmem:[#allocation105_spill] sm:$0xff] %v13346_v34 }
0x11b3   : > { %v13348_v24 = vpop.f32.mrf.mxu0  ;;  %v13350_v44 = vpop.f32.mrf.mxu1 }
0x11b4   : > { %15148 = vst [vmem:[#allocation106_spill] sm:$0xff] %v13348_v24  ;;  %15149 = vst [vmem:[#allocation107_spill] sm:$0xff] %v13350_v44 }
0x11b5   : > { %v13354_v54 = vpop.f32.mrf.mxu0  ;;  %v13356_v13 = vpop.f32.mrf.mxu1 }
0x11b6   : > { %15150 = vst [vmem:[#allocation108_spill] sm:$0xff] %v13354_v54  ;;  %15151 = vst [vmem:[#allocation109_spill] sm:$0xff] %v13356_v13 }
0x11b7   : > { %v13360_v59 = vpop.f32.mrf.mxu0 }
0x11b8   : > { %15152 = vst [vmem:[#allocation110_spill] sm:$0xff] %v13360_v59 }
0x11b9   : > { %v13364_v18 = vpop.f32.mrf.mxu0 }
0x11ba   : > { %15153 = vst [vmem:[#allocation111_spill] sm:$0xff] %v13364_v18 }
0x11bf   : > { %v9377_v29 = vpop.f32.mrf.mxu1 }
0x11c0   : > { %v5277_v46 = vmul.f32 0.125, %v9377_v29 }
0x11c1   : > { %v5053_v8 = vpop.f32.mrf.mxu1 }
0x11c2   : > { %v13369_v30 = vadd.f32 %v5277_v46, %v15047_v2  ;;  %v5275_v22 = vmul.f32 0.125, %v5053_v8 }
0x11c3   : > { %v9378_v32 = vpop.f32.mrf.mxu1  ;;  %v13371_v56 = vpop.f32.mrf.mxu0 }
0x11c4   : > { %15154 = vst [vmem:[#allocation112_spill] sm:$0xff] %v13371_v56  ;;  %v13374_v12 = vadd.f32 %v5275_v22, %v15049_v0  ;;  %v5278_v23 = vmul.f32 0.125, %v9378_v32  ;;  %v5313_v9 = vsel %vm906_vm2, %v13369_v30, -inf }
0x11c5   : > { %5314 = vmax.xlane.f32.xlu0 %v5313_v9  ;;  %v5056_v15 = vpop.f32.mrf.mxu1  ;;  %v13378_v14 = vpop.f32.mrf.mxu0 }
0x11c6   : > { %15155 = vst [vmem:[#allocation113_spill] sm:$0xff] %v13378_v14  ;;  %v5276_v61 = vmul.f32 0.125, %v5056_v15  ;;  %v13383_v62 = vadd.f32 %v5278_v23, %v10965_v3  ;;  %v5307_v17 = vsel %vm906_vm2, %v13374_v12, -inf }
0x11c7   : > { %v13380_v25 = vpop.f32.mrf.mxu0 }
0x11c8   : > { %15156 = vst [vmem:[#allocation114_spill] sm:$0xff] %v13380_v25  ;;  %v13386_v51 = vadd.f32 %v5276_v61, %v15048_v1  ;;  %v5316_v8 = vsel %vm906_vm2, %v13383_v62, -inf }
0x11c9   : > { %5308 = vmax.xlane.f32.xlu0 %v5307_v17  ;;  %v13392_v21 = vpop.f32.mrf.mxu0 }
0x11ca   : > { %15157 = vst [vmem:[#allocation115_spill] sm:$0xff] %v13392_v21  ;;  %v5310_v46 = vsel %vm906_vm2, %v13386_v51, -inf  ;;  %v13464_v21 = vpop.permute.xlu0 %5613 }
0x11cb   : > { %5311 = vmax.xlane.f32.xlu1 %v5310_v46 }
0x11cd   : > { %5317 = vmax.xlane.f32.xlu0 %v5316_v8 }
0x11cf   : > { %v9393_v22 = vpop.f32.mrf.mxu1 }
0x11d0   : > { %v5285_v32 = vmul.f32 0.125, %v9393_v22 }
0x11d1   : > { %v5191_v23 = vpop.f32.mrf.mxu1 }
0x11d2   : > { %v13401_v9 = vadd.f32 %v5285_v32, %v15047_v2  ;;  %v5283_v40 = vmul.f32 0.125, %v5191_v23 }
0x11d3   : > { %v9385_v15 = vpop.f32.mrf.mxu0  ;;  %v9394_v61 = vpop.f32.mrf.mxu1 }
0x11d4   : > { %v5281_v17 = vmul.f32 0.125, %v9385_v15  ;;  %v5286_v42 = vmul.f32 0.125, %v9394_v61  ;;  %v5337_v29 = vsel %vm906_vm2, %v13401_v9, -inf  ;;  %v13414_v61 = vadd.f32 %v5283_v40, %v15049_v0 }
0x11d5   : > { %5338 = vmax.xlane.f32.xlu0 %v5337_v29  ;;  %v5122_v46 = vpop.f32.mrf.mxu0  ;;  %v5194_v4 = vpop.f32.mrf.mxu1 }
0x11d6   : > { %v13406_v60 = vadd.f32 %v5281_v17, %v15047_v2  ;;  %v13409_v8 = vadd.f32 %v5286_v42, %v10965_v3  ;;  %v5284_v32 = vmul.f32 0.125, %v5194_v4  ;;  %v5279_v5 = vmul.f32 0.125, %v5122_v46 }
0x11d7   : > { %v9386_v22 = vpop.f32.mrf.mxu0  ;;  %v5331_v46 = vsel %vm906_vm2, %v13414_v61, -inf }
0x11d8   : > { %v5282_v63 = vmul.f32 0.125, %v9386_v22  ;;  %v5340_v15 = vsel %vm906_vm2, %v13409_v8, -inf  ;;  %v5325_v29 = vsel %vm906_vm2, %v13406_v60, -inf  ;;  %v13422_v42 = vadd.f32 %v5284_v32, %v15048_v1 }
0x11d9   : > { %5341 = vmax.xlane.f32.xlu1 %v5340_v15  ;;  %v5125_v23 = vpop.f32.mrf.mxu0  ;;  %5326 = vmax.xlane.f32.xlu0 %v5325_v29  ;;  %v13427_v40 = vadd.f32 %v5279_v5, %v15049_v0 }
0x11da   : > { %v13419_v17 = vadd.f32 %v5282_v63, %v10965_v3  ;;  %v5280_v4 = vmul.f32 0.125, %v5125_v23  ;;  %v5334_v63 = vsel %vm906_vm2, %v13422_v42, -inf }
0x11db   : > { %v5319_v32 = vsel %vm906_vm2, %v13427_v40, -inf }
0x11dc   : > { %v5328_v22 = vsel %vm906_vm2, %v13419_v17, -inf  ;;  %v13432_v15 = vadd.f32 %v5280_v4, %v15048_v1 }
0x11dd   : > { %5329 = vmax.xlane.f32.xlu1 %v5328_v22  ;;  %5332 = vmax.xlane.f32.xlu0 %v5331_v46 }
0x11de   : > { %v5322_v5 = vsel %vm906_vm2, %v13432_v15, -inf }
0x11e1   : > { %5335 = vmax.xlane.f32.xlu1 %v5334_v63  ;;  %5320 = vmax.xlane.f32.xlu0 %v5319_v32 }
0x11e3   : > { %v9401_v29 = vpop.f32.mrf.mxu0 }
0x11e4   : > { %v5289_v23 = vmul.f32 0.125, %v9401_v29 }
0x11e5   : > { %5323 = vmax.xlane.f32.xlu1 %v5322_v5  ;;  %v5260_v55 = vpop.f32.mrf.mxu0 }
0x11e6   : > { %v13441_v22 = vadd.f32 %v5289_v23, %v15047_v2  ;;  %v5287_v4 = vmul.f32 0.125, %v5260_v55 }
0x11e7   : > { %v9402_v32 = vpop.f32.mrf.mxu0 }
0x11e8   : > { %v13444_v46 = vadd.f32 %v5287_v4, %v15049_v0  ;;  %v5349_v14 = vsel %vm906_vm2, %v13441_v22, -inf  ;;  %v5290_v55 = vmul.f32 0.125, %v9402_v32 }
0x11e9   : > { %5350 = vmax.xlane.f32.xlu0 %v5349_v14  ;;  %v5263_v29 = vpop.f32.mrf.mxu0 }
0x11ea   : > { %v5343_v63 = vsel %vm906_vm2, %v13444_v46, -inf  ;;  %v13455_v23 = vadd.f32 %v5290_v55, %v10965_v3  ;;  %v5288_v5 = vmul.f32 0.125, %v5263_v29 }
0x11ec   : > { %v13458_v14 = vadd.f32 %v5288_v5, %v15048_v1  ;;  %v5352_v4 = vsel %vm906_vm2, %v13455_v23, -inf }
0x11ed   : > { %5344 = vmax.xlane.f32.xlu0 %v5343_v63 }
0x11ee   : > { %v5346_v63 = vsel %vm906_vm2, %v13458_v14, -inf }
0x11f6   : > { %5741 = vrot.lane.b32.xlu1 %v11365_v43, %s10882_s25 }
0x1203   : > { %5554 = vrot.lane.b32.xlu0 %v11413_v33, %s10881_s24 }
0x121a   : > { %5353 = vmax.xlane.f32.xlu1 %v5352_v4 }
0x121e   : > { %5347 = vmax.xlane.f32.xlu1 %v5346_v63 }
0x124e   : > { %v5315_v56 = vpop.xlane.xlu0 %5314 }
0x124f   : > { %v5357_v32 = vsub.f32 %v13369_v30, %v5315_v56 }
0x1251   : > { %v5375_v25 = vmul.f32 1.442695, %v5357_v32 }
0x1252   : > { %v5309_v55 = vpop.xlane.xlu0 %5308 }
0x1253   : > { %10514 = vpow2.f32 %v5375_v25  ;;  %v5355_v29 = vsub.f32 %v13374_v12, %v5309_v55 }
0x1254   : > { %v5312_v5 = vpop.xlane.xlu1 %5311 }
0x1255   : > { %v5371_v34 = vmul.f32 1.442695, %v5355_v29  ;;  %v5356_v13 = vsub.f32 %v13386_v51, %v5312_v5 }
0x1256   : > { %v5318_v37 = vpop.xlane.xlu0 %5317 }
0x1257   : > { %10516 = vpow2.f32 %v5371_v34  ;;  %v5358_v4 = vsub.f32 %v13383_v62, %v5318_v37  ;;  %v5373_v44 = vmul.f32 1.442695, %v5356_v13 }
0x1259   : > { %v5377_v63 = vmul.f32 1.442695, %v5358_v4 }
0x125b   : > { %10518 = vpow2.f32 %v5377_v63 }
0x125c   : > { %10520 = vpow2.f32 %v5373_v44 }
0x125e   : > { %v5339_v24 = vpop.xlane.xlu0 %5338 }
0x125f   : > { %v5365_v30 = vsub.f32 %v13401_v9, %v5339_v24 }
0x1260   : > { %v13471_v56 = vpop.eup %10514 }
0x1261   : > { %v5391_v25 = vmul.f32 1.442695, %v5365_v30  ;;  %v5409_v12 = vsel %vm906_vm2, %v13471_v56, 0.0 }
0x1262   : > { %5410 = vadd.xlane.f32.xlu0 %v5409_v12  ;;  %v5327_v51 = vpop.xlane.xlu0 %5326 }
0x1263   : > { %10522 = vpow2.f32 %v5391_v25  ;;  %v5361_v37 = vsub.f32 %v13406_v60, %v5327_v51 }
0x1264   : > { %v13475_v32 = vpop.eup %10516 }
0x1265   : > { %v5403_v34 = vsel %vm906_vm2, %v13475_v32, 0.0  ;;  %v5383_v44 = vmul.f32 1.442695, %v5361_v37 }
0x1266   : > { %5404 = vadd.xlane.f32.xlu0 %v5403_v34  ;;  %v5333_v13 = vpop.xlane.xlu0 %5332 }
0x1267   : > { %10524 = vpow2.f32 %v5383_v44  ;;  %v5363_v62 = vsub.f32 %v13414_v61, %v5333_v13  ;;  %v5342_v44 = vpop.xlane.xlu1 %5341 }
0x1268   : > { %v13480_v24 = vpop.eup %10518 }
0x1269   : > { %v5412_v9 = vsel %vm906_vm2, %v13480_v24, 0.0  ;;  %v13485_v55 = vpop.eup %10520  ;;  %v5387_v29 = vmul.f32 1.442695, %v5363_v62  ;;  %v5366_v62 = vsub.f32 %v13409_v8, %v5342_v44 }
0x126a   : > { %5413 = vadd.xlane.f32.xlu1 %v5412_v9  ;;  %v5406_v60 = vsel %vm906_vm2, %v13485_v55, 0.0  ;;  %v5321_v5 = vpop.xlane.xlu0 %5320 }
0x126b   : > { %10526 = vpow2.f32 %v5387_v29  ;;  %v5330_v13 = vpop.xlane.xlu1 %5329  ;;  %v5393_v29 = vmul.f32 1.442695, %v5366_v62 }
0x126d   : > { %10528 = vpow2.f32 %v5393_v29 }
0x126e   : > { %5407 = vadd.xlane.f32.xlu1 %v5406_v60  ;;  %v5362_v60 = vsub.f32 %v13419_v17, %v5330_v13 }
0x126f   : > { %v5336_v9 = vpop.xlane.xlu1 %5335 }
0x1270   : > { %v13489_v4 = vpop.eup %10522 }
0x1271   : > { %v5433_v63 = vsel %vm906_vm2, %v13489_v4, 0.0 }
0x1272   : > { %v5351_v30 = vpop.xlane.xlu0 %5350  ;;  %5434 = vadd.xlane.f32.xlu0 %v5433_v63  ;;  %v5385_v63 = vmul.f32 1.442695, %v5362_v60 }
0x1273   : > { %v5369_v44 = vsub.f32 %v13441_v22, %v5351_v30 }
0x1274   : > { %v13493_v61 = vpop.eup %10524  ;;  %10530 = vpow2.f32 %v5385_v63 }
0x1275   : > { %v5421_v25 = vsel %vm906_vm2, %v13493_v61, 0.0  ;;  %v5399_v17 = vmul.f32 1.442695, %v5369_v44 }
0x1276   : > { %v5345_v12 = vpop.xlane.xlu0 %5344  ;;  %5422 = vadd.xlane.f32.xlu0 %v5421_v25  ;;  %v5364_v25 = vsub.f32 %v13422_v42, %v5336_v9 }
0x1277   : > { %v5367_v13 = vsub.f32 %v13444_v46, %v5345_v12 }
0x1278   : > { %v13497_v51 = vpop.eup %10526  ;;  %v5389_v59 = vmul.f32 1.442695, %v5364_v25 }
0x1279   : > { %v5427_v37 = vsel %vm906_vm2, %v13497_v51, 0.0 }
0x127a   : > { %v5555_v34 = vpop.permute.xlu0 %5554  ;;  %5428 = vadd.xlane.f32.xlu0 %v5427_v37  ;;  %v5359_v37 = vsub.f32 %v13427_v40, %v5321_v5  ;;  %10532 = vpow2.f32 %v5389_v59  ;;  %v13516_v42 = vpop.eup %10528  ;;  %v5395_v5 = vmul.f32 1.442695, %v5367_v13 }
0x127b   : > { %9411 = vmatprep.subr.bf16.mxu0 %v5555_v34  ;;  %v5436_v59 = vsel %vm906_vm2, %v13516_v42, 0.0 }
0x127c   : > { %9412 = vmatpush3.bf16.msra.mxu0 %v5555_v34  ;;  %v5324_v34 = vpop.xlane.xlu1 %5323  ;;  %v5379_v18 = vmul.f32 1.442695, %v5359_v37 }
0x127d   : > { %v5360_v54 = vsub.f32 %v13432_v15, %v5324_v34 }
0x127e   : > { %10534 = vpow2.f32 %v5379_v18 }
0x127f   : > { %5676 = vrot.lane.b32.xlu1 %v11427_v47, %s10881_s24  ;;  %v5381_v8 = vmul.f32 1.442695, %v5360_v54 }
0x1280   : > { %v13513_v62 = vpop.permute.xlu1 %5741 }
0x1281   : > { %10536 = vpow2.f32 %v5381_v8  ;;  %v13521_v54 = vpop.eup %10530 }
0x1282   : > { %10538 = vpow2.f32 %v5399_v17  ;;  %v5424_v46 = vsel %vm906_vm2, %v13521_v54, 0.0 }
0x1283   : > { %5674 = vrot.lane.b32.xlu1 %v11688_v20, %s10881_s24  ;;  %10540 = vpow2.f32 %v5395_v5 }
0x1287   : > { %v13526_v30 = vpop.eup %10532 }
0x1288   : > { %v5430_v29 = vsel %vm906_vm2, %v13526_v30, 0.0 }
0x128b   : > { %v13528_v12 = vpop.eup %10534 }
0x128c   : > { %v5415_v63 = vsel %vm906_vm2, %v13528_v12, 0.0 }
0x128e   : > { %v13532_v60 = vpop.eup %10536 }
0x128f   : > { %v13538_v25 = vpop.eup %10538 }
0x1290   : > { %5552 = vrot.lane.b32.xlu0 %v11421_v50, %s10881_s24  ;;  %v5445_v37 = vsel %vm906_vm2, %v13538_v25, 0.0  ;;  %v13542_v34 = vpop.eup %10540 }
0x1291   : > { %v5439_v8 = vsel %vm906_vm2, %v13542_v34, 0.0 }
0x12a3   : > { %v5354_v40 = vpop.xlane.xlu1 %5353 }
0x12a4   : > { %v5370_v9 = vsub.f32 %v13455_v23, %v5354_v40 }
0x12a6   : > { %v5401_v15 = vmul.f32 1.442695, %v5370_v9 }
0x12a7   : > { %5437 = vadd.xlane.f32.xlu1 %v5436_v59  ;;  %v5348_v18 = vpop.xlane.xlu1 %5347 }
0x12a8   : > { %v5368_v22 = vsub.f32 %v13458_v14, %v5348_v18  ;;  %10542 = vpow2.f32 %v5401_v15  ;;  %v5418_v14 = vsel %vm906_vm2, %v13532_v60, 0.0 }
0x12aa   : > { %v5397_v23 = vmul.f32 1.442695, %v5368_v22 }
0x12ab   : > { %5425 = vadd.xlane.f32.xlu1 %v5424_v46 }
0x12ac   : > { %10544 = vpow2.f32 %v5397_v23 }
0x12af   : > { %5431 = vadd.xlane.f32.xlu1 %v5430_v29  ;;  %5416 = vadd.xlane.f32.xlu0 %v5415_v63 }
0x12b3   : > { %5419 = vadd.xlane.f32.xlu1 %v5418_v14 }
0x12b5   : > { %v13546_v44 = vpop.eup %10542 }
0x12b6   : > { %v5448_v17 = vsel %vm906_vm2, %v13546_v44, 0.0 }
0x12b7   : > { %5446 = vadd.xlane.f32.xlu1 %v5445_v37 }
0x12b9   : > { %v13550_v13 = vpop.eup %10544 }
0x12ba   : > { %v5442_v40 = vsel %vm906_vm2, %v13550_v13, 0.0 }
0x12bb   : > { %5440 = vadd.xlane.f32.xlu1 %v5439_v8 }
0x12bf   : > { %5449 = vadd.xlane.f32.xlu1 %v5448_v17 }
0x12c3   : > { %5443 = vadd.xlane.f32.xlu1 %v5442_v40 }
0x12c5   : > { %5739 = vrot.lane.b32.xlu0 %v11357_v45, %s10882_s25 }
0x12c9   : > { %5735 = vrot.lane.b32.xlu0 %v11357_v45, %s10883_s26 }
0x12cd   : > { %5810 = vrot.lane.b32.xlu0 %v11379_v38, %s10882_s25 }
0x12d1   : > { %5804 = vrot.lane.b32.xlu0 %v11371_v27, %s10883_s26 }
0x12d4   : > { %5737 = vrot.lane.b32.xlu1 %v11365_v43, %s10883_s26 }
0x12d5   : > { %5879 = vrot.lane.b32.xlu0 %v11393_v52, %s10882_s25 }
0x12d8   : > { %5808 = vrot.lane.b32.xlu1 %v11371_v27, %s10882_s25 }
0x12d9   : > { %5873 = vrot.lane.b32.xlu0 %v11385_v41, %s10883_s26 }
0x12dc   : > { %5806 = vrot.lane.b32.xlu1 %v11379_v38, %s10883_s26 }
0x12dd   : > { %5948 = vrot.lane.b32.xlu0 %v11407_v28, %s10882_s25 }
0x12e0   : > { %5877 = vrot.lane.b32.xlu1 %v11385_v41, %s10882_s25 }
0x12e1   : > { %5942 = vrot.lane.b32.xlu0 %v11401_v39, %s10883_s26 }
0x12e4   : > { %5875 = vrot.lane.b32.xlu1 %v11393_v52, %s10883_s26 }
0x12e8   : > { %5946 = vrot.lane.b32.xlu1 %v11401_v39, %s10882_s25 }
0x12eb   : > { %v5411_v45 = vpop.xlane.xlu0 %5410 }
0x12ec   : > { %5944 = vrot.lane.b32.xlu1 %v11407_v28, %s10883_s26 }
0x12ef   : > { %v5405_v43 = vpop.xlane.xlu0 %5404 }
0x12f3   : > { %v5414_v27 = vpop.xlane.xlu1 %5413 }
0x12f4   : > { %10546 = vrcp.f32 %v5414_v27 }
0x12f5   : > { %10548 = vrcp.f32 %v5405_v43 }
0x12f6   : > { %10550 = vrcp.f32 %v5411_v45 }
0x12f7   : > { %v5408_v38 = vpop.xlane.xlu1 %5407 }
0x12f8   : > { %10552 = vrcp.f32 %v5408_v38 }
0x12fb   : > { %v5435_v41 = vpop.xlane.xlu0 %5434  ;;  %v13588_v14 = vpop.permute.xlu1 %5676 }
0x12ff   : > { %v5423_v5 = vpop.xlane.xlu0 %5422 }
0x1301   : > { %v10547_v9 = vpop.eup %10546 }
0x1302   : > { %v10549_v59 = vpop.eup %10548  ;;  %v5470_v39 = vmul.f32 %v10547_v9, %v13480_v24 }
0x1303   : > { %v10551_v18 = vpop.eup %10550  ;;  %v5429_v52 = vpop.xlane.xlu0 %5428  ;;  %v5467_v22 = vmul.f32 %v10549_v59, %v13475_v32 }
0x1304   : > { %v5469_v46 = vmul.f32 %v10551_v18, %v13471_v56  ;;  %v5675_v56 = vpop.permute.xlu1 %5674 }
0x1305   : > { %v10553_v15 = vpop.eup %10552 }
0x1306   : > { %v5468_v28 = vmul.f32 %v10553_v15, %v13485_v55  ;;  %v5484_v63 = vpack.c.bf16 %v5470_v39, %v5469_v46 }
0x1307   : > { %v5553_v23 = vpop.permute.xlu0 %5552 }
0x1308   : > { %v5483_v29 = vpack.c.bf16 %v5468_v28, %v5467_v22  ;;  %9413 = vmatprep.subr.bf16.mxu0 %v5553_v23 }
0x1309   : > { %9414 = vmatpush3.bf16.msra.mxu0 %v5553_v23 }
0x130a   : > { %9407 = vmatprep.mubr.msk.bf16.mxu1 %vm906_vm2, %v5483_v29  ;;  %9427 = vmatprep.subr.bf16.mxu0 %v13588_v14 }
0x130b   : > { %9408 = vmatmul.mubr.msk.bf16.vlgmr.msra.gmra.mxu1 %vm906_vm2, %v5484_v63 }
0x130c   : > { %9420 = vmatpush3.bf16.msra.mxu1 %v13326_v57 }
0x130d   : > { %9421 = vmatprep.subr.bf16.mxu1 %v13464_v21 }
0x1310   : > { %9422 = vmatpush3.bf16.msra.mxu1 %v13464_v21 }
0x1311   : > { %9611 = vmatprep.subr.msk.bf16.mxu1 %vm611_vm1, %v13513_v62 }
0x1330   : > { %v5438_v32 = vpop.xlane.xlu1 %5437 }
0x1331   : > { %10554 = vrcp.f32 %v5438_v32 }
0x1332   : > { %10556 = vrcp.f32 %v5429_v52 }
0x1333   : > { %10558 = vrcp.f32 %v5435_v41 }
0x1334   : > { %v5426_v24 = vpop.xlane.xlu1 %5425 }
0x1338   : > { %v5432_v55 = vpop.xlane.xlu1 %5431  ;;  %v5417_v37 = vpop.xlane.xlu0 %5416 }
0x1339   : > { %10560 = vrcp.f32 %v5432_v55 }
0x133a   : > { %10562 = vrcp.f32 %v5426_v24 }
0x133b   : > { %10564 = vrcp.f32 %v5417_v37 }
0x133c   : > { %10566 = vrcp.f32 %v5423_v5  ;;  %v5420_v57 = vpop.xlane.xlu1 %5419  ;;  %v5740_v8 = vpop.permute.xlu0 %5739 }
0x133d   : > { %10568 = vrcp.f32 %v5420_v57 }
0x133e   : > { %v10555_v21 = vpop.eup %10554 }
0x133f   : > { %v10557_v45 = vpop.eup %10556  ;;  %v5478_v9 = vmul.f32 %v10555_v21, %v13516_v42 }
0x1340   : > { %v5447_v17 = vpop.xlane.xlu1 %5446  ;;  %v5736_v40 = vpop.permute.xlu0 %5735  ;;  %v5475_v41 = vmul.f32 %v10557_v45, %v13497_v51 }
0x1341   : > { %v10559_v27 = vpop.eup %10558 }
0x1342   : > { %v5477_v5 = vmul.f32 %v10559_v27, %v13489_v4  ;;  %v5753_v4 = vsel %vm611_vm1, %v13513_v62, 0  ;;  %v5750_v62 = vsel %vm611_vm1, %v5740_v8, 0 }
0x1344   : > { %v5441_v43 = vpop.xlane.xlu1 %5440  ;;  %v5811_v22 = vpop.permute.xlu0 %5810  ;;  %v5488_v29 = vpack.c.bf16 %v5478_v9, %v5477_v5 }
0x1346   : > { %v10561_v38 = vpop.eup %10560 }
0x1347   : > { %v10563_v59 = vpop.eup %10562  ;;  %v5476_v18 = vmul.f32 %v10561_v38, %v13526_v30 }
0x1348   : > { %v10565_v52 = vpop.eup %10564  ;;  %v5450_v15 = vpop.xlane.xlu1 %5449  ;;  %v5474_v23 = vmul.f32 %v10563_v59, %v13521_v54 }
0x1349   : > { %v10567_v39 = vpop.eup %10566  ;;  %v5487_v28 = vpack.c.bf16 %v5476_v18, %v5475_v41  ;;  %10570 = vrcp.f32 %v5450_v15  ;;  %v5471_v42 = vmul.f32 %v10565_v52, %v13528_v12  ;;  %v5805_v12 = vpop.permute.xlu0 %5804 }
0x134a   : > { %v10569_v46 = vpop.eup %10568  ;;  %10572 = vrcp.f32 %v5441_v43  ;;  %v5473_v30 = vmul.f32 %v10567_v39, %v13493_v61 }
0x134b   : > { %9423 = vmatprep.mubr.msk.bf16.mxu1 %vm906_vm2, %v5487_v28  ;;  %v5472_v51 = vmul.f32 %v10569_v46, %v13532_v60  ;;  %10574 = vrcp.f32 %v5447_v17 }
0x134c   : > { %9424 = vmatmul.mubr.msk.bf16.vlgmr.msra.gmra.mxu1 %vm906_vm2, %v5488_v29  ;;  %v5444_v63 = vpop.xlane.xlu1 %5443  ;;  %v5486_v32 = vpack.c.bf16 %v5474_v23, %v5473_v30 }
0x134d   : > { %9436 = vmatpush3.bf16.xpose.msra.mxu1 %v5753_v4  ;;  %10576 = vrcp.f32 %v5444_v63  ;;  %9439 = vmatprep.mubr.msk.bf16.mxu1 %vm611_vm1, %v5736_v40  ;;  %v5485_v54 = vpack.c.bf16 %v5472_v51, %v5471_v42  ;;  %v5880_v24 = vpop.permute.xlu0 %5879 }
0x134e   : > { %9612 = vmatprep.subr.msk.bf16.mxu1 %vm611_vm1, %v5740_v8 }
0x134f   : > { %9415 = vmatprep.mubr.msk.bf16.mxu0 %vm906_vm2, %v5485_v54 }
0x1350   : > { %9416 = vmatmul.mubr.msk.bf16.vlgmr.msra.gmra.mxu0 %vm906_vm2, %v5486_v32  ;;  %v5738_v61 = vpop.permute.xlu1 %5737 }
0x1351   : > { %9428 = vmatpush3.bf16.msra.mxu0 %v13588_v14  ;;  %v5874_v43 = vpop.permute.xlu0 %5873 }
0x1352   : > { %9429 = vmatprep.subr.bf16.mxu0 %v5675_v56 }
0x1354   : > { %v5809_v60 = vpop.permute.xlu1 %5808 }
0x1355   : > { %9430 = vmatpush3.bf16.msra.mxu0 %v5675_v56  ;;  %9438 = vmatpush3.bf16.xpose.msra.mxu1 %v5750_v62  ;;  %v5891_v56 = vsel %vm611_vm1, %v5880_v24, 0 }
0x1356   : > { %9613 = vmatprep.subr.msk.bf16.mxu0 %vm611_vm1, %v5811_v22  ;;  %9615 = vmatprep.subr.msk.bf16.mxu1 %vm611_vm1, %v5880_v24  ;;  %v10571_v55 = vpop.eup %10570 }
0x1357   : > { %v10573_v37 = vpop.eup %10572  ;;  %v5482_v40 = vmul.f32 %v10571_v55, %v13546_v44  ;;  %v5819_v44 = vsel %vm611_vm1, %v5809_v60, 0 }
0x1358   : > { %v5807_v57 = vpop.permute.xlu1 %5806  ;;  %v10575_v17 = vpop.eup %10574  ;;  %v5479_v14 = vmul.f32 %v10573_v37, %v13542_v34  ;;  %v5822_v34 = vsel %vm611_vm1, %v5811_v22, 0 }
0x1359   : > { %v5481_v8 = vmul.f32 %v10575_v17, %v13538_v25 }
0x135a   : > { %v10577_v21 = vpop.eup %10576 }
0x135b   : > { %v5480_v45 = vmul.f32 %v10577_v21, %v13550_v13  ;;  %v5490_v9 = vpack.c.bf16 %v5482_v40, %v5481_v8  ;;  %v5949_v13 = vpop.permute.xlu0 %5948 }
0x135c   : > { %9440 = vmatmul.mubr.msk.bf16.vlgmr.msra.gmra.mxu1 %vm611_vm1, %v5738_v61  ;;  %v5878_v27 = vpop.permute.xlu1 %5877  ;;  %v5960_v18 = vsel %vm611_vm1, %v5949_v13, 0 }
0x135d   : > { %9452 = vmatpush3.bf16.xpose.msra.mxu1 %v5891_v56  ;;  %9455 = vmatprep.mubr.msk.bf16.mxu1 %vm611_vm1, %v5874_v43  ;;  %v5489_v38 = vpack.c.bf16 %v5480_v45, %v5479_v14  ;;  %v5888_v25 = vsel %vm611_vm1, %v5878_v27, 0 }
0x135e   : > { %9616 = vmatprep.subr.msk.bf16.mxu1 %vm611_vm1, %v5878_v27 }
0x135f   : > { %9431 = vmatprep.mubr.msk.bf16.mxu0 %vm906_vm2, %v5489_v38  ;;  %v5943_v41 = vpop.permute.xlu0 %5942 }
0x1360   : > { %9432 = vmatmul.mubr.msk.bf16.vlgmr.msra.gmra.mxu0 %vm906_vm2, %v5490_v9  ;;  %v5876_v59 = vpop.permute.xlu1 %5875 }
0x1361   : > { %9444 = vmatpush3.bf16.xpose.msra.mxu0 %v5822_v34  ;;  %9447 = vmatprep.mubr.msk.bf16.mxu0 %vm611_vm1, %v5805_v12 }
0x1362   : > { %9614 = vmatprep.subr.msk.bf16.mxu0 %vm611_vm1, %v5809_v60 }
0x1364   : > { %v5947_v52 = vpop.permute.xlu1 %5946 }
0x1365   : > { %9454 = vmatpush3.bf16.xpose.msra.mxu1 %v5888_v25  ;;  %v5957_v5 = vsel %vm611_vm1, %v5947_v52, 0 }
0x1368   : > { %v5945_v15 = vpop.permute.xlu1 %5944 }
0x1369   : > { %9446 = vmatpush3.bf16.xpose.msra.mxu0 %v5819_v44 }
0x136a   : > { %9617 = vmatprep.subr.msk.bf16.mxu0 %vm611_vm1, %v5949_v13 }
0x136c   : > { %9456 = vmatmul.mubr.msk.bf16.vlgmr.msra.gmra.mxu1 %vm611_vm1, %v5876_v59 }
0x1370   : > { %9448 = vmatmul.mubr.msk.bf16.vlgmr.msra.gmra.mxu0 %vm611_vm1, %v5807_v57 }
0x1371   : > { %9460 = vmatpush3.bf16.xpose.msra.mxu0 %v5960_v18  ;;  %9463 = vmatprep.mubr.msk.bf16.mxu0 %vm611_vm1, %v5943_v41 }
0x1372   : > { %9618 = vmatprep.subr.msk.bf16.mxu0 %vm611_vm1, %v5947_v52 }
0x1379   : > { %9462 = vmatpush3.bf16.xpose.msra.mxu0 %v5957_v5 }
0x1380   : > { %9464 = vmatmul.mubr.msk.bf16.vlgmr.msra.gmra.mxu0 %vm611_vm1, %v5945_v15 }
0x13cb   : > { %v13641_v39 = vpop.f32.mrf.mxu1 }
0x13cd   : > { %v13643_v22 = vpop.f32.mrf.mxu1 }
0x13cf   : > { %v13645_v28 = vpop.f32.mrf.mxu1 }
0x13d1   : > { %v13649_v23 = vpop.f32.mrf.mxu1 }
0x140c   : > { %v13653_v42 = vpop.f32.mrf.mxu1 }
0x140e   : > { %v13655_v51 = vpop.f32.mrf.mxu1 }
0x1410   : > { %v13657_v30 = vpop.f32.mrf.mxu0  ;;  %v13659_v4 = vpop.f32.mrf.mxu1 }
0x1412   : > { %v13663_v54 = vpop.f32.mrf.mxu0  ;;  %v13665_v32 = vpop.f32.mrf.mxu1 }
0x1414   : > { %v13669_v61 = vpop.f32.mrf.mxu0 }
0x1416   : > { %v13673_v60 = vpop.f32.mrf.mxu0 }
0x141c   : > { %v9441_v55 = vpop.f32.mrf.mxu1 }
0x141d   : > { %v6013_v37 = vmul.f32 0.125, %v9441_v55 }
0x141e   : > { %v5789_v57 = vpop.f32.mrf.mxu1 }
0x141f   : > { %v13678_v17 = vadd.f32 %v6013_v37, %v15047_v2  ;;  %v6011_v21 = vmul.f32 0.125, %v5789_v57 }
0x1420   : > { %v9442_v40 = vpop.f32.mrf.mxu1  ;;  %v13680_v14 = vpop.f32.mrf.mxu0 }
0x1421   : > { %v13683_v45 = vadd.f32 %v6011_v21, %v15049_v0  ;;  %v6014_v8 = vmul.f32 0.125, %v9442_v40  ;;  %v6049_v43 = vsel %vm906_vm2, %v13678_v17, -inf }
0x1422   : > { %6050 = vmax.xlane.f32.xlu0 %v6049_v43  ;;  %v5792_v56 = vpop.f32.mrf.mxu1  ;;  %v13687_v27 = vpop.f32.mrf.mxu0 }
0x1423   : > { %v6012_v38 = vmul.f32 0.125, %v5792_v56  ;;  %v13692_v34 = vadd.f32 %v6014_v8, %v10965_v3  ;;  %v6043_v13 = vsel %vm906_vm2, %v13683_v45, -inf }
0x1424   : > { %v13689_v9 = vpop.f32.mrf.mxu0 }
0x1425   : > { %v13695_v25 = vadd.f32 %v6012_v38, %v15048_v1  ;;  %v6052_v52 = vsel %vm906_vm2, %v13692_v34, -inf }
0x1426   : > { %6044 = vmax.xlane.f32.xlu0 %v6043_v13  ;;  %v13701_v59 = vpop.f32.mrf.mxu0 }
0x1427   : > { %v6046_v18 = vsel %vm906_vm2, %v13695_v25, -inf }
0x1428   : > { %6047 = vmax.xlane.f32.xlu1 %v6046_v18 }
0x142a   : > { %6053 = vmax.xlane.f32.xlu0 %v6052_v52 }
0x142c   : > { %v9457_v5 = vpop.f32.mrf.mxu1 }
0x142d   : > { %v6021_v55 = vmul.f32 0.125, %v9457_v5 }
0x142e   : > { %v5927_v15 = vpop.f32.mrf.mxu1 }
0x142f   : > { %v13713_v43 = vadd.f32 %v6021_v55, %v15047_v2 }
0x1430   : > { %v9449_v37 = vpop.f32.mrf.mxu0  ;;  %v9458_v21 = vpop.f32.mrf.mxu1 }
0x1431   : > { %v6017_v57 = vmul.f32 0.125, %v9449_v37  ;;  %v6022_v38 = vmul.f32 0.125, %v9458_v21  ;;  %v6073_v37 = vsel %vm906_vm2, %v13713_v43, -inf }
0x1432   : > { %v5858_v40 = vpop.f32.mrf.mxu0 }
0x1433   : > { %v13710_v8 = vadd.f32 %v6017_v57, %v15047_v2  ;;  %v6015_v13 = vmul.f32 0.125, %v5858_v40  ;;  %v13723_v57 = vadd.f32 %v6022_v38, %v10965_v3 }
0x1434   : > { %v9450_v56 = vpop.f32.mrf.mxu0 }
0x1435   : > { %v6018_v18 = vmul.f32 0.125, %v9450_v56  ;;  %v6061_v52 = vsel %vm906_vm2, %v13710_v8, -inf  ;;  %v13726_v55 = vadd.f32 %v6015_v13, %v15049_v0  ;;  %v6019_v13 = vmul.f32 0.125, %v5927_v15 }
0x1436   : > { %6062 = vmax.xlane.f32.xlu0 %v6061_v52  ;;  %v5861_v41 = vpop.f32.mrf.mxu0  ;;  %v6076_v52 = vsel %vm906_vm2, %v13723_v57, -inf }
0x1437   : > { %v13718_v5 = vadd.f32 %v6018_v18, %v10965_v3  ;;  %v6016_v21 = vmul.f32 0.125, %v5861_v41  ;;  %v6055_v18 = vsel %vm906_vm2, %v13726_v55, -inf  ;;  %v13744_v44 = vadd.f32 %v6019_v13, %v15049_v0 }
0x1439   : > { %v6064_v40 = vsel %vm906_vm2, %v13718_v5, -inf  ;;  %v13731_v56 = vadd.f32 %v6016_v21, %v15048_v1 }
0x143a   : > { %6065 = vmax.xlane.f32.xlu1 %v6064_v40  ;;  %6074 = vmax.xlane.f32.xlu0 %v6073_v37  ;;  %v5930_v37 = vpop.f32.mrf.mxu1 }
0x143b   : > { %v6058_v38 = vsel %vm906_vm2, %v13731_v56, -inf  ;;  %v6020_v40 = vmul.f32 0.125, %v5930_v37 }
0x143d   : > { %v13747_v12 = vadd.f32 %v6020_v40, %v15048_v1 }
0x143e   : > { %6056 = vmax.xlane.f32.xlu0 %v6055_v18  ;;  %6077 = vmax.xlane.f32.xlu1 %v6076_v52 }
0x143f   : > { %v6070_v37 = vsel %vm906_vm2, %v13747_v12, -inf }
0x1440   : > { %v9465_v41 = vpop.f32.mrf.mxu0 }
0x1441   : > { %v6025_v18 = vmul.f32 0.125, %v9465_v41 }
0x1442   : > { %6059 = vmax.xlane.f32.xlu1 %v6058_v38  ;;  %v5996_v21 = vpop.f32.mrf.mxu0 }
0x1443   : > { %v13750_v38 = vadd.f32 %v6025_v18, %v15047_v2 }
0x1444   : > { %v9466_v52 = vpop.f32.mrf.mxu0 }
0x1445   : > { %v6026_v63 = vmul.f32 0.125, %v9466_v52  ;;  %v6085_v18 = vsel %vm906_vm2, %v13750_v38, -inf }
0x1446   : > { %v5999_v15 = vpop.f32.mrf.mxu0 }
0x1447   : > { %v13760_v41 = vadd.f32 %v6026_v63, %v10965_v3  ;;  %v6024_v40 = vmul.f32 0.125, %v5999_v15 }
0x1453   : > { %6227 = vrot.lane.b32.xlu1 %v11455_v48, %s10883_s26  ;;  %v6023_v48 = vmul.f32 0.125, %v5996_v21  ;;  %v13765_v21 = vadd.f32 %v6024_v40, %v15048_v1 }
0x1454   : > { %6229 = vrot.lane.b32.xlu0 %v11449_v31, %s10883_s26  ;;  %v6067_v31 = vsel %vm906_vm2, %v13744_v44, -inf }
0x1455   : > { %v13757_v13 = vadd.f32 %v6023_v48, %v15049_v0  ;;  %v6082_v63 = vsel %vm906_vm2, %v13765_v21, -inf }
0x1457   : > { %v6079_v52 = vsel %vm906_vm2, %v13757_v13, -inf }
0x1473   : > { %6068 = vmax.xlane.f32.xlu0 %v6067_v31  ;;  %v6088_v31 = vsel %vm906_vm2, %v13760_v41, -inf }
0x1477   : > { %6071 = vmax.xlane.f32.xlu1 %v6070_v37  ;;  %6086 = vmax.xlane.f32.xlu0 %v6085_v18 }
0x147b   : > { %6080 = vmax.xlane.f32.xlu0 %v6079_v52  ;;  %6089 = vmax.xlane.f32.xlu1 %v6088_v31 }
0x147f   : > { %6083 = vmax.xlane.f32.xlu1 %v6082_v63 }
0x1490   : > { %6288 = vrot.lane.b32.xlu1 %v11421_v50, %s10883_s26 }
0x1491   : > { %6290 = vrot.lane.b32.xlu0 %v11413_v33, %s10883_s26 }
0x14ab   : > { %v6051_v48 = vpop.xlane.xlu0 %6050 }
0x14ac   : > { %v6093_v15 = vsub.f32 %v13678_v17, %v6051_v48 }
0x14ae   : > { %v6111_v37 = vmul.f32 1.442695, %v6093_v15 }
0x14af   : > { %v6045_v40 = vpop.xlane.xlu0 %6044 }
0x14b0   : > { %10578 = vpow2.f32 %v6111_v37  ;;  %v6091_v18 = vsub.f32 %v13683_v45, %v6045_v40 }
0x14b1   : > { %v6048_v52 = vpop.xlane.xlu1 %6047 }
0x14b2   : > { %v6107_v31 = vmul.f32 1.442695, %v6091_v18  ;;  %v6092_v62 = vsub.f32 %v13695_v25, %v6048_v52 }
0x14b3   : > { %v6054_v24 = vpop.xlane.xlu0 %6053 }
0x14b4   : > { %10580 = vpow2.f32 %v6107_v31  ;;  %v6094_v63 = vsub.f32 %v13692_v34, %v6054_v24  ;;  %v6109_v50 = vmul.f32 1.442695, %v6092_v62 }
0x14b6   : > { %v6113_v46 = vmul.f32 1.442695, %v6094_v63 }
0x14b8   : > { %10582 = vpow2.f32 %v6113_v46 }
0x14b9   : > { %10584 = vpow2.f32 %v6109_v50 }
0x14bd   : > { %v13781_v33 = vpop.eup %10578 }
0x14be   : > { %v6145_v17 = vsel %vm906_vm2, %v13781_v33, 0.0 }
0x14bf   : > { %v6063_v48 = vpop.xlane.xlu0 %6062  ;;  %6146 = vadd.xlane.f32.xlu0 %v6145_v17 }
0x14c0   : > { %v6097_v45 = vsub.f32 %v13710_v8, %v6063_v48 }
0x14c1   : > { %v13786_v15 = vpop.eup %10580 }
0x14c2   : > { %v6119_v25 = vmul.f32 1.442695, %v6097_v45  ;;  %v6139_v37 = vsel %vm906_vm2, %v13786_v15, 0.0 }
0x14c3   : > { %v6075_v24 = vpop.xlane.xlu0 %6074  ;;  %6140 = vadd.xlane.f32.xlu0 %v6139_v37  ;;  %v6066_v62 = vpop.xlane.xlu1 %6065 }
0x14c4   : > { %10586 = vpow2.f32 %v6119_v25  ;;  %v6101_v46 = vsub.f32 %v13713_v43, %v6075_v24 }
0x14c5   : > { %v13791_v34 = vpop.eup %10582 }
0x14c6   : > { %v6127_v40 = vmul.f32 1.442695, %v6101_v46  ;;  %v6148_v18 = vsel %vm906_vm2, %v13791_v34, 0.0  ;;  %v13795_v52 = vpop.eup %10584 }
0x14c7   : > { %v6057_v8 = vpop.xlane.xlu0 %6056  ;;  %6149 = vadd.xlane.f32.xlu1 %v6148_v18  ;;  %v6078_v31 = vpop.xlane.xlu1 %6077  ;;  %v6142_v17 = vsel %vm906_vm2, %v13795_v52, 0.0  ;;  %v6098_v18 = vsub.f32 %v13718_v5, %v6066_v62 }
0x14c8   : > { %10588 = vpow2.f32 %v6127_v40  ;;  %v6095_v63 = vsub.f32 %v13726_v55, %v6057_v8 }
0x14ca   : > { %v6115_v50 = vmul.f32 1.442695, %v6095_v63 }
0x14cb   : > { %v6230_v48 = vpop.permute.xlu0 %6229  ;;  %6143 = vadd.xlane.f32.xlu1 %v6142_v17  ;;  %v6060_v43 = vpop.xlane.xlu1 %6059  ;;  %v6102_v17 = vsub.f32 %v13723_v57, %v6078_v31 }
0x14cc   : > { %10590 = vpow2.f32 %v6115_v50  ;;  %9467 = vmatprep.subr.bf16.mxu1 %v6230_v48  ;;  %v6121_v50 = vmul.f32 1.442695, %v6098_v18 }
0x14cd   : > { %9468 = vmatpush3.bf16.msra.mxu1 %v6230_v48  ;;  %v6129_v0 = vmul.f32 1.442695, %v6102_v17 }
0x14cf   : > { %v6228_v45 = vpop.permute.xlu1 %6227 }
0x14d0   : > { %9469 = vmatprep.subr.bf16.mxu1 %v6228_v45 }
0x14d1   : > { %v13800_v25 = vpop.eup %10586  ;;  %9470 = vmatpush3.bf16.msra.mxu1 %v6228_v45 }
0x14d2   : > { %v6157_v37 = vsel %vm906_vm2, %v13800_v25, 0.0 }
0x14d3   : > { %6158 = vadd.xlane.f32.xlu0 %v6157_v37 }
0x14d5   : > { %v13804_v55 = vpop.eup %10588 }
0x14d6   : > { %v6169_v24 = vsel %vm906_vm2, %v13804_v55, 0.0 }
0x14d7   : > { %6170 = vadd.xlane.f32.xlu0 %v6169_v24 }
0x14d9   : > { %v13808_v46 = vpop.eup %10590 }
0x14da   : > { %v6151_v40 = vsel %vm906_vm2, %v13808_v46, 0.0 }
0x14db   : > { %6152 = vadd.xlane.f32.xlu0 %v6151_v40  ;;  %v6096_v40 = vsub.f32 %v13731_v56, %v6060_v43 }
0x14fc   : > { %v6069_v8 = vpop.xlane.xlu0 %6068 }
0x14fd   : > { %v6099_v63 = vsub.f32 %v13744_v44, %v6069_v8  ;;  %v6117_v44 = vmul.f32 1.442695, %v6096_v40 }
0x14ff   : > { %v6123_v48 = vmul.f32 1.442695, %v6099_v63 }
0x1500   : > { %v6087_v45 = vpop.xlane.xlu0 %6086  ;;  %v6072_v37 = vpop.xlane.xlu1 %6071 }
0x1501   : > { %10592 = vpow2.f32 %v6123_v48  ;;  %v6105_v24 = vsub.f32 %v13750_v38, %v6087_v45  ;;  %v6100_v29 = vsub.f32 %v13747_v12, %v6072_v37 }
0x1502   : > { %10594 = vpow2.f32 %v6121_v50 }
0x1503   : > { %v6125_v1 = vmul.f32 1.442695, %v6100_v29  ;;  %v6135_v5 = vmul.f32 1.442695, %v6105_v24 }
0x1504   : > { %v6081_v62 = vpop.xlane.xlu0 %6080  ;;  %v6090_v2 = vpop.xlane.xlu1 %6089 }
0x1505   : > { %10596 = vpow2.f32 %v6125_v1  ;;  %v6103_v57 = vsub.f32 %v13757_v13, %v6081_v62  ;;  %v6106_v56 = vsub.f32 %v13760_v41, %v6090_v2 }
0x1506   : > { %10598 = vpow2.f32 %v6129_v0 }
0x1507   : > { %10600 = vpow2.f32 %v6135_v5  ;;  %v6131_v12 = vmul.f32 1.442695, %v6103_v57  ;;  %v6137_v0 = vmul.f32 1.442695, %v6106_v56 }
0x1508   : > { %v6291_v31 = vpop.permute.xlu0 %6290  ;;  %v6084_v18 = vpop.xlane.xlu1 %6083  ;;  %10602 = vpow2.f32 %v6117_v44 }
0x1509   : > { %v6104_v38 = vsub.f32 %v13765_v21, %v6084_v18  ;;  %9475 = vmatprep.subr.bf16.mxu0 %v6291_v31  ;;  %v9784_v18 = vpack.i.bf16 %v12368_v7, %v12362_v36  ;;  %v15162_v36 = vld [vmem:[#allocation89_spill] sm:$0xff] }
0x150a   : > { %9476 = vmatpush3.bf16.msra.mxu0 %v6291_v31  ;;  %v9774_v31 = vpack.i.bf16 %v12048_v19, %v12042_v11  ;;  %v15161_v19 = vld [vmem:[#allocation91_spill] sm:$0xff] }
0x150b   : > { %v6133_v29 = vmul.f32 1.442695, %v6104_v38  ;;  %v9794_v38 = vpack.i.bf16 %v12688_v6, %v12682_v35  ;;  %v15163_v7 = vpack.i.bf16 %v15161_v19, %v15162_v36  ;;  %v15168_v35 = vld [vmem:[#allocation75_spill] sm:$0xff]  ;;  %v15169_v6 = vld [vmem:[#allocation74_spill] sm:$0xff]  ;;  %v15188_v19 = vld [vmem:[#allocation96_spill] sm:$0xff] }
0x150c   : > { %v6289_v43 = vpop.permute.xlu1 %6288 }
0x150d   : > { %10604 = vpow2.f32 %v6133_v29  ;;  %9477 = vmatprep.subr.bf16.mxu0 %v6289_v43  ;;  %v15170_v29 = vpack.i.bf16 %v15168_v35, %v15169_v6 }
0x150e   : > { %v13821_v1 = vpop.eup %10592  ;;  %9478 = vmatpush3.bf16.msra.mxu0 %v6289_v43  ;;  %10606 = vpow2.f32 %v6131_v12  ;;  %v15165_v12 = vld [vmem:[#allocation60_spill] sm:$0xff] }
0x150f   : > { %v6163_v13 = vsel %vm906_vm2, %v13821_v1, 0.0  ;;  %v13825_v8 = vpop.eup %10594  ;;  %10608 = vpow2.f32 %v6137_v0  ;;  %v15171_v0 = vpack.i.bf16 %v13649_v23, %v13643_v22  ;;  %v15179_v22 = vpack.i.bf16 %v13336_v16, %v13332_v49  ;;  %v15184_v49 = vld [vmem:[#allocation53_spill] sm:$0xff]  ;;  %v15185_v16 = vld [vmem:[#allocation51_spill] sm:$0xff] }
0x1510   : > { %6164 = vadd.xlane.f32.xlu1 %v6163_v13  ;;  %v6160_v2 = vsel %vm906_vm2, %v13825_v8, 0.0  ;;  %v15172_v13 = vld [vmem:[#allocation52_spill] sm:$0xff] }
0x1512   : > { %v13827_v21 = vpop.eup %10596 }
0x1513   : > { %v13831_v41 = vpop.eup %10598  ;;  %v6166_v63 = vsel %vm906_vm2, %v13827_v21, 0.0 }
0x1514   : > { %6161 = vadd.xlane.f32.xlu1 %v6160_v2  ;;  %v13835_v50 = vpop.eup %10600  ;;  %6167 = vadd.xlane.f32.xlu0 %v6166_v63  ;;  %v6172_v17 = vsel %vm906_vm2, %v13831_v41, 0.0  ;;  %v15173_v2 = vld [vmem:[#allocation55_spill] sm:$0xff] }
0x1515   : > { %v13839_v48 = vpop.eup %10602  ;;  %v6181_v45 = vsel %vm906_vm2, %v13835_v50, 0.0  ;;  %v9834_v63 = vpack.i.bf16 %v15173_v2, %v15172_v13 }
0x1516   : > { %v6154_v24 = vsel %vm906_vm2, %v13839_v48, 0.0 }
0x1518   : > { %6173 = vadd.xlane.f32.xlu1 %v6172_v17  ;;  %6182 = vadd.xlane.f32.xlu0 %v6181_v45  ;;  %v15174_v17 = vld [vmem:[#allocation90_spill] sm:$0xff]  ;;  %v15175_v45 = vld [vmem:[#allocation88_spill] sm:$0xff] }
0x151a   : > { %v13843_v37 = vpop.eup %10604 }
0x151b   : > { %v6178_v40 = vsel %vm906_vm2, %v13843_v37, 0.0  ;;  %v13849_v5 = vpop.eup %10606 }
0x151c   : > { %6155 = vadd.xlane.f32.xlu1 %v6154_v24  ;;  %6179 = vadd.xlane.f32.xlu0 %v6178_v40  ;;  %v6175_v62 = vsel %vm906_vm2, %v13849_v5, 0.0  ;;  %v13853_v44 = vpop.eup %10608  ;;  %v15176_v24 = vpack.i.bf16 %v15174_v17, %v15175_v45  ;;  %v15177_v40 = vld [vmem:[#allocation66_spill] sm:$0xff] }
0x151d   : > { %v6184_v57 = vsel %vm906_vm2, %v13853_v44, 0.0 }
0x1520   : > { %6176 = vadd.xlane.f32.xlu1 %v6175_v62  ;;  %v15178_v62 = vld [vmem:[#allocation69_spill] sm:$0xff] }
0x1524   : > { %6185 = vadd.xlane.f32.xlu1 %v6184_v57  ;;  %v9844_v57 = vpack.i.bf16 %v15178_v62, %v15177_v40  ;;  %v15202_v62 = vld [vmem:[#allocation98_spill] sm:$0xff] }
0x1532   : > { %6351 = vrot.lane.b32.xlu0 %v11463_v26, %s10883_s26  ;;  %v15158_v26 = vld [vmem:[#allocation47_spill] sm:$0xff] }
0x1535   : > { %6349 = vrot.lane.b32.xlu1 %v11655_v53, %s10883_s26  ;;  %v15159_v53 = vld [vmem:[#allocation46_spill] sm:$0xff] }
0x1536   : > { %9775 = vrot.lane.b32.xlu0 %v9774_v31, %s10882_s25  ;;  %v15160_v11 = vpack.i.bf16 %v15158_v26, %v15159_v53  ;;  %v15180_v31 = vpack.i.bf16 %v13645_v28, %v13641_v39  ;;  %v15186_v53 = vpack.i.bf16 %v15184_v49, %v15185_v16  ;;  %v15212_v49 = vpack.i.bf16 %v13669_v61, %v13657_v30  ;;  %v15213_v16 = vld [vmem:[#allocation50_spill] sm:$0xff] }
0x1539   : > { %6412 = vrot.lane.b32.xlu1 %v11427_v47, %s10883_s26  ;;  %v15164_v47 = vld [vmem:[#allocation61_spill] sm:$0xff] }
0x153a   : > { %9785 = vrot.lane.b32.xlu0 %v9784_v18, %s10880_s23  ;;  %v15166_v56 = vpack.i.bf16 %v15164_v47, %v15165_v12  ;;  %v15181_v18 = vld [vmem:[#allocation82_spill] sm:$0xff]  ;;  %v15191_v47 = vld [vmem:[#allocation64_spill] sm:$0xff]  ;;  %v15193_v12 = vld [vmem:[#allocation111_spill] sm:$0xff] }
0x153d   : > { %6410 = vrot.lane.b32.xlu1 %v11688_v20, %s10883_s26  ;;  %v15167_v20 = vpack.i.bf16 %v13340_v58, %v13334_v10 }
0x153e   : > { %9795 = vrot.lane.b32.xlu0 %v9794_v38, %s10878_s21  ;;  %v15182_v38 = vld [vmem:[#allocation80_spill] sm:$0xff] }
0x153f   : > { %v15183_v26 = vpack.i.bf16 %v15181_v18, %v15182_v38  ;;  %v15210_v18 = vld [vmem:[#allocation77_spill] sm:$0xff]  ;;  %v15211_v38 = vld [vmem:[#allocation83_spill] sm:$0xff] }
0x1541   : > { %9780 = vrot.lane.b32.xlu1 %v15160_v11, %s10882_s25  ;;  %v15187_v11 = vld [vmem:[#allocation99_spill] sm:$0xff] }
0x1542   : > { %9805 = vrot.lane.b32.xlu0 %v15163_v7, %s10876_s19  ;;  %v15189_v36 = vpack.i.bf16 %v15187_v11, %v15188_v19  ;;  %v15190_v7 = vld [vmem:[#allocation67_spill] sm:$0xff]  ;;  %v15216_v19 = vld [vmem:[#allocation65_spill] sm:$0xff] }
0x1543   : > { %v15192_v39 = vpack.i.bf16 %v15190_v7, %v15191_v47  ;;  %v15219_v47 = vld [vmem:[#allocation79_spill] sm:$0xff] }
0x1545   : > { %9790 = vrot.lane.b32.xlu1 %v15166_v56, %s10880_s23  ;;  %v15194_v56 = vld [vmem:[#allocation108_spill] sm:$0xff] }
0x1546   : > { %9815 = vrot.lane.b32.xlu0 %v15167_v20, %s10874_s17  ;;  %v15195_v20 = vpack.i.bf16 %v15193_v12, %v15194_v56 }
0x1548   : > { %v6147_v43 = vpop.xlane.xlu0 %6146 }
0x1549   : > { %9800 = vrot.lane.b32.xlu1 %v15170_v29, %s10878_s21  ;;  %v15196_v29 = vld [vmem:[#allocation81_spill] sm:$0xff] }
0x154a   : > { %9825 = vrot.lane.b32.xlu0 %v15171_v0, %s10872_s1 }
0x154c   : > { %v6141_v10 = vpop.xlane.xlu0 %6140 }
0x154d   : > { %9810 = vrot.lane.b32.xlu1 %v15176_v24, %s10876_s19 }
0x154e   : > { %9835 = vrot.lane.b32.xlu0 %v9834_v63, %s10882_s25  ;;  %v15199_v63 = vpack.i.bf16 %v13673_v60, %v13663_v54  ;;  %v15205_v54 = vld [vmem:[#allocation63_spill] sm:$0xff]  ;;  %v15206_v60 = vld [vmem:[#allocation68_spill] sm:$0xff] }
0x1550   : > { %v6150_v58 = vpop.xlane.xlu1 %6149 }
0x1551   : > { %9820 = vrot.lane.b32.xlu1 %v15179_v22, %s10874_s17  ;;  %10610 = vrcp.f32 %v6150_v58  ;;  %v15201_v58 = vld [vmem:[#allocation54_spill] sm:$0xff] }
0x1552   : > { %10612 = vrcp.f32 %v6141_v10  ;;  %9845 = vrot.lane.b32.xlu0 %v9844_v57, %s10880_s23  ;;  %v15200_v10 = vld [vmem:[#allocation49_spill] sm:$0xff]  ;;  %v15203_v57 = vld [vmem:[#allocation94_spill] sm:$0xff] }
0x1553   : > { %10614 = vrcp.f32 %v6147_v43  ;;  %v15197_v43 = vld [vmem:[#allocation78_spill] sm:$0xff]  ;;  %v9894_v40 = vpack.i.bf16 %v15201_v58, %v15200_v10  ;;  %v15204_v22 = vpack.i.bf16 %v15202_v62, %v15203_v57 }
0x1554   : > { %v6144_v23 = vpop.xlane.xlu1 %6143  ;;  %v15198_v0 = vpack.i.bf16 %v15196_v29, %v15197_v43 }
0x1555   : > { %10616 = vrcp.f32 %v6144_v23  ;;  %9830 = vrot.lane.b32.xlu1 %v15180_v31, %s10872_s1 }
0x1556   : > { %9855 = vrot.lane.b32.xlu0 %v15183_v26, %s10878_s21  ;;  %v9914_v26 = vpack.i.bf16 %v15211_v38, %v15210_v18 }
0x1559   : > { %9840 = vrot.lane.b32.xlu1 %v15186_v53, %s10882_s25  ;;  %v15214_v53 = vld [vmem:[#allocation48_spill] sm:$0xff] }
0x155a   : > { %9865 = vrot.lane.b32.xlu0 %v15189_v36, %s10876_s19  ;;  %v15215_v11 = vpack.i.bf16 %v15213_v16, %v15214_v53  ;;  %v15217_v36 = vld [vmem:[#allocation62_spill] sm:$0xff] }
0x155b   : > { %v15218_v7 = vpack.i.bf16 %v15216_v19, %v15217_v36 }
0x155c   : > { %v6159_v12 = vpop.xlane.xlu0 %6158 }
0x155d   : > { %9850 = vrot.lane.b32.xlu1 %v15192_v39, %s10880_s23  ;;  %v15220_v39 = vld [vmem:[#allocation76_spill] sm:$0xff] }
0x155e   : > { %v10611_v28 = vpop.eup %10610  ;;  %9875 = vrot.lane.b32.xlu0 %v15195_v20, %s10874_s17 }
0x155f   : > { %v10613_v35 = vpop.eup %10612  ;;  %v6206_v2 = vmul.f32 %v10611_v28, %v13791_v34  ;;  %v15221_v28 = vpack.i.bf16 %v15219_v47, %v15220_v39 }
0x1560   : > { %v10615_v6 = vpop.eup %10614  ;;  %v6203_v17 = vmul.f32 %v10613_v35, %v13786_v15  ;;  %v9904_v15 = vpack.i.bf16 %v15206_v60, %v15205_v54  ;;  %v6171_v30 = vpop.xlane.xlu0 %6170 }
0x1561   : > { %9860 = vrot.lane.b32.xlu1 %v15198_v0, %s10878_s21  ;;  %v6205_v24 = vmul.f32 %v10615_v6, %v13781_v33  ;;  %v15207_v33 = vld [vmem:[#allocation110_spill] sm:$0xff] }
0x1562   : > { %v10617_v13 = vpop.eup %10616  ;;  %9885 = vrot.lane.b32.xlu0 %v15199_v63, %s10872_s1 }
0x1563   : > { %v6204_v45 = vmul.f32 %v10617_v13, %v13795_v52  ;;  %v6220_v23 = vpack.c.bf16 %v6206_v2, %v6205_v24  ;;  %v15208_v52 = vld [vmem:[#allocation106_spill] sm:$0xff] }
0x1564   : > { %v15209_v31 = vpack.i.bf16 %v15207_v33, %v15208_v52  ;;  %v6153_v56 = vpop.xlane.xlu0 %6152 }
0x1565   : > { %9870 = vrot.lane.b32.xlu1 %v15204_v22, %s10876_s19  ;;  %v6219_v34 = vpack.c.bf16 %v6204_v45, %v6203_v17 }
0x1566   : > { %9895 = vrot.lane.b32.xlu0 %v9894_v40, %s10882_s25 }
0x1567   : > { %9471 = vmatprep.mubr.msk.bf16.mxu1 %vm906_vm2, %v6219_v34 }
0x1568   : > { %9472 = vmatmul.mubr.msk.bf16.vlgmr.msra.gmra.mxu1 %vm906_vm2, %v6220_v23 }
0x1569   : > { %9880 = vrot.lane.b32.xlu1 %v15209_v31, %s10874_s17 }
0x156a   : > { %9905 = vrot.lane.b32.xlu0 %v9904_v15, %s10880_s23 }
0x156d   : > { %9890 = vrot.lane.b32.xlu1 %v15212_v49, %s10872_s1 }
0x156e   : > { %9915 = vrot.lane.b32.xlu0 %v9914_v26, %s10878_s21 }
0x1571   : > { %9900 = vrot.lane.b32.xlu1 %v15215_v11, %s10882_s25 }
0x1575   : > { %9910 = vrot.lane.b32.xlu1 %v15218_v7, %s10880_s23 }
0x1579   : > { %9920 = vrot.lane.b32.xlu1 %v15221_v28, %s10878_s21 }
0x1599   : > { %v6165_v61 = vpop.xlane.xlu1 %6164 }
0x159a   : > { %10618 = vrcp.f32 %v6165_v61 }
0x159d   : > { %v6162_v20 = vpop.xlane.xlu1 %6161  ;;  %v6168_v35 = vpop.xlane.xlu0 %6167 }
0x159e   : > { %10620 = vrcp.f32 %v6168_v35 }
0x159f   : > { %10622 = vrcp.f32 %v6171_v30  ;;  %v15222_v30 = vmov 0  }
0x15a1   : > { %v6174_v6 = vpop.xlane.xlu1 %6173  ;;  %v6183_v29 = vpop.xlane.xlu0 %6182 }
0x15a2   : > { %10624 = vrcp.f32 %v6174_v6 }
0x15a3   : > { %10626 = vrcp.f32 %v6162_v20 }
0x15a4   : > { %10628 = vrcp.f32 %v6153_v56 }
0x15a5   : > { %10630 = vrcp.f32 %v6159_v12  ;;  %v6156_v43 = vpop.xlane.xlu1 %6155  ;;  %v6180_v0 = vpop.xlane.xlu0 %6179 }
0x15a6   : > { %10632 = vrcp.f32 %v6156_v43  ;;  %v15223_v43 = vld [vmem:[#allocation41_spill] sm:$0xff] }
0x15a7   : > { %10634 = vrcp.f32 %v6180_v0  ;;  %v10619_v2 = vpop.eup %10618 }
0x15a8   : > { %v6211_v24 = vmul.f32 %v10619_v2, %v13821_v1 }
0x15a9   : > { %v6177_v13 = vpop.xlane.xlu1 %6176  ;;  %v6352_v63 = vpop.permute.xlu0 %6351 }
0x15aa   : > { %10636 = vrcp.f32 %v6177_v13  ;;  %9483 = vmatprep.subr.bf16.mxu1 %v6352_v63  ;;  %v15224_v13 = vld [vmem:[#allocation39_spill] sm:$0xff] }
0x15ab   : > { %v10621_v17 = vpop.eup %10620  ;;  %10638 = vrcp.f32 %v6183_v29  ;;  %9484 = vmatpush3.bf16.msra.mxu1 %v6352_v63 }
0x15ac   : > { %v6212_v10 = vmul.f32 %v10621_v17, %v13827_v21  ;;  %v10623_v58 = vpop.eup %10622 }
0x15ad   : > { %v6186_v45 = vpop.xlane.xlu1 %6185  ;;  %v13985_v40 = vpop.permute.xlu0 %9775  ;;  %v6213_v15 = vmul.f32 %v10623_v58, %v13804_v55 }
0x15ae   : > { %10640 = vrcp.f32 %v6186_v45  ;;  %v6223_v57 = vpack.c.bf16 %v6212_v10, %v6211_v24 }
0x15af   : > { %v10625_v62 = vpop.eup %10624 }
0x15b0   : > { %v10627_v22 = vpop.eup %10626  ;;  %v6214_v34 = vmul.f32 %v10625_v62, %v13831_v41  ;;  %9487 = vmatprep.mubr.msk.bf16.mxu1 %vm906_vm2, %v6223_v57 }
0x15b1   : > { %v10629_v23 = vpop.eup %10628  ;;  %v6350_v54 = vpop.permute.xlu1 %6349  ;;  %v6210_v21 = vmul.f32 %v10627_v22, %v13825_v8 }
0x15b2   : > { %v10631_v60 = vpop.eup %10630  ;;  %v13990_v33 = vpop.permute.xlu0 %9785  ;;  %9485 = vmatprep.subr.bf16.mxu1 %v6350_v54  ;;  %v6224_v52 = vpack.c.bf16 %v6214_v34, %v6213_v15  ;;  %v6207_v31 = vmul.f32 %v10629_v23, %v13808_v46 }
0x15b3   : > { %v10633_v1 = vpop.eup %10632  ;;  %9486 = vmatpush3.bf16.msra.mxu1 %v6350_v54  ;;  %v6209_v38 = vmul.f32 %v10631_v60, %v13800_v25 }
0x15b4   : > { %v6208_v18 = vmul.f32 %v10633_v1, %v13839_v48  ;;  %v10635_v41 = vpop.eup %10634 }
0x15b5   : > { %v6413_v26 = vpop.permute.xlu1 %6412  ;;  %v6222_v53 = vpack.c.bf16 %v6210_v21, %v6209_v38  ;;  %v6216_v46 = vmul.f32 %v10635_v41, %v13843_v37 }
0x15b6   : > { %v13996_v49 = vpop.permute.xlu0 %9795  ;;  %9488 = vmatmul.mubr.msk.bf16.vlgmr.msra.gmra.mxu1 %vm906_vm2, %v6224_v52  ;;  %9491 = vmatprep.subr.bf16.mxu0 %v6413_v26  ;;  %v6221_v55 = vpack.c.bf16 %v6208_v18, %v6207_v31 }
0x15b7   : > { %v10637_v16 = vpop.eup %10636 }
0x15b8   : > { %9479 = vmatprep.mubr.msk.bf16.mxu0 %vm906_vm2, %v6221_v55  ;;  %v6215_v8 = vmul.f32 %v10637_v16, %v13849_v5  ;;  %v10639_v11 = vpop.eup %10638 }
0x15b9   : > { %9480 = vmatmul.mubr.msk.bf16.vlgmr.msra.gmra.mxu0 %vm906_vm2, %v6222_v53  ;;  %v6411_v48 = vpop.permute.xlu1 %6410  ;;  %v6217_v7 = vmul.f32 %v10639_v11, %v13835_v50 }
0x15ba   : > { %v14003_v25 = vpop.permute.xlu0 %9805  ;;  %9492 = vmatpush3.bf16.msra.mxu0 %v6413_v26  ;;  %v6225_v19 = vpack.c.bf16 %v6216_v46, %v6215_v8  ;;  %v15225_v46 = vld [vmem:[#allocation40_spill] sm:$0xff] }
0x15bb   : > { %v10641_v36 = vpop.eup %10640  ;;  %9493 = vmatprep.subr.bf16.mxu0 %v6411_v48 }
0x15bc   : > { %v6218_v47 = vmul.f32 %v10641_v36, %v13853_v44  ;;  %9495 = vmatprep.mubr.msk.bf16.mxu0 %vm906_vm2, %v6225_v19 }
0x15bd   : > { %v14008_v39 = vpop.permute.xlu1 %9780 }
0x15be   : > { %v6226_v5 = vpack.c.bf16 %v6218_v47, %v6217_v7  ;;  %v14010_v37 = vpop.permute.xlu0 %9815  ;;  %9494 = vmatpush3.bf16.msra.mxu0 %v6411_v48  ;;  %v15226_v48 = vld [vmem:[#allocation38_spill] sm:$0xff] }
0x15c1   : > { %9496 = vmatmul.mubr.msk.bf16.vlgmr.msra.gmra.mxu0 %vm906_vm2, %v6226_v5  ;;  %v14013_v28 = vpop.permute.xlu1 %9790 }
0x15c2   : > { %v14015_v12 = vpop.permute.xlu0 %9825  ;;  %7572 = vmatprep.mubr.bf16.mxu0 %v15222_v30 }
0x15c5   : > { %v14018_v61 = vpop.permute.xlu1 %9800 }
0x15c6   : > { %v9836_v50 = vpop.permute.xlu0 %9835 }
0x15c7   : > { %v9838_v44 = vunpack.i.h.bf16 %v9836_v50  ;;  %v9837_v56 = vunpack.i.l.bf16 %v9836_v50 }
0x15c9   : > { %v14020_v20 = vpop.permute.xlu1 %9810  ;;  %v6924_v0 = vsel %vm611_vm1, %v15223_v43, %v9838_v44  ;;  %v6923_v2 = vsel %vm611_vm1, %v15224_v13, %v9837_v56 }
0x15ca   : > { %v9846_v35 = vpop.permute.xlu0 %9845 }
0x15cb   : > { %v9848_v6 = vunpack.i.h.bf16 %v9846_v35  ;;  %v9847_v29 = vunpack.i.l.bf16 %v9846_v35 }
0x15cd   : > { %v6940_v63 = vsel %vm6935_vm3, %v6923_v2, %v9847_v29  ;;  %v6941_v17 = vsel %vm6935_vm3, %v6924_v0, %v9848_v6  ;;  %v14028_v45 = vpop.permute.xlu1 %9820 }
0x15ce   : > { %v9856_v24 = vpop.permute.xlu0 %9855 }
0x15cf   : > { %v9858_v10 = vunpack.i.h.bf16 %v9856_v24  ;;  %v9857_v58 = vunpack.i.l.bf16 %v9856_v24 }
0x15d1   : > { %v6957_v62 = vsel %vm6952_vm4, %v6940_v63, %v9857_v58  ;;  %v6958_v57 = vsel %vm6952_vm4, %v6941_v17, %v9858_v10  ;;  %v14032_v22 = vpop.permute.xlu1 %9830 }
0x15d2   : > { %v9866_v34 = vpop.permute.xlu0 %9865 }
0x15d3   : > { %v9868_v23 = vunpack.i.h.bf16 %v9866_v34  ;;  %v9867_v54 = vunpack.i.l.bf16 %v9866_v34 }
0x15d5   : > { %v6973_v60 = vsel %vm906_vm2, %v6957_v62, %v9867_v54  ;;  %v6974_v15 = vsel %vm906_vm2, %v6958_v57, %v9868_v23  ;;  %v9841_v1 = vpop.permute.xlu1 %9840  ;;  %v15227_v57 = vld [vmem:[#allocation37_spill] sm:$0xff]  ;;  %v15228_v23 = vld [vmem:[#allocation35_spill] sm:$0xff] }
0x15d6   : > { %v9876_v21 = vpop.permute.xlu0 %9875  ;;  %v9843_v18 = vunpack.i.h.bf16 %v9841_v1  ;;  %v9842_v41 = vunpack.i.l.bf16 %v9841_v1 }
0x15d7   : > { %v9878_v52 = vunpack.i.h.bf16 %v9876_v21  ;;  %v9877_v31 = vunpack.i.l.bf16 %v9876_v21 }
0x15d8   : > { %v6926_v11 = vsel %vm611_vm1, %v15225_v46, %v9843_v18  ;;  %v6925_v19 = vsel %vm611_vm1, %v15226_v48, %v9842_v41 }
0x15d9   : > { %v6990_v38 = vsel %vm6985_vm5, %v6973_v60, %v9877_v31  ;;  %v6991_v26 = vsel %vm6985_vm5, %v6974_v15, %v9878_v52  ;;  %v9851_v55 = vpop.permute.xlu1 %9850 }
0x15da   : > { %v9886_v16 = vpop.permute.xlu0 %9885  ;;  %v9853_v53 = vunpack.i.h.bf16 %v9851_v55  ;;  %v9852_v8 = vunpack.i.l.bf16 %v9851_v55 }
0x15db   : > { %v9888_v36 = vunpack.i.h.bf16 %v9886_v16  ;;  %v9887_v7 = vunpack.i.l.bf16 %v9886_v16 }
0x15dc   : > { %v6942_v47 = vsel %vm6935_vm3, %v6925_v19, %v9852_v8  ;;  %v6943_v5 = vsel %vm6935_vm3, %v6926_v11, %v9853_v53 }
0x15dd   : > { %v14045_v50 = vsel %vm7002_vm6, %v6990_v38, %v9887_v7  ;;  %v14048_v44 = vsel %vm7002_vm6, %v6991_v26, %v9888_v36  ;;  %v9861_v56 = vpop.permute.xlu1 %9860 }
0x15de   : > { %v9896_v35 = vpop.permute.xlu0 %9895  ;;  %v9863_v6 = vunpack.i.h.bf16 %v9861_v56  ;;  %v9862_v29 = vunpack.i.l.bf16 %v9861_v56  ;;  %v15230_v56 = vld [vmem:[#allocation34_spill] sm:$0xff] }
0x15df   : > { %v9898_v43 = vunpack.i.h.bf16 %v9896_v35  ;;  %v9897_v0 = vunpack.i.l.bf16 %v9896_v35 }
0x15e0   : > { %v6959_v13 = vsel %vm6952_vm4, %v6942_v47, %v9862_v29  ;;  %v6960_v2 = vsel %vm6952_vm4, %v6943_v5, %v9863_v6  ;;  %v15229_v47 = vld [vmem:[#allocation36_spill] sm:$0xff] }
0x15e1   : > { %v9871_v63 = vpop.permute.xlu1 %9870  ;;  %v6928_v34 = vsel %vm611_vm1, %v15227_v57, %v9898_v43  ;;  %v6927_v54 = vsel %vm611_vm1, %v15228_v23, %v9897_v0  ;;  %v10066_v43 = vld [vmem:[%s97_s13 + $0x18] sm:$0xff]   ;;  %v10067_v0 = vld [vmem:[%s97_s13 + $0x10] sm:$0xff]  }
0x15e2   : > { %v9906_v17 = vpop.permute.xlu0 %9905  ;;  %v9873_v24 = vunpack.i.h.bf16 %v9871_v63  ;;  %v9872_v10 = vunpack.i.l.bf16 %v9871_v63  ;;  %9499 = vmatprep.subr.bf16.mxu1 %v10066_v43  ;;  %v15231_v57 = vld [vmem:[#allocation95_spill] sm:$0xff] }
0x15e3   : > { %v9908_v58 = vunpack.i.h.bf16 %v9906_v17  ;;  %v9907_v62 = vunpack.i.l.bf16 %v9906_v17  ;;  %9500 = vmatpush3.bf16.msra.mxu1 %v10066_v43 }
0x15e4   : > { %v6975_v60 = vsel %vm906_vm2, %v6959_v13, %v9872_v10  ;;  %v6976_v15 = vsel %vm906_vm2, %v6960_v2, %v9873_v24  ;;  %9501 = vmatprep.subr.bf16.mxu1 %v10067_v0  ;;  %v10068_v13 = vld [vmem:[%s97_s13 + $0x8] sm:$0xff]   ;;  %v10069_v2 = vld [vmem:[%s97_s13] sm:$0xff]  }
0x15e5   : > { %v14059_v1 = vsel %vm6935_vm3, %v6927_v54, %v9907_v62  ;;  %v14062_v21 = vsel %vm6935_vm3, %v6928_v34, %v9908_v58  ;;  %v9881_v52 = vpop.permute.xlu1 %9880  ;;  %v15232_v34 = vld [vmem:[#allocation92_spill] sm:$0xff]  ;;  %v15234_v54 = vld [vmem:[#allocation97_spill] sm:$0xff] }
0x15e6   : > { %v9883_v31 = vunpack.i.h.bf16 %v9881_v52  ;;  %v9882_v18 = vunpack.i.l.bf16 %v9881_v52  ;;  %v15233_v23 = vpack.i.bf16 %v15231_v57, %v15232_v34  ;;  %v15237_v52 = vld [vmem:[#allocation107_spill] sm:$0xff]  ;;  %v15256_v57 = vld [vmem:[#allocation85_spill] sm:$0xff] }
0x15e7   : > { %9502 = vmatpush3.bf16.msra.mxu1 %v10067_v0 }
0x15e8   : > { %v6992_v41 = vsel %vm6985_vm5, %v6975_v60, %v9882_v18  ;;  %v6993_v38 = vsel %vm6985_vm5, %v6976_v15, %v9883_v31  ;;  %9503 = vmatprep.subr.bf16.mxu1 %v10068_v13  ;;  %v15235_v60 = vld [vmem:[#allocation93_spill] sm:$0xff]  ;;  %v15238_v31 = vld [vmem:[#allocation104_spill] sm:$0xff] }
0x15e9   : > { %v9891_v26 = vpop.permute.xlu1 %9890  ;;  %v15236_v15 = vpack.i.bf16 %v15234_v54, %v15235_v60  ;;  %v15239_v18 = vpack.i.bf16 %v15237_v52, %v15238_v31  ;;  %v15258_v54 = vld [vmem:[#allocation86_spill] sm:$0xff]  ;;  %v15259_v60 = vld [vmem:[#allocation84_spill] sm:$0xff] }
0x15ea   : > { %v9893_v55 = vunpack.i.h.bf16 %v9891_v26  ;;  %v9892_v16 = vunpack.i.l.bf16 %v9891_v26  ;;  %v15261_v31 = vld [vmem:[#allocation102_spill] sm:$0xff] }
0x15eb   : > { %9504 = vmatpush3.bf16.msra.mxu1 %v10068_v13  ;;  %v15249_v13 = vld [vmem:[#allocation58_spill] sm:$0xff] }
0x15ec   : > { %v14067_v53 = vsel %vm7002_vm6, %v6992_v41, %v9892_v16  ;;  %v14070_v8 = vsel %vm7002_vm6, %v6993_v38, %v9893_v55  ;;  %9505 = vmatprep.subr.bf16.mxu1 %v10069_v2  ;;  %v15240_v41 = vld [vmem:[#allocation109_spill] sm:$0xff]  ;;  %v15243_v55 = vpack.i.bf16 %v13659_v4, %v13653_v42  ;;  %v15244_v16 = vpack.i.bf16 %v13665_v32, %v13655_v51  ;;  %v15246_v4 = vld [vmem:[#allocation59_spill] sm:$0xff] }
0x15ed   : > { %v9901_v46 = vpop.permute.xlu1 %9900  ;;  %v15241_v38 = vld [vmem:[#allocation105_spill] sm:$0xff]  ;;  %v15247_v51 = vld [vmem:[#allocation71_spill] sm:$0xff] }
0x15ee   : > { %v9903_v11 = vunpack.i.h.bf16 %v9901_v46  ;;  %v9902_v48 = vunpack.i.l.bf16 %v9901_v46  ;;  %v15242_v26 = vpack.i.bf16 %v15240_v41, %v15241_v38  ;;  %v15245_v42 = vld [vmem:[#allocation57_spill] sm:$0xff]  ;;  %v9778_v38 = vunpack.i.h.bf16 %v13985_v40 }
0x15ef   : > { %9506 = vmatpush3.bf16.msra.mxu1 %v10069_v2  ;;  %v9979_v43 = vpack.i.bf16 %v15246_v4, %v15245_v42  ;;  %v15248_v32 = vld [vmem:[#allocation73_spill] sm:$0xff]  ;;  %v15250_v2 = vld [vmem:[#allocation56_spill] sm:$0xff]  ;;  %v15271_v4 = vld [vmem:[#allocation31_spill] sm:$0xff] }
0x15f0   : > { %v6930_v5 = vsel %vm611_vm1, %v15229_v47, %v9903_v11  ;;  %v6929_v35 = vsel %vm611_vm1, %v15230_v56, %v9902_v48  ;;  %v9989_v0 = vpack.i.bf16 %v15248_v32, %v15247_v51  ;;  %v15270_v42 = vld [vmem:[#allocation33_spill] sm:$0xff] }
0x15f1   : > { %v9911_v19 = vpop.permute.xlu1 %9910 }
0x15f2   : > { %v9913_v36 = vunpack.i.h.bf16 %v9911_v19  ;;  %v9912_v7 = vunpack.i.l.bf16 %v9911_v19 }
0x15f4   : > { %v14077_v6 = vsel %vm6935_vm3, %v6929_v35, %v9912_v7  ;;  %v14080_v29 = vsel %vm6935_vm3, %v6930_v5, %v9913_v36 }
0x1628   : > { %v9473_v63 = vpop.f32.mrf.mxu1 }
0x162a   : > { %v6273_v17 = vpop.f32.mrf.mxu1 }
0x162c   : > { %v9474_v24 = vpop.f32.mrf.mxu1 }
0x162d   : > { %v9924_v10 = vpack.i.bf16 %v9474_v24, %v9473_v63  ;;  %v15251_v63 = vpack.i.bf16 %v15249_v13, %v15250_v2  ;;  %v15253_v24 = vld [vmem:[#allocation70_spill] sm:$0xff]  ;;  %v15272_v13 = vld [vmem:[#allocation115_spill] sm:$0xff]  ;;  %v15273_v2 = vld [vmem:[#allocation113_spill] sm:$0xff] }
0x162e   : > { %v6276_v58 = vpop.f32.mrf.mxu1 }
0x162f   : > { %v9929_v62 = vpack.i.bf16 %v6276_v58, %v6273_v17  ;;  %9925 = vrot.lane.b32.xlu1 %v9924_v10, %s10870_s14  ;;  %v15252_v17 = vld [vmem:[#allocation72_spill] sm:$0xff] }
0x1630   : > { %v15254_v10 = vpack.i.bf16 %v15252_v17, %v15253_v24 }
0x1631   : > { %9930 = vrot.lane.b32.xlu0 %v9929_v62, %s10870_s14  ;;  %v15255_v62 = vld [vmem:[#allocation87_spill] sm:$0xff] }
0x1632   : > { %v15257_v34 = vpack.i.bf16 %v15255_v62, %v15256_v57 }
0x1633   : > { %9940 = vrot.lane.b32.xlu1 %v15233_v23, %s10876_s19 }
0x1635   : > { %9935 = vrot.lane.b32.xlu0 %v15236_v15, %s10876_s19  ;;  %v15260_v15 = vpack.i.bf16 %v15258_v54, %v15259_v60  ;;  %v9817_v54 = vunpack.i.l.bf16 %v14010_v37  ;;  %v9803_v60 = vunpack.i.h.bf16 %v14018_v61 }
0x1637   : > { %9950 = vrot.lane.b32.xlu1 %v15239_v18, %s10874_s17  ;;  %v15262_v18 = vld [vmem:[#allocation100_spill] sm:$0xff] }
0x1638   : > { %v15263_v41 = vpack.i.bf16 %v15261_v31, %v15262_v18  ;;  %v15276_v18 = vld [vmem:[#allocation32_spill] sm:$0xff] }
0x1639   : > { %9945 = vrot.lane.b32.xlu0 %v15242_v26, %s10874_s17  ;;  %v9777_v26 = vunpack.i.l.bf16 %v13985_v40  ;;  %v15267_v40 = vld [vmem:[#allocation114_spill] sm:$0xff] }
0x163b   : > { %9960 = vrot.lane.b32.xlu1 %v15243_v55, %s10872_s1 }
0x163d   : > { %9955 = vrot.lane.b32.xlu0 %v15244_v16, %s10872_s1  ;;  %v9788_v16 = vunpack.i.h.bf16 %v13990_v33 }
0x1676   : > { %v9489_v46 = vpop.f32.mrf.mxu1 }
0x1678   : > { %v6395_v48 = vpop.f32.mrf.mxu1 }
0x1679   : > { %v9481_v11 = vpop.f32.mrf.mxu0 }
0x167a   : > { %v9490_v47 = vpop.f32.mrf.mxu1 }
0x167b   : > { %v6334_v19 = vpop.f32.mrf.mxu0  ;;  %v9969_v35 = vpack.i.bf16 %v9490_v47, %v9489_v46  ;;  %v9787_v46 = vunpack.i.l.bf16 %v13990_v33  ;;  %v9808_v47 = vunpack.i.h.bf16 %v14003_v25  ;;  %v6920_v33 = vsel %vm611_vm1, %v15270_v42, %v9778_v38  ;;  %v15277_v38 = vld [vmem:[#allocation30_spill] sm:$0xff] }
0x167c   : > { %v6398_v58 = vpop.f32.mrf.mxu1 }
0x167d   : > { %v9482_v36 = vpop.f32.mrf.mxu0  ;;  %v10009_v23 = vpack.i.bf16 %v6398_v58, %v6395_v48  ;;  %v15265_v48 = vld [vmem:[#allocation101_spill] sm:$0xff]  ;;  %v9792_v58 = vunpack.i.l.bf16 %v14013_v28 }
0x167e   : > { %v9964_v7 = vpack.i.bf16 %v9482_v36, %v9481_v11  ;;  %v15264_v11 = vld [vmem:[#allocation103_spill] sm:$0xff]  ;;  %v9798_v36 = vunpack.i.h.bf16 %v13996_v49 }
0x167f   : > { %v6337_v5 = vpop.f32.mrf.mxu0 }
0x1680   : > { %v9974_v56 = vpack.i.bf16 %v6337_v5, %v6334_v19  ;;  %9965 = vrot.lane.b32.xlu1 %v9964_v7, %s10870_s14  ;;  %v15266_v19 = vpack.i.bf16 %v15264_v11, %v15265_v48  ;;  %v9797_v7 = vunpack.i.l.bf16 %v13996_v49  ;;  %v9807_v5 = vunpack.i.l.bf16 %v14003_v25  ;;  %v14198_v48 = vpop.permute.xlu0 %9915 }
0x1681   : > { %v9497_v52 = vpop.f32.mrf.mxu0  ;;  %v6937_v49 = vsel %vm6935_vm3, %v6920_v33, %v9788_v16  ;;  %v9782_v25 = vunpack.i.l.bf16 %v14008_v39  ;;  %v9813_v16 = vunpack.i.h.bf16 %v14020_v20  ;;  %v9822_v11 = vunpack.i.l.bf16 %v14028_v45 }
0x1682   : > { %9975 = vrot.lane.b32.xlu0 %v9974_v56, %s10870_s14  ;;  %v15268_v56 = vld [vmem:[#allocation112_spill] sm:$0xff]  ;;  %v6954_v24 = vsel %vm6952_vm4, %v6937_v49, %v9798_v36 }
0x1683   : > { %v6456_v55 = vpop.f32.mrf.mxu0  ;;  %v6970_v57 = vsel %vm906_vm2, %v6954_v24, %v9808_v47 }
0x1684   : > { %9970 = vrot.lane.b32.xlu1 %v9969_v35, %s10870_s14  ;;  %v15269_v35 = vpack.i.bf16 %v15267_v40, %v15268_v56 }
0x1685   : > { %v9498_v51 = vpop.f32.mrf.mxu0 }
0x1686   : > { %9980 = vrot.lane.b32.xlu0 %v9979_v43, %s10882_s25  ;;  %v6919_v43 = vsel %vm611_vm1, %v15271_v4, %v9777_v26  ;;  %v6921_v26 = vsel %vm611_vm1, %v15277_v38, %v9782_v25 }
0x1687   : > { %v6936_v32 = vsel %vm6935_vm3, %v6919_v43, %v9787_v46  ;;  %v6459_v31 = vpop.f32.mrf.mxu0  ;;  %v9823_v46 = vunpack.i.h.bf16 %v14028_v45 }
0x1688   : > { %9985 = vrot.lane.b32.xlu1 %v15251_v63, %s10882_s25  ;;  %v15274_v63 = vpack.i.bf16 %v15272_v13, %v15273_v2  ;;  %v6953_v17 = vsel %vm6952_vm4, %v6936_v32, %v9797_v7  ;;  %v10044_v36 = vpack.i.bf16 %v6459_v31, %v6456_v55 }
0x1689   : > { %v6969_v62 = vsel %vm906_vm2, %v6953_v17, %v9807_v5 }
0x168a   : > { %9990 = vrot.lane.b32.xlu0 %v9989_v0, %s10880_s23  ;;  %v9783_v0 = vunpack.i.h.bf16 %v14008_v39  ;;  %v15275_v39 = vpack.i.bf16 %v13689_v9, %v13680_v14  ;;  %v10049_v14 = vpack.i.bf16 %v9498_v51, %v9497_v52  ;;  %v15278_v9 = vpack.i.bf16 %v13701_v59, %v13687_v27 }
0x168b   : > { %v9832_v52 = vunpack.i.l.bf16 %v14032_v22  ;;  %v9828_v27 = vunpack.i.h.bf16 %v14015_v12  ;;  %v9827_v59 = vunpack.i.l.bf16 %v14015_v12 }
0x168c   : > { %9995 = vrot.lane.b32.xlu1 %v15254_v10, %s10880_s23  ;;  %v9793_v10 = vunpack.i.h.bf16 %v14013_v28  ;;  %v9921_v28 = vpop.permute.xlu1 %9920 }
0x168e   : > { %10000 = vrot.lane.b32.xlu0 %v15257_v34, %s10878_s21  ;;  %v9802_v34 = vunpack.i.l.bf16 %v14018_v61 }
0x1690   : > { %10005 = vrot.lane.b32.xlu1 %v15260_v15, %s10878_s21  ;;  %v9812_v15 = vunpack.i.l.bf16 %v14020_v20  ;;  %v9833_v20 = vunpack.i.h.bf16 %v14032_v22  ;;  %v6986_v22 = vsel %vm6985_vm5, %v6969_v62, %v9817_v54 }
0x1691   : > { %v7003_v32 = vsel %vm7002_vm6, %v6986_v22, %v9827_v59 }
0x1692   : > { %10010 = vrot.lane.b32.xlu0 %v10009_v23, %s10870_s14  ;;  %v9818_v23 = vunpack.i.h.bf16 %v14010_v37  ;;  %v6938_v37 = vsel %vm6935_vm3, %v6921_v26, %v9792_v58 }
0x1694   : > { %10020 = vrot.lane.b32.xlu1 %v15263_v41, %s10876_s19  ;;  %v6922_v41 = vsel %vm611_vm1, %v15276_v18, %v9783_v0  ;;  %v6987_v55 = vsel %vm6985_vm5, %v6970_v57, %v9818_v23 }
0x1695   : > { %v6939_v61 = vsel %vm6935_vm3, %v6922_v41, %v9793_v10  ;;  %v7004_v49 = vsel %vm7002_vm6, %v6987_v55, %v9828_v27 }
0x1696   : > { %10015 = vrot.lane.b32.xlu0 %v15266_v19, %s10876_s19  ;;  %v6955_v19 = vsel %vm6952_vm4, %v6938_v37, %v9802_v34  ;;  %v6956_v7 = vsel %vm6952_vm4, %v6939_v61, %v9803_v60  ;;  %v9923_v34 = vunpack.i.h.bf16 %v9921_v28 }
0x1697   : > { %v6971_v47 = vsel %vm906_vm2, %v6955_v19, %v9812_v15  ;;  %v6972_v5 = vsel %vm906_vm2, %v6956_v7, %v9813_v16 }
0x1698   : > { %10030 = vrot.lane.b32.xlu1 %v15269_v35, %s10874_s17  ;;  %v6988_v35 = vsel %vm6985_vm5, %v6971_v47, %v9822_v11  ;;  %v6989_v12 = vsel %vm6985_vm5, %v6972_v5, %v9823_v46  ;;  %v6964_v38 = vsel %vm6952_vm4, %v14080_v29, %v9923_v34 }
0x1699   : > { %v7005_v33 = vsel %vm7002_vm6, %v6988_v35, %v9832_v52  ;;  %v7006_v4 = vsel %vm7002_vm6, %v6989_v12, %v9833_v20  ;;  %v9918_v35 = vunpack.i.h.bf16 %v14198_v48  ;;  %v9917_v12 = vunpack.i.l.bf16 %v14198_v48 }
0x169a   : > { %10025 = vrot.lane.b32.xlu0 %v15274_v63, %s10874_s17 }
0x169c   : > { %10040 = vrot.lane.b32.xlu1 %v15275_v39, %s10872_s1  ;;  %v9922_v39 = vunpack.i.l.bf16 %v9921_v28 }
0x169e   : > { %10035 = vrot.lane.b32.xlu0 %v15278_v9, %s10872_s1  ;;  %v6963_v41 = vsel %vm6952_vm4, %v14077_v6, %v9922_v39 }
0x16a0   : > { %10050 = vrot.lane.b32.xlu1 %v10049_v14, %s10870_s14 }
0x16a1   : > { %v9926_v45 = vpop.permute.xlu1 %9925 }
0x16a2   : > { %v9928_v40 = vunpack.i.h.bf16 %v9926_v45  ;;  %v9927_v56 = vunpack.i.l.bf16 %v9926_v45  ;;  %10045 = vrot.lane.b32.xlu0 %v10044_v36, %s10870_s14 }
0x16a3   : > { %v9931_v42 = vpop.permute.xlu0 %9930 }
0x16a4   : > { %v9933_v43 = vunpack.i.h.bf16 %v9931_v42  ;;  %v9932_v51 = vunpack.i.l.bf16 %v9931_v42  ;;  %v7022_v0 = vsel %vm7019_vm7, %v7005_v33, %v9927_v56  ;;  %v7023_v25 = vsel %vm7019_vm7, %v7006_v4, %v9928_v40 }
0x16a5   : > { %v7037_v17 = vpack.c.bf16 %v7023_v25, %v7022_v0  ;;  %v9941_v24 = vpop.permute.xlu1 %9940  ;;  %v6961_v25 = vsel %vm6952_vm4, %v14059_v1, %v9917_v12 }
0x16a6   : > { %v7021_v13 = vsel %vm7019_vm7, %v7004_v49, %v9933_v43  ;;  %v7020_v2 = vsel %vm7019_vm7, %v7003_v32, %v9932_v51  ;;  %v9943_v23 = vunpack.i.h.bf16 %v9941_v24  ;;  %v9942_v54 = vunpack.i.l.bf16 %v9941_v24 }
0x16a7   : > { %v7036_v63 = vpack.c.bf16 %v7021_v13, %v7020_v2  ;;  %v9936_v10 = vpop.permute.xlu0 %9935  ;;  %v6962_v13 = vsel %vm6952_vm4, %v14062_v21, %v9918_v35 }
0x16a8   : > { %v6979_v14 = vsel %vm906_vm2, %v6963_v41, %v9942_v54  ;;  %v6980_v9 = vsel %vm906_vm2, %v6964_v38, %v9943_v23  ;;  %v9938_v42 = vunpack.i.h.bf16 %v9936_v10  ;;  %v9937_v33 = vunpack.i.l.bf16 %v9936_v10 }
0x16a9   : > { %9507 = vmatprep.mubr.msk.bf16.mxu1 %vm154_vm0, %v7036_v63  ;;  %v9951_v58 = vpop.permute.xlu1 %9950 }
0x16aa   : > { %9508 = vmatmul.mubr.msk.bf16.vlgmr.msra.gmra.mxu1 %vm154_vm0, %v7037_v17  ;;  %v9953_v15 = vunpack.i.h.bf16 %v9951_v58  ;;  %v9952_v31 = vunpack.i.l.bf16 %v9951_v58  ;;  %v6978_v2 = vsel %vm906_vm2, %v6962_v13, %v9938_v42  ;;  %v6977_v63 = vsel %vm906_vm2, %v6961_v25, %v9937_v33 }
0x16ab   : > { %v9946_v62 = vpop.permute.xlu0 %9945 }
0x16ac   : > { %v6996_v20 = vsel %vm6985_vm5, %v6979_v14, %v9952_v31  ;;  %v6997_v29 = vsel %vm6985_vm5, %v6980_v9, %v9953_v15  ;;  %v9948_v43 = vunpack.i.h.bf16 %v9946_v62  ;;  %v9947_v51 = vunpack.i.l.bf16 %v9946_v62 }
0x16ad   : > { %v9961_v57 = vpop.permute.xlu1 %9960 }
0x16ae   : > { %v9963_v37 = vunpack.i.h.bf16 %v9961_v57  ;;  %v9962_v28 = vunpack.i.l.bf16 %v9961_v57  ;;  %v6994_v48 = vsel %vm6985_vm5, %v6977_v63, %v9947_v51  ;;  %v6995_v24 = vsel %vm6985_vm5, %v6978_v2, %v9948_v43 }
0x16af   : > { %v9956_v60 = vpop.permute.xlu0 %9955 }
0x16b0   : > { %v9958_v32 = vunpack.i.h.bf16 %v9956_v60  ;;  %v9957_v49 = vunpack.i.l.bf16 %v9956_v60 }
0x16b2   : > { %v7011_v62 = vsel %vm7002_vm6, %v6994_v48, %v9957_v49  ;;  %v7012_v57 = vsel %vm7002_vm6, %v6995_v24, %v9958_v32 }
0x16f2   : > { %v9966_v18 = vpop.permute.xlu1 %9965 }
0x16f3   : > { %v9968_v26 = vunpack.i.h.bf16 %v9966_v18  ;;  %v9967_v16 = vunpack.i.l.bf16 %v9966_v18 }
0x16f4   : > { %v9976_v61 = vpop.permute.xlu0 %9975 }
0x16f5   : > { %v7026_v46 = vsel %vm7019_vm7, %v14067_v53, %v9967_v16  ;;  %v7027_v11 = vsel %vm7019_vm7, %v14070_v8, %v9968_v26  ;;  %v9978_v19 = vunpack.i.h.bf16 %v9976_v61  ;;  %v9977_v6 = vunpack.i.l.bf16 %v9976_v61  ;;  %v15280_v61 = vld [vmem:[#allocation43_spill] sm:$0xff] }
0x16f6   : > { %v7039_v52 = vpack.c.bf16 %v7027_v11, %v7026_v46  ;;  %v9971_v36 = vpop.permute.xlu1 %9970  ;;  %v7013_v53 = vsel %vm7002_vm6, %v6996_v20, %v9962_v28  ;;  %v7014_v8 = vsel %vm7002_vm6, %v6997_v29, %v9963_v37  ;;  %v15279_v37 = vld [vmem:[#allocation45_spill] sm:$0xff]  ;;  %v15281_v11 = vld [vmem:[#allocation44_spill] sm:$0xff] }
0x16f7   : > { %v7025_v27 = vsel %vm7019_vm7, %v14048_v44, %v9978_v19  ;;  %v7024_v59 = vsel %vm7019_vm7, %v14045_v50, %v9977_v6  ;;  %v9973_v7 = vunpack.i.h.bf16 %v9971_v36  ;;  %v9972_v47 = vunpack.i.l.bf16 %v9971_v36  ;;  %v15282_v6 = vld [vmem:[#allocation42_spill] sm:$0xff] }
0x16f8   : > { %v7038_v45 = vpack.c.bf16 %v7025_v27, %v7024_v59  ;;  %v9981_v5 = vpop.permute.xlu0 %9980 }
0x16f9   : > { %v7030_v40 = vsel %vm7019_vm7, %v7013_v53, %v9972_v47  ;;  %v7031_v56 = vsel %vm7019_vm7, %v7014_v8, %v9973_v7  ;;  %v9983_v1 = vunpack.i.h.bf16 %v9981_v5  ;;  %v9982_v23 = vunpack.i.l.bf16 %v9981_v5 }
0x16fa   : > { %v7041_v22 = vpack.c.bf16 %v7031_v56, %v7030_v40  ;;  %v9986_v55 = vpop.permute.xlu1 %9985  ;;  %9511 = vmatprep.mubr.msk.bf16.mxu1 %vm154_vm0, %v7038_v45 }
0x16fb   : > { %9512 = vmatmul.mubr.msk.bf16.gmra.mxu1 %vm154_vm0, %v7039_v52  ;;  %v9988_v54 = vunpack.i.h.bf16 %v9986_v55  ;;  %v9987_v60 = vunpack.i.l.bf16 %v9986_v55  ;;  %v6932_v28 = vsel %vm611_vm1, %v15279_v37, %v9983_v1  ;;  %v6931_v46 = vsel %vm611_vm1, %v15280_v61, %v9982_v23 }
0x16fc   : > { %v9991_v44 = vpop.permute.xlu0 %9990 }
0x16fd   : > { %v9993_v18 = vunpack.i.h.bf16 %v9991_v44  ;;  %v9992_v41 = vunpack.i.l.bf16 %v9991_v44  ;;  %v6934_v19 = vsel %vm611_vm1, %v15281_v11, %v9988_v54  ;;  %v6933_v20 = vsel %vm611_vm1, %v15282_v6, %v9987_v60  ;;  %v15285_v11 = vld [vmem:[#allocation21_spill] sm:$0xff] }
0x16fe   : > { %v9996_v50 = vpop.permute.xlu1 %9995 }
0x16ff   : > { %v9998_v38 = vunpack.i.h.bf16 %v9996_v50  ;;  %v9997_v26 = vunpack.i.l.bf16 %v9996_v50  ;;  %v6948_v52 = vsel %vm6935_vm3, %v6931_v46, %v9992_v41  ;;  %v6949_v36 = vsel %vm6935_vm3, %v6932_v28, %v9993_v18  ;;  %v15284_v28 = vld [vmem:[#allocation23_spill] sm:$0xff] }
0x1700   : > { %v10001_v4 = vpop.permute.xlu0 %10000 }
0x1701   : > { %v10003_v14 = vunpack.i.h.bf16 %v10001_v4  ;;  %v10002_v9 = vunpack.i.l.bf16 %v10001_v4  ;;  %v6950_v7 = vsel %vm6935_vm3, %v6933_v20, %v9997_v26  ;;  %v6951_v47 = vsel %vm6935_vm3, %v6934_v19, %v9998_v38 }
0x1702   : > { %v10006_v0 = vpop.permute.xlu1 %10005 }
0x1703   : > { %v10008_v27 = vunpack.i.h.bf16 %v10006_v0  ;;  %v10007_v59 = vunpack.i.l.bf16 %v10006_v0  ;;  %v6965_v5 = vsel %vm6952_vm4, %v6948_v52, %v10002_v9  ;;  %v6966_v40 = vsel %vm6952_vm4, %v6949_v36, %v10003_v14  ;;  %v15286_v52 = vld [vmem:[#allocation22_spill] sm:$0xff] }
0x1704   : > { %v10011_v17 = vpop.permute.xlu0 %10010 }
0x1705   : > { %v10013_v10 = vunpack.i.h.bf16 %v10011_v17  ;;  %v10012_v58 = vunpack.i.l.bf16 %v10011_v17  ;;  %v6967_v42 = vsel %vm6952_vm4, %v6950_v7, %v10007_v59  ;;  %v6968_v33 = vsel %vm6952_vm4, %v6951_v47, %v10008_v27  ;;  %v15287_v27 = vld [vmem:[#allocation20_spill] sm:$0xff] }
0x1706   : > { %v10021_v34 = vpop.permute.xlu1 %10020 }
0x1707   : > { %v7029_v39 = vsel %vm7019_vm7, %v7012_v57, %v10013_v10  ;;  %v7028_v21 = vsel %vm7019_vm7, %v7011_v62, %v10012_v58  ;;  %v10023_v53 = vunpack.i.h.bf16 %v10021_v34  ;;  %v10022_v8 = vunpack.i.l.bf16 %v10021_v34 }
0x1708   : > { %v7040_v15 = vpack.c.bf16 %v7029_v39, %v7028_v21  ;;  %v10016_v31 = vpop.permute.xlu0 %10015 }
0x1709   : > { %v10018_v56 = vunpack.i.h.bf16 %v10016_v31  ;;  %v6983_v51 = vsel %vm906_vm2, %v6967_v42, %v10022_v8  ;;  %v6984_v32 = vsel %vm906_vm2, %v6968_v33, %v10023_v53 }
0x170a   : > { %v10031_v16 = vpop.permute.xlu1 %10030  ;;  %9515 = vmatprep.mubr.msk.bf16.mxu1 %vm154_vm0, %v7040_v15 }
0x170b   : > { %9516 = vmatmul.mubr.msk.bf16.gmra.mxu1 %vm154_vm0, %v7041_v22  ;;  %v10017_v22 = vunpack.i.l.bf16 %v10016_v31  ;;  %v10033_v55 = vunpack.i.h.bf16 %v10031_v16  ;;  %v10032_v44 = vunpack.i.l.bf16 %v10031_v16  ;;  %v6982_v13 = vsel %vm906_vm2, %v6966_v40, %v10018_v56  ;;  %v15283_v16 = vld [vmem:[#allocation24_spill] sm:$0xff] }
0x170c   : > { %v10026_v29 = vpop.permute.xlu0 %10025 }
0x170d   : > { %v10028_v50 = vunpack.i.h.bf16 %v10026_v29  ;;  %v10027_v35 = vunpack.i.l.bf16 %v10026_v29  ;;  %v6981_v2 = vsel %vm906_vm2, %v6965_v5, %v10017_v22  ;;  %v7000_v48 = vsel %vm6985_vm5, %v6983_v51, %v10032_v44  ;;  %v15288_v22 = vld [vmem:[#allocation19_spill] sm:$0xff]  ;;  %v15291_v51 = vld [vmem:[#allocation16_spill] sm:$0xff] }
0x170e   : > { %v10041_v45 = vpop.permute.xlu1 %10040  ;;  %v7001_v24 = vsel %vm6985_vm5, %v6984_v32, %v10033_v55 }
0x170f   : > { %v10043_v4 = vunpack.i.h.bf16 %v10041_v45  ;;  %v10042_v43 = vunpack.i.l.bf16 %v10041_v45  ;;  %v6998_v10 = vsel %vm6985_vm5, %v6981_v2, %v10027_v35  ;;  %v6999_v58 = vsel %vm6985_vm5, %v6982_v13, %v10028_v50  ;;  %v15289_v50 = vld [vmem:[#allocation17_spill] sm:$0xff] }
0x1710   : > { %v10036_v12 = vpop.permute.xlu0 %10035 }
0x1711   : > { %v10038_v49 = vunpack.i.h.bf16 %v10036_v12  ;;  %v10037_v0 = vunpack.i.l.bf16 %v10036_v12  ;;  %v7017_v57 = vsel %vm7002_vm6, %v7000_v48, %v10042_v43  ;;  %v7018_v34 = vsel %vm7002_vm6, %v7001_v24, %v10043_v4  ;;  %v15290_v4 = vld [vmem:[#allocation18_spill] sm:$0xff]  ;;  %v15292_v24 = vld [vmem:[#allocation15_spill] sm:$0xff] }
0x1712   : > { %v10051_v25 = vpop.permute.xlu1 %10050 }
0x1713   : > { %v10053_v63 = vunpack.i.h.bf16 %v10051_v25  ;;  %v10052_v17 = vunpack.i.l.bf16 %v10051_v25  ;;  %v7015_v21 = vsel %vm7002_vm6, %v6998_v10, %v10037_v0  ;;  %v7016_v23 = vsel %vm7002_vm6, %v6999_v58, %v10038_v49 }
0x1714   : > { %v10046_v62 = vpop.permute.xlu0 %10045 }
0x1715   : > { %v10048_v1 = vunpack.i.h.bf16 %v10046_v62  ;;  %v10047_v39 = vunpack.i.l.bf16 %v10046_v62  ;;  %v7034_v54 = vsel %vm7019_vm7, %v7017_v57, %v10052_v17  ;;  %v7035_v60 = vsel %vm7019_vm7, %v7018_v34, %v10053_v63  ;;  %v15293_v62 = vld [vmem:[#allocation13_spill] sm:$0xff] }
0x1716   : > { %v7043_v41 = vpack.c.bf16 %v7035_v60, %v7034_v54  ;;  %v15295_v54 = vld [vmem:[#allocation12_spill] sm:$0xff] }
0x1717   : > { %v7033_v15 = vsel %vm7019_vm7, %v7016_v23, %v10048_v1  ;;  %v7032_v31 = vsel %vm7019_vm7, %v7015_v21, %v10047_v39  ;;  %v15294_v21 = vld [vmem:[#allocation14_spill] sm:$0xff] }
0x1718   : > { %v7042_v18 = vpack.c.bf16 %v7033_v15, %v7032_v31 }
0x171a   : > { %9519 = vmatprep.mubr.msk.bf16.mxu1 %vm154_vm0, %v7042_v18 }
0x171b   : > { %9520 = vmatmul.mubr.msk.bf16.gmra.mxu1 %vm154_vm0, %v7043_v41 }
0x176a   : > { %v9509_v38 = vpop.f32.mrf.mxu1 }
0x176b   : > { %v7139_v14 = vadd.f32 %v9509_v38, %v15283_v16 }
0x176c   : > { %v7130_v26 = vpop.f32.mrf.mxu1 }
0x176d   : > { %v7131_v9 = vadd.f32 %v7130_v26, %v15283_v16  ;;  %v14302_v19 = vadd.f32 %v15285_v11, %v7139_v14  ;;  %v15297_v11 = vld [vmem:[#allocation9_spill] sm:$0xff] }
0x176e   : > { %v9510_v37 = vpop.f32.mrf.mxu1 }
0x176f   : > { %v14299_v61 = vadd.f32 %v15284_v28, %v7131_v9  ;;  %v7142_v6 = vadd.f32 %v9510_v37, %v15283_v16  ;;  %v7215_v47 = vsel %vm154_vm0, %v14302_v19, 0.0  ;;  %v15296_v37 = vld [vmem:[#allocation11_spill] sm:$0xff] }
0x1770   : > { %v7133_v46 = vpop.f32.mrf.mxu1 }
0x1771   : > { %v7134_v20 = vadd.f32 %v7133_v46, %v15283_v16  ;;  %v7209_v29 = vsel %vm154_vm0, %v14299_v61, 0.0  ;;  %v14312_v59 = vadd.f32 %v15287_v27, %v7142_v6  ;;  %v15298_v27 = vld [vmem:[#allocation10_spill] sm:$0xff] }
0x1772   : > { %7210 = vadd.xlane.f32.xlu0 %v7209_v29 }
0x1773   : > { %v14309_v36 = vadd.f32 %v15286_v52, %v7134_v20  ;;  %v7218_v53 = vsel %vm154_vm0, %v14312_v59, 0.0 }
0x1775   : > { %v7212_v7 = vsel %vm154_vm0, %v14309_v36, 0.0 }
0x1776   : > { %7213 = vadd.xlane.f32.xlu1 %v7212_v7  ;;  %7216 = vadd.xlane.f32.xlu0 %v7215_v47  ;;  %v15299_v47 = vld [vmem:[#allocation8_spill] sm:$0xff] }
0x177a   : > { %7219 = vadd.xlane.f32.xlu0 %v7218_v53 }
0x17bb   : > { %v9513_v8 = vpop.f32.mrf.mxu1 }
0x17bc   : > { %v7155_v5 = vadd.f32 %v9513_v8, %v15283_v16 }
0x17bd   : > { %v7146_v45 = vpop.f32.mrf.mxu1 }
0x17be   : > { %v7147_v40 = vadd.f32 %v7146_v45, %v15283_v16  ;;  %v14326_v35 = vadd.f32 %v15289_v50, %v7155_v5 }
0x17bf   : > { %v9514_v56 = vpop.f32.mrf.mxu1 }
0x17c0   : > { %v14323_v55 = vadd.f32 %v15288_v22, %v7147_v40  ;;  %v7158_v12 = vadd.f32 %v9514_v56, %v15283_v16  ;;  %v7227_v0 = vsel %vm154_vm0, %v14326_v35, 0.0 }
0x17c1   : > { %v7149_v44 = vpop.f32.mrf.mxu1 }
0x17c2   : > { %v7150_v42 = vadd.f32 %v7149_v44, %v15283_v16  ;;  %v7221_v33 = vsel %vm154_vm0, %v14323_v55, 0.0  ;;  %v14336_v32 = vadd.f32 %v15291_v51, %v7158_v12 }
0x17c3   : > { %7222 = vadd.xlane.f32.xlu0 %v7221_v33 }
0x17c4   : > { %v14333_v43 = vadd.f32 %v15290_v4, %v7150_v42  ;;  %v7230_v25 = vsel %vm154_vm0, %v14336_v32, 0.0 }
0x17c6   : > { %v7224_v49 = vsel %vm154_vm0, %v14333_v43, 0.0 }
0x17c7   : > { %7225 = vadd.xlane.f32.xlu1 %v7224_v49  ;;  %7228 = vadd.xlane.f32.xlu0 %v7227_v0 }
0x17cb   : > { %v9517_v13 = vpop.f32.mrf.mxu1  ;;  %7231 = vadd.xlane.f32.xlu1 %v7230_v25 }
0x17cc   : > { %v7171_v63 = vadd.f32 %v9517_v13, %v15283_v16 }
0x17cd   : > { %v7162_v2 = vpop.f32.mrf.mxu1 }
0x17ce   : > { %v7163_v17 = vadd.f32 %v7162_v2, %v15283_v16  ;;  %v14350_v57 = vadd.f32 %v15293_v62, %v7171_v63  ;;  %v10070_v62 = vld [vmem:[%s11248_s27 + $0x30] ss:$8 sps:$4 sm:$0xff]  }
0x17cf   : > { %v9518_v48 = vpop.f32.mrf.mxu1 }
0x17d0   : > { %v14347_v10 = vadd.f32 %v15292_v24, %v7163_v17  ;;  %v7174_v34 = vadd.f32 %v9518_v48, %v15283_v16  ;;  %v7239_v31 = vsel %vm154_vm0, %v14350_v57, 0.0 }
0x17d1   : > { %v7165_v58 = vpop.f32.mrf.mxu1 }
0x17d2   : > { %v7166_v1 = vadd.f32 %v7165_v58, %v15283_v16  ;;  %v7233_v39 = vsel %vm154_vm0, %v14347_v10, 0.0  ;;  %v14360_v60 = vadd.f32 %v15295_v54, %v7174_v34  ;;  %v10072_v58 = vld [vmem:[%s11248_s27 + $0x34] ss:$8 sps:$4 sm:$0xff]   ;;  %v10075_v34 = vld [vmem:[%s11248_s27 + $0x24] ss:$8 sps:$4 sm:$0xff]  }
0x17d3   : > { %7234 = vadd.xlane.f32.xlu0 %v7233_v39  ;;  %7548 = vmatprep.subr.bf16.mxu0 %v10072_v58  ;;  %v10078_v39 = vld [vmem:[%s11248_s27 + $0x14] ss:$8 sps:$4 sm:$0xff]   ;;  %v10081_v54 = vld [vmem:[%s11248_s27 + $0x4] ss:$8 sps:$4 sm:$0xff]  }
0x17d4   : > { %v14357_v23 = vadd.f32 %v15294_v21, %v7166_v1  ;;  %v7242_v18 = vsel %vm154_vm0, %v14360_v60, 0.0  ;;  %7549 = vmatpush1.bf16.msra.mxu0 %v10070_v62  ;;  %v10073_v1 = vld [vmem:[%s11248_s27 + $0x20] ss:$8 sps:$4 sm:$0xff]   ;;  %v10076_v21 = vld [vmem:[%s11248_s27 + $0x10] ss:$8 sps:$4 sm:$0xff]  }
0x17d5   : > { %7550 = vmatprep.subr.bf16.mxu0 %v10075_v34 }
0x17d6   : > { %v7236_v15 = vsel %vm154_vm0, %v14357_v23, 0.0 }
0x17d7   : > { %7237 = vadd.xlane.f32.xlu1 %v7236_v15  ;;  %7240 = vadd.xlane.f32.xlu0 %v7239_v31  ;;  %v10079_v15 = vld [vmem:[%s11248_s27] ss:$8 sps:$4 sm:$0xff]   ;;  %s8435_s27 = sshll.u32 %s10866_s0, 1  ;;  %s65_s0 = sadd.s32 1, %s10866_s0  }
0x17d8   : > { %7551 = vmatpush1.bf16.msra.mxu0 %v10073_v1  ;;  %s117_s15 = scalar_lea.vmem %s14955_s6, %s8435_s27  ;;  %p14682_p0 = scmp.ge.s32.totalorder %s65_s0, 10  }
0x17d9   : > { %7552 = vmatprep.subr.bf16.mxu0 %v10078_v39 }
0x17db   : > { %v9521_v41 = vpop.f32.mrf.mxu1  ;;  %7243 = vadd.xlane.f32.xlu1 %v7242_v18 }
0x17dc   : > { %v7187_v26 = vadd.f32 %v9521_v41, %v15283_v16  ;;  %7553 = vmatpush1.bf16.msra.mxu0 %v10076_v21 }
0x17dd   : > { %v7178_v38 = vpop.f32.mrf.mxu1  ;;  %7554 = vmatprep.subr.bf16.mxu0 %v10081_v54 }
0x17de   : > { %v7179_v14 = vadd.f32 %v7178_v38, %v15283_v16  ;;  %v14374_v6 = vadd.f32 %v15297_v11, %v7187_v26 }
0x17df   : > { %v9522_v9 = vpop.f32.mrf.mxu1 }
0x17e0   : > { %v14371_v28 = vadd.f32 %v15296_v37, %v7179_v14  ;;  %v7190_v20 = vadd.f32 %v9522_v9, %v15283_v16  ;;  %v7251_v45 = vsel %vm154_vm0, %v14374_v6, 0.0  ;;  %7555 = vmatpush1.bf16.msra.mxu0 %v10079_v15 }
0x17e1   : > { %v7181_v46 = vpop.f32.mrf.mxu1 }
0x17e2   : > { %v7182_v29 = vadd.f32 %v7181_v46, %v15283_v16  ;;  %v7245_v52 = vsel %vm154_vm0, %v14371_v28, 0.0  ;;  %v14384_v53 = vadd.f32 %v15299_v47, %v7190_v20 }
0x17e3   : > { %7246 = vadd.xlane.f32.xlu0 %v7245_v52 }
0x17e4   : > { %v14381_v7 = vadd.f32 %v15298_v27, %v7182_v29  ;;  %v7254_v16 = vsel %vm154_vm0, %v14384_v53, 0.0 }
0x17e6   : > { %v7248_v8 = vsel %vm154_vm0, %v14381_v7, 0.0 }
0x17e7   : > { %7249 = vadd.xlane.f32.xlu1 %v7248_v8  ;;  %7252 = vadd.xlane.f32.xlu0 %v7251_v45 }
0x17eb   : > { %7255 = vadd.xlane.f32.xlu1 %v7254_v16 }
0x17fb   : > { %v7211_v5 = vpop.xlane.xlu0 %7210 }
0x17fc   : > { %v7257_v40 = vmul.f32 0.015625, %v7211_v5 }
0x17fe   : > { %v14393_v56 = vsub.f32 %v14299_v61, %v7257_v40 }
0x17ff   : > { %v7214_v22 = vpop.xlane.xlu1 %7213  ;;  %v7217_v44 = vpop.xlane.xlu0 %7216 }
0x1800   : > { %v7258_v50 = vmul.f32 0.015625, %v7214_v22  ;;  %v7259_v12 = vmul.f32 0.015625, %v7217_v44  ;;  %v7289_v42 = vmul.f32 %v14393_v56, %v14393_v56 }
0x1802   : > { %v14398_v33 = vsub.f32 %v14309_v36, %v7258_v50  ;;  %v14401_v4 = vsub.f32 %v14302_v19, %v7259_v12  ;;  %v7305_v51 = vsel %vm154_vm0, %v7289_v42, 0.0 }
0x1803   : > { %7306 = vadd.xlane.f32.xlu0 %v7305_v51  ;;  %v7220_v49 = vpop.xlane.xlu0 %7219 }
0x1804   : > { %v7260_v0 = vmul.f32 0.015625, %v7220_v49  ;;  %v7290_v25 = vmul.f32 %v14398_v33, %v14398_v33  ;;  %v7291_v13 = vmul.f32 %v14401_v4, %v14401_v4 }
0x1806   : > { %v14409_v2 = vsub.f32 %v14312_v59, %v7260_v0  ;;  %v7308_v63 = vsel %vm154_vm0, %v7290_v25, 0.0  ;;  %v7311_v17 = vsel %vm154_vm0, %v7291_v13, 0.0 }
0x1807   : > { %7309 = vadd.xlane.f32.xlu1 %v7308_v63  ;;  %7312 = vadd.xlane.f32.xlu0 %v7311_v17 }
0x1808   : > { %v7292_v48 = vmul.f32 %v14409_v2, %v14409_v2 }
0x180a   : > { %v7314_v24 = vsel %vm154_vm0, %v7292_v48, 0.0 }
0x180b   : > { %7315 = vadd.xlane.f32.xlu1 %v7314_v24 }
0x184c   : > { %v7223_v31 = vpop.xlane.xlu0 %7222 }
0x184d   : > { %v7261_v18 = vmul.f32 0.015625, %v7223_v31 }
0x184f   : > { %v14425_v41 = vsub.f32 %v14323_v55, %v7261_v18 }
0x1850   : > { %v7226_v38 = vpop.xlane.xlu1 %7225  ;;  %v7229_v26 = vpop.xlane.xlu0 %7228 }
0x1851   : > { %v7262_v14 = vmul.f32 0.015625, %v7226_v38  ;;  %v7263_v9 = vmul.f32 0.015625, %v7229_v26  ;;  %v7293_v37 = vmul.f32 %v14425_v41, %v14425_v41 }
0x1853   : > { %v14430_v46 = vsub.f32 %v14333_v43, %v7262_v14  ;;  %v14433_v11 = vsub.f32 %v14326_v35, %v7263_v9  ;;  %v7317_v20 = vsel %vm154_vm0, %v7293_v37, 0.0 }
0x1854   : > { %v7232_v29 = vpop.xlane.xlu1 %7231  ;;  %7318 = vadd.xlane.f32.xlu0 %v7317_v20 }
0x1855   : > { %v7264_v52 = vmul.f32 0.015625, %v7232_v29  ;;  %v7294_v27 = vmul.f32 %v14430_v46, %v14430_v46  ;;  %v7295_v47 = vmul.f32 %v14433_v11, %v14433_v11 }
0x1857   : > { %v14441_v8 = vsub.f32 %v14336_v32, %v7264_v52  ;;  %v7320_v45 = vsel %vm154_vm0, %v7294_v27, 0.0  ;;  %v7323_v16 = vsel %vm154_vm0, %v7295_v47, 0.0 }
0x1858   : > { %7321 = vadd.xlane.f32.xlu1 %v7320_v45  ;;  %7324 = vadd.xlane.f32.xlu0 %v7323_v16 }
0x1859   : > { %v7296_v5 = vmul.f32 %v14441_v8, %v14441_v8 }
0x185b   : > { %v7326_v40 = vsel %vm154_vm0, %v7296_v5, 0.0 }
0x185c   : > { %7327 = vadd.xlane.f32.xlu1 %v7326_v40  ;;  %v7235_v22 = vpop.xlane.xlu0 %7234 }
0x185d   : > { %v7265_v44 = vmul.f32 0.015625, %v7235_v22 }
0x185f   : > { %v14449_v50 = vsub.f32 %v14347_v10, %v7265_v44 }
0x1860   : > { %v7238_v12 = vpop.xlane.xlu1 %7237  ;;  %v7241_v42 = vpop.xlane.xlu0 %7240 }
0x1861   : > { %v7266_v51 = vmul.f32 0.015625, %v7238_v12  ;;  %v7267_v49 = vmul.f32 0.015625, %v7241_v42  ;;  %v7297_v0 = vmul.f32 %v14449_v50, %v14449_v50 }
0x1863   : > { %v14454_v25 = vsub.f32 %v14357_v23, %v7266_v51  ;;  %v14457_v13 = vsub.f32 %v14350_v57, %v7267_v49  ;;  %v7329_v63 = vsel %vm154_vm0, %v7297_v0, 0.0 }
0x1864   : > { %v7244_v17 = vpop.xlane.xlu1 %7243  ;;  %7330 = vadd.xlane.f32.xlu0 %v7329_v63 }
0x1865   : > { %v7268_v48 = vmul.f32 0.015625, %v7244_v17  ;;  %v7298_v24 = vmul.f32 %v14454_v25, %v14454_v25  ;;  %v7299_v58 = vmul.f32 %v14457_v13, %v14457_v13 }
0x1867   : > { %v14465_v62 = vsub.f32 %v14360_v60, %v7268_v48  ;;  %v7332_v34 = vsel %vm154_vm0, %v7298_v24, 0.0  ;;  %v7335_v1 = vsel %vm154_vm0, %v7299_v58, 0.0 }
0x1868   : > { %7333 = vadd.xlane.f32.xlu1 %v7332_v34  ;;  %7336 = vadd.xlane.f32.xlu0 %v7335_v1 }
0x1869   : > { %v7300_v39 = vmul.f32 %v14465_v62, %v14465_v62 }
0x186b   : > { %v7338_v21 = vsel %vm154_vm0, %v7300_v39, 0.0 }
0x186c   : > { %7339 = vadd.xlane.f32.xlu1 %v7338_v21  ;;  %v7247_v54 = vpop.xlane.xlu0 %7246 }
0x186d   : > { %v7269_v15 = vmul.f32 0.015625, %v7247_v54 }
0x186f   : > { %v14473_v31 = vsub.f32 %v14371_v28, %v7269_v15  ;;  %v15300_v15 = vld [vmem:[#allocation25_spill] sm:$0xff] }
0x1870   : > { %v7250_v18 = vpop.xlane.xlu1 %7249  ;;  %v7253_v38 = vpop.xlane.xlu0 %7252 }
0x1871   : > { %v7270_v26 = vmul.f32 0.015625, %v7250_v18  ;;  %v7271_v14 = vmul.f32 0.015625, %v7253_v38  ;;  %v7301_v9 = vmul.f32 %v14473_v31, %v14473_v31 }
0x1873   : > { %v14478_v37 = vsub.f32 %v14381_v7, %v7270_v26  ;;  %v14481_v20 = vsub.f32 %v14374_v6, %v7271_v14  ;;  %v7341_v29 = vsel %vm154_vm0, %v7301_v9, 0.0  ;;  %v10082_v14 = vld [vmem:[%s11269_s12 + $0x78] sm:$0xff]  }
0x1874   : > { %v7256_v52 = vpop.xlane.xlu1 %7255  ;;  %7342 = vadd.xlane.f32.xlu0 %v7341_v29  ;;  %v10083_v9 = vld [vmem:[%s11269_s12 + $0x38] sm:$0xff]   ;;  %v10084_v29 = vld [vmem:[%s11269_s12 + $0x70] sm:$0xff]   ;;  %8911 = vmatprep.subr.bf16.mxu1 %v10082_v14 }
0x1875   : > { %v7272_v27 = vmul.f32 0.015625, %v7256_v52  ;;  %v7302_v47 = vmul.f32 %v14478_v37, %v14478_v37  ;;  %v7303_v45 = vmul.f32 %v14481_v20, %v14481_v20  ;;  %8912 = vmatpush3.bf16.msra.mxu1 %v10083_v9 }
0x1876   : > { %8913 = vmatprep.subr.bf16.mxu1 %v10084_v29  ;;  %v10092_v29 = vld [vmem:[%s11269_s12 + $0x50] sm:$0xff]  }
0x1877   : > { %v14489_v16 = vsub.f32 %v14384_v53, %v7272_v27  ;;  %v7344_v5 = vsel %vm154_vm0, %v7302_v47, 0.0  ;;  %v7347_v40 = vsel %vm154_vm0, %v7303_v45, 0.0  ;;  %v15301_v45 = vld [vmem:[#allocation26_spill] sm:$0xff] }
0x1878   : > { %7345 = vadd.xlane.f32.xlu1 %v7344_v5  ;;  %7348 = vadd.xlane.f32.xlu0 %v7347_v40 }
0x1879   : > { %v7304_v22 = vmul.f32 %v14489_v16, %v14489_v16 }
0x187b   : > { %v7350_v44 = vsel %vm154_vm0, %v7304_v22, 0.0  ;;  %v10086_v22 = vld [vmem:[%s11269_s12 + $0x68] sm:$0xff]  }
0x187c   : > { %7351 = vadd.xlane.f32.xlu1 %v7350_v44 }
0x188c   : > { %v7307_v12 = vpop.xlane.xlu0 %7306 }
0x188d   : > { %v7353_v42 = vmul.f32 0.015625, %v7307_v12 }
0x188f   : > { %v7369_v51 = vadd.f32 1e-05, %v7353_v42  ;;  %v10088_v42 = vld [vmem:[%s11269_s12 + $0x60] sm:$0xff]  }
0x1890   : > { %v7310_v49 = vpop.xlane.xlu1 %7309  ;;  %v7313_v0 = vpop.xlane.xlu0 %7312 }
0x1891   : > { %10642 = vrsqrt.f32 %v7369_v51  ;;  %v7354_v63 = vmul.f32 0.015625, %v7310_v49  ;;  %v7355_v17 = vmul.f32 0.015625, %v7313_v0  ;;  %v10089_v0 = vld [vmem:[%s11269_s12 + $0x20] sm:$0xff]  }
0x1893   : > { %v7370_v48 = vadd.f32 1e-05, %v7354_v63  ;;  %v7371_v24 = vadd.f32 1e-05, %v7355_v17  ;;  %v10090_v63 = vld [vmem:[%s11269_s12 + $0x58] sm:$0xff]  }
0x1894   : > { %v7316_v58 = vpop.xlane.xlu1 %7315 }
0x1895   : > { %10644 = vrsqrt.f32 %v7370_v48  ;;  %v7356_v34 = vmul.f32 0.015625, %v7316_v58  ;;  %v10091_v48 = vld [vmem:[%s11269_s12 + $0x18] sm:$0xff]  }
0x1896   : > { %10646 = vrsqrt.f32 %v7371_v24 }
0x1897   : > { %v7372_v1 = vadd.f32 1e-05, %v7356_v34 }
0x1899   : > { %10648 = vrsqrt.f32 %v7372_v1 }
0x189e   : > { %v10643_v39 = vpop.eup %10642 }
0x189f   : > { %v7401_v21 = vmul.f32 %v10643_v39, %v14393_v56 }
0x18a1   : > { %v7421_v18 = vmul.f32 %v15300_v15, %v7401_v21 }
0x18a2   : > { %v10645_v54 = vpop.eup %10644 }
0x18a3   : > { %v7402_v38 = vmul.f32 %v10645_v54, %v14398_v33  ;;  %v10647_v26 = vpop.eup %10646  ;;  %v7441_v5 = vadd.f32 %v15301_v45, %v7421_v18  ;;  %v10085_v33 = vld [vmem:[%s11269_s12 + $0x30] sm:$0xff]  }
0x18a4   : > { %v7403_v47 = vmul.f32 %v10647_v26, %v14401_v4  ;;  %8914 = vmatpush3.bf16.msra.mxu1 %v10085_v33  ;;  %v10094_v33 = vld [vmem:[%s11269_s12 + $0x48] sm:$0xff]  }
0x18a5   : > { %v7422_v52 = vmul.f32 %v15300_v15, %v7402_v38  ;;  %8915 = vmatprep.subr.bf16.mxu1 %v10086_v22 }
0x18a6   : > { %v10649_v27 = vpop.eup %10648  ;;  %v7423_v4 = vmul.f32 %v15300_v15, %v7403_v47 }
0x18a7   : > { %v7404_v56 = vmul.f32 %v10649_v27, %v14409_v2  ;;  %v7442_v40 = vadd.f32 %v15301_v45, %v7422_v52  ;;  %v10087_v2 = vld [vmem:[%s11269_s12 + $0x28] sm:$0xff]   ;;  %v10093_v27 = vld [vmem:[%s11269_s12 + $0x10] sm:$0xff]  }
0x18a8   : > { %v7443_v49 = vadd.f32 %v15301_v45, %v7423_v4  ;;  %8916 = vmatpush3.bf16.msra.mxu1 %v10087_v2 }
0x18a9   : > { %v7457_v44 = vpack.c.bf16 %v7442_v40, %v7441_v5  ;;  %v7424_v12 = vmul.f32 %v15300_v15, %v7404_v56  ;;  %8917 = vmatprep.subr.bf16.mxu1 %v10088_v42 }
0x18ab   : > { %8602 = vmatmul.mubr.msk.bf16.vlgmr.msra.gmra.mxu0 %vm154_vm0, %v7457_v44  ;;  %v7444_v51 = vadd.f32 %v15301_v45, %v7424_v12  ;;  %v10095_v12 = vld [vmem:[%s11269_s12 + $0x8] sm:$0xff]  }
0x18ac   : > { %7582 = vmatprep.mubr.bf16.mxu0 %v15222_v30  ;;  %8918 = vmatpush3.bf16.msra.mxu1 %v10089_v0 }
0x18ad   : > { %v7458_v17 = vpack.c.bf16 %v7444_v51, %v7443_v49  ;;  %8919 = vmatprep.subr.bf16.mxu1 %v10090_v63 }
0x18b0   : > { %8920 = vmatpush3.bf16.msra.mxu1 %v10091_v48 }
0x18b1   : > { %8921 = vmatprep.subr.bf16.mxu1 %v10092_v29 }
0x18b3   : > { %8603 = vmatmul.mubr.msk.bf16.gmra.mxu0 %vm154_vm0, %v7458_v17 }
0x18b4   : > { %7592 = vmatprep.mubr.bf16.mxu0 %v15222_v30  ;;  %8922 = vmatpush3.bf16.msra.mxu1 %v10093_v27 }
0x18b5   : > { %8923 = vmatprep.subr.bf16.mxu1 %v10094_v33 }
0x18b8   : > { %8924 = vmatpush3.bf16.msra.mxu1 %v10095_v12 }
0x18dd   : > { %v7319_v24 = vpop.xlane.xlu0 %7318 }
0x18de   : > { %v7357_v58 = vmul.f32 0.015625, %v7319_v24  ;;  %v10097_v24 = vld [vmem:[%s11269_s12] sm:$0xff]  }
0x18e0   : > { %v7373_v34 = vadd.f32 1e-05, %v7357_v58 }
0x18e1   : > { %v7322_v1 = vpop.xlane.xlu1 %7321  ;;  %v7325_v39 = vpop.xlane.xlu0 %7324 }
0x18e2   : > { %10650 = vrsqrt.f32 %v7373_v34  ;;  %v7358_v21 = vmul.f32 0.015625, %v7322_v1  ;;  %v7359_v54 = vmul.f32 0.015625, %v7325_v39 }
0x18e4   : > { %v7374_v18 = vadd.f32 1e-05, %v7358_v21  ;;  %v7375_v38 = vadd.f32 1e-05, %v7359_v54 }
0x18e5   : > { %v7328_v26 = vpop.xlane.xlu1 %7327 }
0x18e6   : > { %10652 = vrsqrt.f32 %v7374_v18  ;;  %v7360_v14 = vmul.f32 0.015625, %v7328_v26 }
0x18e7   : > { %10654 = vrsqrt.f32 %v7375_v38 }
0x18e8   : > { %v7376_v9 = vadd.f32 1e-05, %v7360_v14 }
0x18ea   : > { %10656 = vrsqrt.f32 %v7376_v9 }
0x18ed   : > { %v7331_v52 = vpop.xlane.xlu0 %7330 }
0x18ee   : > { %v7361_v47 = vmul.f32 0.015625, %v7331_v52 }
0x18ef   : > { %v10651_v56 = vpop.eup %10650 }
0x18f0   : > { %v7405_v5 = vmul.f32 %v10651_v56, %v14425_v41  ;;  %v7377_v40 = vadd.f32 1e-05, %v7361_v47  ;;  %v10096_v41 = vld [vmem:[%s11269_s12 + $0x40] sm:$0xff]  }
0x18f1   : > { %v7334_v22 = vpop.xlane.xlu1 %7333  ;;  %v7337_v44 = vpop.xlane.xlu0 %7336  ;;  %8925 = vmatprep.subr.bf16.mxu1 %v10096_v41 }
0x18f2   : > { %10658 = vrsqrt.f32 %v7377_v40  ;;  %v7362_v4 = vmul.f32 0.015625, %v7334_v22  ;;  %v7363_v2 = vmul.f32 0.015625, %v7337_v44  ;;  %v7425_v51 = vmul.f32 %v15300_v15, %v7405_v5  ;;  %8926 = vmatpush3.bf16.msra.mxu1 %v10097_v24 }
0x18f3   : > { %v10653_v42 = vpop.eup %10652 }
0x18f4   : > { %v7406_v49 = vmul.f32 %v10653_v42, %v14430_v46  ;;  %v7378_v0 = vadd.f32 1e-05, %v7362_v4  ;;  %v7379_v63 = vadd.f32 1e-05, %v7363_v2  ;;  %v10655_v17 = vpop.eup %10654  ;;  %v7445_v39 = vadd.f32 %v15301_v45, %v7425_v51 }
0x18f5   : > { %v7340_v48 = vpop.xlane.xlu1 %7339  ;;  %v7407_v21 = vmul.f32 %v10655_v17, %v14433_v11 }
0x18f6   : > { %10660 = vrsqrt.f32 %v7378_v0  ;;  %v7364_v58 = vmul.f32 0.015625, %v7340_v48  ;;  %v7426_v34 = vmul.f32 %v15300_v15, %v7406_v49 }
0x18f7   : > { %v10657_v1 = vpop.eup %10656  ;;  %10662 = vrsqrt.f32 %v7379_v63  ;;  %v7427_v14 = vmul.f32 %v15300_v15, %v7407_v21 }
0x18f8   : > { %v7408_v46 = vmul.f32 %v10657_v1, %v14441_v8  ;;  %v7380_v54 = vadd.f32 1e-05, %v7364_v58  ;;  %v7446_v18 = vadd.f32 %v15301_v45, %v7426_v34 }
0x18f9   : > { %v7447_v47 = vadd.f32 %v15301_v45, %v7427_v14 }
0x18fa   : > { %10664 = vrsqrt.f32 %v7380_v54  ;;  %v7459_v38 = vpack.c.bf16 %v7446_v18, %v7445_v39  ;;  %v7428_v26 = vmul.f32 %v15300_v15, %v7408_v46 }
0x18fc   : > { %8604 = vmatmul.mubr.msk.bf16.gmra.mxu0 %vm154_vm0, %v7459_v38  ;;  %v7448_v52 = vadd.f32 %v15301_v45, %v7428_v26 }
0x18fd   : > { %v7343_v9 = vpop.xlane.xlu0 %7342  ;;  %7602 = vmatprep.mubr.bf16.mxu0 %v15222_v30 }
0x18fe   : > { %v7365_v29 = vmul.f32 0.015625, %v7343_v9  ;;  %v7460_v22 = vpack.c.bf16 %v7448_v52, %v7447_v47 }
0x18ff   : > { %v10659_v11 = vpop.eup %10658 }
0x1900   : > { %v7409_v8 = vmul.f32 %v10659_v11, %v14449_v50  ;;  %v7381_v27 = vadd.f32 1e-05, %v7365_v29 }
0x1901   : > { %v7346_v56 = vpop.xlane.xlu1 %7345  ;;  %v7349_v5 = vpop.xlane.xlu0 %7348 }
0x1902   : > { %10666 = vrsqrt.f32 %v7381_v27  ;;  %v7366_v40 = vmul.f32 0.015625, %v7346_v56  ;;  %v7367_v33 = vmul.f32 0.015625, %v7349_v5  ;;  %v7429_v12 = vmul.f32 %v15300_v15, %v7409_v8 }
0x1903   : > { %v10661_v44 = vpop.eup %10660 }
0x1904   : > { %v10663_v4 = vpop.eup %10662  ;;  %v7410_v2 = vmul.f32 %v10661_v44, %v14454_v25  ;;  %v7382_v42 = vadd.f32 1e-05, %v7366_v40  ;;  %v7383_v51 = vadd.f32 1e-05, %v7367_v33  ;;  %8605 = vmatmul.mubr.msk.bf16.gmra.mxu0 %vm154_vm0, %v7460_v22  ;;  %v7449_v17 = vadd.f32 %v15301_v45, %v7429_v12  ;;  %v15302_v40 = vld [vmem:[#allocation29_spill] sm:$0xff] }
0x1905   : > { %v7352_v50 = vpop.xlane.xlu1 %7351  ;;  %7612 = vmatprep.mubr.bf16.mxu0 %v15222_v30  ;;  %v7411_v41 = vmul.f32 %v10663_v4, %v14457_v13 }
0x1906   : > { %10668 = vrsqrt.f32 %v7382_v42  ;;  %v7368_v49 = vmul.f32 0.015625, %v7352_v50  ;;  %v7430_v0 = vmul.f32 %v15300_v15, %v7410_v2 }
0x1907   : > { %v10665_v63 = vpop.eup %10664  ;;  %10670 = vrsqrt.f32 %v7383_v51  ;;  %v7431_v1 = vmul.f32 %v15300_v15, %v7411_v41 }
0x1908   : > { %v7412_v48 = vmul.f32 %v10665_v63, %v14465_v62  ;;  %v7384_v25 = vadd.f32 1e-05, %v7368_v49  ;;  %v7450_v24 = vadd.f32 %v15301_v45, %v7430_v0 }
0x1909   : > { %v7451_v62 = vadd.f32 %v15301_v45, %v7431_v1 }
0x190a   : > { %10672 = vrsqrt.f32 %v7384_v25  ;;  %v7461_v58 = vpack.c.bf16 %v7450_v24, %v7449_v17  ;;  %v7432_v34 = vmul.f32 %v15300_v15, %v7412_v48 }
0x190c   : > { %8606 = vmatmul.mubr.msk.bf16.gmra.mxu0 %vm154_vm0, %v7461_v58  ;;  %v7452_v13 = vadd.f32 %v15301_v45, %v7432_v34 }
0x190d   : > { %7622 = vmatprep.mubr.bf16.mxu0 %v15222_v30 }
0x190e   : > { %v7462_v46 = vpack.c.bf16 %v7452_v13, %v7451_v62 }
0x190f   : > { %v10667_v39 = vpop.eup %10666 }
0x1910   : > { %v7413_v21 = vmul.f32 %v10667_v39, %v14473_v31 }
0x1912   : > { %v7433_v38 = vmul.f32 %v15300_v15, %v7413_v21 }
0x1913   : > { %v10669_v54 = vpop.eup %10668 }
0x1914   : > { %v7414_v18 = vmul.f32 %v10669_v54, %v14478_v37  ;;  %8607 = vmatmul.mubr.msk.bf16.gmra.mxu0 %vm154_vm0, %v7462_v46  ;;  %v10671_v26 = vpop.eup %10670  ;;  %v7453_v52 = vadd.f32 %v15301_v45, %v7433_v38 }
0x1915   : > { %7632 = vmatprep.mubr.bf16.mxu0 %v15222_v30  ;;  %v7415_v29 = vmul.f32 %v10671_v26, %v14481_v20 }
0x1916   : > { %v7434_v14 = vmul.f32 %v15300_v15, %v7414_v18 }
0x1917   : > { %v10673_v9 = vpop.eup %10672  ;;  %v7435_v27 = vmul.f32 %v15300_v15, %v7415_v29 }
0x1918   : > { %v7416_v31 = vmul.f32 %v10673_v9, %v14489_v16  ;;  %v7454_v11 = vadd.f32 %v15301_v45, %v7434_v14  ;;  %v118_v16 = vld [vmem:[%s117_s15] sm:$0x3] }
0x1919   : > { %v7455_v56 = vadd.f32 %v15301_v45, %v7435_v27  ;;  %v14580_v33 = vrot.slane %v118_v16, %v15302_v40 }
0x191a   : > { %v7463_v37 = vpack.c.bf16 %v7454_v11, %v7453_v52  ;;  %v7436_v8 = vmul.f32 %v15300_v15, %v7416_v31  ;;  %v15303_v15 = vld [vmem:[#allocation28_spill] sm:$0xff] }
0x191b   : > { %v14583_v22 = vrot.slane %v118_v16, %v15303_v15 }
0x191c   : > { %8608 = vmatmul.mubr.msk.bf16.gmra.mxu0 %vm154_vm0, %v7463_v37  ;;  %v7456_v47 = vadd.f32 %v15301_v45, %v7436_v8 }
0x191d   : > { %7642 = vmatprep.mubr.bf16.mxu0 %v15222_v30 }
0x191e   : > { %v7464_v20 = vpack.c.bf16 %v7456_v47, %v7455_v56 }
0x1924   : > { %8609 = vmatmul.mubr.msk.bf16.gmra.mxu0 %vm154_vm0, %v7464_v20 }
0x196b   : > { %v7574_v5 = vpop.f32.mrf.mxu0 }
0x196c   : > { %v7575_v4 = vadd.f32 %v7574_v5, %v14583_v22 }
0x196d   : > { %v7576_v30 = vpop.f32.mrf.mxu0 }
0x196e   : > { %v7577_v45 = vadd.f32 %v7576_v30, %v14580_v33  ;;  %v7653_v63 = vmax.f32 %v7575_v4, 0.0 }
0x196f   : > { %v7578_v44 = vpop.f32.mrf.mxu0 }
0x1970   : > { %v7579_v12 = vadd.f32 %v7578_v44, %v14583_v22  ;;  %v7654_v49 = vmax.f32 %v7577_v45, 0.0 }
0x1971   : > { %v7580_v2 = vpop.f32.mrf.mxu0 }
0x1972   : > { %v7581_v42 = vadd.f32 %v7580_v2, %v14580_v33  ;;  %v7655_v51 = vmax.f32 %v7579_v12, 0.0 }
0x1973   : > { %v7584_v50 = vpop.f32.mrf.mxu0 }
0x1974   : > { %v7656_v0 = vmax.f32 %v7581_v42, 0.0  ;;  %v7685_v48 = vpack.c.bf16 %v7655_v51, %v7653_v63  ;;  %v7585_v34 = vadd.f32 %v7584_v50, %v14583_v22 }
0x1975   : > { %v7586_v41 = vpop.f32.mrf.mxu0 }
0x1976   : > { %v7686_v17 = vpack.c.bf16 %v7656_v0, %v7654_v49  ;;  %v7587_v24 = vadd.f32 %v7586_v41, %v14580_v33  ;;  %v7657_v46 = vmax.f32 %v7585_v34, 0.0 }
0x1977   : > { %v7588_v25 = vpop.f32.mrf.mxu0 }
0x1978   : > { %v7589_v58 = vadd.f32 %v7588_v25, %v14583_v22  ;;  %7833 = vmatprep.mubr.bf16.mxu1 %v7686_v17  ;;  %v7658_v21 = vmax.f32 %v7587_v24, 0.0 }
0x1979   : > { %v7590_v1 = vpop.f32.mrf.mxu0  ;;  %7834 = vmatmul.mubr.bf16.vlgmr.msra.gmra.mxu1 %v7685_v48 }
0x197a   : > { %v7591_v13 = vadd.f32 %v7590_v1, %v14580_v33  ;;  %v7659_v39 = vmax.f32 %v7589_v58, 0.0 }
0x197c   : > { %v7660_v62 = vmax.f32 %v7591_v13, 0.0  ;;  %v7687_v18 = vpack.c.bf16 %v7659_v39, %v7657_v46 }
0x197e   : > { %v7688_v54 = vpack.c.bf16 %v7660_v62, %v7658_v21 }
0x1980   : > { %7841 = vmatprep.mubr.bf16.mxu1 %v7688_v54 }
0x1981   : > { %7842 = vmatmul.mubr.bf16.gmra.mxu1 %v7687_v18 }
0x19bc   : > { %v7594_v38 = vpop.f32.mrf.mxu0 }
0x19bd   : > { %v7595_v31 = vadd.f32 %v7594_v38, %v14583_v22 }
0x19be   : > { %v7596_v26 = vpop.f32.mrf.mxu0 }
0x19bf   : > { %v7597_v9 = vadd.f32 %v7596_v26, %v14580_v33  ;;  %v7661_v56 = vmax.f32 %v7595_v31, 0.0 }
0x19c0   : > { %v7598_v14 = vpop.f32.mrf.mxu0 }
0x19c1   : > { %v7599_v29 = vadd.f32 %v7598_v14, %v14583_v22  ;;  %v7662_v27 = vmax.f32 %v7597_v9, 0.0 }
0x19c2   : > { %v7600_v52 = vpop.f32.mrf.mxu0 }
0x19c3   : > { %v7601_v11 = vadd.f32 %v7600_v52, %v14580_v33  ;;  %v7663_v37 = vmax.f32 %v7599_v29, 0.0 }
0x19c4   : > { %v7604_v8 = vpop.f32.mrf.mxu0 }
0x19c5   : > { %v7664_v47 = vmax.f32 %v7601_v11, 0.0  ;;  %v7689_v5 = vpack.c.bf16 %v7663_v37, %v7661_v56  ;;  %v7605_v44 = vadd.f32 %v7604_v8, %v14583_v22 }
0x19c6   : > { %v7606_v20 = vpop.f32.mrf.mxu0 }
0x19c7   : > { %v7690_v16 = vpack.c.bf16 %v7664_v47, %v7662_v27  ;;  %v7607_v15 = vadd.f32 %v7606_v20, %v14580_v33  ;;  %v7665_v50 = vmax.f32 %v7605_v44, 0.0 }
0x19c8   : > { %v7608_v40 = vpop.f32.mrf.mxu0 }
0x19c9   : > { %v7609_v30 = vadd.f32 %v7608_v40, %v14583_v22  ;;  %7849 = vmatprep.mubr.bf16.mxu1 %v7690_v16  ;;  %v7666_v42 = vmax.f32 %v7607_v15, 0.0 }
0x19ca   : > { %v7610_v45 = vpop.f32.mrf.mxu0  ;;  %7850 = vmatmul.mubr.bf16.gmra.mxu1 %v7689_v5 }
0x19cb   : > { %v7611_v12 = vadd.f32 %v7610_v45, %v14580_v33  ;;  %v7667_v4 = vmax.f32 %v7609_v30, 0.0 }
0x19cc   : > { %v7614_v2 = vpop.f32.mrf.mxu0 }
0x19cd   : > { %v7668_v51 = vmax.f32 %v7611_v12, 0.0  ;;  %v7691_v63 = vpack.c.bf16 %v7667_v4, %v7665_v50  ;;  %v7615_v25 = vadd.f32 %v7614_v2, %v14583_v22 }
0x19ce   : > { %v7616_v49 = vpop.f32.mrf.mxu0 }
0x19cf   : > { %v7692_v0 = vpack.c.bf16 %v7668_v51, %v7666_v42  ;;  %v7617_v17 = vadd.f32 %v7616_v49, %v14580_v33  ;;  %v7669_v21 = vmax.f32 %v7615_v25, 0.0 }
0x19d0   : > { %v7618_v41 = vpop.f32.mrf.mxu0 }
0x19d1   : > { %v7619_v48 = vadd.f32 %v7618_v41, %v14583_v22  ;;  %7857 = vmatprep.mubr.bf16.mxu1 %v7692_v0  ;;  %v7670_v13 = vmax.f32 %v7617_v17, 0.0 }
0x19d2   : > { %v7620_v24 = vpop.f32.mrf.mxu0  ;;  %7858 = vmatmul.mubr.bf16.gmra.mxu1 %v7691_v63 }
0x19d3   : > { %v7621_v58 = vadd.f32 %v7620_v24, %v14580_v33  ;;  %v7671_v34 = vmax.f32 %v7619_v48, 0.0 }
0x19d4   : > { %v7624_v1 = vpop.f32.mrf.mxu0 }
0x19d5   : > { %v7672_v39 = vmax.f32 %v7621_v58, 0.0  ;;  %v7693_v54 = vpack.c.bf16 %v7671_v34, %v7669_v21  ;;  %v7625_v14 = vadd.f32 %v7624_v1, %v14583_v22 }
0x19d6   : > { %v7626_v62 = vpop.f32.mrf.mxu0 }
0x19d7   : > { %v7694_v46 = vpack.c.bf16 %v7672_v39, %v7670_v13  ;;  %v7627_v38 = vadd.f32 %v7626_v62, %v14580_v33  ;;  %v7673_v8 = vmax.f32 %v7625_v14, 0.0 }
0x19d8   : > { %v7628_v18 = vpop.f32.mrf.mxu0 }
0x19d9   : > { %v7629_v26 = vadd.f32 %v7628_v18, %v14583_v22  ;;  %7865 = vmatprep.mubr.bf16.mxu1 %v7694_v46  ;;  %v7674_v11 = vmax.f32 %v7627_v38, 0.0 }
0x19da   : > { %v7630_v9 = vpop.f32.mrf.mxu0  ;;  %7866 = vmatmul.mubr.bf16.gmra.mxu1 %v7693_v54  ;;  %v15304_v54 = vld [vmem:[#allocation27_spill] sm:$0xff] }
0x19db   : > { %v7631_v29 = vadd.f32 %v7630_v9, %v14580_v33  ;;  %v7675_v31 = vmax.f32 %v7629_v26, 0.0 }
0x19dc   : > { %v7634_v52 = vpop.f32.mrf.mxu0 }
0x19dd   : > { %v7676_v37 = vmax.f32 %v7631_v29, 0.0  ;;  %v7695_v56 = vpack.c.bf16 %v7675_v31, %v7673_v8  ;;  %v7635_v40 = vadd.f32 %v7634_v52, %v14583_v22 }
0x19de   : > { %v7636_v27 = vpop.f32.mrf.mxu0 }
0x19df   : > { %v7696_v47 = vpack.c.bf16 %v7676_v37, %v7674_v11  ;;  %v7637_v16 = vadd.f32 %v7636_v27, %v14580_v33  ;;  %v7677_v2 = vmax.f32 %v7635_v40, 0.0 }
0x19e0   : > { %v7638_v20 = vpop.f32.mrf.mxu0 }
0x19e1   : > { %v7639_v5 = vadd.f32 %v7638_v20, %v14583_v22  ;;  %7873 = vmatprep.mubr.bf16.mxu1 %v7696_v47  ;;  %v7678_v12 = vmax.f32 %v7637_v16, 0.0 }
0x19e2   : > { %v7640_v15 = vpop.f32.mrf.mxu0  ;;  %7874 = vmatmul.mubr.bf16.gmra.mxu1 %v7695_v56 }
0x19e3   : > { %v7641_v30 = vadd.f32 %v7640_v15, %v14580_v33  ;;  %v7679_v44 = vmax.f32 %v7639_v5, 0.0 }
0x19e4   : > { %v7644_v45 = vpop.f32.mrf.mxu0 }
0x19e5   : > { %v7680_v4 = vmax.f32 %v7641_v30, 0.0  ;;  %v7697_v50 = vpack.c.bf16 %v7679_v44, %v7677_v2  ;;  %v7645_v41 = vadd.f32 %v7644_v45, %v14583_v22 }
0x19e6   : > { %v7646_v42 = vpop.f32.mrf.mxu0 }
0x19e7   : > { %v7698_v51 = vpack.c.bf16 %v7680_v4, %v7678_v12  ;;  %v7647_v0 = vadd.f32 %v7646_v42, %v14580_v33  ;;  %v7681_v34 = vmax.f32 %v7645_v41, 0.0 }
0x19e8   : > { %v7648_v49 = vpop.f32.mrf.mxu0 }
0x19e9   : > { %v7649_v63 = vadd.f32 %v7648_v49, %v14583_v22  ;;  %7881 = vmatprep.mubr.bf16.mxu1 %v7698_v51  ;;  %v7682_v24 = vmax.f32 %v7647_v0, 0.0 }
0x19ea   : > { %v7650_v17 = vpop.f32.mrf.mxu0  ;;  %7882 = vmatmul.mubr.bf16.gmra.mxu1 %v7697_v50 }
0x19eb   : > { %v7651_v48 = vadd.f32 %v7650_v17, %v14580_v33  ;;  %v7683_v25 = vmax.f32 %v7649_v63, 0.0 }
0x19ed   : > { %v7684_v58 = vmax.f32 %v7651_v48, 0.0  ;;  %v7699_v13 = vpack.c.bf16 %v7683_v25, %v7681_v34 }
0x19ef   : > { %v7700_v1 = vpack.c.bf16 %v7684_v58, %v7682_v24 }
0x19f1   : > { %7889 = vmatprep.mubr.bf16.mxu1 %v7700_v1 }
0x19f2   : > { %7890 = vmatmul.mubr.bf16.gmra.mxu1 %v7699_v13 }
0x1a39   : > { %v8927_v39 = vpop.f32.mrf.mxu1 }
0x1a3b   : > { %v8928_v21 = vpop.f32.mrf.mxu1 }
0x1a3c   : > { %v8929_v62 = vadd.f32 %v8928_v21, %v8927_v39 }
0x1a3d   : > { %v8930_v46 = vpop.f32.mrf.mxu1 }
0x1a3e   : > { %v7836_v18 = vadd.f32 %v8929_v62, %v15304_v54 }
0x1a3f   : > { %v8931_v38 = vpop.f32.mrf.mxu1 }
0x1a40   : > { %v14619_v4 = vadd.f32 %v7836_v18, %v14299_v61   ;;  %v8932_v26 = vadd.f32 %v8931_v38, %v8930_v46 }
0x1a41   : > { %v8933_v33 = vpop.f32.mrf.mxu1 }
0x1a42   : > { %v15305_v22 = vmov %v14619_v4  ;;  %v7839_v14 = vadd.f32 %v8932_v26, %v15304_v54 }
0x1a43   : > { %v8934_v9 = vpop.f32.mrf.mxu1 }
0x1a44   : > { %v14623_v5 = vadd.f32 %v7839_v14, %v14309_v36   ;;  %v8935_v31 = vadd.f32 %v8934_v9, %v8933_v33 }
0x1a45   : > { %v8936_v52 = vpop.f32.mrf.mxu1 }
0x1a46   : > { %v15306_v29 = vmov %v14623_v5  ;;  %v7844_v11 = vadd.f32 %v8935_v31, %v15304_v54 }
0x1a47   : > { %v8937_v37 = vpop.f32.mrf.mxu1 }
0x1a48   : > { %v14627_v8 = vadd.f32 %v7844_v11, %v14302_v19   ;;  %v8938_v47 = vadd.f32 %v8937_v37, %v8936_v52 }
0x1a4a   : > { %v15307_v27 = vmov %v14627_v8  ;;  %v7847_v61 = vadd.f32 %v8938_v47, %v15304_v54 }
0x1a4c   : > { %v14631_v56 = vadd.f32 %v7847_v61, %v14312_v59  }
0x1a4e   :  { %v7925_v3 = vsel (%p14682_p0), %vm154_vm0, %v14631_v56, 0.0 }
0x1a8a   : > { %v8939_v20 = vpop.f32.mrf.mxu1 }
0x1a8c   : > { %v8940_v16 = vpop.f32.mrf.mxu1 }
0x1a8d   : > { %v8941_v40 = vadd.f32 %v8940_v16, %v8939_v20 }
0x1a8e   : > { %v8942_v15 = vpop.f32.mrf.mxu1 }
0x1a8f   : > { %v7852_v36 = vadd.f32 %v8941_v40, %v15304_v54 }
0x1a90   : > { %v8943_v5 = vpop.f32.mrf.mxu1 }
0x1a91   : > { %v14635_v8 = vadd.f32 %v7852_v36, %v14323_v55   ;;  %v8944_v44 = vadd.f32 %v8943_v5, %v8942_v15  ;;  %v15334_v5 = vmov %v15306_v29 }
0x1a92   : > { %v8945_v45 = vpop.f32.mrf.mxu1 }
0x1a93   : > { %v15308_v30 = vmov %v14635_v8  ;;  %v7855_v19 = vadd.f32 %v8944_v44, %v15304_v54 }
0x1a94   : > { %v8946_v12 = vpop.f32.mrf.mxu1 }
0x1a95   : > { %v14639_v9 = vadd.f32 %v7855_v19, %v14333_v43   ;;  %v8947_v59 = vadd.f32 %v8946_v12, %v8945_v45  ;;  %v7919_v45 = vsel (%p14682_p0), %vm154_vm0, %v15306_v29, 0.0 }
0x1a96   : > { %v8948_v4 = vpop.f32.mrf.mxu1 }
0x1a97   : > { %v15309_v2 = vmov %v14639_v9  ;;  %v7860_v42 = vadd.f32 %v8947_v59, %v15304_v54 }
0x1a98   : > { %v8949_v51 = vpop.f32.mrf.mxu1  ;;  %v7931_v5 = vsel (%p14682_p0), %vm154_vm0, %v15309_v2, 0.0 }
0x1a99   : > { %v14643_v50 = vadd.f32 %v7860_v42, %v14326_v35   ;;  %v8950_v49 = vadd.f32 %v8949_v51, %v8948_v4  ;;  %v15335_v4 = vmov %v15305_v22 }
0x1a9a   : > { %v8951_v0 = vpop.f32.mrf.mxu1  ;;  %v7922_v4 = vsel (%p14682_p0), %vm154_vm0, %v15307_v27, 0.0 }
0x1a9b   : > { %v7863_v55 = vadd.f32 %v8950_v49, %v15304_v54  ;;  %v7934_v42 = vsel (%p14682_p0), %vm154_vm0, %v14643_v50, 0.0 }
0x1a9c   : > { %v8952_v63 = vpop.f32.mrf.mxu1 }
0x1a9d   : > { %v14647_v11 = vadd.f32 %v7863_v55, %v14336_v32   ;;  %v8953_v17 = vadd.f32 %v8952_v63, %v8951_v0 }
0x1a9e   : > { %v8954_v48 = vpop.f32.mrf.mxu1 }
0x1a9f   : > { %v15310_v41 = vmov %v14647_v11  ;;  %v7868_v43 = vadd.f32 %v8953_v17, %v15304_v54 }
0x1aa0   : > { %v8955_v25 = vpop.f32.mrf.mxu1  ;;  %v7937_v51 = vsel (%p14682_p0), %vm154_vm0, %v15310_v41, 0.0 }
0x1aa1   : > { %v14651_v12 = vadd.f32 %v7868_v43, %v14347_v10   ;;  %v8956_v58 = vadd.f32 %v8955_v25, %v8954_v48 }
0x1aa2   : > { %v8957_v34 = vpop.f32.mrf.mxu1 }
0x1aa3   : > { %v15311_v24 = vmov %v14651_v12  ;;  %v7871_v35 = vadd.f32 %v8956_v58, %v15304_v54 }
0x1aa4   : > { %v8958_v1 = vpop.f32.mrf.mxu1  ;;  %v15327_v12 = vmov %v15311_v24 }
0x1aa5   : > { %v14655_v13 = vadd.f32 %v7871_v35, %v14357_v23   ;;  %v8959_v21 = vadd.f32 %v8958_v1, %v8957_v34 }
0x1aa6   : > { %v8960_v62 = vpop.f32.mrf.mxu1 }
0x1aa7   : > { %v15312_v39 = vmov %v14655_v13  ;;  %v7876_v32 = vadd.f32 %v8959_v21, %v15304_v54 }
0x1aa8   : > { %v8961_v46 = vpop.f32.mrf.mxu1  ;;  %v7943_v59 = vsel (%p14682_p0), %vm154_vm0, %v15312_v39, 0.0 }
0x1aa9   : > { %v14659_v14 = vadd.f32 %v7876_v32, %v14350_v57   ;;  %v8962_v18 = vadd.f32 %v8961_v46, %v8960_v62 }
0x1aaa   : > { %v8963_v26 = vpop.f32.mrf.mxu1 }
0x1aab   : > { %v15313_v38 = vmov %v14659_v14  ;;  %v7879_v10 = vadd.f32 %v8962_v18, %v15304_v54 }
0x1aac   : > { %v8964_v33 = vpop.f32.mrf.mxu1 }
0x1aad   : > { %v14663_v15 = vadd.f32 %v7879_v10, %v14360_v60   ;;  %v8965_v9 = vadd.f32 %v8964_v33, %v8963_v26  ;;  %v15329_v10 = vmov %v14643_v50 }
0x1aae   : > { %v8966_v52 = vpop.f32.mrf.mxu1 }
0x1aaf   : > { %v15314_v31 = vmov %v14663_v15  ;;  %v7884_v23 = vadd.f32 %v8965_v9, %v15304_v54  ;;  %v15330_v9 = vmov %v15309_v2 }
0x1ab0   : > { %v8967_v13 = vpop.f32.mrf.mxu1 }
0x1ab1   : > { %v14667_v16 = vadd.f32 %v7884_v23, %v14371_v28   ;;  %v8968_v11 = vadd.f32 %v8967_v13, %v8966_v52  ;;  %v15326_v13 = vmov %v15312_v39 }
0x1ab2   : > { %v8969_v8 = vpop.f32.mrf.mxu1 }
0x1ab3   : > { %v15315_v37 = vmov %v14667_v16  ;;  %v7887_v57 = vadd.f32 %v8968_v11, %v15304_v54  ;;  %v15328_v11 = vmov %v15310_v41 }
0x1ab4   : > { %v8970_v14 = vpop.f32.mrf.mxu1  ;;  %v15323_v16 = vmov %v15315_v37 }
0x1ab5   : > { %v14671_v17 = vadd.f32 %v7887_v57, %v14381_v7   ;;  %v8971_v61 = vadd.f32 %v8970_v14, %v8969_v8  ;;  %v15325_v14 = vmov %v15313_v38  ;;  %v15331_v8 = vmov %v15308_v30 }
0x1ab6   : > { %v8972_v20 = vpop.f32.mrf.mxu1  ;;  %v15332_v7 = vmov %v14631_v56  ;;  %v7928_v16 = vsel (%p14682_p0), %vm154_vm0, %v15308_v30, 0.0 }
0x1ab7   : > { %v15316_v47 = vmov %v14671_v17  ;;  %v7892_v60 = vadd.f32 %v8971_v61, %v15304_v54  ;;  %v7949_v7 = vsel (%p14682_p0), %vm154_vm0, %v15314_v31, 0.0 }
0x1ab8   : > { %v8973_v40 = vpop.f32.mrf.mxu1  ;;  %v15322_v17 = vmov %v15316_v47  ;;  %v7955_v12 = vsel (%p14682_p0), %vm154_vm0, %v15316_v47, 0.0 }
0x1ab9   : > { %v14675_v18 = vadd.f32 %v7892_v60, %v14374_v6   ;;  %v8974_v15 = vadd.f32 %v8973_v40, %v8972_v20  ;;  %v15333_v6 = vmov %v15307_v27 }
0x1aba   :  { %v7946_v6 = vsel (%p14682_p0), %vm154_vm0, %v15313_v38, 0.0 }
0x1abb   : > { %v15317_v36 = vmov %v14675_v18  ;;  %v7895_v28 = vadd.f32 %v8974_v15, %v15304_v54  ;;  %v15324_v15 = vmov %v15314_v31  ;;  %v7940_v54 = vsel (%p14682_p0), %vm154_vm0, %v15311_v24, 0.0 }
0x1abc   : > { %v15321_v18 = vmov %v15317_v36  ;;  %64 = sbr.rel (!%p14682_p0) target bundleno = 8 (0x8), region = 77  ;;  %7941 = vadd.xlane.f32.xlu1 (%p14682_p0), %v7940_v54  ;;  %v7958_v49 = vsel (%p14682_p0), %vm154_vm0, %v15317_v36, 0.0 }
0x1abd   : > { %v14679_v19 = vadd.f32 %v7895_v28, %v14384_v53   ;;  %v7916_v53 = vsel (%p14682_p0), %vm154_vm0, %v15305_v22, 0.0 }
0x1abe   :  { %7917 = vadd.xlane.f32.xlu0 (%p14682_p0), %v7916_v53 }
0x1abf   : > { %v15318_v44 = vmov %v14679_v19 }
0x1ac0   : > { %v15320_v19 = vmov %v15318_v44  ;;  %7944 = vadd.xlane.f32.xlu1 (%p14682_p0), %v7943_v59  ;;  %v7961_v0 = vsel (%p14682_p0), %vm154_vm0, %v15318_v44, 0.0 }
0x1ac1   :  { %v7952_v19 = vsel %vm154_vm0, %v15315_v37, 0.0 }
0x1ac2   :  { %7920 = vadd.xlane.f32.xlu0 %v7919_v45 }
0x1ac4   :  { %7926 = vadd.xlane.f32.xlu1 %v7925_v3 }
0x1ac6   :  { %7923 = vadd.xlane.f32.xlu0 %v7922_v4 }
0x1ac8   :  { %7950 = vadd.xlane.f32.xlu1 %v7949_v7 }
0x1aca   :  { %7947 = vadd.xlane.f32.xlu0 %v7946_v6 }
0x1acc   :  { %7932 = vadd.xlane.f32.xlu1 %v7931_v5 }
0x1ace   :  { %7929 = vadd.xlane.f32.xlu0 %v7928_v16 }
0x1ad0   :  { %7956 = vadd.xlane.f32.xlu1 %v7955_v12 }
0x1ad2   :  { %7953 = vadd.xlane.f32.xlu0 %v7952_v19 }
0x1ad4   :  { %7938 = vadd.xlane.f32.xlu1 %v7937_v51 }
0x1ad6   :  { %7935 = vadd.xlane.f32.xlu0 %v7934_v42 }
0x1ad8   :  { %7962 = vadd.xlane.f32.xlu1 %v7961_v0 }
0x1ada   :  { %7959 = vadd.xlane.f32.xlu0 %v7958_v49 }
0x1b45   :  { %v7942_v63 = vpop.xlane.xlu1 %7941 }
0x1b46   :  { %v7973_v48 = vmul.f32 0.015625, %v7942_v63 }
0x1b47   :  { %v7918_v55 = vpop.xlane.xlu0 %7917 }
0x1b48   :  { %v7965_v17 = vmul.f32 0.015625, %v7918_v55  ;;  %v14774_v25 = vsub.f32 %v15311_v24, %v7973_v48 }
0x1b49   :  { %v7945_v34 = vpop.xlane.xlu1 %7944 }
0x1b4a   :  { %v14771_v43 = vsub.f32 %v15305_v22, %v7965_v17  ;;  %v7974_v1 = vmul.f32 0.015625, %v7945_v34  ;;  %v8005_v62 = vmul.f32 %v14774_v25, %v14774_v25 }
0x1b4b   :  { %v7921_v58 = vpop.xlane.xlu0 %7920 }
0x1b4c   :  { %v7966_v35 = vmul.f32 0.015625, %v7921_v58  ;;  %v7997_v21 = vmul.f32 %v14771_v43, %v14771_v43  ;;  %v14784_v46 = vsub.f32 %v15312_v39, %v7974_v1  ;;  %v8037_v26 = vsel %vm154_vm0, %v8005_v62, 0.0 }
0x1b4d   :  { %v7927_v18 = vpop.xlane.xlu1 %7926 }
0x1b4e   :  { %v14781_v32 = vsub.f32 %v15306_v29, %v7966_v35  ;;  %v8013_v22 = vsel %vm154_vm0, %v7997_v21, 0.0  ;;  %v7968_v33 = vmul.f32 0.015625, %v7927_v18  ;;  %v8006_v52 = vmul.f32 %v14784_v46, %v14784_v46 }
0x1b4f   :  { %8014 = vadd.xlane.f32.xlu0 %v8013_v22  ;;  %v7924_v24 = vpop.xlane.xlu0 %7923 }
0x1b50   :  { %v7967_v10 = vmul.f32 0.015625, %v7924_v24  ;;  %v7998_v9 = vmul.f32 %v14781_v32, %v14781_v32  ;;  %v14796_v39 = vsub.f32 %v14631_v56, %v7968_v33  ;;  %v8040_v8 = vsel %vm154_vm0, %v8006_v52, 0.0  ;;  %v10675_v52 = vld [vmem:[%s14958_s9 + $0x10] sm:$0xff]  }
0x1b51   :  { %v7951_v11 = vpop.xlane.xlu1 %7950 }
0x1b52   :  { %v14793_v29 = vsub.f32 %v15307_v27, %v7967_v10  ;;  %v8016_v23 = vsel %vm154_vm0, %v7998_v9, 0.0  ;;  %v7976_v14 = vmul.f32 0.015625, %v7951_v11  ;;  %v8000_v27 = vmul.f32 %v14796_v39, %v14796_v39 }
0x1b53   :  { %8038 = vadd.xlane.f32.xlu0 %v8037_v26  ;;  %8017 = vadd.xlane.f32.xlu1 %v8016_v23  ;;  %v7948_v13 = vpop.xlane.xlu0 %7947  ;;  %v10676_v23 = vld [vmem:[%s14958_s9 + $0x8] sm:$0xff]  }
0x1b54   :  { %v7975_v57 = vmul.f32 0.015625, %v7948_v13  ;;  %v7999_v61 = vmul.f32 %v14793_v29, %v14793_v29  ;;  %v14808_v56 = vsub.f32 %v15314_v31, %v7976_v14  ;;  %v8022_v28 = vsel %vm154_vm0, %v8000_v27, 0.0  ;;  %v10677_v13 = vld [vmem:[%s14958_s9] sm:$0xff]  }
0x1b55   :  { %v7933_v15 = vpop.xlane.xlu1 %7932 }
0x1b56   :  { %v14805_v20 = vsub.f32 %v15313_v38, %v7975_v57  ;;  %v8019_v60 = vsel %vm154_vm0, %v7999_v61, 0.0  ;;  %v7970_v54 = vmul.f32 0.015625, %v7933_v15  ;;  %v8008_v38 = vmul.f32 %v14808_v56, %v14808_v56 }
0x1b57   :  { %8041 = vadd.xlane.f32.xlu1 %v8040_v8  ;;  %8020 = vadd.xlane.f32.xlu0 %v8019_v60  ;;  %v7930_v40 = vpop.xlane.xlu0 %7929 }
0x1b58   :  { %v7969_v53 = vmul.f32 0.015625, %v7930_v40  ;;  %v8007_v45 = vmul.f32 %v14805_v20, %v14805_v20  ;;  %v14820_v31 = vsub.f32 %v15309_v2, %v7970_v54  ;;  %v8046_v7 = vsel %vm154_vm0, %v8008_v38, 0.0 }
0x1b59   :  { %v7957_v6 = vpop.xlane.xlu1 %7956 }
0x1b5a   :  { %v14817_v59 = vsub.f32 %v15308_v30, %v7969_v53  ;;  %v8043_v4 = vsel %vm154_vm0, %v8007_v45, 0.0  ;;  %v7978_v5 = vmul.f32 0.015625, %v7957_v6  ;;  %v8002_v30 = vmul.f32 %v14820_v31, %v14820_v31 }
0x1b5b   :  { %8023 = vadd.xlane.f32.xlu1 %v8022_v28  ;;  %8044 = vadd.xlane.f32.xlu0 %v8043_v4  ;;  %v7954_v3 = vpop.xlane.xlu0 %7953 }
0x1b5c   :  { %v7977_v16 = vmul.f32 0.015625, %v7954_v3  ;;  %v8001_v19 = vmul.f32 %v14817_v59, %v14817_v59  ;;  %v14832_v2 = vsub.f32 %v15316_v47, %v7978_v5  ;;  %v8028_v0 = vsel %vm154_vm0, %v8002_v30, 0.0  ;;  %v7914_v30 = vld [vmem:[%s14957_s8] sm:$0x3] }
0x1b5d   :  { %v7939_v49 = vpop.xlane.xlu1 %7938 }
0x1b5e   :  { %v14829_v12 = vsub.f32 %v15315_v37, %v7977_v16  ;;  %v8025_v42 = vsel %vm154_vm0, %v8001_v19, 0.0  ;;  %v7972_v63 = vmul.f32 0.015625, %v7939_v49  ;;  %v8010_v37 = vmul.f32 %v14832_v2, %v14832_v2 }
0x1b5f   :  { %8047 = vadd.xlane.f32.xlu1 %v8046_v7  ;;  %8026 = vadd.xlane.f32.xlu0 %v8025_v42  ;;  %v7936_v51 = vpop.xlane.xlu0 %7935 }
0x1b60   :  { %v7971_v55 = vmul.f32 0.015625, %v7936_v51  ;;  %v8009_v17 = vmul.f32 %v14829_v12, %v14829_v12  ;;  %v14844_v47 = vsub.f32 %v15310_v41, %v7972_v63  ;;  %v8052_v1 = vsel %vm154_vm0, %v8010_v37, 0.0  ;;  %v15336_v63 = vld [vmem:[#allocation28_spill] sm:$0xff] }
0x1b61   :  { %v7963_v35 = vpop.xlane.xlu1 %7962 }
0x1b62   :  { %v14841_v48 = vsub.f32 %v14643_v50, %v7971_v55  ;;  %v8049_v58 = vsel %vm154_vm0, %v8009_v17, 0.0  ;;  %v7980_v62 = vmul.f32 0.015625, %v7963_v35  ;;  %v8004_v50 = vmul.f32 %v14844_v47, %v14844_v47 }
0x1b63   :  { %8029 = vadd.xlane.f32.xlu1 %v8028_v0  ;;  %8050 = vadd.xlane.f32.xlu0 %v8049_v58  ;;  %v7960_v34 = vpop.xlane.xlu0 %7959  ;;  %v14882_v17 = vrot.slane %v7914_v30, %v15336_v63 }
0x1b64   :  { %v7979_v21 = vmul.f32 0.015625, %v7960_v34  ;;  %v8003_v22 = vmul.f32 %v14841_v48, %v14841_v48  ;;  %v14856_v41 = vsub.f32 %v15318_v44, %v7980_v62  ;;  %v8034_v26 = vsel %vm154_vm0, %v8004_v50, 0.0  ;;  %v10674_v44 = vld [vmem:[%s14958_s9 + $0x18] sm:$0xff]  }
0x1b65   :  { %9523 = vmatprep.subr.bf16.mxu0 %v10674_v44  ;;  %9547 = vmatprep.subr.bf16.mxu1 %v10674_v44 }
0x1b66   :  { %v14853_v24 = vsub.f32 %v15317_v36, %v7979_v21  ;;  %v8031_v18 = vsel %vm154_vm0, %v8003_v22, 0.0  ;;  %v8012_v33 = vmul.f32 %v14856_v41, %v14856_v41  ;;  %9524 = vmatpush3.bf16.msra.mxu0 %v10674_v44  ;;  %9551 = vmatpush3.bf16.msra.mxu1 %v10674_v44 }
0x1b67   :  { %8053 = vadd.xlane.f32.xlu1 %v8052_v1  ;;  %8032 = vadd.xlane.f32.xlu0 %v8031_v18  ;;  %v15337_v18 = vld [vmem:[#allocation29_spill] sm:$0xff] }
0x1b68   :  { %v8011_v10 = vmul.f32 %v14853_v24, %v14853_v24  ;;  %v8058_v36 = vsel %vm154_vm0, %v8012_v33, 0.0  ;;  %9525 = vmatprep.subr.bf16.mxu0 %v10675_v52  ;;  %9548 = vmatprep.subr.bf16.mxu1 %v10675_v52 }
0x1b6a   :  { %v8055_v9 = vsel %vm154_vm0, %v8011_v10, 0.0  ;;  %9526 = vmatpush3.bf16.msra.mxu0 %v10675_v52  ;;  %9552 = vmatpush3.bf16.msra.mxu1 %v10675_v52 }
0x1b6b   :  { %8035 = vadd.xlane.f32.xlu1 %v8034_v26  ;;  %8056 = vadd.xlane.f32.xlu0 %v8055_v9  ;;  %v14887_v26 = vrot.slane %v7914_v30, %v15337_v18 }
0x1b6c   :  { %9527 = vmatprep.subr.bf16.mxu0 %v10676_v23  ;;  %9549 = vmatprep.subr.bf16.mxu1 %v10676_v23 }
0x1b6e   :  { %9528 = vmatpush3.bf16.msra.mxu0 %v10676_v23  ;;  %9553 = vmatpush3.bf16.msra.mxu1 %v10676_v23 }
0x1b6f   :  { %8059 = vadd.xlane.f32.xlu1 %v8058_v36  ;;  %9529 = vmatprep.subr.bf16.mxu0 %v10677_v13 }
0x1b70   :  { %9550 = vmatprep.subr.bf16.mxu1 %v10677_v13 }
0x1b72   :  { %9530 = vmatpush3.bf16.msra.mxu0 %v10677_v13  ;;  %9554 = vmatpush3.bf16.msra.mxu1 %v10677_v13 }
0x1bd8   :  { %v8015_v11 = vpop.xlane.xlu0 %8014 }
0x1bd9   :  { %v8061_v8 = vmul.f32 0.015625, %v8015_v11 }
0x1bdb   :  { %v8077_v57 = vadd.f32 1e-05, %v8061_v8 }
0x1bdc   :  { %v8018_v14 = vpop.xlane.xlu1 %8017  ;;  %v8039_v61 = vpop.xlane.xlu0 %8038 }
0x1bdd   :  { %10678 = vrsqrt.f32 %v8077_v57  ;;  %v8062_v27 = vmul.f32 0.015625, %v8018_v14  ;;  %v8069_v60 = vmul.f32 0.015625, %v8039_v61 }
0x1bdf   :  { %v8078_v40 = vadd.f32 1e-05, %v8062_v27  ;;  %v8085_v15 = vadd.f32 1e-05, %v8069_v60 }
0x1be0   :  { %v8042_v28 = vpop.xlane.xlu1 %8041  ;;  %v8021_v53 = vpop.xlane.xlu0 %8020 }
0x1be1   :  { %10680 = vrsqrt.f32 %v8078_v40  ;;  %v8070_v54 = vmul.f32 0.015625, %v8042_v28  ;;  %v8063_v45 = vmul.f32 0.015625, %v8021_v53 }
0x1be2   :  { %10682 = vrsqrt.f32 %v8085_v15 }
0x1be3   :  { %v8086_v38 = vadd.f32 1e-05, %v8070_v54  ;;  %v8079_v4 = vadd.f32 1e-05, %v8063_v45 }
0x1be4   :  { %v8024_v3 = vpop.xlane.xlu1 %8023  ;;  %v8045_v6 = vpop.xlane.xlu0 %8044 }
0x1be5   :  { %10684 = vrsqrt.f32 %v8086_v38  ;;  %v8064_v7 = vmul.f32 0.015625, %v8024_v3  ;;  %v8071_v16 = vmul.f32 0.015625, %v8045_v6 }
0x1be6   :  { %10686 = vrsqrt.f32 %v8079_v4 }
0x1be7   :  { %v8080_v5 = vadd.f32 1e-05, %v8064_v7  ;;  %v8087_v19 = vadd.f32 1e-05, %v8071_v16 }
0x1be8   :  { %v8048_v42 = vpop.xlane.xlu1 %8047  ;;  %v8027_v51 = vpop.xlane.xlu0 %8026 }
0x1be9   :  { %10688 = vrsqrt.f32 %v8080_v5  ;;  %v8072_v49 = vmul.f32 0.015625, %v8048_v42  ;;  %v8065_v0 = vmul.f32 0.015625, %v8027_v51 }
0x1bea   :  { %v10679_v55 = vpop.eup %10678  ;;  %10690 = vrsqrt.f32 %v8087_v19 }
0x1beb   :  { %v8088_v37 = vadd.f32 1e-05, %v8072_v49  ;;  %v8081_v58 = vadd.f32 1e-05, %v8065_v0  ;;  %v8109_v34 = vmul.f32 %v10679_v55, %v14771_v43 }
0x1bec   :  { %v8030_v35 = vpop.xlane.xlu1 %8029  ;;  %v8051_v1 = vpop.xlane.xlu0 %8050 }
0x1bed   :  { %10692 = vrsqrt.f32 %v8088_v37  ;;  %v8066_v21 = vmul.f32 0.015625, %v8030_v35  ;;  %v8073_v62 = vmul.f32 0.015625, %v8051_v1  ;;  %v8129_v50 = vmul.f32 %v14882_v17, %v8109_v34 }
0x1bee   :  { %v10681_v22 = vpop.eup %10680  ;;  %10694 = vrsqrt.f32 %v8081_v58 }
0x1bef   :  { %v10683_v10 = vpop.eup %10682  ;;  %v8082_v33 = vadd.f32 1e-05, %v8066_v21  ;;  %v8089_v9 = vadd.f32 1e-05, %v8073_v62  ;;  %v8110_v36 = vmul.f32 %v10681_v22, %v14781_v32  ;;  %v8149_v57 = vadd.f32 %v14887_v26, %v8129_v50 }
0x1bf0   :  { %v8054_v44 = vpop.xlane.xlu1 %8053  ;;  %v8033_v52 = vpop.xlane.xlu0 %8032  ;;  %v8117_v43 = vmul.f32 %v10683_v10, %v14774_v25 }
0x1bf1   :  { %10696 = vrsqrt.f32 %v8082_v33  ;;  %v8074_v23 = vmul.f32 0.015625, %v8054_v44  ;;  %v8067_v13 = vmul.f32 0.015625, %v8033_v52  ;;  %v8130_v11 = vmul.f32 %v14882_v17, %v8110_v36 }
0x1bf2   :  { %v10685_v8 = vpop.eup %10684  ;;  %10698 = vrsqrt.f32 %v8089_v9  ;;  %v8137_v25 = vmul.f32 %v14882_v17, %v8117_v43 }
0x1bf3   :  { %v10687_v14 = vpop.eup %10686  ;;  %v8090_v61 = vadd.f32 1e-05, %v8074_v23  ;;  %v8083_v27 = vadd.f32 1e-05, %v8067_v13  ;;  %v8150_v60 = vadd.f32 %v14887_v26, %v8130_v11  ;;  %v8118_v32 = vmul.f32 %v10685_v8, %v14784_v46 }
0x1bf4   :  { %v8036_v40 = vpop.xlane.xlu1 %8035  ;;  %v8057_v15 = vpop.xlane.xlu0 %8056  ;;  %v8111_v28 = vmul.f32 %v10687_v14, %v14793_v29  ;;  %v8157_v29 = vadd.f32 %v14887_v26, %v8137_v25 }
0x1bf5   :  { %10700 = vrsqrt.f32 %v8090_v61  ;;  %v8068_v53 = vmul.f32 0.015625, %v8036_v40  ;;  %v8075_v54 = vmul.f32 0.015625, %v8057_v15  ;;  %v8165_v45 = vpack.c.bf16 %v8150_v60, %v8149_v57 }
0x1bf6   :  { %v10689_v38 = vpop.eup %10688  ;;  %10702 = vrsqrt.f32 %v8083_v27  ;;  %v8138_v4 = vmul.f32 %v14882_v17, %v8118_v32  ;;  %v8131_v3 = vmul.f32 %v14882_v17, %v8111_v28 }
0x1bf7   :  { %v10691_v6 = vpop.eup %10690  ;;  %v8084_v7 = vadd.f32 1e-05, %v8068_v53  ;;  %v8091_v16 = vadd.f32 1e-05, %v8075_v54  ;;  %9531 = vmatprep.mubr.msk.bf16.mxu0 %vm154_vm0, %v8165_v45  ;;  %v8112_v46 = vmul.f32 %v10689_v38, %v14796_v39  ;;  %v8626_v38 = vld [vmem:[%s14959_s10] ss:$0 sm:$0xff] }
0x1bf8   :  { %v8060_v5 = vpop.xlane.xlu1 %8059  ;;  %v8158_v19 = vadd.f32 %v14887_v26, %v8138_v4  ;;  %v8119_v30 = vmul.f32 %v10691_v6, %v14805_v20  ;;  %v8151_v55 = vadd.f32 %v14887_v26, %v8131_v3  ;;  %s10884_s10 = smov [#allocation2]  }
0x1bf9   :  { %10704 = vrsqrt.f32 %v8084_v7  ;;  %v8076_v42 = vmul.f32 0.015625, %v8060_v5  ;;  %v8132_v51 = vmul.f32 %v14882_v17, %v8112_v46  ;;  %s8354_s19 = sshll.u32 %s10884_s10, 4  ;;  %s8355_s19 = int_to_ptr.vmem [resolvable:$true] %s8354_s19 }
0x1bfa   :  { %v10693_v49 = vpop.eup %10692  ;;  %10706 = vrsqrt.f32 %v8091_v16  ;;  %v8169_v0 = vpack.c.bf16 %v8158_v19, %v8157_v29  ;;  %v8139_v34 = vmul.f32 %v14882_v17, %v8119_v30  ;;  %s10710_s20 = scalar_lea.vmem %s8355_s19, 2048  ;;  %p10715_p2 = scmp.lt.s32.totalorder %s8355_s19, %s8355_s19 }
0x1bfb   :  { %v10695_v63 = vpop.eup %10694  ;;  %v8092_v37 = vadd.f32 1e-05, %v8076_v42  ;;  %v8152_v39 = vadd.f32 %v14887_v26, %v8132_v51  ;;  %v8120_v58 = vmul.f32 %v10693_v49, %v14808_v56  ;;  %p10711_p1 = scmp.ne.s32.totalorder %s8355_s19, %s10710_s20  ;;  %p10716_p3 = scmp.lt.s32.totalorder %s10710_s20, %s10710_s20 }
0x1bfc   :  { %9539 = vmatprep.mubr.msk.bf16.mxu1 %vm154_vm0, %v8169_v0  ;;  %v8113_v20 = vmul.f32 %v10695_v63, %v14817_v59  ;;  %v8159_v22 = vadd.f32 %v14887_v26, %v8139_v34 }
0x1bfd   :  { %10708 = vrsqrt.f32 %v8092_v37  ;;  %v8166_v35 = vpack.c.bf16 %v8152_v39, %v8151_v55  ;;  %v8140_v1 = vmul.f32 %v14882_v17, %v8120_v58  ;;  %p10717_p4 = por %p10716_p3, %p10715_p2 }
0x1bfe   :  { %v10697_v21 = vpop.eup %10696  ;;  %v8133_v18 = vmul.f32 %v14882_v17, %v8113_v20 }
0x1bff   :  { %v10699_v62 = vpop.eup %10698  ;;  %9532 = vmatmul.mubr.msk.bf16.vlgmr.msra.gmra.mxu0 %vm154_vm0, %v8166_v35  ;;  %v8160_v50 = vadd.f32 %v14887_v26, %v8140_v1  ;;  %v8114_v56 = vmul.f32 %v10697_v21, %v14820_v31  ;;  %p10718_p5 = pnand %p10717_p4, %p10711_p1 }
0x1c00   :  { %v8121_v10 = vmul.f32 %v10699_v62, %v14829_v12  ;;  %v8153_v44 = vadd.f32 %v14887_v26, %v8133_v18 }
0x1c01   :  { %v8170_v33 = vpack.c.bf16 %v8160_v50, %v8159_v22  ;;  %v8134_v59 = vmul.f32 %v14882_v17, %v8114_v56 }
0x1c02   :  { %v10701_v9 = vpop.eup %10700  ;;  %v8141_v23 = vmul.f32 %v14882_v17, %v8121_v10 }
0x1c03   :  { %v10703_v36 = vpop.eup %10702  ;;  %9540 = vmatmul.mubr.msk.bf16.vlgmr.msra.gmra.mxu1 %vm154_vm0, %v8170_v33  ;;  %v8154_v52 = vadd.f32 %v14887_v26, %v8134_v59  ;;  %v8122_v43 = vmul.f32 %v10701_v9, %v14832_v2 }
0x1c04   :  { %v8115_v31 = vmul.f32 %v10703_v36, %v14841_v48  ;;  %v8161_v57 = vadd.f32 %v14887_v26, %v8141_v23 }
0x1c05   :  { %v8167_v13 = vpack.c.bf16 %v8154_v52, %v8153_v44  ;;  %v8142_v12 = vmul.f32 %v14882_v17, %v8122_v43 }
0x1c06   :  { %v10705_v11 = vpop.eup %10704  ;;  %v8135_v27 = vmul.f32 %v14882_v17, %v8115_v31 }
0x1c07   :  { %v10707_v8 = vpop.eup %10706  ;;  %9535 = vmatprep.mubr.msk.bf16.mxu0 %vm154_vm0, %v8167_v13  ;;  %v8162_v14 = vadd.f32 %v14887_v26, %v8142_v12  ;;  %v8116_v61 = vmul.f32 %v10705_v11, %v14844_v47 }
0x1c08   :  { %v8123_v2 = vmul.f32 %v10707_v8, %v14853_v24  ;;  %v8155_v40 = vadd.f32 %v14887_v26, %v8135_v27 }
0x1c09   :  { %v8171_v60 = vpack.c.bf16 %v8162_v14, %v8161_v57  ;;  %v8136_v48 = vmul.f32 %v14882_v17, %v8116_v61 }
0x1c0a   :  { %v10709_v32 = vpop.eup %10708  ;;  %v8143_v28 = vmul.f32 %v14882_v17, %v8123_v2 }
0x1c0b   :  { %9543 = vmatprep.mubr.msk.bf16.mxu1 %vm154_vm0, %v8171_v60  ;;  %v8156_v15 = vadd.f32 %v14887_v26, %v8136_v48  ;;  %v8124_v25 = vmul.f32 %v10709_v32, %v14856_v41 }
0x1c0c   :  { %v8163_v24 = vadd.f32 %v14887_v26, %v8143_v28 }
0x1c0d   :  { %v8168_v53 = vpack.c.bf16 %v8156_v15, %v8155_v40  ;;  %v8144_v47 = vmul.f32 %v14882_v17, %v8124_v25 }
0x1c0f   :  { %9536 = vmatmul.mubr.msk.bf16.gmra.mxu0 %vm154_vm0, %v8168_v53  ;;  %v8164_v54 = vadd.f32 %v14887_v26, %v8144_v47 }
0x1c11   :  { %v8172_v45 = vpack.c.bf16 %v8164_v54, %v8163_v24 }
0x1c13   :  { %9544 = vmatmul.mubr.msk.bf16.gmra.mxu1 %vm154_vm0, %v8172_v45 }
0x1cbf   :  { %v9533_v4 = vpop.f32.mrf.mxu0 }
0x1cc0   :  { %v8279_v41 = vadd.f32 %v9533_v4, %v8626_v38 }
0x1cc1   :  { %v8270_v3 = vpop.f32.mrf.mxu0 }
0x1cc2   :  { %8335 = vst [vmem:[#allocation2 + $0x10] sm:$0xff] %v8279_v41  ;;  %v8271_v6 = vadd.f32 %v8626_v38, %v8270_v3 }
0x1cc3   :  { %v9534_v7 = vpop.f32.mrf.mxu0  ;;  %v9541_v17 = vpop.f32.mrf.mxu1 }
0x1cc4   :  { %8333 = vst [vmem:[#allocation2] sm:$0xff] %v8271_v6  ;;  %v8282_v16 = vadd.f32 %v9534_v7, %v8626_v38  ;;  %v8311_v46 = vadd.f32 %v9541_v17, %v8626_v38 }
0x1cc5   :  { %v8273_v5 = vpop.f32.mrf.mxu0  ;;  %v8302_v29 = vpop.f32.mrf.mxu1 }
0x1cc6   :  { %8336 = vst [vmem:[#allocation2 + $0x18] sm:$0xff] %v8282_v16  ;;  %8343 = vst [vmem:[#allocation2 + $0x50] sm:$0xff] %v8311_v46  ;;  %v8274_v26 = vadd.f32 %v8626_v38, %v8273_v5  ;;  %v8303_v19 = vadd.f32 %v8626_v38, %v8302_v29 }
0x1cc7   :  { %v9542_v30 = vpop.f32.mrf.mxu1 }
0x1cc8   :  { %8334 = vst [vmem:[#allocation2 + $0x8] sm:$0xff] %v8274_v26  ;;  %8341 = vst [vmem:[#allocation2 + $0x40] sm:$0xff] %v8303_v19  ;;  %v8314_v42 = vadd.f32 %v9542_v30, %v8626_v38 }
0x1cc9   :  { %v8305_v51 = vpop.f32.mrf.mxu1 }
0x1cca   :  { %8344 = vst [vmem:[#allocation2 + $0x58] sm:$0xff] %v8314_v42  ;;  %v8306_v49 = vadd.f32 %v8626_v38, %v8305_v51 }
0x1ccc   :  { %8342 = vst [vmem:[#allocation2 + $0x48] sm:$0xff] %v8306_v49 }
0x1ccf   :  { %v9537_v0 = vpop.f32.mrf.mxu0 }
0x1cd0   :  { %v8295_v55 = vadd.f32 %v9537_v0, %v8626_v38 }
0x1cd1   :  { %v8286_v63 = vpop.f32.mrf.mxu0 }
0x1cd2   :  { %8339 = vst [vmem:[#allocation2 + $0x30] sm:$0xff] %v8295_v55  ;;  %v8287_v37 = vadd.f32 %v8626_v38, %v8286_v63 }
0x1cd3   :  { %v9538_v39 = vpop.f32.mrf.mxu0  ;;  %v9545_v58 = vpop.f32.mrf.mxu1 }
0x1cd4   :  { %8337 = vst [vmem:[#allocation2 + $0x20] sm:$0xff] %v8287_v37  ;;  %v8298_v34 = vadd.f32 %v9538_v39, %v8626_v38  ;;  %v8327_v20 = vadd.f32 %v9545_v58, %v8626_v38 }
0x1cd5   :  { %v8289_v35 = vpop.f32.mrf.mxu0  ;;  %v8318_v1 = vpop.f32.mrf.mxu1 }
0x1cd6   :  { %8340 = vst [vmem:[#allocation2 + $0x38] sm:$0xff] %v8298_v34  ;;  %8347 = vst [vmem:[#allocation2 + $0x70] sm:$0xff] %v8327_v20  ;;  %v8290_v21 = vadd.f32 %v8626_v38, %v8289_v35  ;;  %v8319_v62 = vadd.f32 %v8626_v38, %v8318_v1 }
0x1cd7   :  { %v9546_v22 = vpop.f32.mrf.mxu1 }
0x1cd8   :  { %8338 = vst [vmem:[#allocation2 + $0x28] sm:$0xff] %v8290_v21  ;;  %8345 = vst [vmem:[#allocation2 + $0x60] sm:$0xff] %v8319_v62  ;;  %v8330_v50 = vadd.f32 %v9546_v22, %v8626_v38 }
0x1cd9   :  { %v8321_v56 = vpop.f32.mrf.mxu1 }
0x1cda   :  { %8348 = vst [vmem:[#allocation2 + $0x78] sm:$0xff] %v8330_v50  ;;  %v8322_v18 = vadd.f32 %v8626_v38, %v8321_v56 }
0x1cdc   :  { %8346 = vst [vmem:[#allocation2 + $0x68] sm:$0xff] %v8322_v18 }
0x1cdd   :  { %10721 = shalt.err (!%p10718_p5)
}
0x1cde   :  { %s10885_s21 = smov 128   ;;  %s10886_s22 = smov 8  }
0x1cdf   :  { %8360 = dma.vmem_to_hbm [thread:$0]  %s8355_s19, 2048, %s14960_s11, [#allocation3], %s10885_s21, %s10885_s21, %s10886_s22  }
0x1ce0   :  { %10798 = dma.done.wait [#allocation3], 2048  }
0x1ce1   :  { %10799 = vsyncadd [#allocation3], 4294965248 }
0x1ce2   :  { %8364 = vsyncpa [#allocation3], 1 }

</bundles_post_ra>
